<compile_context>
chip_gen: v5e
topology: v5e:2x2
jax: 0.10.0
libtpu: 0.0.40
codegen_flags: <defaults>
</compile_context>

<pallas_src>
import functools

import jax
import jax.numpy as jnp
from jax.experimental import pallas as pl
from jax.experimental.pallas import tpu as pltpu


VMEM_LIMIT = 32 * 1024 * 1024   # safe on v5e/v6e (128 MiB) and v7x (64 MiB)
LANE = 128                      # padded channel width for lane-dense stores


def _ceil_div(a, b):
    return -(-a // b)


def _round_up(x, m):
    return _ceil_div(x, m) * m


def _pick_tile_m(M, tile_m):
    """Balanced row tiling: multiple of 8 (or full M), >=2 tiles when sensible."""
    nt = max(1, _ceil_div(M, tile_m))
    if nt == 1 and M >= 256:
        nt = 2                      # give the v7x megacore >=2 grid steps
    tm = _round_up(_ceil_div(M, nt), 8)
    return M if tm >= M else tm


def _pick_tile_b(B, cap=128):
    nt = max(1, _ceil_div(B, cap))
    if nt == 1 and B >= 16:
        nt = 2                      # give the v7x megacore >=2 grid steps
    tb = _round_up(_ceil_div(B, nt), 8)
    return B if tb >= B else tb


# ----------------------------------------------------------------------------
# Pallas kernel 1: M-tiled fused matmul + bias + optional ReLU
# (hot path for conv1 / conv2 via im2col; N is always 128 -> lane-dense store).
# ----------------------------------------------------------------------------
def _matmul_bias_act_kernel(x_ref, w_ref, b_ref, o_ref, *, apply_relu):
    acc = jnp.dot(x_ref[...], w_ref[...], preferred_element_type=jnp.float32)
    acc = acc + b_ref[...]                      # (1, N) f32 broadcast over rows
    if apply_relu:
        acc = jnp.maximum(acc, 0.0)
    o_ref[...] = acc.astype(o_ref.dtype)


def matmul_bias_act(x, w, b, *, relu, out_dtype, tile_m=1024):
    """y = act(x @ w + b).  x:(M,K) bf16, w:(K,N) bf16, b:(1,N) f32 -> (M,N)."""
    M, K = x.shape
    K2, N = w.shape
    assert K == K2
    tm = _pick_tile_m(M, tile_m)
    grid = (pl.cdiv(M, tm),)        # last block may be partial: reads are
                                    # garbage rows, writes are masked -> OK
    return pl.pallas_call(
        functools.partial(_matmul_bias_act_kernel, apply_relu=relu),
        out_shape=jax.ShapeDtypeStruct((M, N), out_dtype),
        grid=grid,
        in_specs=[
            pl.BlockSpec((tm, K), lambda i: (i, 0)),   # streamed activation tile
            pl.BlockSpec((K, N), lambda i: (0, 0)),    # weight resident in VMEM
            pl.BlockSpec((1, N), lambda i: (0, 0)),    # bias resident in VMEM
        ],
        out_specs=pl.BlockSpec((tm, N), lambda i: (i, 0)),
        compiler_params=pltpu.CompilerParams(
            dimension_semantics=("parallel",),
            vmem_limit_bytes=VMEM_LIMIT),
    )(x, w, b)


# ----------------------------------------------------------------------------
# Pallas kernel 2: fused tail  conv3 + (NHWC flatten) + fc1 + ReLU + fc2.
#
# cols3 is the conv3 im2col laid out position-major: (16, B, 1152) where the
# leading dim is the 4x4 output position p.  fc1_w is stored as (16, 128, 512)
# so fc1 is computed as  sum_p relu(conv3_p) @ fc1_w[p]  -- everything stays
# 2D, no in-kernel reshapes, all weights resident in VMEM.
# ----------------------------------------------------------------------------
def _tail_kernel(cols_ref, w3_ref, b3_ref, w1_ref, b1_ref, w2_ref, b2_ref, o_ref):
    n_pos = cols_ref.shape[0]                   # 16 spatial positions (4x4)
    tb = cols_ref.shape[1]
    hidden = w1_ref.shape[-1]                   # 512
    acc = jnp.zeros((tb, hidden), jnp.float32)
    for p in range(n_pos):                      # static unrolled loop
        h3 = jnp.dot(cols_ref[p], w3_ref[...],
                     preferred_element_type=jnp.float32)        # conv3 @ pos p
        h3 = jnp.maximum(h3 + b3_ref[...], 0.0).astype(cols_ref.dtype)
        acc = acc + jnp.dot(h3, w1_ref[p],
                            preferred_element_type=jnp.float32)  # fc1 partial
    h = jnp.maximum(acc + b1_ref[...], 0.0).astype(w2_ref.dtype)
    q = jnp.dot(h, w2_ref[...], preferred_element_type=jnp.float32)
    o_ref[...] = (q + b2_ref[...]).astype(o_ref.dtype)


def conv3_fc_head(cols3, w3, b3, w1, b1, w2, b2, *, tile_b=128):
    """cols3:(16,B,1152) bf16 -> q:(B,128) f32 (pad cols sliced off outside)."""
    P, B, K3 = cols3.shape
    H = w1.shape[-1]
    N = w2.shape[-1]
    tb = _pick_tile_b(B, tile_b)
    grid = (pl.cdiv(B, tb),)
    return pl.pallas_call(
        _tail_kernel,
        out_shape=jax.ShapeDtypeStruct((B, N), jnp.float32),
        grid=grid,
        in_specs=[
            pl.BlockSpec((P, tb, K3), lambda i: (0, i, 0)),  # streamed batch tile
            pl.BlockSpec((K3, LANE), lambda i: (0, 0)),      # conv3 weight
            pl.BlockSpec((1, LANE), lambda i: (0, 0)),
            pl.BlockSpec((P, LANE, H), lambda i: (0, 0, 0)), # fc1 weight blocks
            pl.BlockSpec((1, H), lambda i: (0, 0)),
            pl.BlockSpec((H, N), lambda i: (0, 0)),          # fc2 weight
            pl.BlockSpec((1, N), lambda i: (0, 0)),
        ],
        out_specs=pl.BlockSpec((tb, N), lambda i: (i, 0)),
        compiler_params=pltpu.CompilerParams(
            dimension_semantics=("parallel",),
            vmem_limit_bytes=VMEM_LIMIT),
    )(cols3, w3, b3, w1, b1, w2, b2)


# ----------------------------------------------------------------------------
# Parameters: torch-layout init (Xavier-uniform weights, bias = 0.01), then a
# one-time prepare step (reshape / permute / channel-pad / bf16 cast).
# ----------------------------------------------------------------------------
def _xavier_uniform(key, shape, fan_in, fan_out):
    limit = jnp.sqrt(6.0 / (fan_in + fan_out))
    return jax.random.uniform(key, shape, jnp.float32, -limit, limit)


def init_dqn_params(key, in_dim, out_dim):
    ks = jax.random.split(key, 5)
    p = {}
    # conv weights in torch layout (Cout, Cin, KH, KW)
    p["conv1_w"] = _xavier_uniform(ks[0], (32, in_dim, 8, 8), in_dim * 64, 32 * 64)
    p["conv1_b"] = jnp.full((32,), 0.01, jnp.float32)
    p["conv2_w"] = _xavier_uniform(ks[1], (64, 32, 4, 4), 32 * 16, 64 * 16)
    p["conv2_b"] = jnp.full((64,), 0.01, jnp.float32)
    p["conv3_w"] = _xavier_uniform(ks[2], (128, 64, 3, 3), 64 * 9, 128 * 9)
    p["conv3_b"] = jnp.full((128,), 0.01, jnp.float32)
    # fc weights in torch layout (out_features, in_features)
    p["fc1_w"] = _xavier_uniform(ks[3], (512, 2048), 2048, 512)
    p["fc1_b"] = jnp.full((512,), 0.01, jnp.float32)
    p["fc2_w"] = _xavier_uniform(ks[4], (out_dim, 512), 512, out_dim)
    p["fc2_b"] = jnp.full((out_dim,), 0.01, jnp.float32)
    return p


def prepare_params(tp):
    """One-time (per-model) transform of torch-layout params into kernel layout."""
    p = {}

    # conv1: rows ordered (dH, dW, hh, ww, cin) to match the s2d im2col columns
    # (kh = 4*dH + hh, kw = 4*dW + ww); cout padded 32 -> 128 (zero cols/bias).
    w = tp["conv1_w"]                                   # (32, Cin, 8, 8)
    cout1, cin1 = w.shape[0], w.shape[1]
    w = w.reshape(cout1, cin1, 2, 4, 2, 4)              # (cout,cin,dH,hh,dW,ww)
    w = jnp.transpose(w, (2, 4, 3, 5, 1, 0))            # (dH,dW,hh,ww,cin,cout)
    w = w.reshape(64 * cin1, cout1)
    p["conv1_w"] = jnp.pad(w, ((0, 0), (0, LANE - cout1))).astype(jnp.bfloat16)
    p["conv1_b"] = jnp.pad(tp["conv1_b"].reshape(1, -1),
                           ((0, 0), (0, LANE - cout1))).astype(jnp.float32)

    # conv2: rows ordered (kh, kw, cin_padded-to-128); cout padded 64 -> 128.
    w = tp["conv2_w"]                                   # (64, 32, 4, 4)
    cout2, cin2, k2, _ = w.shape
    w_t = jnp.transpose(w, (2, 3, 1, 0))                # (4,4,32,64)
    w_full = jnp.zeros((k2, k2, LANE, cout2), jnp.float32).at[:, :, :cin2, :].set(w_t)
    w2d = w_full.reshape(k2 * k2 * LANE, cout2)
    p["conv2_w"] = jnp.pad(w2d, ((0, 0), (0, LANE - cout2))).astype(jnp.bfloat16)
    p["conv2_b"] = jnp.pad(tp["conv2_b"].reshape(1, -1),
                           ((0, 0), (0, LANE - cout2))).astype(jnp.float32)

    # conv3: rows ordered (kh, kw, cin_padded-to-128); cout is already 128.
    w = tp["conv3_w"]                                   # (128, 64, 3, 3)
    cout3, cin3, k3, _ = w.shape
    w_t = jnp.transpose(w, (2, 3, 1, 0))                # (3,3,64,128)
    w_full = jnp.zeros((k3, k3, LANE, cout3), jnp.float32).at[:, :, :cin3, :].set(w_t)
    p["conv3_w"] = w_full.reshape(k3 * k3 * LANE, cout3).astype(jnp.bfloat16)
    p["conv3_b"] = tp["conv3_b"].astype(jnp.float32).reshape(1, cout3)

    # fc1: torch column order is NCHW flatten (c=128, h=4, w=4) -> index 16c+p.
    # Fold the permutation and store as 16 per-position (128, 512) blocks.
    w1 = tp["fc1_w"].T                                  # (2048, 512), rows 16c+p
    w1 = w1.reshape(128, 16, 512).transpose(1, 0, 2)    # (p, c, n) = (16,128,512)
    p["fc1_w"] = w1.astype(jnp.bfloat16)
    p["fc1_b"] = tp["fc1_b"].astype(jnp.float32).reshape(1, 512)

    # fc2: pad out_dim -> 128 (zero cols / zero bias); sliced off in the wrapper.
    out_dim = tp["fc2_w"].shape[0]
    assert out_dim <= LANE
    p["fc2_w"] = jnp.pad(tp["fc2_w"].T,
                         ((0, 0), (0, LANE - out_dim))).astype(jnp.bfloat16)
    p["fc2_b"] = jnp.pad(tp["fc2_b"].reshape(1, -1),
                         ((0, 0), (0, LANE - out_dim))).astype(jnp.float32)
    return p


# ----------------------------------------------------------------------------
# Forward pass.
# ----------------------------------------------------------------------------
def dqn_forward(params, x, *, out_dim):
    """x: (B, in_dim, 80, 80) NCHW -> qvals (B, out_dim) f32."""
    B, C, H, W = x.shape
    assert (H, W) == (80, 80), "fc_in_dim=2048 forces 80x80 input"
    x = jnp.transpose(x.astype(jnp.bfloat16), (0, 2, 3, 1))          # NHWC bf16

    # ---- conv1 (k=8, s=4): space-to-depth(4) => k=2, s=1 conv, 4 block gathers
    s2d = (x.reshape(B, 20, 4, 20, 4, C)
             .transpose(0, 1, 3, 2, 4, 5)
             .reshape(B, 20, 20, 16 * C))
    patches = [s2d[:, dh:dh + 19, dw:dw + 19, :]
               for dh in (0, 1) for dw in (0, 1)]
    cols1 = jnp.concatenate(patches, axis=-1).reshape(B * 19 * 19, 64 * C)
    y1 = matmul_bias_act(cols1, params["conv1_w"], params["conv1_b"],
                         relu=True, out_dtype=jnp.bfloat16)          # (B*361,128)
    y1 = y1.reshape(B, 19, 19, LANE)

    # ---- conv2 (k=4, s=3): im2col (16 strided block gathers) + matmul
    p2 = [y1[:, kh:kh + 16:3, kw:kw + 16:3, :]
          for kh in range(4) for kw in range(4)]
    cols2 = jnp.concatenate(p2, axis=-1).reshape(B * 36, 16 * LANE)
    y2 = matmul_bias_act(cols2, params["conv2_w"], params["conv2_b"],
                         relu=True, out_dtype=jnp.bfloat16)          # (B*36,128)
    y2 = y2.reshape(B, 6, 6, LANE)

    # ---- fused conv3 + flatten + fc1 + ReLU + fc2 (single Pallas kernel)
    p3 = [y2[:, kh:kh + 4, kw:kw + 4, :]
          for kh in range(3) for kw in range(3)]
    cols3 = (jnp.concatenate(p3, axis=-1)                # (B,4,4,1152)
               .reshape(B, 16, 9 * LANE)
               .transpose(1, 0, 2))                      # (16,B,1152) pos-major
    q = conv3_fc_head(cols3, params["conv3_w"], params["conv3_b"],
                      params["fc1_w"], params["fc1_b"],
                      params["fc2_w"], params["fc2_b"])  # (B,128) f32
    return q[:, :out_dim]


# ----------------------------------------------------------------------------
# Pure-XLA reference (f32) for correctness checking.
# ----------------------------------------------------------------------------
def _reference_forward(tp, x):
    x = x.astype(jnp.float32)

    def conv(x, w, b, s):
        y = jax.lax.conv_general_dilated(
            x, w, window_strides=(s, s), padding="VALID",
            dimension_numbers=("NCHW", "OIHW", "NCHW"))
        return jax.nn.relu(y + b.reshape(1, -1, 1, 1))

    x = conv(x, tp["conv1_w"], tp["conv1_b"], 4)
    x = conv(x, tp["conv2_w"], tp["conv2_b"], 3)
    x = conv(x, tp["conv3_w"], tp["conv3_b"], 1)
    x = x.reshape(x.shape[0], -1)                     # NCHW flatten, as in torch
    x = jax.nn.relu(x @ tp["fc1_w"].T + tp["fc1_b"])
    return x @ tp["fc2_w"].T + tp["fc2_b"]


if __name__ == "__main__":
    key = jax.random.PRNGKey(0)
    k_param, k_x = jax.random.split(key)

    B, in_dim, out_dim = 2, 4, 6       # 80x80 spatial is forced by fc_in_dim=2048
    torch_params = init_dqn_params(k_param, in_dim, out_dim)
    params = jax.tree_util.tree_map(jax.block_until_ready,
                                    prepare_params(torch_params))
    x = jax.random.normal(k_x, (B, in_dim, 80, 80), jnp.float32)

    fwd = jax.jit(functools.partial(dqn_forward, out_dim=out_dim))
    qvals = jax.block_until_ready(fwd(params, x))

    assert qvals.shape == (B, out_dim), qvals.shape
    assert qvals.dtype == jnp.float32
    assert bool(jnp.all(jnp.isfinite(qvals)))

    q_ref = _reference_forward(torch_params, x)
    assert bool(jnp.allclose(qvals, q_ref, rtol=0.1, atol=0.1)), (
        float(jnp.max(jnp.abs(qvals - q_ref))))

    print("KERNEL_OK")
</pallas_src>

<mosaic_0001>
module attributes {stable_mosaic.version = 11 : i64} {
  func.func @_matmul_bias_act_kernel(%arg0: i32, %arg1: memref<368x256xbf16, #tpu.memory_space<vmem>>, %arg2: memref<256x128xbf16, #tpu.memory_space<vmem>>, %arg3: memref<1x128xf32, #tpu.memory_space<vmem>>, %arg4: memref<368x128xbf16, #tpu.memory_space<vmem>>) attributes {dimension_semantics = [#tpu.dimension_semantics<parallel>], iteration_bounds = array<i64: 2>, scalar_prefetch = 0 : i64, scratch_operands = 0 : i64, tpu.core_type = #tpu.core_type<tc>, window_params = [{transform_indices = @transform_0, window_bounds = array<i64: 368, 256>}, {pipeline_mode = #tpu.pipeline_mode<synchronous>, transform_indices = @transform_1, window_bounds = array<i64: 256, 128>}, {pipeline_mode = #tpu.pipeline_mode<synchronous>, transform_indices = @transform_2, window_bounds = array<i64: 1, 128>}, {transform_indices = @transform_3, window_bounds = array<i64: 368, 128>}]} {
    %c0 = arith.constant 0 : index
    %c0_0 = arith.constant 0 : index
    %0 = vector.load %arg1[%c0, %c0_0] : memref<368x256xbf16, #tpu.memory_space<vmem>>, vector<368x256xbf16>
    %c0_1 = arith.constant 0 : index
    %c0_2 = arith.constant 0 : index
    %1 = vector.load %arg2[%c0_1, %c0_2] : memref<256x128xbf16, #tpu.memory_space<vmem>>, vector<256x128xbf16>
    %cst = arith.constant dense<0.000000e+00> : vector<368x128xf32>
    %2 = tpu.matmul %0, %1, %cst {dimension_numbers = #tpu.dot_dimension_numbers<[1], [0], [0], [1], [0, 0, 1, 1], [], []>} : vector<368x256xbf16>, vector<256x128xbf16>, vector<368x128xf32> -> vector<368x128xf32>
    %c0_3 = arith.constant 0 : index
    %c0_4 = arith.constant 0 : index
    %3 = vector.load %arg3[%c0_3, %c0_4] : memref<1x128xf32, #tpu.memory_space<vmem>>, vector<1x128xf32>
    %4 = vector.broadcast %3 : vector<1x128xf32> to vector<368x128xf32>
    %5 = arith.addf %2, %4 : vector<368x128xf32>
    %cst_5 = arith.constant 0.000000e+00 : f32
    %6 = vector.broadcast %cst_5 : f32 to vector<368x128xf32>
    %7 = arith.maximumf %5, %6 : vector<368x128xf32>
    %8 = arith.truncf %7 : vector<368x128xf32> to vector<368x128xbf16>
    %c0_6 = arith.constant 0 : index
    %c0_7 = arith.constant 0 : index
    %9 = vector.load %arg4[%c0_6, %c0_7] : memref<368x128xbf16, #tpu.memory_space<vmem>>, vector<368x128xbf16>
    tpu.vector_store %arg4[%c0_6, %c0_7], %8 {strides = array<i32>} : memref<368x128xbf16, #tpu.memory_space<vmem>>, vector<368x128xbf16>,
    return
  }
  func.func @transform_0(%arg0: i32) -> (i32, i32) {
    %c0_i32 = arith.constant 0 : i32
    %c0_i32_0 = arith.constant 0 : i32
    return %arg0, %c0_i32 : i32, i32
  }
  func.func @transform_1(%arg0: i32) -> (i32, i32) {
    %c0_i32 = arith.constant 0 : i32
    %c0_i32_0 = arith.constant 0 : i32
    %c0_i32_1 = arith.constant 0 : i32
    return %c0_i32, %c0_i32_0 : i32, i32
  }
  func.func @transform_2(%arg0: i32) -> (i32, i32) {
    %c0_i32 = arith.constant 0 : i32
    %c0_i32_0 = arith.constant 0 : i32
    %c0_i32_1 = arith.constant 0 : i32
    return %c0_i32, %c0_i32_0 : i32, i32
  }
  func.func @transform_3(%arg0: i32) -> (i32, i32) {
    %c0_i32 = arith.constant 0 : i32
    %c0_i32_0 = arith.constant 0 : i32
    return %arg0, %c0_i32 : i32, i32
  }
}

module attributes {stable_mosaic.version = 11 : i64} {
  func.func @_matmul_bias_act_kernel(%arg0: i32, %arg1: memref<72x2048xbf16, #tpu.memory_space<vmem>>, %arg2: memref<2048x128xbf16, #tpu.memory_space<vmem>>, %arg3: memref<1x128xf32, #tpu.memory_space<vmem>>, %arg4: memref<72x128xbf16, #tpu.memory_space<vmem>>) attributes {dimension_semantics = [#tpu.dimension_semantics<parallel>], iteration_bounds = array<i64: 1>, scalar_prefetch = 0 : i64, scratch_operands = 0 : i64, tpu.core_type = #tpu.core_type<tc>, window_params = [{transform_indices = @transform_0, window_bounds = array<i64: 72, 2048>}, {pipeline_mode = #tpu.pipeline_mode<synchronous>, transform_indices = @transform_1, window_bounds = array<i64: 2048, 128>}, {pipeline_mode = #tpu.pipeline_mode<synchronous>, transform_indices = @transform_2, window_bounds = array<i64: 1, 128>}, {transform_indices = @transform_3, window_bounds = array<i64: 72, 128>}]} {
    %c0 = arith.constant 0 : index
    %c0_0 = arith.constant 0 : index
    %0 = vector.load %arg1[%c0, %c0_0] : memref<72x2048xbf16, #tpu.memory_space<vmem>>, vector<72x2048xbf16>
    %c0_1 = arith.constant 0 : index
    %c0_2 = arith.constant 0 : index
    %1 = vector.load %arg2[%c0_1, %c0_2] : memref<2048x128xbf16, #tpu.memory_space<vmem>>, vector<2048x128xbf16>
    %cst = arith.constant dense<0.000000e+00> : vector<72x128xf32>
    %2 = tpu.matmul %0, %1, %cst {dimension_numbers = #tpu.dot_dimension_numbers<[1], [0], [0], [1], [0, 0, 1, 1], [], []>} : vector<72x2048xbf16>, vector<2048x128xbf16>, vector<72x128xf32> -> vector<72x128xf32>
    %c0_3 = arith.constant 0 : index
    %c0_4 = arith.constant 0 : index
    %3 = vector.load %arg3[%c0_3, %c0_4] : memref<1x128xf32, #tpu.memory_space<vmem>>, vector<1x128xf32>
    %4 = vector.broadcast %3 : vector<1x128xf32> to vector<72x128xf32>
    %5 = arith.addf %2, %4 : vector<72x128xf32>
    %cst_5 = arith.constant 0.000000e+00 : f32
    %6 = vector.broadcast %cst_5 : f32 to vector<72x128xf32>
    %7 = arith.maximumf %5, %6 : vector<72x128xf32>
    %8 = arith.truncf %7 : vector<72x128xf32> to vector<72x128xbf16>
    %c0_6 = arith.constant 0 : index
    %c0_7 = arith.constant 0 : index
    %9 = vector.load %arg4[%c0_6, %c0_7] : memref<72x128xbf16, #tpu.memory_space<vmem>>, vector<72x128xbf16>
    tpu.vector_store %arg4[%c0_6, %c0_7], %8 {strides = array<i32>} : memref<72x128xbf16, #tpu.memory_space<vmem>>, vector<72x128xbf16>,
    return
  }
  func.func @transform_0(%arg0: i32) -> (i32, i32) {
    %c0_i32 = arith.constant 0 : i32
    %c0_i32_0 = arith.constant 0 : i32
    return %arg0, %c0_i32 : i32, i32
  }
  func.func @transform_1(%arg0: i32) -> (i32, i32) {
    %c0_i32 = arith.constant 0 : i32
    %c0_i32_0 = arith.constant 0 : i32
    %c0_i32_1 = arith.constant 0 : i32
    return %c0_i32, %c0_i32_0 : i32, i32
  }
  func.func @transform_2(%arg0: i32) -> (i32, i32) {
    %c0_i32 = arith.constant 0 : i32
    %c0_i32_0 = arith.constant 0 : i32
    %c0_i32_1 = arith.constant 0 : i32
    return %c0_i32, %c0_i32_0 : i32, i32
  }
  func.func @transform_3(%arg0: i32) -> (i32, i32) {
    %c0_i32 = arith.constant 0 : i32
    %c0_i32_0 = arith.constant 0 : i32
    return %arg0, %c0_i32 : i32, i32
  }
}

module attributes {stable_mosaic.version = 11 : i64} {
  func.func @_tail_kernel(%arg0: i32, %arg1: memref<16x2x1152xbf16, #tpu.memory_space<vmem>>, %arg2: memref<1152x128xbf16, #tpu.memory_space<vmem>>, %arg3: memref<1x128xf32, #tpu.memory_space<vmem>>, %arg4: memref<16x128x512xbf16, #tpu.memory_space<vmem>>, %arg5: memref<1x512xf32, #tpu.memory_space<vmem>>, %arg6: memref<512x128xbf16, #tpu.memory_space<vmem>>, %arg7: memref<1x128xf32, #tpu.memory_space<vmem>>, %arg8: memref<2x128xf32, #tpu.memory_space<vmem>>) attributes {dimension_semantics = [#tpu.dimension_semantics<parallel>], iteration_bounds = array<i64: 1>, scalar_prefetch = 0 : i64, scratch_operands = 0 : i64, tpu.core_type = #tpu.core_type<tc>, window_params = [{transform_indices = @transform_0, window_bounds = array<i64: 16, 2, 1152>}, {pipeline_mode = #tpu.pipeline_mode<synchronous>, transform_indices = @transform_1, window_bounds = array<i64: 1152, 128>}, {pipeline_mode = #tpu.pipeline_mode<synchronous>, transform_indices = @transform_2, window_bounds = array<i64: 1, 128>}, {pipeline_mode = #tpu.pipeline_mode<synchronous>, transform_indices = @transform_3, window_bounds = array<i64: 16, 128, 512>}, {pipeline_mode = #tpu.pipeline_mode<synchronous>, transform_indices = @transform_4, window_bounds = array<i64: 1, 512>}, {pipeline_mode = #tpu.pipeline_mode<synchronous>, transform_indices = @transform_5, window_bounds = array<i64: 512, 128>}, {pipeline_mode = #tpu.pipeline_mode<synchronous>, transform_indices = @transform_6, window_bounds = array<i64: 1, 128>}, {transform_indices = @transform_7, window_bounds = array<i64: 2, 128>}]} {
    %cst = arith.constant 0.000000e+00 : f32
    %0 = vector.broadcast %cst : f32 to vector<2x512xf32>
    %c0 = arith.constant 0 : index
    %c0_0 = arith.constant 0 : index
    %c0_1 = arith.constant 0 : index
    %1 = vector.load %arg1[%c0, %c0_0, %c0_1] : memref<16x2x1152xbf16, #tpu.memory_space<vmem>>, vector<1x2x1152xbf16>
    %2 = vector.shape_cast %1 : vector<1x2x1152xbf16> to vector<2x1152xbf16>
    %c0_2 = arith.constant 0 : index
    %c0_3 = arith.constant 0 : index
    %3 = vector.load %arg2[%c0_2, %c0_3] : memref<1152x128xbf16, #tpu.memory_space<vmem>>, vector<1152x128xbf16>
    %cst_4 = arith.constant dense<0.000000e+00> : vector<2x128xf32>
    %4 = tpu.matmul %2, %3, %cst_4 {dimension_numbers = #tpu.dot_dimension_numbers<[1], [0], [0], [1], [0, 0, 1, 1], [], []>} : vector<2x1152xbf16>, vector<1152x128xbf16>, vector<2x128xf32> -> vector<2x128xf32>
    %c0_5 = arith.constant 0 : index
    %c0_6 = arith.constant 0 : index
    %5 = vector.load %arg3[%c0_5, %c0_6] : memref<1x128xf32, #tpu.memory_space<vmem>>, vector<1x128xf32>
    %6 = vector.broadcast %5 : vector<1x128xf32> to vector<2x128xf32>
    %7 = arith.addf %4, %6 : vector<2x128xf32>
    %cst_7 = arith.constant 0.000000e+00 : f32
    %8 = vector.broadcast %cst_7 : f32 to vector<2x128xf32>
    %9 = arith.maximumf %7, %8 : vector<2x128xf32>
    %10 = arith.truncf %9 : vector<2x128xf32> to vector<2x128xbf16>
    %c0_8 = arith.constant 0 : index
    %c0_9 = arith.constant 0 : index
    %c0_10 = arith.constant 0 : index
    %11 = vector.load %arg4[%c0_8, %c0_9, %c0_10] : memref<16x128x512xbf16, #tpu.memory_space<vmem>>, vector<1x128x512xbf16>
    %12 = vector.shape_cast %11 : vector<1x128x512xbf16> to vector<128x512xbf16>
    %cst_11 = arith.constant dense<0.000000e+00> : vector<2x512xf32>
    %13 = tpu.matmul %10, %12, %cst_11 {dimension_numbers = #tpu.dot_dimension_numbers<[1], [0], [0], [1], [0, 0, 1, 1], [], []>} : vector<2x128xbf16>, vector<128x512xbf16>, vector<2x512xf32> -> vector<2x512xf32>
    %14 = arith.addf %0, %13 : vector<2x512xf32>
    %c1 = arith.constant 1 : index
    %c0_12 = arith.constant 0 : index
    %c0_13 = arith.constant 0 : index
    %15 = vector.load %arg1[%c1, %c0_12, %c0_13] : memref<16x2x1152xbf16, #tpu.memory_space<vmem>>, vector<1x2x1152xbf16>
    %16 = vector.shape_cast %15 : vector<1x2x1152xbf16> to vector<2x1152xbf16>
    %c0_14 = arith.constant 0 : index
    %c0_15 = arith.constant 0 : index
    %17 = vector.load %arg2[%c0_14, %c0_15] : memref<1152x128xbf16, #tpu.memory_space<vmem>>, vector<1152x128xbf16>
    %cst_16 = arith.constant dense<0.000000e+00> : vector<2x128xf32>
    %18 = tpu.matmul %16, %17, %cst_16 {dimension_numbers = #tpu.dot_dimension_numbers<[1], [0], [0], [1], [0, 0, 1, 1], [], []>} : vector<2x1152xbf16>, vector<1152x128xbf16>, vector<2x128xf32> -> vector<2x128xf32>
    %c0_17 = arith.constant 0 : index
    %c0_18 = arith.constant 0 : index
    %19 = vector.load %arg3[%c0_17, %c0_18] : memref<1x128xf32, #tpu.memory_space<vmem>>, vector<1x128xf32>
    %20 = vector.broadcast %19 : vector<1x128xf32> to vector<2x128xf32>
    %21 = arith.addf %18, %20 : vector<2x128xf32>
    %cst_19 = arith.constant 0.000000e+00 : f32
    %22 = vector.broadcast %cst_19 : f32 to vector<2x128xf32>
    %23 = arith.maximumf %21, %22 : vector<2x128xf32>
    %24 = arith.truncf %23 : vector<2x128xf32> to vector<2x128xbf16>
    %c1_20 = arith.constant 1 : index
    %c0_21 = arith.constant 0 : index
    %c0_22 = arith.constant 0 : index
    %25 = vector.load %arg4[%c1_20, %c0_21, %c0_22] : memref<16x128x512xbf16, #tpu.memory_space<vmem>>, vector<1x128x512xbf16>
    %26 = vector.shape_cast %25 : vector<1x128x512xbf16> to vector<128x512xbf16>
    %cst_23 = arith.constant dense<0.000000e+00> : vector<2x512xf32>
    %27 = tpu.matmul %24, %26, %cst_23 {dimension_numbers = #tpu.dot_dimension_numbers<[1], [0], [0], [1], [0, 0, 1, 1], [], []>} : vector<2x128xbf16>, vector<128x512xbf16>, vector<2x512xf32> -> vector<2x512xf32>
    %28 = arith.addf %14, %27 : vector<2x512xf32>
    %c2 = arith.constant 2 : index
    %c0_24 = arith.constant 0 : index
    %c0_25 = arith.constant 0 : index
    %29 = vector.load %arg1[%c2, %c0_24, %c0_25] : memref<16x2x1152xbf16, #tpu.memory_space<vmem>>, vector<1x2x1152xbf16>
    %30 = vector.shape_cast %29 : vector<1x2x1152xbf16> to vector<2x1152xbf16>
    %c0_26 = arith.constant 0 : index
    %c0_27 = arith.constant 0 : index
    %31 = vector.load %arg2[%c0_26, %c0_27] : memref<1152x128xbf16, #tpu.memory_space<vmem>>, vector<1152x128xbf16>
    %cst_28 = arith.constant dense<0.000000e+00> : vector<2x128xf32>
    %32 = tpu.matmul %30, %31, %cst_28 {dimension_numbers = #tpu.dot_dimension_numbers<[1], [0], [0], [1], [0, 0, 1, 1], [], []>} : vector<2x1152xbf16>, vector<1152x128xbf16>, vector<2x128xf32> -> vector<2x128xf32>
    %c0_29 = arith.constant 0 : index
    %c0_30 = arith.constant 0 : index
    %33 = vector.load %arg3[%c0_29, %c0_30] : memref<1x128xf32, #tpu.memory_space<vmem>>, vector<1x128xf32>
    %34 = vector.broadcast %33 : vector<1x128xf32> to vector<2x128xf32>
    %35 = arith.addf %32, %34 : vector<2x128xf32>
    %cst_31 = arith.constant 0.000000e+00 : f32
    %36 = vector.broadcast %cst_31 : f32 to vector<2x128xf32>
    %37 = arith.maximumf %35, %36 : vector<2x128xf32>
    %38 = arith.truncf %37 : vector<2x128xf32> to vector<2x128xbf16>
    %c2_32 = arith.constant 2 : index
    %c0_33 = arith.constant 0 : index
    %c0_34 = arith.constant 0 : index
    %39 = vector.load %arg4[%c2_32, %c0_33, %c0_34] : memref<16x128x512xbf16, #tpu.memory_space<vmem>>, vector<1x128x512xbf16>
    %40 = vector.shape_cast %39 : vector<1x128x512xbf16> to vector<128x512xbf16>
    %cst_35 = arith.constant dense<0.000000e+00> : vector<2x512xf32>
    %41 = tpu.matmul %38, %40, %cst_35 {dimension_numbers = #tpu.dot_dimension_numbers<[1], [0], [0], [1], [0, 0, 1, 1], [], []>} : vector<2x128xbf16>, vector<128x512xbf16>, vector<2x512xf32> -> vector<2x512xf32>
    %42 = arith.addf %28, %41 : vector<2x512xf32>
    %c3 = arith.constant 3 : index
    %c0_36 = arith.constant 0 : index
    %c0_37 = arith.constant 0 : index
    %43 = vector.load %arg1[%c3, %c0_36, %c0_37] : memref<16x2x1152xbf16, #tpu.memory_space<vmem>>, vector<1x2x1152xbf16>
    %44 = vector.shape_cast %43 : vector<1x2x1152xbf16> to vector<2x1152xbf16>
    %c0_38 = arith.constant 0 : index
    %c0_39 = arith.constant 0 : index
    %45 = vector.load %arg2[%c0_38, %c0_39] : memref<1152x128xbf16, #tpu.memory_space<vmem>>, vector<1152x128xbf16>
    %cst_40 = arith.constant dense<0.000000e+00> : vector<2x128xf32>
    %46 = tpu.matmul %44, %45, %cst_40 {dimension_numbers = #tpu.dot_dimension_numbers<[1], [0], [0], [1], [0, 0, 1, 1], [], []>} : vector<2x1152xbf16>, vector<1152x128xbf16>, vector<2x128xf32> -> vector<2x128xf32>
    %c0_41 = arith.constant 0 : index
    %c0_42 = arith.constant 0 : index
    %47 = vector.load %arg3[%c0_41, %c0_42] : memref<1x128xf32, #tpu.memory_space<vmem>>, vector<1x128xf32>
    %48 = vector.broadcast %47 : vector<1x128xf32> to vector<2x128xf32>
    %49 = arith.addf %46, %48 : vector<2x128xf32>
    %cst_43 = arith.constant 0.000000e+00 : f32
    %50 = vector.broadcast %cst_43 : f32 to vector<2x128xf32>
    %51 = arith.maximumf %49, %50 : vector<2x128xf32>
    %52 = arith.truncf %51 : vector<2x128xf32> to vector<2x128xbf16>
    %c3_44 = arith.constant 3 : index
    %c0_45 = arith.constant 0 : index
    %c0_46 = arith.constant 0 : index
    %53 = vector.load %arg4[%c3_44, %c0_45, %c0_46] : memref<16x128x512xbf16, #tpu.memory_space<vmem>>, vector<1x128x512xbf16>
    %54 = vector.shape_cast %53 : vector<1x128x512xbf16> to vector<128x512xbf16>
    %cst_47 = arith.constant dense<0.000000e+00> : vector<2x512xf32>
    %55 = tpu.matmul %52, %54, %cst_47 {dimension_numbers = #tpu.dot_dimension_numbers<[1], [0], [0], [1], [0, 0, 1, 1], [], []>} : vector<2x128xbf16>, vector<128x512xbf16>, vector<2x512xf32> -> vector<2x512xf32>
    %56 = arith.addf %42, %55 : vector<2x512xf32>
    %c4 = arith.constant 4 : index
    %c0_48 = arith.constant 0 : index
    %c0_49 = arith.constant 0 : index
    %57 = vector.load %arg1[%c4, %c0_48, %c0_49] : memref<16x2x1152xbf16, #tpu.memory_space<vmem>>, vector<1x2x1152xbf16>
    %58 = vector.shape_cast %57 : vector<1x2x1152xbf16> to vector<2x1152xbf16>
    %c0_50 = arith.constant 0 : index
    %c0_51 = arith.constant 0 : index
    %59 = vector.load %arg2[%c0_50, %c0_51] : memref<1152x128xbf16, #tpu.memory_space<vmem>>, vector<1152x128xbf16>
    %cst_52 = arith.constant dense<0.000000e+00> : vector<2x128xf32>
    %60 = tpu.matmul %58, %59, %cst_52 {dimension_numbers = #tpu.dot_dimension_numbers<[1], [0], [0], [1], [0, 0, 1, 1], [], []>} : vector<2x1152xbf16>, vector<1152x128xbf16>, vector<2x128xf32> -> vector<2x128xf32>
    %c0_53 = arith.constant 0 : index
    %c0_54 = arith.constant 0 : index
    %61 = vector.load %arg3[%c0_53, %c0_54] : memref<1x128xf32, #tpu.memory_space<vmem>>, vector<1x128xf32>
    %62 = vector.broadcast %61 : vector<1x128xf32> to vector<2x128xf32>
    %63 = arith.addf %60, %62 : vector<2x128xf32>
    %cst_55 = arith.constant 0.000000e+00 : f32
    %64 = vector.broadcast %cst_55 : f32 to vector<2x128xf32>
    %65 = arith.maximumf %63, %64 : vector<2x128xf32>
    %66 = arith.truncf %65 : vector<2x128xf32> to vector<2x128xbf16>
    %c4_56 = arith.constant 4 : index
    %c0_57 = arith.constant 0 : index
    %c0_58 = arith.constant 0 : index
    %67 = vector.load %arg4[%c4_56, %c0_57, %c0_58] : memref<16x128x512xbf16, #tpu.memory_space<vmem>>, vector<1x128x512xbf16>
    %68 = vector.shape_cast %67 : vector<1x128x512xbf16> to vector<128x512xbf16>
    %cst_59 = arith.constant dense<0.000000e+00> : vector<2x512xf32>
    %69 = tpu.matmul %66, %68, %cst_59 {dimension_numbers = #tpu.dot_dimension_numbers<[1], [0], [0], [1], [0, 0, 1, 1], [], []>} : vector<2x128xbf16>, vector<128x512xbf16>, vector<2x512xf32> -> vector<2x512xf32>
    %70 = arith.addf %56, %69 : vector<2x512xf32>
    %c5 = arith.constant 5 : index
    %c0_60 = arith.constant 0 : index
    %c0_61 = arith.constant 0 : index
    %71 = vector.load %arg1[%c5, %c0_60, %c0_61] : memref<16x2x1152xbf16, #tpu.memory_space<vmem>>, vector<1x2x1152xbf16>
    %72 = vector.shape_cast %71 : vector<1x2x1152xbf16> to vector<2x1152xbf16>
    %c0_62 = arith.constant 0 : index
    %c0_63 = arith.constant 0 : index
    %73 = vector.load %arg2[%c0_62, %c0_63] : memref<1152x128xbf16, #tpu.memory_space<vmem>>, vector<1152x128xbf16>
    %cst_64 = arith.constant dense<0.000000e+00> : vector<2x128xf32>
    %74 = tpu.matmul %72, %73, %cst_64 {dimension_numbers = #tpu.dot_dimension_numbers<[1], [0], [0], [1], [0, 0, 1, 1], [], []>} : vector<2x1152xbf16>, vector<1152x128xbf16>, vector<2x128xf32> -> vector<2x128xf32>
    %c0_65 = arith.constant 0 : index
    %c0_66 = arith.constant 0 : index
    %75 = vector.load %arg3[%c0_65, %c0_66] : memref<1x128xf32, #tpu.memory_space<vmem>>, vector<1x128xf32>
    %76 = vector.broadcast %75 : vector<1x128xf32> to vector<2x128xf32>
    %77 = arith.addf %74, %76 : vector<2x128xf32>
    %cst_67 = arith.constant 0.000000e+00 : f32
    %78 = vector.broadcast %cst_67 : f32 to vector<2x128xf32>
    %79 = arith.maximumf %77, %78 : vector<2x128xf32>
    %80 = arith.truncf %79 : vector<2x128xf32> to vector<2x128xbf16>
    %c5_68 = arith.constant 5 : index
    %c0_69 = arith.constant 0 : index
    %c0_70 = arith.constant 0 : index
    %81 = vector.load %arg4[%c5_68, %c0_69, %c0_70] : memref<16x128x512xbf16, #tpu.memory_space<vmem>>, vector<1x128x512xbf16>
    %82 = vector.shape_cast %81 : vector<1x128x512xbf16> to vector<128x512xbf16>
    %cst_71 = arith.constant dense<0.000000e+00> : vector<2x512xf32>
    %83 = tpu.matmul %80, %82, %cst_71 {dimension_numbers = #tpu.dot_dimension_numbers<[1], [0], [0], [1], [0, 0, 1, 1], [], []>} : vector<2x128xbf16>, vector<128x512xbf16>, vector<2x512xf32> -> vector<2x512xf32>
    %84 = arith.addf %70, %83 : vector<2x512xf32>
    %c6 = arith.constant 6 : index
    %c0_72 = arith.constant 0 : index
    %c0_73 = arith.constant 0 : index
    %85 = vector.load %arg1[%c6, %c0_72, %c0_73] : memref<16x2x1152xbf16, #tpu.memory_space<vmem>>, vector<1x2x1152xbf16>
    %86 = vector.shape_cast %85 : vector<1x2x1152xbf16> to vector<2x1152xbf16>
    %c0_74 = arith.constant 0 : index
    %c0_75 = arith.constant 0 : index
    %87 = vector.load %arg2[%c0_74, %c0_75] : memref<1152x128xbf16, #tpu.memory_space<vmem>>, vector<1152x128xbf16>
    %cst_76 = arith.constant dense<0.000000e+00> : vector<2x128xf32>
    %88 = tpu.matmul %86, %87, %cst_76 {dimension_numbers = #tpu.dot_dimension_numbers<[1], [0], [0], [1], [0, 0, 1, 1], [], []>} : vector<2x1152xbf16>, vector<1152x128xbf16>, vector<2x128xf32> -> vector<2x128xf32>
    %c0_77 = arith.constant 0 : index
    %c0_78 = arith.constant 0 : index
    %89 = vector.load %arg3[%c0_77, %c0_78] : memref<1x128xf32, #tpu.memory_space<vmem>>, vector<1x128xf32>
    %90 = vector.broadcast %89 : vector<1x128xf32> to vector<2x128xf32>
    %91 = arith.addf %88, %90 : vector<2x128xf32>
    %cst_79 = arith.constant 0.000000e+00 : f32
    %92 = vector.broadcast %cst_79 : f32 to vector<2x128xf32>
    %93 = arith.maximumf %91, %92 : vector<2x128xf32>
    %94 = arith.truncf %93 : vector<2x128xf32> to vector<2x128xbf16>
    %c6_80 = arith.constant 6 : index
    %c0_81 = arith.constant 0 : index
    %c0_82 = arith.constant 0 : index
    %95 = vector.load %arg4[%c6_80, %c0_81, %c0_82] : memref<16x128x512xbf16, #tpu.memory_space<vmem>>, vector<1x128x512xbf16>
    %96 = vector.shape_cast %95 : vector<1x128x512xbf16> to vector<128x512xbf16>
    %cst_83 = arith.constant dense<0.000000e+00> : vector<2x512xf32>
    %97 = tpu.matmul %94, %96, %cst_83 {dimension_numbers = #tpu.dot_dimension_numbers<[1], [0], [0], [1], [0, 0, 1, 1], [], []>} : vector<2x128xbf16>, vector<128x512xbf16>, vector<2x512xf32> -> vector<2x512xf32>
    %98 = arith.addf %84, %97 : vector<2x512xf32>
    %c7 = arith.constant 7 : index
    %c0_84 = arith.constant 0 : index
    %c0_85 = arith.constant 0 : index
    %99 = vector.load %arg1[%c7, %c0_84, %c0_85] : memref<16x2x1152xbf16, #tpu.memory_space<vmem>>, vector<1x2x1152xbf16>
    %100 = vector.shape_cast %99 : vector<1x2x1152xbf16> to vector<2x1152xbf16>
    %c0_86 = arith.constant 0 : index
    %c0_87 = arith.constant 0 : index
    %101 = vector.load %arg2[%c0_86, %c0_87] : memref<1152x128xbf16, #tpu.memory_space<vmem>>, vector<1152x128xbf16>
    %cst_88 = arith.constant dense<0.000000e+00> : vector<2x128xf32>
    %102 = tpu.matmul %100, %101, %cst_88 {dimension_numbers = #tpu.dot_dimension_numbers<[1], [0], [0], [1], [0, 0, 1, 1], [], []>} : vector<2x1152xbf16>, vector<1152x128xbf16>, vector<2x128xf32> -> vector<2x128xf32>
    %c0_89 = arith.constant 0 : index
    %c0_90 = arith.constant 0 : index
    %103 = vector.load %arg3[%c0_89, %c0_90] : memref<1x128xf32, #tpu.memory_space<vmem>>, vector<1x128xf32>
    %104 = vector.broadcast %103 : vector<1x128xf32> to vector<2x128xf32>
    %105 = arith.addf %102, %104 : vector<2x128xf32>
    %cst_91 = arith.constant 0.000000e+00 : f32
    %106 = vector.broadcast %cst_91 : f32 to vector<2x128xf32>
    %107 = arith.maximumf %105, %106 : vector<2x128xf32>
    %108 = arith.truncf %107 : vector<2x128xf32> to vector<2x128xbf16>
    %c7_92 = arith.constant 7 : index
    %c0_93 = arith.constant 0 : index
    %c0_94 = arith.constant 0 : index
    %109 = vector.load %arg4[%c7_92, %c0_93, %c0_94] : memref<16x128x512xbf16, #tpu.memory_space<vmem>>, vector<1x128x512xbf16>
    %110 = vector.shape_cast %109 : vector<1x128x512xbf16> to vector<128x512xbf16>
    %cst_95 = arith.constant dense<0.000000e+00> : vector<2x512xf32>
    %111 = tpu.matmul %108, %110, %cst_95 {dimension_numbers = #tpu.dot_dimension_numbers<[1], [0], [0], [1], [0, 0, 1, 1], [], []>} : vector<2x128xbf16>, vector<128x512xbf16>, vector<2x512xf32> -> vector<2x512xf32>
    %112 = arith.addf %98, %111 : vector<2x512xf32>
    %c8 = arith.constant 8 : index
    %c0_96 = arith.constant 0 : index
    %c0_97 = arith.constant 0 : index
    %113 = vector.load %arg1[%c8, %c0_96, %c0_97] : memref<16x2x1152xbf16, #tpu.memory_space<vmem>>, vector<1x2x1152xbf16>
    %114 = vector.shape_cast %113 : vector<1x2x1152xbf16> to vector<2x1152xbf16>
    %c0_98 = arith.constant 0 : index
    %c0_99 = arith.constant 0 : index
    %115 = vector.load %arg2[%c0_98, %c0_99] : memref<1152x128xbf16, #tpu.memory_space<vmem>>, vector<1152x128xbf16>
    %cst_100 = arith.constant dense<0.000000e+00> : vector<2x128xf32>
    %116 = tpu.matmul %114, %115, %cst_100 {dimension_numbers = #tpu.dot_dimension_numbers<[1], [0], [0], [1], [0, 0, 1, 1], [], []>} : vector<2x1152xbf16>, vector<1152x128xbf16>, vector<2x128xf32> -> vector<2x128xf32>
    %c0_101 = arith.constant 0 : index
    %c0_102 = arith.constant 0 : index
    %117 = vector.load %arg3[%c0_101, %c0_102] : memref<1x128xf32, #tpu.memory_space<vmem>>, vector<1x128xf32>
    %118 = vector.broadcast %117 : vector<1x128xf32> to vector<2x128xf32>
    %119 = arith.addf %116, %118 : vector<2x128xf32>
    %cst_103 = arith.constant 0.000000e+00 : f32
    %120 = vector.broadcast %cst_103 : f32 to vector<2x128xf32>
    %121 = arith.maximumf %119, %120 : vector<2x128xf32>
    %122 = arith.truncf %121 : vector<2x128xf32> to vector<2x128xbf16>
    %c8_104 = arith.constant 8 : index
    %c0_105 = arith.constant 0 : index
    %c0_106 = arith.constant 0 : index
    %123 = vector.load %arg4[%c8_104, %c0_105, %c0_106] : memref<16x128x512xbf16, #tpu.memory_space<vmem>>, vector<1x128x512xbf16>
    %124 = vector.shape_cast %123 : vector<1x128x512xbf16> to vector<128x512xbf16>
    %cst_107 = arith.constant dense<0.000000e+00> : vector<2x512xf32>
    %125 = tpu.matmul %122, %124, %cst_107 {dimension_numbers = #tpu.dot_dimension_numbers<[1], [0], [0], [1], [0, 0, 1, 1], [], []>} : vector<2x128xbf16>, vector<128x512xbf16>, vector<2x512xf32> -> vector<2x512xf32>
    %126 = arith.addf %112, %125 : vector<2x512xf32>
    %c9 = arith.constant 9 : index
    %c0_108 = arith.constant 0 : index
    %c0_109 = arith.constant 0 : index
    %127 = vector.load %arg1[%c9, %c0_108, %c0_109] : memref<16x2x1152xbf16, #tpu.memory_space<vmem>>, vector<1x2x1152xbf16>
    %128 = vector.shape_cast %127 : vector<1x2x1152xbf16> to vector<2x1152xbf16>
    %c0_110 = arith.constant 0 : index
    %c0_111 = arith.constant 0 : index
    %129 = vector.load %arg2[%c0_110, %c0_111] : memref<1152x128xbf16, #tpu.memory_space<vmem>>, vector<1152x128xbf16>
    %cst_112 = arith.constant dense<0.000000e+00> : vector<2x128xf32>
    %130 = tpu.matmul %128, %129, %cst_112 {dimension_numbers = #tpu.dot_dimension_numbers<[1], [0], [0], [1], [0, 0, 1, 1], [], []>} : vector<2x1152xbf16>, vector<1152x128xbf16>, vector<2x128xf32> -> vector<2x128xf32>
    %c0_113 = arith.constant 0 : index
    %c0_114 = arith.constant 0 : index
    %131 = vector.load %arg3[%c0_113, %c0_114] : memref<1x128xf32, #tpu.memory_space<vmem>>, vector<1x128xf32>
    %132 = vector.broadcast %131 : vector<1x128xf32> to vector<2x128xf32>
    %133 = arith.addf %130, %132 : vector<2x128xf32>
    %cst_115 = arith.constant 0.000000e+00 : f32
    %134 = vector.broadcast %cst_115 : f32 to vector<2x128xf32>
    %135 = arith.maximumf %133, %134 : vector<2x128xf32>
    %136 = arith.truncf %135 : vector<2x128xf32> to vector<2x128xbf16>
    %c9_116 = arith.constant 9 : index
    %c0_117 = arith.constant 0 : index
    %c0_118 = arith.constant 0 : index
    %137 = vector.load %arg4[%c9_116, %c0_117, %c0_118] : memref<16x128x512xbf16, #tpu.memory_space<vmem>>, vector<1x128x512xbf16>
    %138 = vector.shape_cast %137 : vector<1x128x512xbf16> to vector<128x512xbf16>
    %cst_119 = arith.constant dense<0.000000e+00> : vector<2x512xf32>
    %139 = tpu.matmul %136, %138, %cst_119 {dimension_numbers = #tpu.dot_dimension_numbers<[1], [0], [0], [1], [0, 0, 1, 1], [], []>} : vector<2x128xbf16>, vector<128x512xbf16>, vector<2x512xf32> -> vector<2x512xf32>
    %140 = arith.addf %126, %139 : vector<2x512xf32>
    %c10 = arith.constant 10 : index
    %c0_120 = arith.constant 0 : index
    %c0_121 = arith.constant 0 : index
    %141 = vector.load %arg1[%c10, %c0_120, %c0_121] : memref<16x2x1152xbf16, #tpu.memory_space<vmem>>, vector<1x2x1152xbf16>
    %142 = vector.shape_cast %141 : vector<1x2x1152xbf16> to vector<2x1152xbf16>
    %c0_122 = arith.constant 0 : index
    %c0_123 = arith.constant 0 : index
    %143 = vector.load %arg2[%c0_122, %c0_123] : memref<1152x128xbf16, #tpu.memory_space<vmem>>, vector<1152x128xbf16>
    %cst_124 = arith.constant dense<0.000000e+00> : vector<2x128xf32>
    %144 = tpu.matmul %142, %143, %cst_124 {dimension_numbers = #tpu.dot_dimension_numbers<[1], [0], [0], [1], [0, 0, 1, 1], [], []>} : vector<2x1152xbf16>, vector<1152x128xbf16>, vector<2x128xf32> -> vector<2x128xf32>
    %c0_125 = arith.constant 0 : index
    %c0_126 = arith.constant 0 : index
    %145 = vector.load %arg3[%c0_125, %c0_126] : memref<1x128xf32, #tpu.memory_space<vmem>>, vector<1x128xf32>
    %146 = vector.broadcast %145 : vector<1x128xf32> to vector<2x128xf32>
    %147 = arith.addf %144, %146 : vector<2x128xf32>
    %cst_127 = arith.constant 0.000000e+00 : f32
    %148 = vector.broadcast %cst_127 : f32 to vector<2x128xf32>
    %149 = arith.maximumf %147, %148 : vector<2x128xf32>
    %150 = arith.truncf %149 : vector<2x128xf32> to vector<2x128xbf16>
    %c10_128 = arith.constant 10 : index
    %c0_129 = arith.constant 0 : index
    %c0_130 = arith.constant 0 : index
    %151 = vector.load %arg4[%c10_128, %c0_129, %c0_130] : memref<16x128x512xbf16, #tpu.memory_space<vmem>>, vector<1x128x512xbf16>
    %152 = vector.shape_cast %151 : vector<1x128x512xbf16> to vector<128x512xbf16>
    %cst_131 = arith.constant dense<0.000000e+00> : vector<2x512xf32>
    %153 = tpu.matmul %150, %152, %cst_131 {dimension_numbers = #tpu.dot_dimension_numbers<[1], [0], [0], [1], [0, 0, 1, 1], [], []>} : vector<2x128xbf16>, vector<128x512xbf16>, vector<2x512xf32> -> vector<2x512xf32>
    %154 = arith.addf %140, %153 : vector<2x512xf32>
    %c11 = arith.constant 11 : index
    %c0_132 = arith.constant 0 : index
    %c0_133 = arith.constant 0 : index
    %155 = vector.load %arg1[%c11, %c0_132, %c0_133] : memref<16x2x1152xbf16, #tpu.memory_space<vmem>>, vector<1x2x1152xbf16>
    %156 = vector.shape_cast %155 : vector<1x2x1152xbf16> to vector<2x1152xbf16>
    %c0_134 = arith.constant 0 : index
    %c0_135 = arith.constant 0 : index
    %157 = vector.load %arg2[%c0_134, %c0_135] : memref<1152x128xbf16, #tpu.memory_space<vmem>>, vector<1152x128xbf16>
    %cst_136 = arith.constant dense<0.000000e+00> : vector<2x128xf32>
    %158 = tpu.matmul %156, %157, %cst_136 {dimension_numbers = #tpu.dot_dimension_numbers<[1], [0], [0], [1], [0, 0, 1, 1], [], []>} : vector<2x1152xbf16>, vector<1152x128xbf16>, vector<2x128xf32> -> vector<2x128xf32>
    %c0_137 = arith.constant 0 : index
    %c0_138 = arith.constant 0 : index
    %159 = vector.load %arg3[%c0_137, %c0_138] : memref<1x128xf32, #tpu.memory_space<vmem>>, vector<1x128xf32>
    %160 = vector.broadcast %159 : vector<1x128xf32> to vector<2x128xf32>
    %161 = arith.addf %158, %160 : vector<2x128xf32>
    %cst_139 = arith.constant 0.000000e+00 : f32
    %162 = vector.broadcast %cst_139 : f32 to vector<2x128xf32>
    %163 = arith.maximumf %161, %162 : vector<2x128xf32>
    %164 = arith.truncf %163 : vector<2x128xf32> to vector<2x128xbf16>
    %c11_140 = arith.constant 11 : index
    %c0_141 = arith.constant 0 : index
    %c0_142 = arith.constant 0 : index
    %165 = vector.load %arg4[%c11_140, %c0_141, %c0_142] : memref<16x128x512xbf16, #tpu.memory_space<vmem>>, vector<1x128x512xbf16>
    %166 = vector.shape_cast %165 : vector<1x128x512xbf16> to vector<128x512xbf16>
    %cst_143 = arith.constant dense<0.000000e+00> : vector<2x512xf32>
    %167 = tpu.matmul %164, %166, %cst_143 {dimension_numbers = #tpu.dot_dimension_numbers<[1], [0], [0], [1], [0, 0, 1, 1], [], []>} : vector<2x128xbf16>, vector<128x512xbf16>, vector<2x512xf32> -> vector<2x512xf32>
    %168 = arith.addf %154, %167 : vector<2x512xf32>
    %c12 = arith.constant 12 : index
    %c0_144 = arith.constant 0 : index
    %c0_145 = arith.constant 0 : index
    %169 = vector.load %arg1[%c12, %c0_144, %c0_145] : memref<16x2x1152xbf16, #tpu.memory_space<vmem>>, vector<1x2x1152xbf16>
    %170 = vector.shape_cast %169 : vector<1x2x1152xbf16> to vector<2x1152xbf16>
    %c0_146 = arith.constant 0 : index
    %c0_147 = arith.constant 0 : index
    %171 = vector.load %arg2[%c0_146, %c0_147] : memref<1152x128xbf16, #tpu.memory_space<vmem>>, vector<1152x128xbf16>
    %cst_148 = arith.constant dense<0.000000e+00> : vector<2x128xf32>
    %172 = tpu.matmul %170, %171, %cst_148 {dimension_numbers = #tpu.dot_dimension_numbers<[1], [0], [0], [1], [0, 0, 1, 1], [], []>} : vector<2x1152xbf16>, vector<1152x128xbf16>, vector<2x128xf32> -> vector<2x128xf32>
    %c0_149 = arith.constant 0 : index
    %c0_150 = arith.constant 0 : index
    %173 = vector.load %arg3[%c0_149, %c0_150] : memref<1x128xf32, #tpu.memory_space<vmem>>, vector<1x128xf32>
    %174 = vector.broadcast %173 : vector<1x128xf32> to vector<2x128xf32>
    %175 = arith.addf %172, %174 : vector<2x128xf32>
    %cst_151 = arith.constant 0.000000e+00 : f32
    %176 = vector.broadcast %cst_151 : f32 to vector<2x128xf32>
    %177 = arith.maximumf %175, %176 : vector<2x128xf32>
    %178 = arith.truncf %177 : vector<2x128xf32> to vector<2x128xbf16>
    %c12_152 = arith.constant 12 : index
    %c0_153 = arith.constant 0 : index
    %c0_154 = arith.constant 0 : index
    %179 = vector.load %arg4[%c12_152, %c0_153, %c0_154] : memref<16x128x512xbf16, #tpu.memory_space<vmem>>, vector<1x128x512xbf16>
    %180 = vector.shape_cast %179 : vector<1x128x512xbf16> to vector<128x512xbf16>
    %cst_155 = arith.constant dense<0.000000e+00> : vector<2x512xf32>
    %181 = tpu.matmul %178, %180, %cst_155 {dimension_numbers = #tpu.dot_dimension_numbers<[1], [0], [0], [1], [0, 0, 1, 1], [], []>} : vector<2x128xbf16>, vector<128x512xbf16>, vector<2x512xf32> -> vector<2x512xf32>
    %182 = arith.addf %168, %181 : vector<2x512xf32>
    %c13 = arith.constant 13 : index
    %c0_156 = arith.constant 0 : index
    %c0_157 = arith.constant 0 : index
    %183 = vector.load %arg1[%c13, %c0_156, %c0_157] : memref<16x2x1152xbf16, #tpu.memory_space<vmem>>, vector<1x2x1152xbf16>
    %184 = vector.shape_cast %183 : vector<1x2x1152xbf16> to vector<2x1152xbf16>
    %c0_158 = arith.constant 0 : index
    %c0_159 = arith.constant 0 : index
    %185 = vector.load %arg2[%c0_158, %c0_159] : memref<1152x128xbf16, #tpu.memory_space<vmem>>, vector<1152x128xbf16>
    %cst_160 = arith.constant dense<0.000000e+00> : vector<2x128xf32>
    %186 = tpu.matmul %184, %185, %cst_160 {dimension_numbers = #tpu.dot_dimension_numbers<[1], [0], [0], [1], [0, 0, 1, 1], [], []>} : vector<2x1152xbf16>, vector<1152x128xbf16>, vector<2x128xf32> -> vector<2x128xf32>
    %c0_161 = arith.constant 0 : index
    %c0_162 = arith.constant 0 : index
    %187 = vector.load %arg3[%c0_161, %c0_162] : memref<1x128xf32, #tpu.memory_space<vmem>>, vector<1x128xf32>
    %188 = vector.broadcast %187 : vector<1x128xf32> to vector<2x128xf32>
    %189 = arith.addf %186, %188 : vector<2x128xf32>
    %cst_163 = arith.constant 0.000000e+00 : f32
    %190 = vector.broadcast %cst_163 : f32 to vector<2x128xf32>
    %191 = arith.maximumf %189, %190 : vector<2x128xf32>
    %192 = arith.truncf %191 : vector<2x128xf32> to vector<2x128xbf16>
    %c13_164 = arith.constant 13 : index
    %c0_165 = arith.constant 0 : index
    %c0_166 = arith.constant 0 : index
    %193 = vector.load %arg4[%c13_164, %c0_165, %c0_166] : memref<16x128x512xbf16, #tpu.memory_space<vmem>>, vector<1x128x512xbf16>
    %194 = vector.shape_cast %193 : vector<1x128x512xbf16> to vector<128x512xbf16>
    %cst_167 = arith.constant dense<0.000000e+00> : vector<2x512xf32>
    %195 = tpu.matmul %192, %194, %cst_167 {dimension_numbers = #tpu.dot_dimension_numbers<[1], [0], [0], [1], [0, 0, 1, 1], [], []>} : vector<2x128xbf16>, vector<128x512xbf16>, vector<2x512xf32> -> vector<2x512xf32>
    %196 = arith.addf %182, %195 : vector<2x512xf32>
    %c14 = arith.constant 14 : index
    %c0_168 = arith.constant 0 : index
    %c0_169 = arith.constant 0 : index
    %197 = vector.load %arg1[%c14, %c0_168, %c0_169] : memref<16x2x1152xbf16, #tpu.memory_space<vmem>>, vector<1x2x1152xbf16>
    %198 = vector.shape_cast %197 : vector<1x2x1152xbf16> to vector<2x1152xbf16>
    %c0_170 = arith.constant 0 : index
    %c0_171 = arith.constant 0 : index
    %199 = vector.load %arg2[%c0_170, %c0_171] : memref<1152x128xbf16, #tpu.memory_space<vmem>>, vector<1152x128xbf16>
    %cst_172 = arith.constant dense<0.000000e+00> : vector<2x128xf32>
    %200 = tpu.matmul %198, %199, %cst_172 {dimension_numbers = #tpu.dot_dimension_numbers<[1], [0], [0], [1], [0, 0, 1, 1], [], []>} : vector<2x1152xbf16>, vector<1152x128xbf16>, vector<2x128xf32> -> vector<2x128xf32>
    %c0_173 = arith.constant 0 : index
    %c0_174 = arith.constant 0 : index
    %201 = vector.load %arg3[%c0_173, %c0_174] : memref<1x128xf32, #tpu.memory_space<vmem>>, vector<1x128xf32>
    %202 = vector.broadcast %201 : vector<1x128xf32> to vector<2x128xf32>
    %203 = arith.addf %200, %202 : vector<2x128xf32>
    %cst_175 = arith.constant 0.000000e+00 : f32
    %204 = vector.broadcast %cst_175 : f32 to vector<2x128xf32>
    %205 = arith.maximumf %203, %204 : vector<2x128xf32>
    %206 = arith.truncf %205 : vector<2x128xf32> to vector<2x128xbf16>
    %c14_176 = arith.constant 14 : index
    %c0_177 = arith.constant 0 : index
    %c0_178 = arith.constant 0 : index
    %207 = vector.load %arg4[%c14_176, %c0_177, %c0_178] : memref<16x128x512xbf16, #tpu.memory_space<vmem>>, vector<1x128x512xbf16>
    %208 = vector.shape_cast %207 : vector<1x128x512xbf16> to vector<128x512xbf16>
    %cst_179 = arith.constant dense<0.000000e+00> : vector<2x512xf32>
    %209 = tpu.matmul %206, %208, %cst_179 {dimension_numbers = #tpu.dot_dimension_numbers<[1], [0], [0], [1], [0, 0, 1, 1], [], []>} : vector<2x128xbf16>, vector<128x512xbf16>, vector<2x512xf32> -> vector<2x512xf32>
    %210 = arith.addf %196, %209 : vector<2x512xf32>
    %c15 = arith.constant 15 : index
    %c0_180 = arith.constant 0 : index
    %c0_181 = arith.constant 0 : index
    %211 = vector.load %arg1[%c15, %c0_180, %c0_181] : memref<16x2x1152xbf16, #tpu.memory_space<vmem>>, vector<1x2x1152xbf16>
    %212 = vector.shape_cast %211 : vector<1x2x1152xbf16> to vector<2x1152xbf16>
    %c0_182 = arith.constant 0 : index
    %c0_183 = arith.constant 0 : index
    %213 = vector.load %arg2[%c0_182, %c0_183] : memref<1152x128xbf16, #tpu.memory_space<vmem>>, vector<1152x128xbf16>
    %cst_184 = arith.constant dense<0.000000e+00> : vector<2x128xf32>
    %214 = tpu.matmul %212, %213, %cst_184 {dimension_numbers = #tpu.dot_dimension_numbers<[1], [0], [0], [1], [0, 0, 1, 1], [], []>} : vector<2x1152xbf16>, vector<1152x128xbf16>, vector<2x128xf32> -> vector<2x128xf32>
    %c0_185 = arith.constant 0 : index
    %c0_186 = arith.constant 0 : index
    %215 = vector.load %arg3[%c0_185, %c0_186] : memref<1x128xf32, #tpu.memory_space<vmem>>, vector<1x128xf32>
    %216 = vector.broadcast %215 : vector<1x128xf32> to vector<2x128xf32>
    %217 = arith.addf %214, %216 : vector<2x128xf32>
    %cst_187 = arith.constant 0.000000e+00 : f32
    %218 = vector.broadcast %cst_187 : f32 to vector<2x128xf32>
    %219 = arith.maximumf %217, %218 : vector<2x128xf32>
    %220 = arith.truncf %219 : vector<2x128xf32> to vector<2x128xbf16>
    %c15_188 = arith.constant 15 : index
    %c0_189 = arith.constant 0 : index
    %c0_190 = arith.constant 0 : index
    %221 = vector.load %arg4[%c15_188, %c0_189, %c0_190] : memref<16x128x512xbf16, #tpu.memory_space<vmem>>, vector<1x128x512xbf16>
    %222 = vector.shape_cast %221 : vector<1x128x512xbf16> to vector<128x512xbf16>
    %cst_191 = arith.constant dense<0.000000e+00> : vector<2x512xf32>
    %223 = tpu.matmul %220, %222, %cst_191 {dimension_numbers = #tpu.dot_dimension_numbers<[1], [0], [0], [1], [0, 0, 1, 1], [], []>} : vector<2x128xbf16>, vector<128x512xbf16>, vector<2x512xf32> -> vector<2x512xf32>
    %224 = arith.addf %210, %223 : vector<2x512xf32>
    %c0_192 = arith.constant 0 : index
    %c0_193 = arith.constant 0 : index
    %225 = vector.load %arg5[%c0_192, %c0_193] : memref<1x512xf32, #tpu.memory_space<vmem>>, vector<1x512xf32>
    %226 = vector.broadcast %225 : vector<1x512xf32> to vector<2x512xf32>
    %227 = arith.addf %224, %226 : vector<2x512xf32>
    %cst_194 = arith.constant 0.000000e+00 : f32
    %228 = vector.broadcast %cst_194 : f32 to vector<2x512xf32>
    %229 = arith.maximumf %227, %228 : vector<2x512xf32>
    %230 = arith.truncf %229 : vector<2x512xf32> to vector<2x512xbf16>
    %c0_195 = arith.constant 0 : index
    %c0_196 = arith.constant 0 : index
    %231 = vector.load %arg6[%c0_195, %c0_196] : memref<512x128xbf16, #tpu.memory_space<vmem>>, vector<512x128xbf16>
    %cst_197 = arith.constant dense<0.000000e+00> : vector<2x128xf32>
    %232 = tpu.matmul %230, %231, %cst_197 {dimension_numbers = #tpu.dot_dimension_numbers<[1], [0], [0], [1], [0, 0, 1, 1], [], []>} : vector<2x512xbf16>, vector<512x128xbf16>, vector<2x128xf32> -> vector<2x128xf32>
    %c0_198 = arith.constant 0 : index
    %c0_199 = arith.constant 0 : index
    %233 = vector.load %arg7[%c0_198, %c0_199] : memref<1x128xf32, #tpu.memory_space<vmem>>, vector<1x128xf32>
    %234 = vector.broadcast %233 : vector<1x128xf32> to vector<2x128xf32>
    %235 = arith.addf %232, %234 : vector<2x128xf32>
    %c0_200 = arith.constant 0 : index
    %c0_201 = arith.constant 0 : index
    %236 = vector.load %arg8[%c0_200, %c0_201] : memref<2x128xf32, #tpu.memory_space<vmem>>, vector<2x128xf32>
    tpu.vector_store %arg8[%c0_200, %c0_201], %235 {strides = array<i32>} : memref<2x128xf32, #tpu.memory_space<vmem>>, vector<2x128xf32>,
    return
  }
  func.func @transform_0(%arg0: i32) -> (i32, i32, i32) {
    %c0_i32 = arith.constant 0 : i32
    %c0_i32_0 = arith.constant 0 : i32
    %c0_i32_1 = arith.constant 0 : i32
    return %c0_i32, %arg0, %c0_i32_0 : i32, i32, i32
  }
  func.func @transform_1(%arg0: i32) -> (i32, i32) {
    %c0_i32 = arith.constant 0 : i32
    %c0_i32_0 = arith.constant 0 : i32
    %c0_i32_1 = arith.constant 0 : i32
    return %c0_i32, %c0_i32_0 : i32, i32
  }
  func.func @transform_2(%arg0: i32) -> (i32, i32) {
    %c0_i32 = arith.constant 0 : i32
    %c0_i32_0 = arith.constant 0 : i32
    %c0_i32_1 = arith.constant 0 : i32
    return %c0_i32, %c0_i32_0 : i32, i32
  }
  func.func @transform_3(%arg0: i32) -> (i32, i32, i32) {
    %c0_i32 = arith.constant 0 : i32
    %c0_i32_0 = arith.constant 0 : i32
    %c0_i32_1 = arith.constant 0 : i32
    %c0_i32_2 = arith.constant 0 : i32
    return %c0_i32, %c0_i32_0, %c0_i32_1 : i32, i32, i32
  }
  func.func @transform_4(%arg0: i32) -> (i32, i32) {
    %c0_i32 = arith.constant 0 : i32
    %c0_i32_0 = arith.constant 0 : i32
    %c0_i32_1 = arith.constant 0 : i32
    return %c0_i32, %c0_i32_0 : i32, i32
  }
  func.func @transform_5(%arg0: i32) -> (i32, i32) {
    %c0_i32 = arith.constant 0 : i32
    %c0_i32_0 = arith.constant 0 : i32
    %c0_i32_1 = arith.constant 0 : i32
    return %c0_i32, %c0_i32_0 : i32, i32
  }
  func.func @transform_6(%arg0: i32) -> (i32, i32) {
    %c0_i32 = arith.constant 0 : i32
    %c0_i32_0 = arith.constant 0 : i32
    %c0_i32_1 = arith.constant 0 : i32
    return %c0_i32, %c0_i32_0 : i32, i32
  }
  func.func @transform_7(%arg0: i32) -> (i32, i32) {
    %c0_i32 = arith.constant 0 : i32
    %c0_i32_0 = arith.constant 0 : i32
    return %arg0, %c0_i32 : i32, i32
  }
}

</mosaic_0001>

<bundles_post_ra>
// kernel: dqn_forward.3
= control target key start
LH: loop header
LB: loop body
LE: loop exit
PB: predicated region body
PF: predicated region fallthrough
CT: control target
= control target key end

     0   :  { %s2020_s12 = smov 0   ;;  %s2022_s13 = smov 0   ;;  %s2424_s0 = inlined_call_operand.vmem [shape: bf16[722,256], index: 0, kind: input, shape index: {}]   ;;  %s2425_s1 = inlined_call_operand.vmem [shape: bf16[256,128], index: 1, kind: input, shape index: {}]   ;;  %s2426_s2 = inlined_call_operand.vmem [shape: f32[1,128], index: 2, kind: input, shape index: {}]   ;;  %s2427_s3 = inlined_call_operand.vmem [shape: bf16[722,128], index: 3, kind: output, shape index: {}]  }
   0x1   :  { %s2024_s14 = smov 0  }
   0x2 LB: > { %s2033_s15 = sadd.s32 4294967295, %s1966_s14   ;;  %s2035_s16 = sadd.s32 1, %s1966_s14   ;;  %s1966_s14 = sphi %s2024_s14, %s2436_s14   ;;  %s1962_s13 = sphi %s2022_s13, %s2435_s13   ;;  %s1958_s12 = sphi %s2020_s12, %s2434_s12  }
   0x3   : > { %s85_s17 = ssub.s32 %s1966_s14, %s2035_s16  ;;  %s88_s18 = sadd.s32 1, %s1962_s13 }
   0x4   : > { %p86_p0 = scmp.eq.s32.totalorder %s85_s17, 0  ;;  %p98_p1 = scmp.ne.s32.totalorder %s1962_s13, %s1958_s12 }
   0x5   : > { %p99_p2 = scmp.eq.s32.totalorder %s2033_s15, 1  ;;  %p1337_p3 = scmp.ge.s32.totalorder %s1966_s14, 1 }
   0x6   : > { %s2043_s19 = scalar_select %p86_p0, %s1962_s13, %s88_s18  }
   0x7   : > { %p2045_p4 = por %p99_p2, %p98_p1  ;;  %p149_p5 = scmp.lt.s32.totalorder %s1966_s14, 3 }
   0x9   : > { %p150_p6 = pnand %p1337_p3, %p149_p5 }
   0xa   : > { %s2068_s6 = smul.u32 (!%p150_p6), 46, %s2033_s15  ;;  %s175_s18 = sand.u32 (!%p150_p6), 1, %s1958_s12  }
   0xb   : > { %153 = sbr.rel (%p150_p6) target bundleno = 437 (0x1b5), region = 32 }
   0xc   : > { %p184_p7 = scmp.lt.s32.totalorder (!%p150_p6), %s2068_s6, 90 }
  0x10   : > { %v1657_v0 = vld [vmem:[%s2425_s1 + $0x38] sm:$0xff]  ;;  %v1656_v2 = vld [vmem:[%s2425_s1 + $0x30] sm:$0xff]  ;;  %v1655_v4 = vld [vmem:[%s2425_s1 + $0x28] sm:$0xff]  ;;  %s185_s21 = scalar_select %p184_p7, %s2068_s6, 90 }
  0x11   : > { %v1665_v1 = vld [vmem:[%s2425_s1 + $0x78] sm:$0xff]  ;;  %608 = vmatpush.bf16.msra.mxu0 %v1657_v0  ;;  %1806 = vmatpush.bf16.msra.mxu2 %v1657_v0  ;;  %v1664_v3 = vld [vmem:[%s2425_s1 + $0x70] sm:$0xff]  ;;  %v1663_v5 = vld [vmem:[%s2425_s1 + $0x68] sm:$0xff]  ;;  %s1002_s22 = ssub.s32 (%p2045_p4), 91, %s2068_s6  ;;  %s1666_s23 = smul.u32 (%p2045_p4), 184, %s2033_s15 }
  0x12   : > { %732 = vmatpush.bf16.msra.mxu1 %v1665_v1  ;;  %1814 = vmatpush.bf16.msra.mxu3 %v1665_v1  ;;  %v1654_v6 = vld [vmem:[%s2425_s1 + $0x20] sm:$0xff]  ;;  %v1653_v8 = vld [vmem:[%s2425_s1 + $0x18] sm:$0xff]  ;;  %v1652_v10 = vld [vmem:[%s2425_s1 + $0x10] sm:$0xff]  ;;  %s1603_s26 = sshll.u32 %s185_s21, 3  ;;  %s1822_s21 = smul.u32 184, %s175_s18 }
  0x13   : > { %v1662_v7 = vld [vmem:[%s2425_s1 + $0x60] sm:$0xff]  ;;  %v1661_v9 = vld [vmem:[%s2425_s1 + $0x58] sm:$0xff]  ;;  %v1660_v11 = vld [vmem:[%s2425_s1 + $0x50] sm:$0xff]  ;;  %s2096_s4 = scalar_lea.vmem %s2424_s0, %s1603_s26  ;;  %p1003_p8 = scmp.lt.s32.totalorder (%p2045_p4), %s1002_s22, 46 }
  0x14   : > { %v1651_v12 = vld [vmem:[%s2425_s1 + $0x8] sm:$0xff]  ;;  %v1650_v14 = vld [vmem:[%s2425_s1] sm:$0xff]  ;;  %v1430_v18 = vld [vmem:[%s2096_s4 + $0xb0] sm:$0xf]  ;;  %s2199_s12 = scalar_lea.vmem [#allocation2], %s1822_s21   ;;  %s2289_s26 = scalar_lea.vmem (%p2045_p4), %s2427_s3, %s1666_s23  }
  0x15   : > { %609 = vmatpush.bf16.msra.mxu0 %v1656_v2  ;;  %1807 = vmatpush.bf16.msra.mxu2 %v1656_v2  ;;  %v1659_v13 = vld [vmem:[%s2425_s1 + $0x48] sm:$0xff]  ;;  %v1658_v15 = vld [vmem:[%s2425_s1 + $0x40] sm:$0xff]  ;;  %v1627_v19 = vld [vmem:[%s2096_s4 + $0xb4] sm:$0xf0] }
  0x16   : > { %733 = vmatpush.bf16.msra.mxu1 %v1664_v3  ;;  %1815 = vmatpush.bf16.msra.mxu3 %v1664_v3  ;;  %v1342_v16 = vld [vmem:[%s2096_s4] sm:$0xf]  ;;  %v1605_v17 = vld [vmem:[%s2096_s4 + $0x4] sm:$0xf0]  ;;  %v1604_v20 = vld [vmem:[%s2096_s4 + $0x4] sm:$0xf]  ;;  %v1431_v25 = vor.u32 %v1627_v19, %v1430_v18 }
  0x17   : > { %v1344_v21 = vld [vmem:[%s2096_s4 + $0x8] sm:$0xf0]  ;;  %v1628_v22 = vld [vmem:[%s2096_s4 + $0xc4] sm:$0xf]  ;;  %v1343_v24 = vor.u32 %v1605_v17, %v1342_v16  ;;  %v1350_v28 = vld [vmem:[%s2096_s4 + $0x10] sm:$0xf] }
  0x18   : > { %v1440_v23 = vld [vmem:[%s2096_s4 + $0xc8] sm:$0xf0]  ;;  %v1347_v26 = vor.u32 %v1604_v20, %v1344_v21  ;;  %v1607_v29 = vld [vmem:[%s2096_s4 + $0x14] sm:$0xf0]  ;;  %v1438_v30 = vld [vmem:[%s2096_s4 + $0xc0] sm:$0xf] }
  0x19   : > { %610 = vmatpush.bf16.msra.mxu0 %v1655_v4  ;;  %1808 = vmatpush.bf16.msra.mxu2 %v1655_v4  ;;  %v1443_v27 = vor.u32 %v1628_v22, %v1440_v23  ;;  %v1629_v31 = vld [vmem:[%s2096_s4 + $0xc4] sm:$0xf0]  ;;  %v1606_v32 = vld [vmem:[%s2096_s4 + $0x14] sm:$0xf]  ;;  %v1352_v33 = vld [vmem:[%s2096_s4 + $0x18] sm:$0xf0]  ;;  %v1351_v36 = vor.u32 %v1607_v29, %v1350_v28 }
  0x1a   : > { %734 = vmatpush.bf16.msra.mxu1 %v1663_v5  ;;  %1816 = vmatpush.bf16.msra.mxu3 %v1663_v5  ;;  %v1630_v34 = vld [vmem:[%s2096_s4 + $0xd4] sm:$0xf]  ;;  %v1448_v35 = vld [vmem:[%s2096_s4 + $0xd8] sm:$0xf0]  ;;  %v1439_v37 = vor.u32 %v1629_v31, %v1438_v30  ;;  %v1355_v38 = vor.u32 %v1606_v32, %v1352_v33  ;;  %v1358_v40 = vld [vmem:[%s2096_s4 + $0x20] sm:$0xf] }
  0x1b   : > { %v1451_v39 = vor.u32 %v1630_v34, %v1448_v35  ;;  %v1609_v41 = vld [vmem:[%s2096_s4 + $0x24] sm:$0xf0]  ;;  %v1446_v42 = vld [vmem:[%s2096_s4 + $0xd0] sm:$0xf]  ;;  %v1631_v43 = vld [vmem:[%s2096_s4 + $0xd4] sm:$0xf0] }
  0x1c   : > { %v1608_v44 = vld [vmem:[%s2096_s4 + $0x24] sm:$0xf]  ;;  %v1360_v45 = vld [vmem:[%s2096_s4 + $0x28] sm:$0xf0]  ;;  %v1359_v48 = vor.u32 %v1609_v41, %v1358_v40  ;;  %v1447_v49 = vor.u32 %v1631_v43, %v1446_v42  ;;  %v1366_v52 = vld [vmem:[%s2096_s4 + $0x30] sm:$0xf] }
  0x1d   : > { %611 = vmatpush.bf16.msra.mxu0 %v1654_v6  ;;  %1809 = vmatpush.bf16.msra.mxu2 %v1654_v6  ;;  %v1632_v46 = vld [vmem:[%s2096_s4 + $0xe4] sm:$0xf]  ;;  %v1456_v47 = vld [vmem:[%s2096_s4 + $0xe8] sm:$0xf0]  ;;  %v1363_v50 = vor.u32 %v1608_v44, %v1360_v45  ;;  %v1611_v53 = vld [vmem:[%s2096_s4 + $0x34] sm:$0xf0] }
  0x1e   : > { %735 = vmatpush.bf16.msra.mxu1 %v1662_v7  ;;  %1817 = vmatpush.bf16.msra.mxu3 %v1662_v7  ;;  %v1459_v51 = vor.u32 %v1632_v46, %v1456_v47  ;;  %v1454_v54 = vld [vmem:[%s2096_s4 + $0xe0] sm:$0xf]  ;;  %v1633_v55 = vld [vmem:[%s2096_s4 + $0xe4] sm:$0xf0]  ;;  %v1610_v56 = vld [vmem:[%s2096_s4 + $0x34] sm:$0xf]  ;;  %v1367_v60 = vor.u32 %v1611_v53, %v1366_v52 }
  0x1f   : > { %v1368_v57 = vld [vmem:[%s2096_s4 + $0x38] sm:$0xf0]  ;;  %v1634_v58 = vld [vmem:[%s2096_s4 + $0xf4] sm:$0xf]  ;;  %v1455_v61 = vor.u32 %v1633_v55, %v1454_v54  ;;  %v1374_v0 = vld [vmem:[%s2096_s4 + $0x40] sm:$0xf] }
  0x20   : > { %v1464_v59 = vld [vmem:[%s2096_s4 + $0xf8] sm:$0xf0]  ;;  %v1371_v62 = vor.u32 %v1610_v56, %v1368_v57  ;;  %v1613_v1 = vld [vmem:[%s2096_s4 + $0x44] sm:$0xf0]  ;;  %v1462_v2 = vld [vmem:[%s2096_s4 + $0xf0] sm:$0xf] }
  0x21   : > { %612 = vmatpush.bf16.msra.mxu0 %v1653_v8  ;;  %1810 = vmatpush.bf16.msra.mxu2 %v1653_v8  ;;  %v1467_v63 = vor.u32 %v1634_v58, %v1464_v59  ;;  %v1635_v3 = vld [vmem:[%s2096_s4 + $0xf4] sm:$0xf0]  ;;  %v1612_v4 = vld [vmem:[%s2096_s4 + $0x44] sm:$0xf]  ;;  %v1376_v5 = vld [vmem:[%s2096_s4 + $0x48] sm:$0xf0]  ;;  %v1375_v8 = vor.u32 %v1613_v1, %v1374_v0 }
  0x22   : > { %736 = vmatpush.bf16.msra.mxu1 %v1661_v9  ;;  %1818 = vmatpush.bf16.msra.mxu3 %v1661_v9  ;;  %v1636_v6 = vld [vmem:[%s2096_s4 + $0x104] sm:$0xf]  ;;  %v1472_v7 = vld [vmem:[%s2096_s4 + $0x108] sm:$0xf0]  ;;  %v1463_v9 = vor.u32 %v1635_v3, %v1462_v2  ;;  %v1614_v16 = vld [vmem:[%s2096_s4 + $0x54] sm:$0xf] }
  0x23   : > { %v1384_v17 = vld [vmem:[%s2096_s4 + $0x58] sm:$0xf0]  ;;  %v1638_v18 = vld [vmem:[%s2096_s4 + $0x114] sm:$0xf]  ;;  %v1616_v28 = vld [vmem:[%s2096_s4 + $0x64] sm:$0xf] }
  0x24   : > { %v1480_v19 = vld [vmem:[%s2096_s4 + $0x118] sm:$0xf0]  ;;  %v1387_v22 = vor.u32 %v1614_v16, %v1384_v17  ;;  %v1392_v29 = vld [vmem:[%s2096_s4 + $0x68] sm:$0xf0]  ;;  %v1640_v30 = vld [vmem:[%s2096_s4 + $0x124] sm:$0xf] }
  0x25   : > { %613 = vmatpush.bf16.msra.mxu0 %v1652_v10  ;;  %1811 = vmatpush.bf16.msra.mxu2 %v1652_v10  ;;  %v1379_v10 = vor.u32 %v1612_v4, %v1376_v5  ;;  %v1483_v23 = vor.u32 %v1638_v18, %v1480_v19  ;;  %v1488_v31 = vld [vmem:[%s2096_s4 + $0x128] sm:$0xf0]  ;;  %v1395_v34 = vor.u32 %v1616_v28, %v1392_v29  ;;  %v1618_v40 = vld [vmem:[%s2096_s4 + $0x74] sm:$0xf]  ;;  %v1400_v41 = vld [vmem:[%s2096_s4 + $0x78] sm:$0xf0] }
  0x26   : > { %737 = vmatpush.bf16.msra.mxu1 %v1660_v11  ;;  %1819 = vmatpush.bf16.msra.mxu3 %v1660_v11  ;;  %v1475_v11 = vor.u32 %v1636_v6, %v1472_v7  ;;  %v1491_v35 = vor.u32 %v1640_v30, %v1488_v31  ;;  %v1642_v42 = vld [vmem:[%s2096_s4 + $0x134] sm:$0xf]  ;;  %v1496_v43 = vld [vmem:[%s2096_s4 + $0x138] sm:$0xf0]  ;;  %v1403_v46 = vor.u32 %v1618_v40, %v1400_v41  ;;  %v1620_v52 = vld [vmem:[%s2096_s4 + $0x84] sm:$0xf] }
  0x27   : > { %v1499_v47 = vor.u32 %v1642_v42, %v1496_v43  ;;  %v1408_v53 = vld [vmem:[%s2096_s4 + $0x88] sm:$0xf0]  ;;  %v1644_v54 = vld [vmem:[%s2096_s4 + $0x144] sm:$0xf]  ;;  %v1414_v7 = vld [vmem:[%s2096_s4 + $0x90] sm:$0xf] }
  0x28   : > { %v1504_v55 = vld [vmem:[%s2096_s4 + $0x148] sm:$0xf0]  ;;  %v1411_v59 = vor.u32 %v1620_v52, %v1408_v53  ;;  %v1512_v16 = vld [vmem:[%s2096_s4 + $0x158] sm:$0xf0]  ;;  %v1648_v43 = vld [vmem:[%s2096_s4 + $0x164] sm:$0xf] }
  0x29   : > { %614 = vmatpush.bf16.msra.mxu0 %v1651_v12  ;;  %1812 = vmatpush.bf16.msra.mxu2 %v1651_v12  ;;  %v1382_v12 = vld [vmem:[%s2096_s4 + $0x50] sm:$0xf]  ;;  %v1424_v40 = vld [vmem:[%s2096_s4 + $0xa8] sm:$0xf0] }
  0x2a   : > { %738 = vmatpush.bf16.msra.mxu1 %v1659_v13  ;;  %1820 = vmatpush.bf16.msra.mxu3 %v1659_v13  ;;  %v1615_v13 = vld [vmem:[%s2096_s4 + $0x54] sm:$0xf0] }
  0x2b   : > { %v1383_v20 = vor.u32 %v1615_v13, %v1382_v12  ;;  %v1416_v12 = vld [vmem:[%s2096_s4 + $0x98] sm:$0xf0] }
  0x2d   : > { %615 = vmatpush.bf16.msra.mxu0 %v1650_v14  ;;  %1813 = vmatpush.bf16.msra.mxu2 %v1650_v14  ;;  %v1470_v14 = vld [vmem:[%s2096_s4 + $0x100] sm:$0xf] }
  0x2e   : > { %739 = vmatpush.bf16.msra.mxu1 %v1658_v15  ;;  %1821 = vmatpush.bf16.msra.mxu3 %v1658_v15  ;;  %v1637_v15 = vld [vmem:[%s2096_s4 + $0x104] sm:$0xf0] }
  0x2f   : > { %v1471_v21 = vor.u32 %v1637_v15, %v1470_v14  ;;  %v1646_v15 = vld [vmem:[%s2096_s4 + $0x154] sm:$0xf] }
  0x30   : > { %616 = vmatmul.bf16.vlgmr.msra.gmra.mxu0 %v1343_v24  ;;  %671 = vmatmul.bf16.vlgmr.msra.gmra.mxu2 %v1431_v25  ;;  %v1390_v24 = vld [vmem:[%s2096_s4 + $0x60] sm:$0xf]  ;;  %v1617_v25 = vld [vmem:[%s2096_s4 + $0x64] sm:$0xf0] }
  0x31   : > { %740 = vmatmul.bf16.vlgmr.msra.gmra.mxu1 %v1347_v26  ;;  %800 = vmatmul.bf16.vlgmr.msra.gmra.mxu3 %v1443_v27  ;;  %v1478_v26 = vld [vmem:[%s2096_s4 + $0x110] sm:$0xf]  ;;  %v1639_v27 = vld [vmem:[%s2096_s4 + $0x114] sm:$0xf0]  ;;  %v1391_v32 = vor.u32 %v1617_v25, %v1390_v24  ;;  %v1515_v24 = vor.u32 %v1646_v15, %v1512_v16 }
  0x32   : > { %v1479_v33 = vor.u32 %v1639_v27, %v1478_v26 }
  0x40   : > { %621 = vmatmul.bf16.gmra.mxu0 %v1351_v36  ;;  %676 = vmatmul.bf16.gmra.mxu2 %v1439_v37  ;;  %v1398_v36 = vld [vmem:[%s2096_s4 + $0x70] sm:$0xf]  ;;  %v1619_v37 = vld [vmem:[%s2096_s4 + $0x74] sm:$0xf0] }
  0x41   : > { %745 = vmatmul.bf16.gmra.mxu1 %v1355_v38  ;;  %805 = vmatmul.bf16.gmra.mxu3 %v1451_v39  ;;  %v1486_v38 = vld [vmem:[%s2096_s4 + $0x120] sm:$0xf]  ;;  %v1641_v39 = vld [vmem:[%s2096_s4 + $0x124] sm:$0xf0]  ;;  %v1399_v44 = vor.u32 %v1619_v37, %v1398_v36  ;;  %v1510_v37 = vld [vmem:[%s2096_s4 + $0x150] sm:$0xf] }
  0x42   : > { %v1487_v45 = vor.u32 %v1641_v39, %v1486_v38  ;;  %v1625_v36 = vld [vmem:[%s2096_s4 + $0xa4] sm:$0xf0]  ;;  %v1647_v38 = vld [vmem:[%s2096_s4 + $0x154] sm:$0xf0]  ;;  %v1624_v39 = vld [vmem:[%s2096_s4 + $0xa4] sm:$0xf] }
  0x43   : > { %v1427_v53 = vor.u32 %v1624_v39, %v1424_v40 }
  0x50   : > { %626 = vmatmul.bf16.gmra.mxu0 %v1359_v48  ;;  %681 = vmatmul.bf16.gmra.mxu2 %v1447_v49  ;;  %v1406_v48 = vld [vmem:[%s2096_s4 + $0x80] sm:$0xf]  ;;  %v1621_v49 = vld [vmem:[%s2096_s4 + $0x84] sm:$0xf0] }
  0x51   : > { %750 = vmatmul.bf16.gmra.mxu1 %v1363_v50  ;;  %810 = vmatmul.bf16.gmra.mxu3 %v1459_v51  ;;  %v1494_v50 = vld [vmem:[%s2096_s4 + $0x130] sm:$0xf]  ;;  %v1643_v51 = vld [vmem:[%s2096_s4 + $0x134] sm:$0xf0]  ;;  %v1407_v56 = vor.u32 %v1621_v49, %v1406_v48 }
  0x52   : > { %v1495_v57 = vor.u32 %v1643_v51, %v1494_v50  ;;  %v1511_v50 = vor.u32 %v1647_v38, %v1510_v37 }
  0x60   : > { %631 = vmatmul.bf16.gmra.mxu0 %v1367_v60  ;;  %686 = vmatmul.bf16.gmra.mxu2 %v1455_v61  ;;  %v1507_v60 = vor.u32 %v1644_v54, %v1504_v55  ;;  %v2182_v61 = vld [vmem:[%s2426_s2] ss:$0 sm:$0xff] }
  0x61   : > { %755 = vmatmul.bf16.gmra.mxu1 %v1371_v62  ;;  %815 = vmatmul.bf16.gmra.mxu3 %v1467_v63 }
  0x70   : > { %636 = vmatmul.bf16.gmra.mxu0 %v1375_v8  ;;  %691 = vmatmul.bf16.gmra.mxu2 %v1463_v9  ;;  %v1623_v8 = vld [vmem:[%s2096_s4 + $0x94] sm:$0xf0]  ;;  %v1502_v9 = vld [vmem:[%s2096_s4 + $0x140] sm:$0xf] }
  0x71   : > { %760 = vmatmul.bf16.gmra.mxu1 %v1379_v10  ;;  %820 = vmatmul.bf16.gmra.mxu3 %v1475_v11  ;;  %v1645_v10 = vld [vmem:[%s2096_s4 + $0x144] sm:$0xf0]  ;;  %v1622_v11 = vld [vmem:[%s2096_s4 + $0x94] sm:$0xf]  ;;  %v1415_v19 = vor.u32 %v1623_v8, %v1414_v7  ;;  %v1518_v7 = vld [vmem:[%s2096_s4 + $0x160] sm:$0xf] }
  0x72   : > { %v1649_v8 = vld [vmem:[%s2096_s4 + $0x164] sm:$0xf0] }
  0x80   : > { %641 = vmatmul.bf16.gmra.mxu0 %v1383_v20  ;;  %696 = vmatmul.bf16.gmra.mxu2 %v1471_v21  ;;  %v1503_v20 = vor.u32 %v1645_v10, %v1502_v9 }
  0x81   : > { %765 = vmatmul.bf16.gmra.mxu1 %v1387_v22  ;;  %825 = vmatmul.bf16.gmra.mxu3 %v1483_v23  ;;  %v1419_v23 = vor.u32 %v1622_v11, %v1416_v12  ;;  %v1626_v11 = vld [vmem:[%s2096_s4 + $0xb4] sm:$0xf]  ;;  %v1432_v12 = vld [vmem:[%s2096_s4 + $0xb8] sm:$0xf0] }
  0x90   : > { %646 = vmatmul.bf16.gmra.mxu0 %v1391_v32  ;;  %701 = vmatmul.bf16.gmra.mxu2 %v1479_v33 }
  0x91   : > { %770 = vmatmul.bf16.gmra.mxu1 %v1395_v34  ;;  %830 = vmatmul.bf16.gmra.mxu3 %v1491_v35  ;;  %v1422_v35 = vld [vmem:[%s2096_s4 + $0xa0] sm:$0xf] }
  0xa0   : > { %651 = vmatmul.bf16.gmra.mxu0 %v1399_v44  ;;  %706 = vmatmul.bf16.gmra.mxu2 %v1487_v45  ;;  %v1520_v44 = vld [vmem:[%s2096_s4 + $0x168] sm:$0xf0] }
  0xa1   : > { %775 = vmatmul.bf16.gmra.mxu1 %v1403_v46  ;;  %835 = vmatmul.bf16.gmra.mxu3 %v1499_v47  ;;  %v1423_v46 = vor.u32 %v1625_v36, %v1422_v35  ;;  %v1523_v54 = vor.u32 %v1648_v43, %v1520_v44 }
  0xad   : > { %v617_v58 = vpop.f32.mrf.mxu0 }
  0xae   : > { %v741_v62 = vpop.f32.mrf.mxu1  ;;  %v618_v63 = vadd.f32 %v2182_v61, %v617_v58 }
  0xb0   : > { %656 = vmatmul.bf16.gmra.mxu0 %v1407_v56  ;;  %711 = vmatmul.bf16.gmra.mxu2 %v1495_v57  ;;  %v742_v3 = vadd.f32 %v741_v62, %v618_v63 }
  0xb1   : > { %780 = vmatmul.bf16.gmra.mxu1 %v1411_v59  ;;  %840 = vmatmul.bf16.gmra.mxu3 %v1507_v60 }
  0xb2   : > { %v856_v13 = vmax.f32 %v742_v3, 0.0 }
  0xb3   : > { %v2185_v0 = vpop.f32.mrf.mxu2 }
  0xb4   : > { %v801_v1 = vpop.f32.mrf.mxu3 }
  0xb5   : > { %v619_v2 = vpop.f32.mrf.mxu0 }
  0xb6   : > { %v620_v4 = vadd.f32 %v2182_v61, %v619_v2  ;;  %v743_v5 = vpop.f32.mrf.mxu1 }
  0xb8   : > { %v744_v6 = vadd.f32 %v743_v5, %v620_v4 }
  0xba   : > { %v857_v14 = vmax.f32 %v744_v6, 0.0 }
  0xbb   : > { %v2197_v17 = vpop.f32.mrf.mxu2 }
  0xbc   : > { %v1672_v18 = vpack.c.bf16 %v857_v14, %v856_v13  ;;  %v803_v21 = vpop.f32.mrf.mxu3 }
  0xbd   : > { %v622_v22 = vpop.f32.mrf.mxu0 }
  0xbe   : > { %1673 = vst [vmem:[%s2199_s12] sm:$0xff] %v1672_v18   ;;  %v746_v25 = vpop.f32.mrf.mxu1  ;;  %v623_v26 = vadd.f32 %v2182_v61, %v622_v22  ;;  %v1519_v18 = vor.u32 %v1649_v8, %v1518_v7 }
  0xc0   : > { %661 = vmatmul.bf16.gmra.mxu0 %v1415_v19  ;;  %716 = vmatmul.bf16.gmra.mxu2 %v1503_v20  ;;  %v747_v30 = vadd.f32 %v746_v25, %v623_v26 }
  0xc1   : > { %785 = vmatmul.bf16.gmra.mxu1 %v1419_v23  ;;  %845 = vmatmul.bf16.gmra.mxu3 %v1515_v24 }
  0xc2   : > { %v858_v41 = vmax.f32 %v747_v30, 0.0 }
  0xc3   : > { %v677_v27 = vpop.f32.mrf.mxu2 }
  0xc4   : > { %v806_v28 = vpop.f32.mrf.mxu3  ;;  %v678_v33 = vadd.f32 %v2182_v61, %v677_v27 }
  0xc5   : > { %v624_v29 = vpop.f32.mrf.mxu0 }
  0xc6   : > { %v625_v31 = vadd.f32 %v2182_v61, %v624_v29  ;;  %v748_v32 = vpop.f32.mrf.mxu1  ;;  %v802_v47 = vadd.f32 %v801_v1, %v678_v33 }
  0xc8   : > { %v749_v34 = vadd.f32 %v748_v32, %v625_v31  ;;  %v880_v57 = vmax.f32 %v802_v47, 0.0 }
  0xca   : > { %v859_v42 = vmax.f32 %v749_v34, 0.0 }
  0xcb   : > { %v679_v45 = vpop.f32.mrf.mxu2 }
  0xcc   : > { %v1677_v48 = vpack.c.bf16 %v859_v42, %v858_v41  ;;  %v680_v49 = vadd.f32 %v2182_v61, %v679_v45  ;;  %v808_v51 = vpop.f32.mrf.mxu3 }
  0xcd   : > { %v627_v52 = vpop.f32.mrf.mxu0 }
  0xce   : > { %1784 = vst [vmem:[%s2199_s12 + $0x8] sm:$0xff] %v1677_v48   ;;  %v804_v55 = vadd.f32 %v803_v21, %v680_v49  ;;  %v751_v56 = vpop.f32.mrf.mxu1  ;;  %v628_v60 = vadd.f32 %v2182_v61, %v627_v52  ;;  %v1435_v21 = vor.u32 %v1626_v11, %v1432_v12 }
  0xd0   : > { %v881_v58 = vmax.f32 %v804_v55, 0.0  ;;  %666 = vmatmul.bf16.gmra.mxu0 %v1423_v46  ;;  %721 = vmatmul.bf16.gmra.mxu2 %v1511_v50  ;;  %v752_v2 = vadd.f32 %v751_v56, %v628_v60 }
  0xd1   : > { %790 = vmatmul.bf16.gmra.mxu1 %v1427_v53  ;;  %850 = vmatmul.bf16.gmra.mxu3 %v1523_v54 }
  0xd2   : > { %v1732_v59 = vpack.c.bf16 %v881_v58, %v880_v57  ;;  %v860_v9 = vmax.f32 %v752_v2, 0.0 }
  0xd3   : > { %v682_v62 = vpop.f32.mrf.mxu2 }
  0xd4   : > { %1795 = vst [vmem:[%s2199_s12 + $0x60] sm:$0xff] %v1732_v59   ;;  %v811_v63 = vpop.f32.mrf.mxu3  ;;  %v683_v5 = vadd.f32 %v2182_v61, %v682_v62 }
  0xd5   : > { %v629_v1 = vpop.f32.mrf.mxu0 }
  0xd6   : > { %v630_v3 = vadd.f32 %v2182_v61, %v629_v1  ;;  %v753_v4 = vpop.f32.mrf.mxu1  ;;  %v807_v14 = vadd.f32 %v806_v28, %v683_v5 }
  0xd8   : > { %v754_v6 = vadd.f32 %v753_v4, %v630_v3  ;;  %v882_v24 = vmax.f32 %v807_v14, 0.0 }
  0xda   : > { %v861_v10 = vmax.f32 %v754_v6, 0.0 }
  0xdb   : > { %v684_v13 = vpop.f32.mrf.mxu2 }
  0xdc   : > { %v1682_v15 = vpack.c.bf16 %v861_v10, %v860_v9  ;;  %v685_v16 = vadd.f32 %v2182_v61, %v684_v13  ;;  %v813_v19 = vpop.f32.mrf.mxu3 }
  0xdd   : > { %v632_v20 = vpop.f32.mrf.mxu0 }
  0xde   : > { %1785 = vst [vmem:[%s2199_s12 + $0x10] sm:$0xff] %v1682_v15   ;;  %v809_v22 = vadd.f32 %v808_v51, %v685_v16  ;;  %v756_v23 = vpop.f32.mrf.mxu1  ;;  %v633_v27 = vadd.f32 %v2182_v61, %v632_v20 }
  0xe0   : > { %v883_v25 = vmax.f32 %v809_v22, 0.0  ;;  %726 = vmatmul.bf16.gmra.mxu2 %v1519_v18  ;;  %v757_v31 = vadd.f32 %v756_v23, %v633_v27 }
  0xe1   : > { %795 = vmatmul.bf16.gmra.mxu1 %v1435_v21 }
  0xe2   : > { %v1737_v26 = vpack.c.bf16 %v883_v25, %v882_v24  ;;  %v862_v36 = vmax.f32 %v757_v31, 0.0 }
  0xe3   : > { %v687_v29 = vpop.f32.mrf.mxu2 }
  0xe4   : > { %1796 = vst [vmem:[%s2199_s12 + $0x68] sm:$0xff] %v1737_v26   ;;  %v816_v28 = vpop.f32.mrf.mxu3  ;;  %v688_v34 = vadd.f32 %v2182_v61, %v687_v29 }
  0xe5   : > { %v634_v30 = vpop.f32.mrf.mxu0 }
  0xe6   : > { %v635_v32 = vadd.f32 %v2182_v61, %v634_v30  ;;  %v758_v33 = vpop.f32.mrf.mxu1  ;;  %v812_v39 = vadd.f32 %v811_v63, %v688_v34 }
  0xe8   : > { %v759_v35 = vadd.f32 %v758_v33, %v635_v32  ;;  %v884_v46 = vmax.f32 %v812_v39, 0.0 }
  0xea   : > { %v863_v37 = vmax.f32 %v759_v35, 0.0 }
  0xeb   : > { %v689_v38 = vpop.f32.mrf.mxu2 }
  0xec   : > { %v1687_v40 = vpack.c.bf16 %v863_v37, %v862_v36  ;;  %v690_v41 = vadd.f32 %v2182_v61, %v689_v38  ;;  %v818_v42 = vpop.f32.mrf.mxu3 }
  0xed   : > { %v637_v43 = vpop.f32.mrf.mxu0 }
  0xee   : > { %1786 = vst [vmem:[%s2199_s12 + $0x18] sm:$0xff] %v1687_v40   ;;  %v814_v44 = vadd.f32 %v813_v19, %v690_v41  ;;  %v761_v45 = vpop.f32.mrf.mxu1  ;;  %v638_v49 = vadd.f32 %v2182_v61, %v637_v43 }
  0xf0   : > { %v885_v47 = vmax.f32 %v814_v44, 0.0  ;;  %v762_v53 = vadd.f32 %v761_v45, %v638_v49 }
  0xf2   : > { %v1742_v48 = vpack.c.bf16 %v885_v47, %v884_v46  ;;  %v864_v58 = vmax.f32 %v762_v53, 0.0 }
  0xf3   : > { %v692_v50 = vpop.f32.mrf.mxu2 }
  0xf4   : > { %1797 = vst [vmem:[%s2199_s12 + $0x70] sm:$0xff] %v1742_v48   ;;  %v821_v51 = vpop.f32.mrf.mxu3  ;;  %v693_v56 = vadd.f32 %v2182_v61, %v692_v50 }
  0xf5   : > { %v639_v52 = vpop.f32.mrf.mxu0 }
  0xf6   : > { %v640_v54 = vadd.f32 %v2182_v61, %v639_v52  ;;  %v763_v55 = vpop.f32.mrf.mxu1  ;;  %v817_v62 = vadd.f32 %v816_v28, %v693_v56 }
  0xf8   : > { %v764_v57 = vadd.f32 %v763_v55, %v640_v54  ;;  %v886_v6 = vmax.f32 %v817_v62, 0.0 }
  0xfa   : > { %v865_v59 = vmax.f32 %v764_v57, 0.0 }
  0xfb   : > { %v694_v60 = vpop.f32.mrf.mxu2 }
  0xfc   : > { %v1692_v63 = vpack.c.bf16 %v865_v59, %v864_v58  ;;  %v695_v1 = vadd.f32 %v2182_v61, %v694_v60  ;;  %v823_v2 = vpop.f32.mrf.mxu3 }
  0xfd   : > { %v642_v3 = vpop.f32.mrf.mxu0 }
  0xfe   : > { %1787 = vst [vmem:[%s2199_s12 + $0x20] sm:$0xff] %v1692_v63   ;;  %v819_v4 = vadd.f32 %v818_v42, %v695_v1  ;;  %v766_v5 = vpop.f32.mrf.mxu1  ;;  %v643_v9 = vadd.f32 %v2182_v61, %v642_v3 }
 0x100   : > { %v887_v7 = vmax.f32 %v819_v4, 0.0  ;;  %v767_v13 = vadd.f32 %v766_v5, %v643_v9 }
 0x102   : > { %v1747_v8 = vpack.c.bf16 %v887_v7, %v886_v6  ;;  %v866_v19 = vmax.f32 %v767_v13, 0.0 }
 0x103   : > { %v697_v10 = vpop.f32.mrf.mxu2 }
 0x104   : > { %1798 = vst [vmem:[%s2199_s12 + $0x78] sm:$0xff] %v1747_v8   ;;  %v826_v11 = vpop.f32.mrf.mxu3  ;;  %v698_v16 = vadd.f32 %v2182_v61, %v697_v10 }
 0x105   : > { %v644_v12 = vpop.f32.mrf.mxu0 }
 0x106   : > { %v645_v14 = vadd.f32 %v2182_v61, %v644_v12  ;;  %v768_v15 = vpop.f32.mrf.mxu1  ;;  %v822_v22 = vadd.f32 %v821_v51, %v698_v16 }
 0x108   : > { %v769_v18 = vadd.f32 %v768_v15, %v645_v14  ;;  %v888_v28 = vmax.f32 %v822_v22, 0.0 }
 0x10a   : > { %v867_v20 = vmax.f32 %v769_v18, 0.0 }
 0x10b   : > { %v699_v21 = vpop.f32.mrf.mxu2 }
 0x10c   : > { %v1697_v23 = vpack.c.bf16 %v867_v20, %v866_v19  ;;  %v700_v24 = vadd.f32 %v2182_v61, %v699_v21  ;;  %v828_v25 = vpop.f32.mrf.mxu3 }
 0x10d   : > { %v647_v26 = vpop.f32.mrf.mxu0 }
 0x10e   : > { %1788 = vst [vmem:[%s2199_s12 + $0x28] sm:$0xff] %v1697_v23   ;;  %v824_v27 = vadd.f32 %v823_v2, %v700_v24  ;;  %v771_v29 = vpop.f32.mrf.mxu1  ;;  %v648_v32 = vadd.f32 %v2182_v61, %v647_v26 }
 0x110   : > { %v889_v30 = vmax.f32 %v824_v27, 0.0  ;;  %v772_v36 = vadd.f32 %v771_v29, %v648_v32 }
 0x112   : > { %v1752_v31 = vpack.c.bf16 %v889_v30, %v888_v28  ;;  %v868_v41 = vmax.f32 %v772_v36, 0.0 }
 0x113   : > { %v702_v33 = vpop.f32.mrf.mxu2 }
 0x114   : > { %1799 = vst [vmem:[%s2199_s12 + $0x80] sm:$0xff] %v1752_v31   ;;  %v831_v34 = vpop.f32.mrf.mxu3  ;;  %v703_v39 = vadd.f32 %v2182_v61, %v702_v33 }
 0x115   : > { %v649_v35 = vpop.f32.mrf.mxu0 }
 0x116   : > { %v650_v37 = vadd.f32 %v2182_v61, %v649_v35  ;;  %v773_v38 = vpop.f32.mrf.mxu1  ;;  %v827_v44 = vadd.f32 %v826_v11, %v703_v39 }
 0x118   : > { %v774_v40 = vadd.f32 %v773_v38, %v650_v37  ;;  %v890_v51 = vmax.f32 %v827_v44, 0.0 }
 0x11a   : > { %v869_v42 = vmax.f32 %v774_v40, 0.0 }
 0x11b   : > { %v704_v43 = vpop.f32.mrf.mxu2 }
 0x11c   : > { %v1702_v45 = vpack.c.bf16 %v869_v42, %v868_v41  ;;  %v705_v46 = vadd.f32 %v2182_v61, %v704_v43  ;;  %v833_v48 = vpop.f32.mrf.mxu3 }
 0x11d   : > { %v652_v47 = vpop.f32.mrf.mxu0 }
 0x11e   : > { %1789 = vst [vmem:[%s2199_s12 + $0x30] sm:$0xff] %v1702_v45   ;;  %v829_v49 = vadd.f32 %v828_v25, %v705_v46  ;;  %v776_v50 = vpop.f32.mrf.mxu1  ;;  %v653_v54 = vadd.f32 %v2182_v61, %v652_v47 }
 0x120   : > { %v891_v52 = vmax.f32 %v829_v49, 0.0  ;;  %v777_v57 = vadd.f32 %v776_v50, %v653_v54 }
 0x122   : > { %v1757_v53 = vpack.c.bf16 %v891_v52, %v890_v51  ;;  %v870_v1 = vmax.f32 %v777_v57, 0.0 }
 0x123   : > { %v707_v55 = vpop.f32.mrf.mxu2 }
 0x124   : > { %1800 = vst [vmem:[%s2199_s12 + $0x88] sm:$0xff] %v1757_v53   ;;  %v836_v60 = vpop.f32.mrf.mxu3  ;;  %v708_v62 = vadd.f32 %v2182_v61, %v707_v55 }
 0x125   : > { %v654_v56 = vpop.f32.mrf.mxu0 }
 0x126   : > { %v655_v58 = vadd.f32 %v2182_v61, %v654_v56  ;;  %v778_v59 = vpop.f32.mrf.mxu1  ;;  %v832_v4 = vadd.f32 %v831_v34, %v708_v62 }
 0x128   : > { %v779_v63 = vadd.f32 %v778_v59, %v655_v58  ;;  %v892_v10 = vmax.f32 %v832_v4, 0.0 }
 0x12a   : > { %v871_v2 = vmax.f32 %v779_v63, 0.0 }
 0x12b   : > { %v709_v3 = vpop.f32.mrf.mxu2 }
 0x12c   : > { %v1707_v5 = vpack.c.bf16 %v871_v2, %v870_v1  ;;  %v710_v6 = vadd.f32 %v2182_v61, %v709_v3  ;;  %v838_v12 = vpop.f32.mrf.mxu3 }
 0x12d   : > { %v657_v7 = vpop.f32.mrf.mxu0 }
 0x12e   : > { %1790 = vst [vmem:[%s2199_s12 + $0x38] sm:$0xff] %v1707_v5   ;;  %v834_v8 = vadd.f32 %v833_v48, %v710_v6  ;;  %v781_v9 = vpop.f32.mrf.mxu1  ;;  %v658_v14 = vadd.f32 %v2182_v61, %v657_v7 }
 0x130   : > { %v893_v11 = vmax.f32 %v834_v8, 0.0  ;;  %v782_v18 = vadd.f32 %v781_v9, %v658_v14 }
 0x132   : > { %v1762_v13 = vpack.c.bf16 %v893_v11, %v892_v10  ;;  %v872_v23 = vmax.f32 %v782_v18, 0.0 }
 0x133   : > { %v712_v15 = vpop.f32.mrf.mxu2 }
 0x134   : > { %1801 = vst [vmem:[%s2199_s12 + $0x90] sm:$0xff] %v1762_v13   ;;  %v713_v21 = vadd.f32 %v2182_v61, %v712_v15  ;;  %v841_v26 = vpop.f32.mrf.mxu3 }
 0x135   : > { %v659_v16 = vpop.f32.mrf.mxu0 }
 0x136   : > { %v660_v19 = vadd.f32 %v2182_v61, %v659_v16  ;;  %v783_v20 = vpop.f32.mrf.mxu1  ;;  %v837_v27 = vadd.f32 %v836_v60, %v713_v21  ;;  %v673_v16 = vadd.f32 %v2182_v61, %v2185_v0 }
 0x138   : > { %v784_v22 = vadd.f32 %v783_v20, %v660_v19  ;;  %v894_v33 = vmax.f32 %v837_v27, 0.0  ;;  %v675_v20 = vadd.f32 %v2182_v61, %v2197_v17 }
 0x13a   : > { %v873_v24 = vmax.f32 %v784_v22, 0.0 }
 0x13b   : > { %v714_v25 = vpop.f32.mrf.mxu2 }
 0x13c   : > { %v1712_v29 = vpack.c.bf16 %v873_v24, %v872_v23  ;;  %v715_v28 = vadd.f32 %v2182_v61, %v714_v25  ;;  %v843_v39 = vpop.f32.mrf.mxu3 }
 0x13d   : > { %v662_v30 = vpop.f32.mrf.mxu0 }
 0x13e   : > { %1791 = vst [vmem:[%s2199_s12 + $0x40] sm:$0xff] %v1712_v29   ;;  %v839_v31 = vadd.f32 %v838_v12, %v715_v28  ;;  %v786_v32 = vpop.f32.mrf.mxu1  ;;  %v663_v36 = vadd.f32 %v2182_v61, %v662_v30 }
 0x140   : > { %v895_v34 = vmax.f32 %v839_v31, 0.0  ;;  %v787_v40 = vadd.f32 %v786_v32, %v663_v36 }
 0x142   : > { %v1767_v35 = vpack.c.bf16 %v895_v34, %v894_v33  ;;  %v874_v45 = vmax.f32 %v787_v40, 0.0 }
 0x143   : > { %v717_v37 = vpop.f32.mrf.mxu2 }
 0x144   : > { %1802 = vst [vmem:[%s2199_s12 + $0x98] sm:$0xff] %v1767_v35   ;;  %v718_v43 = vadd.f32 %v2182_v61, %v717_v37  ;;  %v846_v54 = vpop.f32.mrf.mxu3 }
 0x145   : > { %v664_v38 = vpop.f32.mrf.mxu0 }
 0x146   : > { %v665_v41 = vadd.f32 %v2182_v61, %v664_v38  ;;  %v788_v42 = vpop.f32.mrf.mxu1  ;;  %v842_v48 = vadd.f32 %v841_v26, %v718_v43 }
 0x148   : > { %v789_v44 = vadd.f32 %v788_v42, %v665_v41  ;;  %v896_v55 = vmax.f32 %v842_v48, 0.0 }
 0x14a   : > { %v875_v46 = vmax.f32 %v789_v44, 0.0 }
 0x14b   : > { %v719_v47 = vpop.f32.mrf.mxu2 }
 0x14c   : > { %v1717_v49 = vpack.c.bf16 %v875_v46, %v874_v45  ;;  %v720_v50 = vadd.f32 %v2182_v61, %v719_v47  ;;  %v848_v4 = vpop.f32.mrf.mxu3 }
 0x14d   : > { %v667_v51 = vpop.f32.mrf.mxu0 }
 0x14e   : > { %1792 = vst [vmem:[%s2199_s12 + $0x48] sm:$0xff] %v1717_v49   ;;  %v844_v52 = vadd.f32 %v843_v39, %v720_v50  ;;  %v791_v53 = vpop.f32.mrf.mxu1  ;;  %v668_v58 = vadd.f32 %v2182_v61, %v667_v51 }
 0x150   : > { %v897_v56 = vmax.f32 %v844_v52, 0.0  ;;  %v792_v62 = vadd.f32 %v791_v53, %v668_v58 }
 0x152   : > { %v1772_v57 = vpack.c.bf16 %v897_v56, %v896_v55  ;;  %v876_v5 = vmax.f32 %v792_v62, 0.0 }
 0x153   : > { %v722_v59 = vpop.f32.mrf.mxu2 }
 0x154   : > { %1803 = vst [vmem:[%s2199_s12 + $0xa0] sm:$0xff] %v1772_v57   ;;  %v723_v2 = vadd.f32 %v2182_v61, %v722_v59  ;;  %v851_v18 = vpop.f32.mrf.mxu3 }
 0x155   : > { %v669_v60 = vpop.f32.mrf.mxu0 }
 0x156   : > { %v670_v63 = vadd.f32 %v2182_v61, %v669_v60  ;;  %v793_v1 = vpop.f32.mrf.mxu1  ;;  %v847_v8 = vadd.f32 %v846_v54, %v723_v2 }
 0x158   : > { %v794_v3 = vadd.f32 %v793_v1, %v670_v63  ;;  %v898_v13 = vmax.f32 %v847_v8, 0.0 }
 0x15a   : > { %v877_v6 = vmax.f32 %v794_v3, 0.0 }
 0x15b   : > { %v724_v7 = vpop.f32.mrf.mxu2 }
 0x15c   : > { %v1722_v9 = vpack.c.bf16 %v877_v6, %v876_v5  ;;  %v725_v10 = vadd.f32 %v2182_v61, %v724_v7  ;;  %v853_v0 = vpop.f32.mrf.mxu3 }
 0x15e   : > { %1793 = vst [vmem:[%s2199_s12 + $0x50] sm:$0xff] %v1722_v9   ;;  %v849_v11 = vadd.f32 %v848_v4, %v725_v10  ;;  %v796_v12 = vpop.f32.mrf.mxu1 }
 0x15f   : > { %v797_v21 = vadd.f32 %v796_v12, %v673_v16 }
 0x160   : > { %v899_v14 = vmax.f32 %v849_v11, 0.0 }
 0x161   : > { %v878_v25 = vmax.f32 %v797_v21, 0.0 }
 0x162   : > { %v1777_v15 = vpack.c.bf16 %v899_v14, %v898_v13 }
 0x163   : > { %v727_v19 = vpop.f32.mrf.mxu2 }
 0x164   : > { %1804 = vst [vmem:[%s2199_s12 + $0xa8] sm:$0xff] %v1777_v15   ;;  %v728_v24 = vadd.f32 %v2182_v61, %v727_v19 }
 0x166   : > { %v798_v22 = vpop.f32.mrf.mxu1  ;;  %v852_v28 = vadd.f32 %v851_v18, %v728_v24 }
 0x167   : > { %v799_v23 = vadd.f32 %v798_v22, %v675_v20 }
 0x168   : > { %v900_v32 = vmax.f32 %v852_v28, 0.0 }
 0x169   : > { %v879_v26 = vmax.f32 %v799_v23, 0.0 }
 0x16b   : > { %v1727_v27 = vpack.c.bf16 %v879_v26, %v878_v25  ;;  %v729_v29 = vpop.f32.mrf.mxu2 }
 0x16c   : > { %v730_v30 = vadd.f32 %v2182_v61, %v729_v29 }
 0x16d   : > { %1794 = vst [vmem:[%s2199_s12 + $0x58] sm:$0xff] %v1727_v27  }
 0x16e   : > { %v854_v31 = vadd.f32 %v853_v0, %v730_v30 }
 0x170   : > { %v901_v33 = vmax.f32 %v854_v31, 0.0  ;;  %1000 = sbr.rel (!%p2045_p4) target bundleno = 437 (0x1b5), region = 36 }
 0x172   : > { %v1782_v34 = vpack.c.bf16 %v901_v33, %v900_v32 }
 0x174   : > { %1805 = vst [vmem:[%s2199_s12 + $0xb0] sm:$0xff] %v1782_v34  }
 0x175   : > { %s2438_s22 = smov (!%p1003_p8, %s1002_s22), 46 }
 0x176   : > { %s1588_s27 = sshll.u32 %s2438_s22, 2 }
 0x177   : > { %p1591_p9 = scmp.eq.s32.totalorder %s1588_s27, 0 }
 0x178   : > { %s2295_s28 = sshrl.u32 (!%p1591_p9), %s2438_s22, 5 }
 0x179   : > { %1011 = sbr.rel (%p1591_p9) target bundleno = 437 (0x1b5), region = 40  ;;  %p1592_p10 = scmp.le.s32.totalorder (!%p1591_p9), %s2295_s28, 0 }
 0x17e   : > { %1290 = sbr.rel (%p1592_p10) target bundleno = 420 (0x1a4), region = 112  ;;  %s2429_s15 = smov (!%p1592_p10), %s2289_s26 }
 0x17f   : > { %s2430_s20 = smov (!%p1592_p10), %s2199_s12  ;;  %s2304_s6 = smov (!%p1592_p10), 0  }
 0x180   : > { %s2306_s29 = smov (!%p1592_p10), 0  }
 0x183 LB: >> { %v1028_v61 = vld [vmem:[%s1974_s20] sm:$0xf]  ;;  %v1030_v17 = vld [vmem:[%s1974_s20 + $0x4] sm:$0xf]  ;;  %v1032_v35 = vld [vmem:[%s1974_s20 + $0x8] sm:$0xf]  ;;  %s1982_s29 = sphi %s2306_s29, %s1022_s29   ;;  %s1978_s6 = sphi %s2304_s6, %s2433_s6   ;;  %s1974_s20 = sphi %s2430_s20, %s2432_s20   ;;  %s1970_s15 = sphi %s2429_s15, %s2431_s15  }
 0x184   : >> { %1029 = vst [vmem:[%s1970_s15] sm:$0xf] %v1028_v61  ;;  %v1034_v36 = vld [vmem:[%s1974_s20 + $0xc] sm:$0xf]  ;;  %v1036_v37 = vld [vmem:[%s1974_s20 + $0x10] sm:$0xf]  ;;  %s1092_s30 = sadd.s32 1, %s1978_s6 }
 0x185   : >> { %1031 = vst [vmem:[%s1970_s15 + $0x4] sm:$0xf] %v1030_v17  ;;  %v1038_v38 = vld [vmem:[%s1974_s20 + $0x14] sm:$0xf]  ;;  %v1040_v39 = vld [vmem:[%s1974_s20 + $0x18] sm:$0xf]  ;;  %p1093_p11 = scmp.ge.s32.totalorder %s1092_s30, %s2295_s28 }
 0x186   : >> { %1033 = vst [vmem:[%s1970_s15 + $0x8] sm:$0xf] %v1032_v35  ;;  %v1042_v40 = vld [vmem:[%s1974_s20 + $0x1c] sm:$0xf]  ;;  %v1044_v41 = vld [vmem:[%s1974_s20 + $0x20] sm:$0xf] }
 0x187   : >> { %1035 = vst [vmem:[%s1970_s15 + $0xc] sm:$0xf] %v1034_v36  ;;  %v1046_v42 = vld [vmem:[%s1974_s20 + $0x24] sm:$0xf]  ;;  %v1048_v43 = vld [vmem:[%s1974_s20 + $0x28] sm:$0xf] }
 0x188   : >> { %1037 = vst [vmem:[%s1970_s15 + $0x10] sm:$0xf] %v1036_v37  ;;  %v1050_v44 = vld [vmem:[%s1974_s20 + $0x2c] sm:$0xf]  ;;  %v1052_v45 = vld [vmem:[%s1974_s20 + $0x30] sm:$0xf] }
 0x189   : >> { %1039 = vst [vmem:[%s1970_s15 + $0x14] sm:$0xf] %v1038_v38  ;;  %v1054_v46 = vld [vmem:[%s1974_s20 + $0x34] sm:$0xf]  ;;  %v1056_v47 = vld [vmem:[%s1974_s20 + $0x38] sm:$0xf] }
 0x18a   : >> { %1041 = vst [vmem:[%s1970_s15 + $0x18] sm:$0xf] %v1040_v39  ;;  %v1058_v48 = vld [vmem:[%s1974_s20 + $0x3c] sm:$0xf]  ;;  %v1060_v49 = vld [vmem:[%s1974_s20 + $0x40] sm:$0xf] }
 0x18b   : >> { %1043 = vst [vmem:[%s1970_s15 + $0x1c] sm:$0xf] %v1042_v40  ;;  %v1062_v50 = vld [vmem:[%s1974_s20 + $0x44] sm:$0xf]  ;;  %s2440_s30 = smov (%p1093_p11, %s1092_s30), 0  ;;  %s1022_s29 = sadd.s32 1, %s1982_s29  }
 0x18c   : >> { %1045 = vst [vmem:[%s1970_s15 + $0x20] sm:$0xf] %v1044_v41  ;;  %v1064_v51 = vld [vmem:[%s1974_s20 + $0x48] sm:$0xf]  ;;  %v1066_v52 = vld [vmem:[%s1974_s20 + $0x4c] sm:$0xf]  ;;  %p1021_p12 = scmp.ge.s32.totalorder %s1022_s29, %s2295_s28  ;;  %s2433_s6 = smov %s2440_s30 }
 0x18d   : >> { %1047 = vst [vmem:[%s1970_s15 + $0x24] sm:$0xf] %v1046_v42  ;;  %s1593_s4 = sshll.u32 %s2440_s30, 7  ;;  %v1068_v53 = vld [vmem:[%s1974_s20 + $0x50] sm:$0xf] }
 0x18e   : >> { %1049 = vst [vmem:[%s1970_s15 + $0x28] sm:$0xf] %v1048_v43  ;;  %s2365_s5 = scalar_lea.vmem %s2199_s12, %s1593_s4 [#allocation2]   ;;  %s1098_s7 = scalar_lea.vmem %s2289_s26, %s1593_s4   ;;  %v1070_v54 = vld [vmem:[%s1974_s20 + $0x54] sm:$0xf]  ;;  %v1072_v55 = vld [vmem:[%s1974_s20 + $0x58] sm:$0xf] }
 0x18f   : >> { %1051 = vst [vmem:[%s1970_s15 + $0x2c] sm:$0xf] %v1050_v44  ;;  %v1074_v56 = vld [vmem:[%s1974_s20 + $0x5c] sm:$0xf]  ;;  %v1076_v57 = vld [vmem:[%s1974_s20 + $0x60] sm:$0xf] }
 0x190   : >> { %1053 = vst [vmem:[%s1970_s15 + $0x30] sm:$0xf] %v1052_v45  ;;  %v1078_v58 = vld [vmem:[%s1974_s20 + $0x64] sm:$0xf]  ;;  %v1080_v59 = vld [vmem:[%s1974_s20 + $0x68] sm:$0xf] }
 0x191   : >> { %1055 = vst [vmem:[%s1970_s15 + $0x34] sm:$0xf] %v1054_v46  ;;  %v1082_v60 = vld [vmem:[%s1974_s20 + $0x6c] sm:$0xf]  ;;  %v1084_v62 = vld [vmem:[%s1974_s20 + $0x70] sm:$0xf] }
 0x192   : >> { %1057 = vst [vmem:[%s1970_s15 + $0x38] sm:$0xf] %v1056_v47  ;;  %v1086_v63 = vld [vmem:[%s1974_s20 + $0x74] sm:$0xf]  ;;  %v1088_v1 = vld [vmem:[%s1974_s20 + $0x78] sm:$0xf] }
 0x193   : >> { %1059 = vst [vmem:[%s1970_s15 + $0x3c] sm:$0xf] %v1058_v48  ;;  %v1090_v2 = vld [vmem:[%s1974_s20 + $0x7c] sm:$0xf]  ;;  %s2432_s20 = smov %s2365_s5 }
 0x194   : >> { %1061 = vst [vmem:[%s1970_s15 + $0x40] sm:$0xf] %v1060_v49 }
 0x195   : >> { %1063 = vst [vmem:[%s1970_s15 + $0x44] sm:$0xf] %v1062_v50 }
 0x196   : >> { %1065 = vst [vmem:[%s1970_s15 + $0x48] sm:$0xf] %v1064_v51 }
 0x197   : >> { %1067 = vst [vmem:[%s1970_s15 + $0x4c] sm:$0xf] %v1066_v52 }
 0x198   : >> { %1069 = vst [vmem:[%s1970_s15 + $0x50] sm:$0xf] %v1068_v53 }
 0x199   : >> { %1071 = vst [vmem:[%s1970_s15 + $0x54] sm:$0xf] %v1070_v54 }
 0x19a   : >> { %1073 = vst [vmem:[%s1970_s15 + $0x58] sm:$0xf] %v1072_v55 }
 0x19b   : >> { %1075 = vst [vmem:[%s1970_s15 + $0x5c] sm:$0xf] %v1074_v56 }
 0x19c   : >> { %1077 = vst [vmem:[%s1970_s15 + $0x60] sm:$0xf] %v1076_v57 }
 0x19d   : >> { %1079 = vst [vmem:[%s1970_s15 + $0x64] sm:$0xf] %v1078_v58 }
 0x19e   : >> { %1081 = vst [vmem:[%s1970_s15 + $0x68] sm:$0xf] %v1080_v59 }
 0x19f   : >> { %1083 = vst [vmem:[%s1970_s15 + $0x6c] sm:$0xf] %v1082_v60  ;;  %1024 = sbr.rel (!%p1021_p12) target bundleno = 387 (0x183), region = 118 }
 0x1a0   : >> { %1085 = vst [vmem:[%s1970_s15 + $0x70] sm:$0xf] %v1084_v62 }
 0x1a1   : >> { %1087 = vst [vmem:[%s1970_s15 + $0x74] sm:$0xf] %v1086_v63 }
 0x1a2   : >> { %1089 = vst [vmem:[%s1970_s15 + $0x78] sm:$0xf] %v1088_v1 }
 0x1a3   : >> { %1091 = vst [vmem:[%s1970_s15 + $0x7c] sm:$0xf] %v1090_v2  ;;  %s2431_s15 = smov %s1098_s7 }
 0x1a4 PF: > { %s2406_s8 = sand.u32 31, %s2438_s22   ;;  %s1667_s9 = sshll.u32 %s2295_s28, 7 }
 0x1a5   : > { %s1103_s10 = scalar_lea.vmem %s2199_s12, %s1667_s9 [#allocation2]   ;;  %s1105_s11 = scalar_lea.vmem %s2289_s26, %s1667_s9  }
 0x1a6   : > { %p1598_p13 = scmp.le.s32.totalorder %s2406_s8, 0 }
 0x1a7   : > { %s1984_s14 = smov (!%p1598_p13), %s1105_s11   ;;  %s1988_s17 = smov (!%p1598_p13), %s1103_s10  }
 0x1a8   : > { %1304 = sbr.rel (%p1598_p13) target bundleno = 437 (0x1b5), region = 123  ;;  %s1992_s18 = smov (!%p1598_p13), 0  }
 0x1a9   : > { %s1996_s21 = smov (!%p1598_p13), 0  }
 0x1ad LB: >> { %v1115_v3 = vld [vmem:[%s1990_s17] sm:$0xf]  ;;  %s1117_s22 = sadd.s32 1, %s1994_s18  ;;  %s1109_s21 = sadd.s32 1, %s1998_s21   ;;  %s1998_s21 = sphi %s1996_s21, %s1109_s21   ;;  %s1994_s18 = sphi %s1992_s18, %s1993_s18   ;;  %s1990_s17 = sphi %s1988_s17, %s1122_s17   ;;  %s1986_s14 = sphi %s1984_s14, %s1123_s14  }
 0x1ae   : >> { %1116 = vst [vmem:[%s1986_s14] sm:$0xf] %v1115_v3  ;;  %p1118_p0 = scmp.ge.s32.totalorder %s1117_s22, %s2406_s8  ;;  %p1108_p1 = scmp.ge.s32.totalorder %s1109_s21, %s2406_s8 }
 0x1b0   : >> { %s2442_s22 = smov (%p1118_p0, %s1117_s22), 0  ;;  %1111 = sbr.rel (!%p1108_p1) target bundleno = 429 (0x1ad), region = 129 }
 0x1b1   : >> { %s1599_s12 = sshll.u32 %s2442_s22, 2  ;;  %s1993_s18 = smov %s2442_s22  }
 0x1b2   : >> { %s1122_s17 = scalar_lea.vmem %s1103_s10, %s1599_s12 [#allocation2]   ;;  %s1123_s14 = scalar_lea.vmem %s1105_s11, %s1599_s12  }
 0x1b5 PF: > { %p10_p2 = scmp.ge.s32.totalorder %s2035_s16, 4   ;;  %s2434_s12 = smov %s1962_s13 }
 0x1b6   : > { %s2435_s13 = smov %s2043_s19  ;;  %s2436_s14 = smov %s2035_s16 }
 0x1b7   :  { %12 = sbr.rel (!%p10_p2) target bundleno = 2 (0x2), region = 140 }

// kernel: dqn_forward.4
= control target key start
LH: loop header
LB: loop body
LE: loop exit
PB: predicated region body
PF: predicated region fallthrough
CT: control target
= control target key end

     0   :  { %s3955_s1 = inlined_call_operand.vmem [shape: bf16[2048,128], index: 1, kind: input, shape index: {}]   ;;  %s3956_s2 = inlined_call_operand.vmem [shape: f32[1,128], index: 2, kind: input, shape index: {}]   ;;  %s3957_s0 = inlined_call_operand.vmem [shape: bf16[72,2048], index: 0, kind: input, shape index: {}]   ;;  %s3958_s3 = inlined_call_operand.vmem [shape: bf16[72,128], index: 3, kind: output, shape index: {}]  }
   0x1   :  { %v2888_v0 = vld [vmem:[%s3955_s1 + $0x38] sm:$0xff]  ;;  %v2887_v4 = vld [vmem:[%s3955_s1 + $0x30] sm:$0xff]  ;;  %v2886_v8 = vld [vmem:[%s3955_s1 + $0x28] sm:$0xff] }
   0x2   :  { %v2896_v1 = vld [vmem:[%s3955_s1 + $0x78] sm:$0xff]  ;;  %1490 = vmatpush.bf16.msra.mxu0 %v2888_v0  ;;  %v2895_v5 = vld [vmem:[%s3955_s1 + $0x70] sm:$0xff]  ;;  %v2894_v9 = vld [vmem:[%s3955_s1 + $0x68] sm:$0xff] }
   0x3   :  { %v2904_v2 = vld [vmem:[%s3955_s1 + $0xb8] sm:$0xff]  ;;  %1523 = vmatpush.bf16.msra.mxu1 %v2896_v1  ;;  %v2903_v6 = vld [vmem:[%s3955_s1 + $0xb0] sm:$0xff]  ;;  %v2902_v10 = vld [vmem:[%s3955_s1 + $0xa8] sm:$0xff] }
   0x4   :  { %v2912_v3 = vld [vmem:[%s3955_s1 + $0xf8] sm:$0xff]  ;;  %1556 = vmatpush.bf16.msra.mxu2 %v2904_v2  ;;  %v2911_v7 = vld [vmem:[%s3955_s1 + $0xf0] sm:$0xff]  ;;  %v2910_v11 = vld [vmem:[%s3955_s1 + $0xe8] sm:$0xff] }
   0x5   :  { %1589 = vmatpush.bf16.msra.mxu3 %v2912_v3  ;;  %v2885_v12 = vld [vmem:[%s3955_s1 + $0x20] sm:$0xff]  ;;  %v2884_v16 = vld [vmem:[%s3955_s1 + $0x18] sm:$0xff]  ;;  %v2883_v20 = vld [vmem:[%s3955_s1 + $0x10] sm:$0xff] }
   0x6   :  { %1491 = vmatpush.bf16.msra.mxu0 %v2887_v4  ;;  %v2893_v13 = vld [vmem:[%s3955_s1 + $0x60] sm:$0xff]  ;;  %v2892_v17 = vld [vmem:[%s3955_s1 + $0x58] sm:$0xff]  ;;  %v2891_v21 = vld [vmem:[%s3955_s1 + $0x50] sm:$0xff] }
   0x7   :  { %1524 = vmatpush.bf16.msra.mxu1 %v2895_v5  ;;  %v2901_v14 = vld [vmem:[%s3955_s1 + $0xa0] sm:$0xff]  ;;  %v2900_v18 = vld [vmem:[%s3955_s1 + $0x98] sm:$0xff]  ;;  %v2899_v22 = vld [vmem:[%s3955_s1 + $0x90] sm:$0xff] }
   0x8   :  { %1557 = vmatpush.bf16.msra.mxu2 %v2903_v6  ;;  %v2909_v15 = vld [vmem:[%s3955_s1 + $0xe0] sm:$0xff]  ;;  %v2908_v19 = vld [vmem:[%s3955_s1 + $0xd8] sm:$0xff]  ;;  %v2907_v23 = vld [vmem:[%s3955_s1 + $0xd0] sm:$0xff] }
   0x9   :  { %1590 = vmatpush.bf16.msra.mxu3 %v2911_v7  ;;  %v2882_v24 = vld [vmem:[%s3955_s1 + $0x8] sm:$0xff]  ;;  %v2881_v28 = vld [vmem:[%s3955_s1] sm:$0xff]  ;;  %v2936_v40 = vld [vmem:[%s3955_s1 + $0x1b8] sm:$0xff] }
   0xa   :  { %1492 = vmatpush.bf16.msra.mxu0 %v2886_v8  ;;  %v2890_v25 = vld [vmem:[%s3955_s1 + $0x48] sm:$0xff]  ;;  %v2889_v29 = vld [vmem:[%s3955_s1 + $0x40] sm:$0xff]  ;;  %v2944_v41 = vld [vmem:[%s3955_s1 + $0x1f8] sm:$0xff] }
   0xb   :  { %1525 = vmatpush.bf16.msra.mxu1 %v2894_v9  ;;  %v2898_v26 = vld [vmem:[%s3955_s1 + $0x88] sm:$0xff]  ;;  %v2897_v30 = vld [vmem:[%s3955_s1 + $0x80] sm:$0xff]  ;;  %v2920_v46 = vld [vmem:[%s3955_s1 + $0x138] sm:$0xff] }
   0xc   :  { %1558 = vmatpush.bf16.msra.mxu2 %v2902_v10  ;;  %v2906_v27 = vld [vmem:[%s3955_s1 + $0xc8] sm:$0xff]  ;;  %v2905_v31 = vld [vmem:[%s3955_s1 + $0xc0] sm:$0xff]  ;;  %v2928_v47 = vld [vmem:[%s3955_s1 + $0x178] sm:$0xff] }
   0xd   :  { %1591 = vmatpush.bf16.msra.mxu3 %v2910_v11  ;;  %v2051_v32 = vld [vmem:[%s3957_s0] sm:$0xf]  ;;  %v2817_v34 = vld [vmem:[%s3957_s0 + $0x4] sm:$0xf]  ;;  %v2059_v36 = vld [vmem:[%s3957_s0 + $0x8] sm:$0xf] }
   0xe   :  { %1493 = vmatpush.bf16.msra.mxu0 %v2885_v12  ;;  %v2825_v33 = vld [vmem:[%s3957_s0 + $0x3c] sm:$0xf0]  ;;  %v2053_v35 = vld [vmem:[%s3957_s0 + $0x40] sm:$0xf0]  ;;  %v2826_v37 = vld [vmem:[%s3957_s0 + $0x44] sm:$0xf0] }
   0xf   :  { %1526 = vmatpush.bf16.msra.mxu1 %v2893_v13  ;;  %v2818_v38 = vld [vmem:[%s3957_s0 + $0xc] sm:$0xf]  ;;  %v2052_v42 = vor.u32 %v2825_v33, %v2051_v32  ;;  %v2056_v43 = vor.u32 %v2817_v34, %v2053_v35  ;;  %v2060_v44 = vor.u32 %v2826_v37, %v2059_v36  ;;  %v2935_v48 = vld [vmem:[%s3955_s1 + $0x1b0] sm:$0xff]  ;;  %v2115_v56 = vld [vmem:[%s3957_s0 + $0x80] sm:$0xf] }
  0x10   :  { %1559 = vmatpush.bf16.msra.mxu2 %v2901_v14  ;;  %v2061_v39 = vld [vmem:[%s3957_s0 + $0x48] sm:$0xf0]  ;;  %v2943_v49 = vld [vmem:[%s3955_s1 + $0x1f0] sm:$0xff]  ;;  %v2933_v57 = vld [vmem:[%s3955_s1 + $0x1a0] sm:$0xff] }
  0x11   :  { %1592 = vmatpush.bf16.msra.mxu3 %v2909_v15  ;;  %v2064_v45 = vor.u32 %v2818_v38, %v2061_v39  ;;  %v2919_v50 = vld [vmem:[%s3955_s1 + $0x130] sm:$0xff]  ;;  %v2934_v52 = vld [vmem:[%s3955_s1 + $0x1a8] sm:$0xff]  ;;  %v2941_v58 = vld [vmem:[%s3955_s1 + $0x1e0] sm:$0xff] }
  0x12   :  { %1494 = vmatpush.bf16.msra.mxu0 %v2884_v16  ;;  %v2927_v51 = vld [vmem:[%s3955_s1 + $0x170] sm:$0xff]  ;;  %v2942_v53 = vld [vmem:[%s3955_s1 + $0x1e8] sm:$0xff]  ;;  %v2841_v59 = vld [vmem:[%s3957_s0 + $0xbc] sm:$0xf0] }
  0x13   :  { %1527 = vmatpush.bf16.msra.mxu1 %v2892_v17  ;;  %v2918_v54 = vld [vmem:[%s3955_s1 + $0x128] sm:$0xff]  ;;  %v2833_v60 = vld [vmem:[%s3957_s0 + $0x84] sm:$0xf]  ;;  %v2932_v4 = vld [vmem:[%s3955_s1 + $0x198] sm:$0xff]  ;;  %v2116_v6 = vor.u32 %v2841_v59, %v2115_v56 }
  0x14   :  { %1560 = vmatpush.bf16.msra.mxu2 %v2900_v18  ;;  %v2926_v55 = vld [vmem:[%s3955_s1 + $0x168] sm:$0xff]  ;;  %v2117_v61 = vld [vmem:[%s3957_s0 + $0xc0] sm:$0xf0]  ;;  %v2940_v5 = vld [vmem:[%s3955_s1 + $0x1d8] sm:$0xff] }
  0x15   :  { %1593 = vmatpush.bf16.msra.mxu3 %v2908_v19  ;;  %v2123_v62 = vld [vmem:[%s3957_s0 + $0x88] sm:$0xf]  ;;  %v2834_v0 = vld [vmem:[%s3957_s0 + $0x8c] sm:$0xf]  ;;  %v2917_v2 = vld [vmem:[%s3955_s1 + $0x120] sm:$0xff]  ;;  %v2120_v7 = vor.u32 %v2833_v60, %v2117_v61 }
  0x16   :  { %1495 = vmatpush.bf16.msra.mxu0 %v2883_v20  ;;  %v2842_v63 = vld [vmem:[%s3957_s0 + $0xc4] sm:$0xf0]  ;;  %v2125_v1 = vld [vmem:[%s3957_s0 + $0xc8] sm:$0xf0]  ;;  %v2925_v3 = vld [vmem:[%s3955_s1 + $0x160] sm:$0xff] }
  0x17   :  { %1528 = vmatpush.bf16.msra.mxu1 %v2891_v21  ;;  %v2124_v8 = vor.u32 %v2842_v63, %v2123_v62  ;;  %v2128_v9 = vor.u32 %v2834_v0, %v2125_v1  ;;  %v2916_v10 = vld [vmem:[%s3955_s1 + $0x118] sm:$0xff]  ;;  %v2931_v12 = vld [vmem:[%s3955_s1 + $0x190] sm:$0xff]  ;;  %v2930_v16 = vld [vmem:[%s3955_s1 + $0x188] sm:$0xff] }
  0x18   :  { %1561 = vmatpush.bf16.msra.mxu2 %v2899_v22  ;;  %v2924_v11 = vld [vmem:[%s3955_s1 + $0x158] sm:$0xff]  ;;  %v2939_v13 = vld [vmem:[%s3955_s1 + $0x1d0] sm:$0xff]  ;;  %v2938_v17 = vld [vmem:[%s3955_s1 + $0x1c8] sm:$0xff] }
  0x19   :  { %1594 = vmatpush.bf16.msra.mxu3 %v2907_v23  ;;  %v2915_v14 = vld [vmem:[%s3955_s1 + $0x110] sm:$0xff]  ;;  %v2914_v18 = vld [vmem:[%s3955_s1 + $0x108] sm:$0xff]  ;;  %v2179_v19 = vld [vmem:[%s3957_s0 + $0x100] sm:$0xf] }
  0x1a   :  { %1496 = vmatpush.bf16.msra.mxu0 %v2882_v24  ;;  %v2923_v15 = vld [vmem:[%s3955_s1 + $0x150] sm:$0xff]  ;;  %v2857_v20 = vld [vmem:[%s3957_s0 + $0x13c] sm:$0xf0]  ;;  %v2849_v21 = vld [vmem:[%s3957_s0 + $0x104] sm:$0xf] }
  0x1b   :  { %1529 = vmatpush.bf16.msra.mxu1 %v2890_v25  ;;  %v2181_v22 = vld [vmem:[%s3957_s0 + $0x140] sm:$0xf0]  ;;  %v2187_v23 = vld [vmem:[%s3957_s0 + $0x108] sm:$0xf]  ;;  %v2850_v25 = vld [vmem:[%s3957_s0 + $0x10c] sm:$0xf] }
  0x1c   :  { %1562 = vmatpush.bf16.msra.mxu2 %v2898_v26  ;;  %v2858_v24 = vld [vmem:[%s3957_s0 + $0x144] sm:$0xf0]  ;;  %v2189_v26 = vld [vmem:[%s3957_s0 + $0x148] sm:$0xf0]  ;;  %v2929_v32 = vld [vmem:[%s3955_s1 + $0x180] sm:$0xff] }
  0x1d   :  { %1595 = vmatpush.bf16.msra.mxu3 %v2906_v27  ;;  %v2180_v27 = vor.u32 %v2857_v20, %v2179_v19  ;;  %v2937_v33 = vld [vmem:[%s3955_s1 + $0x1c0] sm:$0xff] }
  0x1e   :  { %1497 = vmatpush.bf16.msra.mxu0 %v2881_v28  ;;  %v2184_v28 = vor.u32 %v2849_v21, %v2181_v22  ;;  %v2913_v34 = vld [vmem:[%s3955_s1 + $0x100] sm:$0xff]  ;;  %v2964_v22 = vld [vmem:[%s3955_s1 + $0x298] sm:$0xff] }
  0x1f   :  { %1530 = vmatpush.bf16.msra.mxu1 %v2889_v29  ;;  %v2188_v29 = vor.u32 %v2858_v24, %v2187_v23  ;;  %v2921_v35 = vld [vmem:[%s3955_s1 + $0x140] sm:$0xff]  ;;  %v2972_v23 = vld [vmem:[%s3955_s1 + $0x2d8] sm:$0xff] }
  0x20   :  { %1563 = vmatpush.bf16.msra.mxu2 %v2897_v30  ;;  %v2192_v30 = vor.u32 %v2850_v25, %v2189_v26  ;;  %v2243_v36 = vld [vmem:[%s3957_s0 + $0x180] sm:$0xf]  ;;  %v2865_v38 = vld [vmem:[%s3957_s0 + $0x184] sm:$0xf]  ;;  %v2948_v24 = vld [vmem:[%s3955_s1 + $0x218] sm:$0xff] }
  0x21   :  { %1596 = vmatpush.bf16.msra.mxu3 %v2905_v31  ;;  %1498 = vmatmul.bf16.vlgmr.msra.gmra.mxu0 %v2052_v42  ;;  %v2922_v31 = vld [vmem:[%s3955_s1 + $0x148] sm:$0xff]  ;;  %v2873_v37 = vld [vmem:[%s3957_s0 + $0x1bc] sm:$0xf0]  ;;  %v2245_v39 = vld [vmem:[%s3957_s0 + $0x1c0] sm:$0xf0] }
  0x22   :  { %1531 = vmatmul.bf16.vlgmr.msra.gmra.mxu1 %v2056_v43  ;;  %1622 = vmatpush.bf16.msrb.mxu0 %v2920_v46  ;;  %v2866_v42 = vld [vmem:[%s3957_s0 + $0x18c] sm:$0xf]  ;;  %v78_v56 = vld [vmem:[%s3957_s0 + $0x200] sm:$0xff]  ;;  %v2956_v25 = vld [vmem:[%s3955_s1 + $0x258] sm:$0xff] }
  0x23   :  { %1564 = vmatmul.bf16.vlgmr.msra.gmra.mxu2 %v2060_v44  ;;  %1655 = vmatpush.bf16.msrb.mxu1 %v2928_v47  ;;  %v2253_v43 = vld [vmem:[%s3957_s0 + $0x1c8] sm:$0xf0]  ;;  %v2244_v44 = vor.u32 %v2873_v37, %v2243_v36  ;;  %v547_v59 = vunpack.c.h.b16 %v78_v56  ;;  %v2949_v20 = vld [vmem:[%s3955_s1 + $0x220] sm:$0xff]  ;;  %v2131_v26 = vld [vmem:[%s3957_s0 + $0x90] sm:$0xf] }
  0x24   :  { %1688 = vmatpush.bf16.msrb.mxu2 %v2936_v40  ;;  %1597 = vmatmul.bf16.vlgmr.msra.gmra.mxu3 %v2064_v45  ;;  %v2251_v40 = vld [vmem:[%s3957_s0 + $0x188] sm:$0xf]  ;;  %v2248_v45 = vor.u32 %v2865_v38, %v2245_v39  ;;  %v2256_v47 = vor.u32 %v2866_v42, %v2253_v43  ;;  %v2957_v21 = vld [vmem:[%s3955_s1 + $0x260] sm:$0xff]  ;;  %v2963_v38 = vld [vmem:[%s3955_s1 + $0x290] sm:$0xff] }
  0x25   :  { %1721 = vmatpush.bf16.msrb.mxu3 %v2944_v41  ;;  %v2874_v41 = vld [vmem:[%s3957_s0 + $0x1c4] sm:$0xf0]  ;;  %v627_v63 = vpack.c.b16 %v547_v59, %v547_v59  ;;  %v2971_v39 = vld [vmem:[%s3955_s1 + $0x2d0] sm:$0xff] }
  0x26   :  { %1623 = vmatpush.bf16.msrb.mxu0 %v2919_v50  ;;  %v2252_v46 = vor.u32 %v2874_v41, %v2251_v40  ;;  %v2952_v50 = vld [vmem:[%s3955_s1 + $0x238] sm:$0xff]  ;;  %v2947_v40 = vld [vmem:[%s3955_s1 + $0x210] sm:$0xff] }
  0x27   :  { %1656 = vmatpush.bf16.msrb.mxu1 %v2927_v51  ;;  %v2960_v51 = vld [vmem:[%s3955_s1 + $0x278] sm:$0xff]  ;;  %v2195_v41 = vld [vmem:[%s3957_s0 + $0x110] sm:$0xf] }
  0x28   :  { %1689 = vmatpush.bf16.msrb.mxu2 %v2935_v48  ;;  %v2968_v48 = vld [vmem:[%s3955_s1 + $0x2b8] sm:$0xff]  ;;  %v2859_v42 = vld [vmem:[%s3957_s0 + $0x14c] sm:$0xf0] }
  0x29   :  { %1722 = vmatpush.bf16.msrb.mxu3 %v2943_v49  ;;  %v2976_v49 = vld [vmem:[%s3955_s1 + $0x2f8] sm:$0xff]  ;;  %v2955_v43 = vld [vmem:[%s3955_s1 + $0x250] sm:$0xff] }
  0x2a   :  { %1624 = vmatpush.bf16.msrb.mxu0 %v2918_v54  ;;  %v2951_v54 = vld [vmem:[%s3955_s1 + $0x230] sm:$0xff] }
  0x2b   :  { %1657 = vmatpush.bf16.msrb.mxu1 %v2926_v55  ;;  %v2959_v55 = vld [vmem:[%s3955_s1 + $0x270] sm:$0xff] }
  0x2c   :  { %1690 = vmatpush.bf16.msrb.mxu2 %v2934_v52  ;;  %v2967_v52 = vld [vmem:[%s3955_s1 + $0x2b0] sm:$0xff] }
  0x2d   :  { %1723 = vmatpush.bf16.msrb.mxu3 %v2942_v53  ;;  %v2975_v53 = vld [vmem:[%s3955_s1 + $0x2f0] sm:$0xff] }
  0x2e   :  { %1625 = vmatpush.bf16.msrb.mxu0 %v2917_v2  ;;  %v2966_v2 = vld [vmem:[%s3955_s1 + $0x2a8] sm:$0xff]  ;;  %v2875_v59 = vld [vmem:[%s3957_s0 + $0x1cc] sm:$0xf0] }
  0x2f   :  { %1658 = vmatpush.bf16.msrb.mxu1 %v2925_v3  ;;  %v2974_v3 = vld [vmem:[%s3955_s1 + $0x2e8] sm:$0xff] }
  0x30   :  { %1691 = vmatpush.bf16.msrb.mxu2 %v2933_v57  ;;  %v79_v57 = vld [vmem:[%s3957_s0 + $0x208] sm:$0xff] }
  0x31   :  { %1724 = vmatpush.bf16.msrb.mxu3 %v2941_v58  ;;  %1503 = vmatmul.bf16.gmra.mxu0 %v2116_v6  ;;  %v546_v58 = vunpack.c.l.b16 %v78_v56  ;;  %v548_v60 = vunpack.c.l.b16 %v79_v57  ;;  %v549_v61 = vunpack.c.h.b16 %v79_v57  ;;  %v2965_v6 = vld [vmem:[%s3955_s1 + $0x2a0] sm:$0xff]  ;;  %v2946_v56 = vld [vmem:[%s3955_s1 + $0x208] sm:$0xff] }
  0x32   :  { %1536 = vmatmul.bf16.gmra.mxu1 %v2120_v7  ;;  %1626 = vmatpush.bf16.msrb.mxu0 %v2916_v10  ;;  %v2973_v7 = vld [vmem:[%s3955_s1 + $0x2e0] sm:$0xff]  ;;  %v2819_v10 = vld [vmem:[%s3957_s0 + $0x14] sm:$0xf]  ;;  %v2954_v57 = vld [vmem:[%s3955_s1 + $0x248] sm:$0xff] }
  0x33   :  { %1569 = vmatmul.bf16.gmra.mxu2 %v2124_v8  ;;  %1659 = vmatpush.bf16.msrb.mxu1 %v2924_v11  ;;  %v626_v62 = vpack.c.b16 %v546_v58, %v546_v58  ;;  %v628_v0 = vpack.c.b16 %v548_v60, %v548_v60  ;;  %v629_v1 = vpack.c.b16 %v549_v61, %v549_v61  ;;  %v2067_v8 = vld [vmem:[%s3957_s0 + $0x10] sm:$0xf]  ;;  %v2069_v11 = vld [vmem:[%s3957_s0 + $0x50] sm:$0xf0]  ;;  %v3515_v61 = vld [vmem:[%s3956_s2] ss:$0 sm:$0xff] }
  0x34   :  { %1692 = vmatpush.bf16.msrb.mxu2 %v2932_v4  ;;  %1602 = vmatmul.bf16.gmra.mxu3 %v2128_v9  ;;  %v2950_v4 = vld [vmem:[%s3955_s1 + $0x228] sm:$0xff]  ;;  %v2827_v9 = vld [vmem:[%s3957_s0 + $0x4c] sm:$0xf0]  ;;  %v2867_v60 = vld [vmem:[%s3957_s0 + $0x194] sm:$0xf] }
  0x35   :  { %1725 = vmatpush.bf16.msrb.mxu3 %v2940_v5  ;;  %v2958_v5 = vld [vmem:[%s3955_s1 + $0x268] sm:$0xff]  ;;  %v2259_v58 = vld [vmem:[%s3957_s0 + $0x190] sm:$0xf] }
  0x36   :  { %1627 = vmatpush.bf16.msrb.mxu0 %v2915_v14  ;;  %v2820_v14 = vld [vmem:[%s3957_s0 + $0x1c] sm:$0xf] }
  0x37   :  { %1660 = vmatpush.bf16.msrb.mxu1 %v2923_v15  ;;  %v2077_v15 = vld [vmem:[%s3957_s0 + $0x58] sm:$0xf0] }
  0x38   :  { %1693 = vmatpush.bf16.msrb.mxu2 %v2931_v12  ;;  %v2075_v12 = vld [vmem:[%s3957_s0 + $0x18] sm:$0xf]  ;;  %v2080_v19 = vor.u32 %v2820_v14, %v2077_v15 }
  0x39   :  { %1726 = vmatpush.bf16.msrb.mxu3 %v2939_v13  ;;  %v2828_v13 = vld [vmem:[%s3957_s0 + $0x54] sm:$0xf0] }
  0x3a   :  { %1628 = vmatpush.bf16.msrb.mxu0 %v2914_v18  ;;  %v2076_v18 = vor.u32 %v2828_v13, %v2075_v12  ;;  %v3000_v15 = vld [vmem:[%s3955_s1 + $0x3b8] sm:$0xff] }
  0x3b   :  { %1661 = vmatpush.bf16.msrb.mxu1 %v2922_v31  ;;  %v2844_v31 = vld [vmem:[%s3957_s0 + $0xd4] sm:$0xf0] }
  0x3c   :  { %1694 = vmatpush.bf16.msrb.mxu2 %v2930_v16  ;;  %v2068_v16 = vor.u32 %v2827_v9, %v2067_v8 }
  0x3d   :  { %1727 = vmatpush.bf16.msrb.mxu3 %v2938_v17  ;;  %v2072_v17 = vor.u32 %v2819_v10, %v2069_v11 }
  0x3e   :  { %1629 = vmatpush.bf16.msrb.mxu0 %v2913_v34 }
  0x3f   :  { %1662 = vmatpush.bf16.msrb.mxu1 %v2921_v35 }
  0x40   :  { %1695 = vmatpush.bf16.msrb.mxu2 %v2929_v32  ;;  %v2836_v32 = vld [vmem:[%s3957_s0 + $0x9c] sm:$0xf] }
  0x41   :  { %1508 = vmatmul.bf16.gmra.mxu0 %v2180_v27  ;;  %1728 = vmatpush.bf16.msrb.mxu3 %v2937_v33  ;;  %v2843_v27 = vld [vmem:[%s3957_s0 + $0xcc] sm:$0xf0]  ;;  %v2141_v33 = vld [vmem:[%s3957_s0 + $0xd8] sm:$0xf0] }
  0x42   :  { %1541 = vmatmul.bf16.gmra.mxu1 %v2184_v28  ;;  %1754 = vmatpush.bf16.msra.mxu0 %v2952_v50  ;;  %v2835_v28 = vld [vmem:[%s3957_s0 + $0x94] sm:$0xf]  ;;  %v2132_v34 = vor.u32 %v2843_v27, %v2131_v26  ;;  %v2144_v37 = vor.u32 %v2836_v32, %v2141_v33  ;;  %v2196_v50 = vor.u32 %v2859_v42, %v2195_v41  ;;  %v2992_v27 = vld [vmem:[%s3955_s1 + $0x378] sm:$0xff] }
  0x43   :  { %1574 = vmatmul.bf16.gmra.mxu2 %v2188_v29  ;;  %1787 = vmatpush.bf16.msra.mxu1 %v2960_v51  ;;  %v2133_v29 = vld [vmem:[%s3957_s0 + $0xd0] sm:$0xf0] }
  0x44   :  { %1607 = vmatmul.bf16.gmra.mxu3 %v2192_v30  ;;  %1820 = vmatpush.bf16.msra.mxu2 %v2968_v48  ;;  %v2139_v30 = vld [vmem:[%s3957_s0 + $0x98] sm:$0xf]  ;;  %v2136_v35 = vor.u32 %v2835_v28, %v2133_v29  ;;  %v2852_v48 = vld [vmem:[%s3957_s0 + $0x11c] sm:$0xf] }
  0x45   :  { %1853 = vmatpush.bf16.msra.mxu3 %v2976_v49  ;;  %v2140_v36 = vor.u32 %v2844_v31, %v2139_v30  ;;  %v2205_v49 = vld [vmem:[%s3957_s0 + $0x158] sm:$0xf0]  ;;  %v2999_v31 = vld [vmem:[%s3955_s1 + $0x3b0] sm:$0xff] }
  0x46   :  { %1755 = vmatpush.bf16.msra.mxu0 %v2951_v54  ;;  %v2962_v54 = vld [vmem:[%s3955_s1 + $0x288] sm:$0xff] }
  0x47   :  { %1788 = vmatpush.bf16.msra.mxu1 %v2959_v55  ;;  %v2970_v55 = vld [vmem:[%s3955_s1 + $0x2c8] sm:$0xff] }
  0x48   :  { %1821 = vmatpush.bf16.msra.mxu2 %v2967_v52 }
  0x49   :  { %1854 = vmatpush.bf16.msra.mxu3 %v2975_v53  ;;  %v2208_v53 = vor.u32 %v2852_v48, %v2205_v49  ;;  %v2991_v48 = vld [vmem:[%s3955_s1 + $0x370] sm:$0xff] }
  0x4a   :  { %1756 = vmatpush.bf16.msra.mxu0 %v2950_v4  ;;  %v2876_v4 = vld [vmem:[%s3957_s0 + $0x1d4] sm:$0xf0] }
  0x4b   :  { %1789 = vmatpush.bf16.msra.mxu1 %v2958_v5  ;;  %v2868_v5 = vld [vmem:[%s3957_s0 + $0x19c] sm:$0xf] }
  0x4c   :  { %1822 = vmatpush.bf16.msra.mxu2 %v2966_v2  ;;  %v2267_v2 = vld [vmem:[%s3957_s0 + $0x198] sm:$0xf] }
  0x4d   :  { %1855 = vmatpush.bf16.msra.mxu3 %v2974_v3  ;;  %v2953_v3 = vld [vmem:[%s3955_s1 + $0x240] sm:$0xff]  ;;  %v2268_v11 = vor.u32 %v2876_v4, %v2267_v2  ;;  %v2091_v2 = vld [vmem:[%s3957_s0 + $0x28] sm:$0xf]  ;;  %v2822_v4 = vld [vmem:[%s3957_s0 + $0x2c] sm:$0xf] }
  0x4e   :  { %1757 = vmatpush.bf16.msra.mxu0 %v2949_v20 }
  0x4f   :  { %1790 = vmatpush.bf16.msra.mxu1 %v2957_v21 }
  0x50   :  { %1823 = vmatpush.bf16.msra.mxu2 %v2965_v6  ;;  %v2269_v6 = vld [vmem:[%s3957_s0 + $0x1d8] sm:$0xf0] }
  0x51   :  { %1513 = vmatmul.bf16.gmra.mxu0 %v2244_v44  ;;  %1856 = vmatpush.bf16.msra.mxu3 %v2973_v7  ;;  %v2851_v44 = vld [vmem:[%s3957_s0 + $0x114] sm:$0xf]  ;;  %v2260_v7 = vor.u32 %v2875_v59, %v2259_v58  ;;  %v2272_v12 = vor.u32 %v2868_v5, %v2269_v6  ;;  %v2998_v58 = vld [vmem:[%s3955_s1 + $0x3a8] sm:$0xff] }
  0x52   :  { %1546 = vmatmul.bf16.gmra.mxu1 %v2248_v45  ;;  %1758 = vmatpush.bf16.msra.mxu0 %v2948_v24  ;;  %v2197_v45 = vld [vmem:[%s3957_s0 + $0x150] sm:$0xf0]  ;;  %v2093_v5 = vld [vmem:[%s3957_s0 + $0x68] sm:$0xf0] }
  0x53   :  { %1579 = vmatmul.bf16.gmra.mxu2 %v2252_v46  ;;  %1791 = vmatpush.bf16.msra.mxu1 %v2956_v25  ;;  %v2203_v46 = vld [vmem:[%s3957_s0 + $0x118] sm:$0xf]  ;;  %v2200_v51 = vor.u32 %v2851_v44, %v2197_v45  ;;  %v3007_v45 = vld [vmem:[%s3955_s1 + $0x3f0] sm:$0xff] }
  0x54   :  { %1612 = vmatmul.bf16.gmra.mxu3 %v2256_v47  ;;  %1824 = vmatpush.bf16.msra.mxu2 %v2964_v22  ;;  %v2860_v47 = vld [vmem:[%s3957_s0 + $0x154] sm:$0xf0] }
  0x55   :  { %1857 = vmatpush.bf16.msra.mxu3 %v2972_v23  ;;  %v2204_v52 = vor.u32 %v2860_v47, %v2203_v46  ;;  %v80_v23 = vld [vmem:[%s3957_s0 + $0x210] sm:$0xff]  ;;  %v81_v25 = vld [vmem:[%s3957_s0 + $0x218] sm:$0xff] }
  0x56   :  { %1759 = vmatpush.bf16.msra.mxu0 %v2947_v40  ;;  %v550_v29 = vunpack.c.l.b16 %v80_v23  ;;  %v551_v30 = vunpack.c.h.b16 %v80_v23  ;;  %v552_v32 = vunpack.c.l.b16 %v81_v25  ;;  %v553_v33 = vunpack.c.h.b16 %v81_v25  ;;  %v2983_v46 = vld [vmem:[%s3955_s1 + $0x330] sm:$0xff] }
  0x57   :  { %1792 = vmatpush.bf16.msra.mxu1 %v2955_v43 }
  0x58   :  { %1825 = vmatpush.bf16.msra.mxu2 %v2963_v38  ;;  %v632_v41 = vpack.c.b16 %v552_v32, %v552_v32  ;;  %v633_v42 = vpack.c.b16 %v553_v33, %v553_v33  ;;  %v2980_v32 = vld [vmem:[%s3955_s1 + $0x318] sm:$0xff] }
  0x59   :  { %1858 = vmatpush.bf16.msra.mxu3 %v2971_v39 }
  0x5a   :  { %1760 = vmatpush.bf16.msra.mxu0 %v2946_v56  ;;  %v2083_v56 = vld [vmem:[%s3957_s0 + $0x20] sm:$0xf] }
  0x5b   :  { %1793 = vmatpush.bf16.msra.mxu1 %v2954_v57  ;;  %v2829_v57 = vld [vmem:[%s3957_s0 + $0x5c] sm:$0xf0] }
  0x5c   :  { %1826 = vmatpush.bf16.msra.mxu2 %v2962_v54 }
  0x5d   :  { %1859 = vmatpush.bf16.msra.mxu3 %v2970_v55 }
  0x5f   :  { %1794 = vmatpush.bf16.msra.mxu1 %v2953_v3  ;;  %v2830_v3 = vld [vmem:[%s3957_s0 + $0x64] sm:$0xf0] }
  0x61   :  { %1518 = vmatmul.bf16.gmra.mxu0 %v626_v62  ;;  %v2961_v62 = vld [vmem:[%s3955_s1 + $0x280] sm:$0xff] }
  0x62   :  { %1551 = vmatmul.bf16.gmra.mxu1 %v627_v63  ;;  %v2969_v63 = vld [vmem:[%s3955_s1 + $0x2c0] sm:$0xff]  ;;  %1827 = vmatpush.bf16.msra.mxu2 %v2961_v62  ;;  %v2982_v62 = vld [vmem:[%s3955_s1 + $0x328] sm:$0xff] }
  0x63   :  { %1584 = vmatmul.bf16.gmra.mxu2 %v628_v0  ;;  %v2945_v0 = vld [vmem:[%s3955_s1 + $0x200] sm:$0xff]  ;;  %1860 = vmatpush.bf16.msra.mxu3 %v2969_v63  ;;  %v2990_v63 = vld [vmem:[%s3955_s1 + $0x368] sm:$0xff] }
  0x64   :  { %1617 = vmatmul.bf16.gmra.mxu3 %v629_v1  ;;  %v2261_v1 = vld [vmem:[%s3957_s0 + $0x1d0] sm:$0xf0]  ;;  %1761 = vmatpush.bf16.msra.mxu0 %v2945_v0  ;;  %v2821_v0 = vld [vmem:[%s3957_s0 + $0x24] sm:$0xf] }
  0x65   :  { %v2264_v8 = vor.u32 %v2867_v60, %v2261_v1  ;;  %v3006_v60 = vld [vmem:[%s3955_s1 + $0x3e8] sm:$0xff]  ;;  %v2085_v1 = vld [vmem:[%s3957_s0 + $0x60] sm:$0xf0] }
  0x71   :  { %1630 = vmatmul.bf16.vlgmr.msrb.gmra.mxu0 %v2068_v16  ;;  %v3008_v16 = vld [vmem:[%s3955_s1 + $0x3f8] sm:$0xff] }
  0x72   :  { %1663 = vmatmul.bf16.vlgmr.msrb.gmra.mxu1 %v2072_v17  ;;  %v2984_v17 = vld [vmem:[%s3955_s1 + $0x338] sm:$0xff] }
  0x73   :  { %1696 = vmatmul.bf16.vlgmr.msrb.gmra.mxu2 %v2076_v18  ;;  %1886 = vmatpush.bf16.msrb.mxu0 %v2984_v17 }
  0x74   :  { %1729 = vmatmul.bf16.vlgmr.msrb.gmra.mxu3 %v2080_v19  ;;  %1952 = vmatpush.bf16.msrb.mxu2 %v3000_v15 }
  0x75   :  { %1985 = vmatpush.bf16.msrb.mxu3 %v3008_v16  ;;  %1919 = vmatpush.bf16.msrb.mxu1 %v2992_v27 }
  0x77   :  { %1887 = vmatpush.bf16.msrb.mxu0 %v2983_v46 }
  0x78   :  { %1953 = vmatpush.bf16.msrb.mxu2 %v2999_v31  ;;  %v3004_v31 = vld [vmem:[%s3955_s1 + $0x3d8] sm:$0xff] }
  0x79   :  { %1986 = vmatpush.bf16.msrb.mxu3 %v3007_v45  ;;  %1920 = vmatpush.bf16.msrb.mxu1 %v2991_v48 }
  0x7b   :  { %1888 = vmatpush.bf16.msrb.mxu0 %v2982_v62 }
  0x7c   :  { %1954 = vmatpush.bf16.msrb.mxu2 %v2998_v58 }
  0x7d   :  { %1987 = vmatpush.bf16.msrb.mxu3 %v3006_v60  ;;  %1921 = vmatpush.bf16.msrb.mxu1 %v2990_v63 }
  0x81   :  { %1635 = vmatmul.bf16.gmra.mxu0 %v2132_v34 }
  0x82   :  { %1668 = vmatmul.bf16.gmra.mxu1 %v2136_v35 }
  0x83   :  { %1701 = vmatmul.bf16.gmra.mxu2 %v2140_v36  ;;  %v630_v36 = vpack.c.b16 %v550_v29, %v550_v29 }
  0x84   :  { %1734 = vmatmul.bf16.gmra.mxu3 %v2144_v37  ;;  %v631_v37 = vpack.c.b16 %v551_v30, %v551_v30  ;;  %v2996_v30 = vld [vmem:[%s3955_s1 + $0x398] sm:$0xff] }
  0x91   :  { %1640 = vmatmul.bf16.gmra.mxu0 %v2196_v50 }
  0x92   :  { %1673 = vmatmul.bf16.gmra.mxu1 %v2200_v51 }
  0x93   :  { %1706 = vmatmul.bf16.gmra.mxu2 %v2204_v52 }
  0x94   :  { %1739 = vmatmul.bf16.gmra.mxu3 %v2208_v53 }
  0x9e   :  { %v1499_v9 = vpop.f32.mrf.mxu0 }
  0x9f   :  { %v1532_v10 = vpop.f32.mrf.mxu1  ;;  %v1500_v13 = vadd.f32 %v3515_v61, %v1499_v9  ;;  %v2088_v9 = vor.u32 %v2821_v0, %v2085_v1 }
  0xa1   :  { %v1533_v14 = vadd.f32 %v1532_v10, %v1500_v13  ;;  %1645 = vmatmul.bf16.gmra.mxu0 %v2260_v7  ;;  %v2092_v13 = vor.u32 %v2830_v3, %v2091_v2  ;;  %v3003_v2 = vld [vmem:[%s3955_s1 + $0x3d0] sm:$0xff] }
  0xa2   :  { %1678 = vmatmul.bf16.gmra.mxu1 %v2264_v8  ;;  %v2084_v8 = vor.u32 %v2829_v57, %v2083_v56  ;;  %v2995_v57 = vld [vmem:[%s3955_s1 + $0x390] sm:$0xff] }
  0xa3   :  { %1711 = vmatmul.bf16.gmra.mxu2 %v2268_v11  ;;  %v2979_v3 = vld [vmem:[%s3955_s1 + $0x310] sm:$0xff] }
  0xa4   :  { %1744 = vmatmul.bf16.gmra.mxu3 %v2272_v12 }
  0xa6   :  { %v1565_v18 = vpop.f32.mrf.mxu2  ;;  %v1501_v21 = vpop.f32.mrf.mxu0 }
  0xa7   :  { %v1598_v19 = vpop.f32.mrf.mxu3  ;;  %v1566_v20 = vadd.f32 %v1565_v18, %v1533_v14  ;;  %v1534_v22 = vpop.f32.mrf.mxu1  ;;  %v1502_v24 = vadd.f32 %v3515_v61, %v1501_v21  ;;  %v2096_v14 = vor.u32 %v2822_v4, %v2093_v5  ;;  %v2997_v18 = vld [vmem:[%s3955_s1 + $0x3a0] sm:$0xff] }
  0xa8   :  { %v2989_v21 = vld [vmem:[%s3955_s1 + $0x360] sm:$0xff]  ;;  %1955 = vmatpush.bf16.msrb.mxu2 %v2997_v18 }
  0xa9   :  { %v3561_v26 = vadd.f32 %v1598_v19, %v1566_v20  ;;  %v1535_v28 = vadd.f32 %v1534_v22, %v1502_v24  ;;  %v3005_v19 = vld [vmem:[%s3955_s1 + $0x3e0] sm:$0xff]  ;;  %1922 = vmatpush.bf16.msrb.mxu1 %v2989_v21 }
  0xaa   :  { %v2981_v20 = vld [vmem:[%s3955_s1 + $0x320] sm:$0xff]  ;;  %1988 = vmatpush.bf16.msrb.mxu3 %v3005_v19 }
  0xab   :  { %1889 = vmatpush.bf16.msrb.mxu0 %v2981_v20  ;;  %v2211_v5 = vld [vmem:[%s3957_s0 + $0x120] sm:$0xf] }
  0xac   :  { %1956 = vmatpush.bf16.msrb.mxu2 %v2996_v30  ;;  %v3002_v30 = vld [vmem:[%s3955_s1 + $0x3c8] sm:$0xff] }
  0xae   :  { %v1567_v34 = vpop.f32.mrf.mxu2  ;;  %v1504_v39 = vpop.f32.mrf.mxu0  ;;  %1989 = vmatpush.bf16.msrb.mxu3 %v3004_v31  ;;  %v2978_v31 = vld [vmem:[%s3955_s1 + $0x308] sm:$0xff] }
  0xaf   :  { %v1600_v35 = vpop.f32.mrf.mxu3  ;;  %v1568_v38 = vadd.f32 %v1567_v34, %v1535_v28  ;;  %v1537_v40 = vpop.f32.mrf.mxu1  ;;  %v1505_v43 = vadd.f32 %v3515_v61, %v1504_v39  ;;  %v2147_v34 = vld [vmem:[%s3957_s0 + $0xa0] sm:$0xf]  ;;  %v2846_v39 = vld [vmem:[%s3957_s0 + $0xe4] sm:$0xf0]  ;;  %1890 = vmatpush.bf16.msrb.mxu0 %v2980_v32 }
  0xb0   :  { %1957 = vmatpush.bf16.msrb.mxu2 %v2995_v57 }
  0xb1   :  { %v3570_v44 = vadd.f32 %v1600_v35, %v1568_v38  ;;  %v1538_v47 = vadd.f32 %v1537_v40, %v1505_v43  ;;  %1650 = vmatmul.bf16.gmra.mxu0 %v630_v36  ;;  %v2845_v35 = vld [vmem:[%s3957_s0 + $0xdc] sm:$0xf0]  ;;  %v2837_v36 = vld [vmem:[%s3957_s0 + $0xa4] sm:$0xf]  ;;  %v2155_v38 = vld [vmem:[%s3957_s0 + $0xa8] sm:$0xf] }
  0xb2   :  { %1683 = vmatmul.bf16.gmra.mxu1 %v631_v37  ;;  %v2149_v37 = vld [vmem:[%s3957_s0 + $0xe0] sm:$0xf0]  ;;  %v2838_v40 = vld [vmem:[%s3957_s0 + $0xac] sm:$0xf]  ;;  %v2148_v45 = vor.u32 %v2845_v35, %v2147_v34  ;;  %1990 = vmatpush.bf16.msrb.mxu3 %v3003_v2 }
  0xb3   :  { %1716 = vmatmul.bf16.gmra.mxu2 %v632_v41  ;;  %v2157_v41 = vld [vmem:[%s3957_s0 + $0xe8] sm:$0xf0]  ;;  %v2152_v46 = vor.u32 %v2837_v36, %v2149_v37  ;;  %1891 = vmatpush.bf16.msrb.mxu0 %v2979_v3 }
  0xb4   :  { %1749 = vmatmul.bf16.gmra.mxu3 %v633_v42 }
  0xb6   :  { %v1570_v49 = vpop.f32.mrf.mxu2  ;;  %v1506_v52 = vpop.f32.mrf.mxu0  ;;  %1991 = vmatpush.bf16.msrb.mxu3 %v3002_v30 }
  0xb7   :  { %v1603_v50 = vpop.f32.mrf.mxu3  ;;  %v1571_v51 = vadd.f32 %v1570_v49, %v1538_v47  ;;  %v1539_v53 = vpop.f32.mrf.mxu1  ;;  %v1507_v54 = vadd.f32 %v3515_v61, %v1506_v52  ;;  %v2988_v47 = vld [vmem:[%s3955_s1 + $0x358] sm:$0xff]  ;;  %v2160_v52 = vor.u32 %v2838_v40, %v2157_v41  ;;  %1892 = vmatpush.bf16.msrb.mxu0 %v2978_v31  ;;  %v2869_v40 = vld [vmem:[%s3957_s0 + $0x1a4] sm:$0xf] }
  0xb8   :  { %1923 = vmatpush.bf16.msrb.mxu1 %v2988_v47  ;;  %v2993_v41 = vld [vmem:[%s3955_s1 + $0x380] sm:$0xff] }
  0xb9   :  { %v3582_v55 = vadd.f32 %v1603_v50, %v1571_v51  ;;  %v1540_v59 = vadd.f32 %v1539_v53, %v1507_v54  ;;  %v2156_v51 = vor.u32 %v2846_v39, %v2155_v38  ;;  %v2275_v38 = vld [vmem:[%s3957_s0 + $0x1a0] sm:$0xf] }
  0xba   :  { %v2877_v39 = vld [vmem:[%s3957_s0 + $0x1dc] sm:$0xf0] }
  0xbb   :  { %v2985_v47 = vld [vmem:[%s3955_s1 + $0x340] sm:$0xff] }
  0xbe   :  { %v1572_v6 = vpop.f32.mrf.mxu2  ;;  %v1509_v11 = vpop.f32.mrf.mxu0 }
  0xbf   :  { %v1605_v7 = vpop.f32.mrf.mxu3  ;;  %v1573_v10 = vadd.f32 %v1572_v6, %v1540_v59  ;;  %v1542_v12 = vpop.f32.mrf.mxu1  ;;  %v1510_v15 = vadd.f32 %v3515_v61, %v1509_v11  ;;  %v2861_v6 = vld [vmem:[%s3957_s0 + $0x15c] sm:$0xf0]  ;;  %v2862_v11 = vld [vmem:[%s3957_s0 + $0x164] sm:$0xf0] }
  0xc1   :  { %v3621_v16 = vadd.f32 %v1605_v7, %v1573_v10  ;;  %v1543_v17 = vadd.f32 %v1542_v12, %v1510_v15  ;;  %1762 = vmatmul.bf16.vlgmr.msra.gmra.mxu0 %v2084_v8  ;;  %v2987_v7 = vld [vmem:[%s3955_s1 + $0x350] sm:$0xff]  ;;  %v2853_v8 = vld [vmem:[%s3957_s0 + $0x124] sm:$0xf]  ;;  %v2219_v10 = vld [vmem:[%s3957_s0 + $0x128] sm:$0xf] }
  0xc2   :  { %1795 = vmatmul.bf16.vlgmr.msra.gmra.mxu1 %v2088_v9  ;;  %v2213_v9 = vld [vmem:[%s3957_s0 + $0x160] sm:$0xf0]  ;;  %v2854_v12 = vld [vmem:[%s3957_s0 + $0x12c] sm:$0xf] }
  0xc3   :  { %1828 = vmatmul.bf16.vlgmr.msra.gmra.mxu2 %v2092_v13  ;;  %v2221_v13 = vld [vmem:[%s3957_s0 + $0x168] sm:$0xf0]  ;;  %1924 = vmatpush.bf16.msrb.mxu1 %v2987_v7  ;;  %v2216_v18 = vor.u32 %v2853_v8, %v2213_v9 }
  0xc4   :  { %1861 = vmatmul.bf16.vlgmr.msra.gmra.mxu3 %v2096_v14 }
  0xc6   :  { %v1575_v22 = vpop.f32.mrf.mxu2  ;;  %v1511_v25 = vpop.f32.mrf.mxu0 }
  0xc7   :  { %v1608_v23 = vpop.f32.mrf.mxu3  ;;  %v1576_v24 = vadd.f32 %v1575_v22, %v1543_v17  ;;  %v1544_v27 = vpop.f32.mrf.mxu1  ;;  %v1512_v28 = vadd.f32 %v3515_v61, %v1511_v25  ;;  %v2212_v17 = vor.u32 %v2861_v6, %v2211_v5  ;;  %v2220_v22 = vor.u32 %v2862_v11, %v2219_v10  ;;  %v82_v6 = vld [vmem:[%s3957_s0 + $0x220] sm:$0xff] }
  0xc8   :  { %v554_v10 = vunpack.c.l.b16 %v82_v6  ;;  %v555_v11 = vunpack.c.h.b16 %v82_v6  ;;  %v2165_v6 = vld [vmem:[%s3957_s0 + $0xf0] sm:$0xf0] }
  0xc9   :  { %v3636_v29 = vadd.f32 %v1608_v23, %v1576_v24  ;;  %v1545_v33 = vadd.f32 %v1544_v27, %v1512_v28  ;;  %v2224_v23 = vor.u32 %v2854_v12, %v2221_v13  ;;  %v2994_v27 = vld [vmem:[%s3955_s1 + $0x388] sm:$0xff] }
  0xca   :  { %1958 = vmatpush.bf16.msrb.mxu2 %v2994_v27 }
  0xce   :  { %v1577_v42 = vpop.f32.mrf.mxu2  ;;  %v1514_v49 = vpop.f32.mrf.mxu0  ;;  %1959 = vmatpush.bf16.msrb.mxu2 %v2993_v41  ;;  %v2824_v41 = vld [vmem:[%s3957_s0 + $0x3c] sm:$0xf] }
  0xcf   :  { %v1610_v43 = vpop.f32.mrf.mxu3  ;;  %v1578_v48 = vadd.f32 %v1577_v42, %v1545_v33  ;;  %v1547_v50 = vpop.f32.mrf.mxu1  ;;  %v1515_v53 = vadd.f32 %v3515_v61, %v1514_v49  ;;  %v3001_v42 = vld [vmem:[%s3955_s1 + $0x3c0] sm:$0xff]  ;;  %v2870_v49 = vld [vmem:[%s3957_s0 + $0x1ac] sm:$0xf] }
  0xd0   :  { %1992 = vmatpush.bf16.msrb.mxu3 %v3001_v42  ;;  %v2109_v42 = vld [vmem:[%s3957_s0 + $0x78] sm:$0xf0] }
  0xd1   :  { %v3675_v54 = vadd.f32 %v1610_v43, %v1578_v48  ;;  %v1548_v56 = vadd.f32 %v1547_v50, %v1515_v53  ;;  %1767 = vmatmul.bf16.gmra.mxu0 %v2148_v45  ;;  %v2977_v43 = vld [vmem:[%s3955_s1 + $0x300] sm:$0xff]  ;;  %v2878_v48 = vld [vmem:[%s3957_s0 + $0x1e4] sm:$0xf0]  ;;  %v2285_v50 = vld [vmem:[%s3957_s0 + $0x1e8] sm:$0xf0]  ;;  %v2276_v53 = vor.u32 %v2877_v39, %v2275_v38 }
  0xd2   :  { %1800 = vmatmul.bf16.gmra.mxu1 %v2152_v46  ;;  %v2277_v45 = vld [vmem:[%s3957_s0 + $0x1e0] sm:$0xf0]  ;;  %v2283_v46 = vld [vmem:[%s3957_s0 + $0x1a8] sm:$0xf]  ;;  %1893 = vmatpush.bf16.msrb.mxu0 %v2977_v43  ;;  %v2823_v38 = vld [vmem:[%s3957_s0 + $0x34] sm:$0xf] }
  0xd3   :  { %1833 = vmatmul.bf16.gmra.mxu2 %v2156_v51  ;;  %v2101_v39 = vld [vmem:[%s3957_s0 + $0x70] sm:$0xf0] }
  0xd4   :  { %1866 = vmatmul.bf16.gmra.mxu3 %v2160_v52 }
  0xd6   :  { %v1580_v58 = vpop.f32.mrf.mxu2  ;;  %v1516_v62 = vpop.f32.mrf.mxu0 }
  0xd7   :  { %v1613_v59 = vpop.f32.mrf.mxu3  ;;  %v1581_v60 = vadd.f32 %v1580_v58, %v1548_v56  ;;  %v1549_v63 = vpop.f32.mrf.mxu1  ;;  %v1517_v0 = vadd.f32 %v3515_v61, %v1516_v62  ;;  %v2280_v56 = vor.u32 %v2869_v40, %v2277_v45  ;;  %v2832_v40 = vld [vmem:[%s3957_s0 + $0x74] sm:$0xf0] }
  0xd9   :  { %v3681_v1 = vadd.f32 %v1613_v59, %v1581_v60  ;;  %v1550_v4 = vadd.f32 %v1549_v63, %v1517_v0  ;;  %v2284_v59 = vor.u32 %v2878_v48, %v2283_v46  ;;  %v2288_v60 = vor.u32 %v2870_v49, %v2285_v50 }
  0xde   :  { %v1582_v14 = vpop.f32.mrf.mxu2  ;;  %v1519_v20 = vpop.f32.mrf.mxu0 }
  0xdf   :  { %v1615_v15 = vpop.f32.mrf.mxu3  ;;  %v1583_v19 = vadd.f32 %v1582_v14, %v1550_v4  ;;  %v1552_v21 = vpop.f32.mrf.mxu1  ;;  %v1520_v24 = vadd.f32 %v3515_v61, %v1519_v20  ;;  %v2986_v61 = vld [vmem:[%s3955_s1 + $0x348] sm:$0xff] }
  0xe0   :  { %1925 = vmatpush.bf16.msrb.mxu1 %v2986_v61 }
  0xe1   :  { %v3717_v25 = vadd.f32 %v1615_v15, %v1583_v19  ;;  %v1553_v28 = vadd.f32 %v1552_v21, %v1520_v24  ;;  %1772 = vmatmul.bf16.gmra.mxu0 %v2212_v17  ;;  %v634_v17 = vpack.c.b16 %v554_v10, %v554_v10 }
  0xe2   :  { %1805 = vmatmul.bf16.gmra.mxu1 %v2216_v18  ;;  %v635_v18 = vpack.c.b16 %v555_v11, %v555_v11 }
  0xe3   :  { %1838 = vmatmul.bf16.gmra.mxu2 %v2220_v22 }
  0xe4   :  { %1871 = vmatmul.bf16.gmra.mxu3 %v2224_v23  ;;  %1926 = vmatpush.bf16.msrb.mxu1 %v2985_v47  ;;  %v2104_v47 = vor.u32 %v2823_v38, %v2101_v39  ;;  %v2856_v38 = vld [vmem:[%s3957_s0 + $0x13c] sm:$0xf] }
  0xe5   :  { %v2237_v39 = vld [vmem:[%s3957_s0 + $0x178] sm:$0xf0] }
  0xe6   :  { %v1585_v32 = vpop.f32.mrf.mxu2  ;;  %v1521_v35 = vpop.f32.mrf.mxu0 }
  0xe7   :  { %v1618_v33 = vpop.f32.mrf.mxu3  ;;  %v1586_v34 = vadd.f32 %v1585_v32, %v1553_v28  ;;  %v1554_v36 = vpop.f32.mrf.mxu1 }
  0xe8   :  { %v2831_v36 = vld [vmem:[%s3957_s0 + $0x6c] sm:$0xf0] }
  0xe9   :  { %v3731_v37 = vadd.f32 %v1618_v33, %v1586_v34 }
  0xee   :  { %v1587_v51 = vpop.f32.mrf.mxu2  ;;  %v1631_v57 = vpop.f32.mrf.mxu0 }
  0xef   :  { %v1620_v52 = vpop.f32.mrf.mxu3  ;;  %v1664_v58 = vpop.f32.mrf.mxu1  ;;  %v1632_v62 = vadd.f32 %v1631_v57, %v3561_v26  ;;  %v83_v26 = vld [vmem:[%s3957_s0 + $0x228] sm:$0xff] }
  0xf0   :  { %v556_v12 = vunpack.c.l.b16 %v83_v26  ;;  %v557_v13 = vunpack.c.h.b16 %v83_v26  ;;  %v2112_v52 = vor.u32 %v2824_v41, %v2109_v42  ;;  %v2840_v26 = vld [vmem:[%s3957_s0 + $0xbc] sm:$0xf] }
  0xf1   :  { %v1665_v63 = vadd.f32 %v1664_v58, %v1632_v62  ;;  %1777 = vmatmul.bf16.gmra.mxu0 %v2276_v53 }
  0xf2   :  { %1810 = vmatmul.bf16.gmra.mxu1 %v2280_v56  ;;  %v636_v22 = vpack.c.b16 %v556_v12, %v556_v12 }
  0xf3   :  { %1843 = vmatmul.bf16.gmra.mxu2 %v2284_v59 }
  0xf4   :  { %1876 = vmatmul.bf16.gmra.mxu3 %v2288_v60 }
  0xf6   :  { %v1697_v0 = vpop.f32.mrf.mxu2  ;;  %v1633_v4 = vpop.f32.mrf.mxu0 }
  0xf7   :  { %v1730_v2 = vpop.f32.mrf.mxu3  ;;  %v1698_v3 = vadd.f32 %v1697_v0, %v1665_v63  ;;  %v1666_v5 = vpop.f32.mrf.mxu1  ;;  %v1634_v7 = vadd.f32 %v1633_v4, %v3570_v44  ;;  %v637_v44 = vpack.c.b16 %v557_v13, %v557_v13  ;;  %v2847_v4 = vld [vmem:[%s3957_s0 + $0xec] sm:$0xf0] }
  0xf9   :  { %v3777_v8 = vadd.f32 %v1730_v2, %v1698_v3  ;;  %v1667_v9 = vadd.f32 %v1666_v5, %v1634_v7  ;;  %v2839_v5 = vld [vmem:[%s3957_s0 + $0xb4] sm:$0xf]  ;;  %v2848_v7 = vld [vmem:[%s3957_s0 + $0xf4] sm:$0xf0] }
  0xfa   :  { %v2168_v13 = vor.u32 %v2839_v5, %v2165_v6  ;;  %v2301_v5 = vld [vmem:[%s3957_s0 + $0x1f8] sm:$0xf0] }
  0xfe   :  { %v1699_v14 = vpop.f32.mrf.mxu2  ;;  %v1636_v20 = vpop.f32.mrf.mxu0 }
  0xff   :  { %v1732_v15 = vpop.f32.mrf.mxu3  ;;  %v1700_v19 = vadd.f32 %v1699_v14, %v1667_v9  ;;  %v1669_v21 = vpop.f32.mrf.mxu1  ;;  %v1637_v23 = vadd.f32 %v1636_v20, %v3582_v55  ;;  %v2099_v55 = vld [vmem:[%s3957_s0 + $0x30] sm:$0xf]  ;;  %v2173_v9 = vld [vmem:[%s3957_s0 + $0xf8] sm:$0xf0] }
 0x100   :  { %v2100_v46 = vor.u32 %v2831_v36, %v2099_v55  ;;  %v2229_v55 = vld [vmem:[%s3957_s0 + $0x170] sm:$0xf0]  ;;  %v2864_v36 = vld [vmem:[%s3957_s0 + $0x174] sm:$0xf0] }
 0x101   :  { %v3780_v24 = vadd.f32 %v1732_v15, %v1700_v19  ;;  %v1670_v27 = vadd.f32 %v1669_v21, %v1637_v23  ;;  %1782 = vmatmul.bf16.gmra.mxu0 %v634_v17  ;;  %v2176_v19 = vor.u32 %v2840_v26, %v2173_v9 }
 0x102   :  { %1815 = vmatmul.bf16.gmra.mxu1 %v635_v18 }
 0x103   :  { %1848 = vmatmul.bf16.gmra.mxu2 %v636_v22 }
 0x104   :  { %1881 = vmatmul.bf16.gmra.mxu3 %v637_v44 }
 0x106   :  { %v1702_v28 = vpop.f32.mrf.mxu2  ;;  %v1638_v61 = vpop.f32.mrf.mxu0 }
 0x107   :  { %v1735_v30 = vpop.f32.mrf.mxu3  ;;  %v1703_v31 = vadd.f32 %v1702_v28, %v1670_v27  ;;  %v1671_v32 = vpop.f32.mrf.mxu1  ;;  %v1639_v33 = vadd.f32 %v1638_v61, %v3621_v16  ;;  %v2107_v16 = vld [vmem:[%s3957_s0 + $0x38] sm:$0xf] }
 0x108   :  { %v2108_v51 = vor.u32 %v2832_v40, %v2107_v16 }
 0x109   :  { %v3783_v34 = vadd.f32 %v1735_v30, %v1703_v31  ;;  %v1672_v35 = vadd.f32 %v1671_v32, %v1639_v33  ;;  %v2863_v33 = vld [vmem:[%s3957_s0 + $0x16c] sm:$0xf0] }
 0x10e   :  { %v1704_v43 = vpop.f32.mrf.mxu2  ;;  %v1641_v49 = vpop.f32.mrf.mxu0 }
 0x10f   :  { %v1737_v45 = vpop.f32.mrf.mxu3  ;;  %v1705_v48 = vadd.f32 %v1704_v43, %v1672_v35  ;;  %v1674_v50 = vpop.f32.mrf.mxu1  ;;  %v1642_v53 = vadd.f32 %v1641_v49, %v3636_v29  ;;  %v2163_v29 = vld [vmem:[%s3957_s0 + $0xb0] sm:$0xf]  ;;  %v2855_v35 = vld [vmem:[%s3957_s0 + $0x134] sm:$0xf] }
 0x110   :  { %v2164_v12 = vor.u32 %v2847_v4, %v2163_v29  ;;  %v2232_v42 = vor.u32 %v2855_v35, %v2229_v55  ;;  %v2880_v29 = vld [vmem:[%s3957_s0 + $0x1f4] sm:$0xf0]  ;;  %v2872_v4 = vld [vmem:[%s3957_s0 + $0x1bc] sm:$0xf] }
 0x111   :  { %v3810_v56 = vadd.f32 %v1737_v45, %v1705_v48  ;;  %v1675_v57 = vadd.f32 %v1674_v50, %v1642_v53  ;;  %1894 = vmatmul.bf16.vlgmr.msrb.gmra.mxu0 %v2100_v46  ;;  %v2240_v48 = vor.u32 %v2856_v38, %v2237_v39 }
 0x112   :  { %1927 = vmatmul.bf16.vlgmr.msrb.gmra.mxu1 %v2104_v47 }
 0x113   :  { %1960 = vmatmul.bf16.vlgmr.msrb.gmra.mxu2 %v2108_v51 }
 0x114   :  { %1993 = vmatmul.bf16.vlgmr.msrb.gmra.mxu3 %v2112_v52 }
 0x116   :  { %v1707_v58 = vpop.f32.mrf.mxu2  ;;  %v1643_v62 = vpop.f32.mrf.mxu0 }
 0x117   :  { %v1740_v59 = vpop.f32.mrf.mxu3  ;;  %v1708_v60 = vadd.f32 %v1707_v58, %v1675_v57  ;;  %v1676_v63 = vpop.f32.mrf.mxu1  ;;  %v1644_v0 = vadd.f32 %v1643_v62, %v3675_v54  ;;  %v2171_v54 = vld [vmem:[%s3957_s0 + $0xb8] sm:$0xf]  ;;  %v2291_v62 = vld [vmem:[%s3957_s0 + $0x1b0] sm:$0xf] }
 0x118   :  { %v2172_v18 = vor.u32 %v2848_v7, %v2171_v54 }
 0x119   :  { %v3813_v2 = vadd.f32 %v1740_v59, %v1708_v60  ;;  %v1677_v3 = vadd.f32 %v1676_v63, %v1644_v0  ;;  %v2871_v63 = vld [vmem:[%s3957_s0 + $0x1b4] sm:$0xf] }
 0x11a   :  { %v2293_v0 = vld [vmem:[%s3957_s0 + $0x1f0] sm:$0xf0] }
 0x11b   :  { %v2296_v26 = vor.u32 %v2871_v63, %v2293_v0 }
 0x11e   :  { %v1709_v10 = vpop.f32.mrf.mxu2  ;;  %v1646_v15 = vpop.f32.mrf.mxu0 }
 0x11f   :  { %v1742_v11 = vpop.f32.mrf.mxu3  ;;  %v1710_v14 = vadd.f32 %v1709_v10, %v1677_v3  ;;  %v1679_v17 = vpop.f32.mrf.mxu1  ;;  %v1647_v20 = vadd.f32 %v1646_v15, %v3681_v1  ;;  %v2227_v1 = vld [vmem:[%s3957_s0 + $0x130] sm:$0xf]  ;;  %v2299_v3 = vld [vmem:[%s3957_s0 + $0x1b8] sm:$0xf] }
 0x120   :  { %v2228_v41 = vor.u32 %v2863_v33, %v2227_v1 }
 0x121   :  { %v3840_v21 = vadd.f32 %v1742_v11, %v1710_v14  ;;  %v1680_v22 = vadd.f32 %v1679_v17, %v1647_v20  ;;  %1899 = vmatmul.bf16.gmra.mxu0 %v2164_v12  ;;  %v2300_v11 = vor.u32 %v2880_v29, %v2299_v3  ;;  %v2304_v12 = vor.u32 %v2872_v4, %v2301_v5 }
 0x122   :  { %1932 = vmatmul.bf16.gmra.mxu1 %v2168_v13 }
 0x123   :  { %1965 = vmatmul.bf16.gmra.mxu2 %v2172_v18 }
 0x124   :  { %1998 = vmatmul.bf16.gmra.mxu3 %v2176_v19 }
 0x126   :  { %v1712_v44 = vpop.f32.mrf.mxu2  ;;  %v1648_v28 = vpop.f32.mrf.mxu0 }
 0x127   :  { %v1745_v23 = vpop.f32.mrf.mxu3  ;;  %v1713_v27 = vadd.f32 %v1712_v44, %v1680_v22  ;;  %v1681_v30 = vpop.f32.mrf.mxu1  ;;  %v1649_v31 = vadd.f32 %v1648_v28, %v3717_v25  ;;  %v2235_v25 = vld [vmem:[%s3957_s0 + $0x138] sm:$0xf]  ;;  %v84_v22 = vld [vmem:[%s3957_s0 + $0x230] sm:$0xff] }
 0x128   :  { %v2236_v47 = vor.u32 %v2864_v36, %v2235_v25  ;;  %v558_v28 = vunpack.c.l.b16 %v84_v22 }
 0x129   :  { %v3843_v61 = vadd.f32 %v1745_v23, %v1713_v27  ;;  %v1682_v32 = vadd.f32 %v1681_v30, %v1649_v31  ;;  %v559_v30 = vunpack.c.h.b16 %v84_v22 }
 0x12a   :  { %v638_v35 = vpack.c.b16 %v558_v28, %v558_v28 }
 0x12b   :  { %v639_v55 = vpack.c.b16 %v559_v30, %v559_v30 }
 0x12e   :  { %v1714_v16 = vpop.f32.mrf.mxu2  ;;  %v1651_v45 = vpop.f32.mrf.mxu0 }
 0x12f   :  { %v1747_v40 = vpop.f32.mrf.mxu3  ;;  %v1715_v43 = vadd.f32 %v1714_v16, %v1682_v32  ;;  %v1684_v46 = vpop.f32.mrf.mxu1  ;;  %v1652_v49 = vadd.f32 %v1651_v45, %v3731_v37  ;;  %v2879_v37 = vld [vmem:[%s3957_s0 + $0x1ec] sm:$0xf0] }
 0x130   :  { %v2292_v7 = vor.u32 %v2879_v37, %v2291_v62 }
 0x131   :  { %v3870_v50 = vadd.f32 %v1747_v40, %v1715_v43  ;;  %v1685_v51 = vadd.f32 %v1684_v46, %v1652_v49  ;;  %1904 = vmatmul.bf16.gmra.mxu0 %v2228_v41 }
 0x132   :  { %1937 = vmatmul.bf16.gmra.mxu1 %v2232_v42 }
 0x133   :  { %1970 = vmatmul.bf16.gmra.mxu2 %v2236_v47 }
 0x134   :  { %2003 = vmatmul.bf16.gmra.mxu3 %v2240_v48 }
 0x136   :  { %v1717_v52 = vpop.f32.mrf.mxu2  ;;  %v1653_v58 = vpop.f32.mrf.mxu0 }
 0x137   :  { %v1750_v53 = vpop.f32.mrf.mxu3  ;;  %v1718_v57 = vadd.f32 %v1717_v52, %v1685_v51  ;;  %v1686_v59 = vpop.f32.mrf.mxu1 }
 0x139   :  { %v3872_v60 = vadd.f32 %v1750_v53, %v1718_v57 }
 0x13e   :  { %v1719_v6 = vpop.f32.mrf.mxu2  ;;  %v1763_v9 = vpop.f32.mrf.mxu0 }
 0x13f   :  { %v1752_v54 = vpop.f32.mrf.mxu3  ;;  %v1796_v10 = vpop.f32.mrf.mxu1  ;;  %v1764_v13 = vadd.f32 %v1763_v9, %v3777_v8  ;;  %v85_v8 = vld [vmem:[%s3957_s0 + $0x238] sm:$0xff] }
 0x140   :  { %v560_v31 = vunpack.c.l.b16 %v85_v8  ;;  %v561_v32 = vunpack.c.h.b16 %v85_v8 }
 0x141   :  { %v1797_v14 = vadd.f32 %v1796_v10, %v1764_v13  ;;  %1909 = vmatmul.bf16.gmra.mxu0 %v2292_v7 }
 0x142   :  { %1942 = vmatmul.bf16.gmra.mxu1 %v2296_v26  ;;  %v640_v39 = vpack.c.b16 %v560_v31, %v560_v31 }
 0x143   :  { %1975 = vmatmul.bf16.gmra.mxu2 %v2300_v11 }
 0x144   :  { %2008 = vmatmul.bf16.gmra.mxu3 %v2304_v12 }
 0x146   :  { %v1829_v15 = vpop.f32.mrf.mxu2  ;;  %v1765_v19 = vpop.f32.mrf.mxu0 }
 0x147   :  { %v1862_v17 = vpop.f32.mrf.mxu3  ;;  %v1830_v18 = vadd.f32 %v1829_v15, %v1797_v14  ;;  %v1798_v20 = vpop.f32.mrf.mxu1  ;;  %v1766_v44 = vadd.f32 %v1765_v19, %v3780_v24  ;;  %v641_v24 = vpack.c.b16 %v561_v32, %v561_v32 }
 0x149   :  { %v3906_v23 = vadd.f32 %v1862_v17, %v1830_v18  ;;  %v1799_v27 = vadd.f32 %v1798_v20, %v1766_v44 }
 0x14e   :  { %v1831_v1 = vpop.f32.mrf.mxu2  ;;  %v1768_v36 = vpop.f32.mrf.mxu0 }
 0x14f   :  { %v1864_v33 = vpop.f32.mrf.mxu3  ;;  %v1832_v25 = vadd.f32 %v1831_v1, %v1799_v27  ;;  %v1801_v38 = vpop.f32.mrf.mxu1  ;;  %v1769_v16 = vadd.f32 %v1768_v36, %v3783_v34 }
 0x151   :  { %v3909_v40 = vadd.f32 %v1864_v33, %v1832_v25  ;;  %v1802_v41 = vadd.f32 %v1801_v38, %v1769_v16  ;;  %1914 = vmatmul.bf16.gmra.mxu0 %v638_v35 }
 0x152   :  { %1947 = vmatmul.bf16.gmra.mxu1 %v639_v55 }
 0x153   :  { %1980 = vmatmul.bf16.gmra.mxu2 %v640_v39 }
 0x154   :  { %2013 = vmatmul.bf16.gmra.mxu3 %v641_v24 }
 0x156   :  { %v1834_v42 = vpop.f32.mrf.mxu2  ;;  %v1770_v46 = vpop.f32.mrf.mxu0 }
 0x157   :  { %v1867_v43 = vpop.f32.mrf.mxu3  ;;  %v1835_v45 = vadd.f32 %v1834_v42, %v1802_v41  ;;  %v1803_v47 = vpop.f32.mrf.mxu1  ;;  %v1771_v48 = vadd.f32 %v1770_v46, %v3810_v56 }
 0x159   :  { %v3912_v49 = vadd.f32 %v1867_v43, %v1835_v45  ;;  %v1804_v51 = vadd.f32 %v1803_v47, %v1771_v48 }
 0x15e   :  { %v1836_v52 = vpop.f32.mrf.mxu2  ;;  %v1773_v57 = vpop.f32.mrf.mxu0 }
 0x15f   :  { %v1869_v53 = vpop.f32.mrf.mxu3  ;;  %v1837_v34 = vadd.f32 %v1836_v52, %v1804_v51  ;;  %v1806_v58 = vpop.f32.mrf.mxu1  ;;  %v1774_v59 = vadd.f32 %v1773_v57, %v3813_v2 }
 0x161   :  { %v3915_v62 = vadd.f32 %v1869_v53, %v1837_v34  ;;  %v1807_v37 = vadd.f32 %v1806_v58, %v1774_v59 }
 0x166   :  { %v1839_v63 = vpop.f32.mrf.mxu2  ;;  %v1775_v29 = vpop.f32.mrf.mxu0 }
 0x167   :  { %v1872_v0 = vpop.f32.mrf.mxu3  ;;  %v1840_v3 = vadd.f32 %v1839_v63, %v1807_v37  ;;  %v1808_v4 = vpop.f32.mrf.mxu1  ;;  %v1776_v56 = vadd.f32 %v1775_v29, %v3840_v21 }
 0x169   :  { %v3918_v5 = vadd.f32 %v1872_v0, %v1840_v3  ;;  %v1809_v6 = vadd.f32 %v1808_v4, %v1776_v56 }
 0x16e   :  { %v1841_v54 = vpop.f32.mrf.mxu2  ;;  %v1778_v9 = vpop.f32.mrf.mxu0 }
 0x16f   :  { %v1874_v7 = vpop.f32.mrf.mxu3  ;;  %v1842_v26 = vadd.f32 %v1841_v54, %v1809_v6  ;;  %v1811_v10 = vpop.f32.mrf.mxu1  ;;  %v1779_v2 = vadd.f32 %v1778_v9, %v3843_v61 }
 0x171   :  { %v3921_v11 = vadd.f32 %v1874_v7, %v1842_v26  ;;  %v1812_v12 = vadd.f32 %v1811_v10, %v1779_v2 }
 0x176   :  { %v1844_v13 = vpop.f32.mrf.mxu2  ;;  %v1780_v17 = vpop.f32.mrf.mxu0 }
 0x177   :  { %v1877_v14 = vpop.f32.mrf.mxu3  ;;  %v1845_v15 = vadd.f32 %v1844_v13, %v1812_v12  ;;  %v1813_v18 = vpop.f32.mrf.mxu1  ;;  %v1781_v21 = vadd.f32 %v1780_v17, %v3870_v50 }
 0x179   :  { %v3924_v19 = vadd.f32 %v1877_v14, %v1845_v15  ;;  %v1814_v20 = vadd.f32 %v1813_v18, %v1781_v21 }
 0x17e   :  { %v1846_v22 = vpop.f32.mrf.mxu2  ;;  %v1783_v27 = vpop.f32.mrf.mxu0 }
 0x17f   :  { %v1879_v44 = vpop.f32.mrf.mxu3  ;;  %v1847_v8 = vadd.f32 %v1846_v22, %v1814_v20  ;;  %v1816_v28 = vpop.f32.mrf.mxu1  ;;  %v1784_v61 = vadd.f32 %v1783_v27, %v3872_v60 }
 0x181   :  { %v3927_v30 = vadd.f32 %v1879_v44, %v1847_v8  ;;  %v1817_v31 = vadd.f32 %v1816_v28, %v1784_v61 }
 0x186   :  { %v1849_v32 = vpop.f32.mrf.mxu2  ;;  %v1785_v35 = vpop.f32.mrf.mxu0 }
 0x187   :  { %v1882_v1 = vpop.f32.mrf.mxu3  ;;  %v1850_v33 = vadd.f32 %v1849_v32, %v1817_v31  ;;  %v1818_v55 = vpop.f32.mrf.mxu1 }
 0x189   :  { %v3929_v25 = vadd.f32 %v1882_v1, %v1850_v33 }
 0x18e   :  { %v1851_v50 = vpop.f32.mrf.mxu2  ;;  %v1895_v38 = vpop.f32.mrf.mxu0 }
 0x18f   :  { %v1884_v36 = vpop.f32.mrf.mxu3  ;;  %v1928_v39 = vpop.f32.mrf.mxu1  ;;  %v1896_v24 = vadd.f32 %v1895_v38, %v3906_v23 }
 0x191   :  { %v1929_v43 = vadd.f32 %v1928_v39, %v1896_v24 }
 0x196   :  { %v1961_v16 = vpop.f32.mrf.mxu2  ;;  %v1897_v42 = vpop.f32.mrf.mxu0 }
 0x197   :  { %v1994_v41 = vpop.f32.mrf.mxu3  ;;  %v1930_v60 = vpop.f32.mrf.mxu1  ;;  %v1898_v45 = vadd.f32 %v1897_v42, %v3909_v40  ;;  %v1962_v46 = vadd.f32 %v1961_v16, %v1929_v43 }
 0x199   :  { %v1931_v47 = vadd.f32 %v1930_v60, %v1898_v45  ;;  %v1995_v52 = vadd.f32 %v1994_v41, %v1962_v46 }
 0x19b   :  { %v2018_v59 = vmax.f32 %v1995_v52, 0.0 }
 0x19e   :  { %v1963_v48 = vpop.f32.mrf.mxu2  ;;  %v1900_v34 = vpop.f32.mrf.mxu0 }
 0x19f   :  { %v1996_v51 = vpop.f32.mrf.mxu3  ;;  %v1964_v53 = vadd.f32 %v1963_v48, %v1931_v47  ;;  %v1933_v57 = vpop.f32.mrf.mxu1  ;;  %v1901_v23 = vadd.f32 %v1900_v34, %v3912_v49 }
 0x1a1   :  { %v1997_v58 = vadd.f32 %v1996_v51, %v1964_v53  ;;  %v1934_v4 = vadd.f32 %v1933_v57, %v1901_v23 }
 0x1a3   :  { %v2019_v37 = vmax.f32 %v1997_v58, 0.0 }
 0x1a5   :  { %v3012_v63 = vpack.c.bf16 %v2019_v37, %v2018_v59 }
 0x1a6   :  { %v1966_v0 = vpop.f32.mrf.mxu2  ;;  %v1902_v40 = vpop.f32.mrf.mxu0 }
 0x1a7   :  { %v1999_v3 = vpop.f32.mrf.mxu3  ;;  %3013 = vst [vmem:[%s3958_s3] sm:$0xff] %v3012_v63   ;;  %v1935_v29 = vpop.f32.mrf.mxu1  ;;  %v1903_v56 = vadd.f32 %v1902_v40, %v3915_v62  ;;  %v1967_v6 = vadd.f32 %v1966_v0, %v1934_v4 }
 0x1a9   :  { %v1936_v54 = vadd.f32 %v1935_v29, %v1903_v56  ;;  %v2000_v9 = vadd.f32 %v1999_v3, %v1967_v6 }
 0x1ab   :  { %v2020_v13 = vmax.f32 %v2000_v9, 0.0 }
 0x1ae   :  { %v1968_v7 = vpop.f32.mrf.mxu2  ;;  %v1905_v2 = vpop.f32.mrf.mxu0 }
 0x1af   :  { %v2001_v26 = vpop.f32.mrf.mxu3  ;;  %v1969_v10 = vadd.f32 %v1968_v7, %v1936_v54  ;;  %v1938_v12 = vpop.f32.mrf.mxu1  ;;  %v1906_v17 = vadd.f32 %v1905_v2, %v3918_v5 }
 0x1b1   :  { %v2002_v49 = vadd.f32 %v2001_v26, %v1969_v10  ;;  %v1939_v22 = vadd.f32 %v1938_v12, %v1906_v17 }
 0x1b3   :  { %v2021_v14 = vmax.f32 %v2002_v49, 0.0 }
 0x1b5   :  { %v3017_v15 = vpack.c.bf16 %v2021_v14, %v2020_v13 }
 0x1b6   :  { %v1971_v18 = vpop.f32.mrf.mxu2  ;;  %v1907_v62 = vpop.f32.mrf.mxu0 }
 0x1b7   :  { %v2004_v21 = vpop.f32.mrf.mxu3  ;;  %3029 = vst [vmem:[%s3958_s3 + $0x8] sm:$0xff] %v3017_v15   ;;  %v1940_v20 = vpop.f32.mrf.mxu1  ;;  %v1908_v44 = vadd.f32 %v1907_v62, %v3921_v11  ;;  %v1972_v8 = vadd.f32 %v1971_v18, %v1939_v22 }
 0x1b9   :  { %v1941_v27 = vadd.f32 %v1940_v20, %v1908_v44  ;;  %v2005_v31 = vadd.f32 %v2004_v21, %v1972_v8 }
 0x1bb   :  { %v2022_v35 = vmax.f32 %v2005_v31, 0.0 }
 0x1be   :  { %v1973_v28 = vpop.f32.mrf.mxu2  ;;  %v1910_v1 = vpop.f32.mrf.mxu0 }
 0x1bf   :  { %v2006_v61 = vpop.f32.mrf.mxu3  ;;  %v1974_v32 = vadd.f32 %v1973_v28, %v1941_v27  ;;  %v1943_v33 = vpop.f32.mrf.mxu1  ;;  %v1911_v36 = vadd.f32 %v1910_v1, %v3924_v19 }
 0x1c1   :  { %v2007_v5 = vadd.f32 %v2006_v61, %v1974_v32  ;;  %v1944_v16 = vadd.f32 %v1943_v33, %v1911_v36 }
 0x1c3   :  { %v2023_v55 = vmax.f32 %v2007_v5, 0.0 }
 0x1c5   :  { %v3022_v50 = vpack.c.bf16 %v2023_v55, %v2022_v35 }
 0x1c6   :  { %v1976_v38 = vpop.f32.mrf.mxu2  ;;  %v1912_v11 = vpop.f32.mrf.mxu0 }
 0x1c7   :  { %v2009_v39 = vpop.f32.mrf.mxu3  ;;  %3030 = vst [vmem:[%s3958_s3 + $0x10] sm:$0xff] %v3022_v50   ;;  %v1945_v24 = vpop.f32.mrf.mxu1  ;;  %v1913_v41 = vadd.f32 %v1912_v11, %v3927_v30  ;;  %v1977_v42 = vadd.f32 %v1976_v38, %v1944_v16 }
 0x1c9   :  { %v1946_v60 = vadd.f32 %v1945_v24, %v1913_v41  ;;  %v2010_v46 = vadd.f32 %v2009_v39, %v1977_v42 }
 0x1cb   :  { %v2024_v53 = vmax.f32 %v2010_v46, 0.0 }
 0x1ce   :  { %v1978_v43 = vpop.f32.mrf.mxu2  ;;  %v1915_v48 = vpop.f32.mrf.mxu0 }
 0x1cf   :  { %v2011_v45 = vpop.f32.mrf.mxu3  ;;  %v1979_v47 = vadd.f32 %v1978_v43, %v1946_v60  ;;  %v1948_v51 = vpop.f32.mrf.mxu1  ;;  %v1916_v52 = vadd.f32 %v1915_v48, %v3929_v25 }
 0x1d1   :  { %v2012_v19 = vadd.f32 %v2011_v45, %v1979_v47  ;;  %v1949_v58 = vadd.f32 %v1948_v51, %v1916_v52 }
 0x1d3   :  { %v2025_v34 = vmax.f32 %v2012_v19, 0.0 }
 0x1d5   :  { %v3027_v57 = vpack.c.bf16 %v2025_v34, %v2024_v53 }
 0x1d6   :  { %v1981_v59 = vpop.f32.mrf.mxu2  ;;  %v1917_v63 = vpop.f32.mrf.mxu0 }
 0x1d7   :  { %v2014_v37 = vpop.f32.mrf.mxu3  ;;  %3031 = vst [vmem:[%s3958_s3 + $0x18] sm:$0xff] %v3027_v57   ;;  %v1982_v30 = vadd.f32 %v1981_v59, %v1949_v58  ;;  %v1950_v23 = vpop.f32.mrf.mxu1 }
 0x1d9   :  { %v2015_v0 = vadd.f32 %v2014_v37, %v1982_v30 }
 0x1db   :  { %v2026_v3 = vmax.f32 %v2015_v0, 0.0 }
 0x1dd   :  { %v2035_v40 = vpack.c.bf16 %v2026_v3, %v2026_v3 }
 0x1de   :  { %v1983_v29 = vpop.f32.mrf.mxu2 }
 0x1df   :  { %v2016_v4 = vpop.f32.mrf.mxu3  ;;  %2044 = vst [vmem:[%s3958_s3 + $0x20] sm:$0xf] %v2035_v40 }

// kernel: dqn_forward.5
= control target key start
LH: loop header
LB: loop body
LE: loop exit
PB: predicated region body
PF: predicated region fallthrough
CT: control target
= control target key end

     0   :  { %s19014_s0 = inlined_call_operand.vmem [shape: bf16[16,2,1152], index: 0, kind: input, shape index: {}]   ;;  %s19015_s1 = inlined_call_operand.vmem [shape: bf16[1152,128], index: 1, kind: input, shape index: {}]   ;;  %s19016_s2 = inlined_call_operand.vmem [shape: f32[1,128], index: 2, kind: input, shape index: {}]   ;;  %s19017_s3 = inlined_call_operand.vmem [shape: bf16[16,128,512], index: 3, kind: input, shape index: {}]   ;;  %s19018_s4 = inlined_call_operand.vmem [shape: f32[1,512], index: 4, kind: input, shape index: {}]   ;;  %s19019_s5 = inlined_call_operand.vmem [shape: bf16[512,128], index: 5, kind: input, shape index: {}]   ;;  %s19020_s6 = inlined_call_operand.vmem [shape: f32[1,128], index: 6, kind: input, shape index: {}]   ;;  %s19021_s7 = inlined_call_operand.hbm [shape: f32[2,128], index: 7, kind: output, shape index: {}]  }
   0x1   :  { %v11410_v0 = vld [vmem:[%s19015_s1 + $0x38] sm:$0xff]  ;;  %v11432_v4 = vld [vmem:[%s19015_s1 + $0x30] sm:$0xff]  ;;  %v11456_v8 = vld [vmem:[%s19015_s1 + $0x28] sm:$0xff] }
   0x2   :  { %v11415_v1 = vld [vmem:[%s19015_s1 + $0x78] sm:$0xff]  ;;  %631 = vmatpush.bf16.msra.mxu0 %v11410_v0  ;;  %v11437_v5 = vld [vmem:[%s19015_s1 + $0x70] sm:$0xff]  ;;  %v11461_v9 = vld [vmem:[%s19015_s1 + $0x68] sm:$0xff] }
   0x3   :  { %v11420_v2 = vld [vmem:[%s19015_s1 + $0xb8] sm:$0xff]  ;;  %644 = vmatpush.bf16.msra.mxu1 %v11415_v1  ;;  %v11444_v6 = vld [vmem:[%s19015_s1 + $0xb0] sm:$0xff]  ;;  %v11468_v10 = vld [vmem:[%s19015_s1 + $0xa8] sm:$0xff] }
   0x4   :  { %v11425_v3 = vld [vmem:[%s19015_s1 + $0xf8] sm:$0xff]  ;;  %657 = vmatpush.bf16.msra.mxu2 %v11420_v2  ;;  %v11449_v7 = vld [vmem:[%s19015_s1 + $0xf0] sm:$0xff]  ;;  %v11473_v11 = vld [vmem:[%s19015_s1 + $0xe8] sm:$0xff] }
   0x5   :  { %670 = vmatpush.bf16.msra.mxu3 %v11425_v3  ;;  %v11480_v12 = vld [vmem:[%s19015_s1 + $0x20] sm:$0xff]  ;;  %v11504_v16 = vld [vmem:[%s19015_s1 + $0x18] sm:$0xff]  ;;  %v11529_v21 = vld [vmem:[%s19015_s1 + $0x10] sm:$0xff] }
   0x6   :  { %632 = vmatpush.bf16.msra.mxu0 %v11432_v4  ;;  %v11485_v13 = vld [vmem:[%s19015_s1 + $0x60] sm:$0xff]  ;;  %v11509_v17 = vld [vmem:[%s19015_s1 + $0x58] sm:$0xff]  ;;  %v11536_v22 = vld [vmem:[%s19015_s1 + $0x50] sm:$0xff] }
   0x7   :  { %645 = vmatpush.bf16.msra.mxu1 %v11437_v5  ;;  %v11492_v14 = vld [vmem:[%s19015_s1 + $0xa0] sm:$0xff]  ;;  %v11516_v18 = vld [vmem:[%s19015_s1 + $0x98] sm:$0xff]  ;;  %v11543_v23 = vld [vmem:[%s19015_s1 + $0x90] sm:$0xff] }
   0x8   :  { %658 = vmatpush.bf16.msra.mxu2 %v11444_v6  ;;  %v11497_v15 = vld [vmem:[%s19015_s1 + $0xe0] sm:$0xff]  ;;  %v11521_v19 = vld [vmem:[%s19015_s1 + $0xd8] sm:$0xff]  ;;  %v11548_v24 = vld [vmem:[%s19015_s1 + $0xd0] sm:$0xff] }
   0x9   :  { %671 = vmatpush.bf16.msra.mxu3 %v11449_v7  ;;  %v27_v20 = vld [vmem:[%s19014_s0] sm:$0xff] }
   0xa   :  { %633 = vmatpush.bf16.msra.mxu0 %v11456_v8  ;;  %178 = vst [vmem:[#allocation1] ss:$9 sm:$0xff] %v27_v20 }
   0xb   :  { %646 = vmatpush.bf16.msra.mxu1 %v11461_v9 }
   0xc   :  { %659 = vmatpush.bf16.msra.mxu2 %v11468_v10 }
   0xd   :  { %672 = vmatpush.bf16.msra.mxu3 %v11473_v11 }
   0xe   :  { %634 = vmatpush.bf16.msra.mxu0 %v11480_v12 }
   0xf   :  { %647 = vmatpush.bf16.msra.mxu1 %v11485_v13 }
  0x10   :  { %660 = vmatpush.bf16.msra.mxu2 %v11492_v14 }
  0x11   :  { %673 = vmatpush.bf16.msra.mxu3 %v11497_v15 }
  0x12   :  { %635 = vmatpush.bf16.msra.mxu0 %v11504_v16 }
  0x13   :  { %648 = vmatpush.bf16.msra.mxu1 %v11509_v17 }
  0x14   :  { %661 = vmatpush.bf16.msra.mxu2 %v11516_v18 }
  0x15   :  { %674 = vmatpush.bf16.msra.mxu3 %v11521_v19 }
  0x16   :  { %12 = vsyncpa [#allocation3], 0  ;;  %636 = vmatpush.bf16.msra.mxu0 %v11529_v21  ;;  %v11555_v25 = vld [vmem:[%s19015_s1 + $0x8] sm:$0xff]  ;;  %v11579_v29 = vld [vmem:[%s19015_s1] sm:$0xff]  ;;  %s11366_s8 = smov [#allocation2]   ;;  %s7227_s11 = sshll.u32 %s19021_s7, 4  ;;  %s7228_s11 = int_to_ptr.hbm [resolvable:$true] %s7227_s11 }
  0x17   :  { %649 = vmatpush.bf16.msra.mxu1 %v11536_v22  ;;  %v11560_v26 = vld [vmem:[%s19015_s1 + $0x48] sm:$0xff]  ;;  %v11584_v30 = vld [vmem:[%s19015_s1 + $0x40] sm:$0xff]  ;;  %v11591_v31 = vld [vmem:[%s19015_s1 + $0x138] sm:$0xff]  ;;  %s7225_s9 = sshll.u32 %s11366_s8, 4  ;;  %s7226_s9 = int_to_ptr.vmem [resolvable:$true] %s7225_s9 }
  0x18   :  { %662 = vmatpush.bf16.msra.mxu2 %v11543_v23  ;;  %v11567_v27 = vld [vmem:[%s19015_s1 + $0x88] sm:$0xff]  ;;  %v11596_v32 = vld [vmem:[%s19015_s1 + $0x178] sm:$0xff]  ;;  %v11601_v33 = vld [vmem:[%s19015_s1 + $0x80] sm:$0xff] }
  0x19   :  { %675 = vmatpush.bf16.msra.mxu3 %v11548_v24  ;;  %v11572_v28 = vld [vmem:[%s19015_s1 + $0xc8] sm:$0xff]  ;;  %v11606_v34 = vld [vmem:[%s19015_s1 + $0xc0] sm:$0xff]  ;;  %v11611_v35 = vld [vmem:[%s19015_s1 + $0x1b8] sm:$0xff] }
  0x1a   :  { %637 = vmatpush.bf16.msra.mxu0 %v11555_v25  ;;  %v11616_v36 = vld [vmem:[%s19015_s1 + $0x1f8] sm:$0xff]  ;;  %v11623_v37 = vld [vmem:[%s19015_s1 + $0x130] sm:$0xff]  ;;  %v179_v39 = vld [vmem:[#allocation1] sm:$0xff] }
  0x1b   :  { %650 = vmatpush.bf16.msra.mxu1 %v11560_v26  ;;  %v11630_v38 = vld [vmem:[%s19015_s1 + $0x170] sm:$0xff]  ;;  %v182_v44 = vld [vmem:[#allocation1 + $0x1b] sm:$0xff]  ;;  %v11651_v45 = vld [vmem:[%s19015_s1 + $0x128] sm:$0xff] }
  0x1c   :  { %663 = vmatpush.bf16.msra.mxu2 %v11567_v27  ;;  %v180_v40 = vld [vmem:[#allocation1 + $0x9] sm:$0xff]  ;;  %v181_v43 = vld [vmem:[#allocation1 + $0x12] sm:$0xff]  ;;  %v11675_v49 = vld [vmem:[%s19015_s1 + $0x120] sm:$0xff] }
  0x1d   :  { %676 = vmatpush.bf16.msra.mxu3 %v11572_v28  ;;  %v11637_v41 = vld [vmem:[%s19015_s1 + $0x1b0] sm:$0xff]  ;;  %v11656_v46 = vld [vmem:[%s19015_s1 + $0x168] sm:$0xff]  ;;  %v11680_v50 = vld [vmem:[%s19015_s1 + $0x160] sm:$0xff] }
  0x1e   :  { %638 = vmatpush.bf16.msra.mxu0 %v11579_v29  ;;  %v11644_v42 = vld [vmem:[%s19015_s1 + $0x1f0] sm:$0xff]  ;;  %v11663_v47 = vld [vmem:[%s19015_s1 + $0x1a8] sm:$0xff]  ;;  %v11687_v51 = vld [vmem:[%s19015_s1 + $0x1a0] sm:$0xff] }
  0x1f   :  { %651 = vmatpush.bf16.msra.mxu1 %v11584_v30  ;;  %19180 = vst [vmem:[#allocation5_spill] sm:$0xff] %v11644_v42  ;;  %v11668_v48 = vld [vmem:[%s19015_s1 + $0x1e8] sm:$0xff]  ;;  %v11692_v52 = vld [vmem:[%s19015_s1 + $0x1e0] sm:$0xff]  ;;  %v11699_v53 = vld [vmem:[%s19015_s1 + $0x118] sm:$0xff] }
  0x20   :  { %664 = vmatpush.bf16.msra.mxu2 %v11601_v33  ;;  %19181 = vst [vmem:[#allocation6_spill] sm:$0xff] %v11668_v48  ;;  %v11704_v54 = vld [vmem:[%s19015_s1 + $0x158] sm:$0xff]  ;;  %v11723_v57 = vld [vmem:[%s19015_s1 + $0x110] sm:$0xff]  ;;  %v183_v62 = vld [vmem:[#allocation1 + $0x24] sm:$0xff] }
  0x21   :  { %677 = vmatpush.bf16.msra.mxu3 %v11606_v34  ;;  %639 = vmatmul.bf16.vlgmr.msra.gmra.mxu0 %v179_v39  ;;  %19182 = vst [vmem:[#allocation7_spill] sm:$0xff] %v11692_v52  ;;  %v11711_v55 = vld [vmem:[%s19015_s1 + $0x198] sm:$0xff]  ;;  %v11728_v58 = vld [vmem:[%s19015_s1 + $0x150] sm:$0xff]  ;;  %v28_v39 = vld [vmem:[%s19014_s0 + $0x8] sm:$0x1] }
  0x22   :  { %683 = vmatpush.bf16.msrb.mxu0 %v11591_v31  ;;  %652 = vmatmul.bf16.vlgmr.msra.gmra.mxu1 %v180_v40  ;;  %v11716_v56 = vld [vmem:[%s19015_s1 + $0x1d8] sm:$0xff]  ;;  %v11733_v59 = vld [vmem:[%s19015_s1 + $0x190] sm:$0xff]  ;;  %v11750_v40 = vld [vmem:[%s19015_s1 + $0x108] sm:$0xff] }
  0x23   :  { %696 = vmatpush.bf16.msrb.mxu1 %v11596_v32  ;;  %665 = vmatmul.bf16.vlgmr.msra.gmra.mxu2 %v181_v43  ;;  %19183 = vst [vmem:[#allocation8_spill] sm:$0xff] %v11716_v56  ;;  %v11740_v60 = vld [vmem:[%s19015_s1 + $0x1d0] sm:$0xff]  ;;  %v186_v63 = vld [vmem:[#allocation1 + $0x3f] sm:$0xff]  ;;  %v11755_v43 = vld [vmem:[%s19015_s1 + $0x148] sm:$0xff] }
  0x24   :  { %709 = vmatpush.bf16.msrb.mxu2 %v11611_v35  ;;  %678 = vmatmul.bf16.vlgmr.msra.gmra.mxu3 %v182_v44  ;;  %19184 = vst [vmem:[#allocation9_spill] sm:$0xff] %v11740_v60  ;;  %v185_v61 = vld [vmem:[#allocation1 + $0x36] sm:$0xff]  ;;  %v184_v20 = vld [vmem:[#allocation1 + $0x2d] sm:$0xff] }
  0x25   :  { %722 = vmatpush.bf16.msrb.mxu3 %v11616_v36  ;;  %188 = vst [vmem:[#allocation1] ss:$9 sm:$0xff] %v28_v39  ;;  %v11762_v44 = vld [vmem:[%s19015_s1 + $0x188] sm:$0xff]  ;;  %v11774_v39 = vld [vmem:[%s19015_s1 + $0x100] sm:$0xff] }
  0x26   :  { %684 = vmatpush.bf16.msrb.mxu0 %v11623_v37 }
  0x27   :  { %697 = vmatpush.bf16.msrb.mxu1 %v11630_v38 }
  0x28   :  { %710 = vmatpush.bf16.msrb.mxu2 %v11637_v41 }
  0x29   :  { %723 = vmatpush.bf16.msrb.mxu3 %v11644_v42  ;;  %v11796_v42 = vld [vmem:[%s19015_s1 + $0x1c0] sm:$0xff] }
  0x2a   :  { %685 = vmatpush.bf16.msrb.mxu0 %v11651_v45 }
  0x2b   :  { %698 = vmatpush.bf16.msrb.mxu1 %v11656_v46 }
  0x2c   :  { %711 = vmatpush.bf16.msrb.mxu2 %v11663_v47 }
  0x2d   :  { %724 = vmatpush.bf16.msrb.mxu3 %v11668_v48  ;;  %v11791_v48 = vld [vmem:[%s19015_s1 + $0x180] sm:$0xff] }
  0x2e   :  { %686 = vmatpush.bf16.msrb.mxu0 %v11675_v49 }
  0x2f   :  { %699 = vmatpush.bf16.msrb.mxu1 %v11680_v50 }
  0x30   :  { %712 = vmatpush.bf16.msrb.mxu2 %v11687_v51 }
  0x31   :  { %725 = vmatpush.bf16.msrb.mxu3 %v11692_v52  ;;  %v11784_v52 = vld [vmem:[%s19015_s1 + $0x238] sm:$0xff] }
  0x32   :  { %687 = vmatpush.bf16.msrb.mxu0 %v11699_v53 }
  0x33   :  { %700 = vmatpush.bf16.msrb.mxu1 %v11704_v54 }
  0x34   :  { %713 = vmatpush.bf16.msrb.mxu2 %v11711_v55 }
  0x35   :  { %726 = vmatpush.bf16.msrb.mxu3 %v11716_v56  ;;  %v11767_v56 = vld [vmem:[%s19015_s1 + $0x1c8] sm:$0xff] }
  0x36   :  { %688 = vmatpush.bf16.msrb.mxu0 %v11723_v57  ;;  %19185 = vst [vmem:[#allocation10_spill] sm:$0xff] %v11767_v56 }
  0x37   :  { %701 = vmatpush.bf16.msrb.mxu1 %v11728_v58 }
  0x38   :  { %714 = vmatpush.bf16.msrb.mxu2 %v11733_v59 }
  0x39   :  { %727 = vmatpush.bf16.msrb.mxu3 %v11740_v60  ;;  %v11779_v60 = vld [vmem:[%s19015_s1 + $0x140] sm:$0xff] }
  0x3a   :  { %689 = vmatpush.bf16.msrb.mxu0 %v11750_v40 }
  0x3b   :  { %702 = vmatpush.bf16.msrb.mxu1 %v11755_v43 }
  0x3c   :  { %715 = vmatpush.bf16.msrb.mxu2 %v11762_v44 }
  0x3d   :  { %728 = vmatpush.bf16.msrb.mxu3 %v11767_v56  ;;  %v11805_v56 = vld [vmem:[%s19015_s1 + $0x230] sm:$0xff] }
  0x3e   :  { %690 = vmatpush.bf16.msrb.mxu0 %v11774_v39 }
  0x3f   :  { %703 = vmatpush.bf16.msrb.mxu1 %v11779_v60 }
  0x40   :  { %716 = vmatpush.bf16.msrb.mxu2 %v11791_v48 }
  0x41   :  { %729 = vmatpush.bf16.msrb.mxu3 %v11796_v42  ;;  %691 = vmatmul.bf16.vlgmr.msrb.gmra.mxu0 %v183_v62  ;;  %v10343_v62 = vld [vmem:[%s19017_s3 + $0x1ec] sm:$0xf] }
  0x42   :  { %735 = vmatpush.bf16.msra.mxu0 %v11784_v52  ;;  %704 = vmatmul.bf16.vlgmr.msrb.gmra.mxu1 %v184_v20  ;;  %v7682_v20 = vld [vmem:[%s19017_s3 + $0x1f8] sm:$0xf0] }
  0x43   :  { %807 = vmatpush.bf16.msra.mxu1 %v11410_v0  ;;  %v11816_v0 = vld [vmem:[%s19015_s1 + $0x228] sm:$0xff]  ;;  %717 = vmatmul.bf16.vlgmr.msrb.gmra.mxu2 %v185_v61  ;;  %v10345_v61 = vld [vmem:[%s19017_s3 + $0x1f4] sm:$0xf0] }
  0x44   :  { %820 = vmatpush.bf16.msra.mxu2 %v11415_v1  ;;  %730 = vmatmul.bf16.vlgmr.msrb.gmra.mxu3 %v186_v63  ;;  %v189_v1 = vld [vmem:[#allocation1] sm:$0xff] }
  0x45   :  { %833 = vmatpush.bf16.msra.mxu3 %v11420_v2  ;;  %v7524_v2 = vld [vmem:[%s19014_s0 + $0x9] sm:$0xff] }
  0x46   :  { %736 = vmatpush.bf16.msra.mxu0 %v11805_v56  ;;  %786 = vst [vmem:[#allocation1] ss:$9 sm:$0xff] %v7524_v2  ;;  %v7642_v2 = vld [vmem:[%s19017_s3 + $0x1b0] sm:$0xf0] }
  0x47   :  { %808 = vmatpush.bf16.msra.mxu1 %v11432_v4  ;;  %v11828_v4 = vld [vmem:[%s19015_s1 + $0x220] sm:$0xff] }
  0x48   :  { %821 = vmatpush.bf16.msra.mxu2 %v11437_v5  ;;  %v11837_v5 = vld [vmem:[%s19015_s1 + $0x218] sm:$0xff] }
  0x49   :  { %834 = vmatpush.bf16.msra.mxu3 %v11444_v6  ;;  %v11846_v6 = vld [vmem:[%s19015_s1 + $0x210] sm:$0xff] }
  0x4a   :  { %737 = vmatpush.bf16.msra.mxu0 %v11816_v0 }
  0x4b   :  { %809 = vmatpush.bf16.msra.mxu1 %v11456_v8  ;;  %v11855_v8 = vld [vmem:[%s19015_s1 + $0x208] sm:$0xff] }
  0x4c   :  { %822 = vmatpush.bf16.msra.mxu2 %v11461_v9  ;;  %v11864_v9 = vld [vmem:[%s19015_s1 + $0x200] sm:$0xff] }
  0x4d   :  { %835 = vmatpush.bf16.msra.mxu3 %v11468_v10  ;;  %v787_v10 = vld [vmem:[#allocation1] sm:$0xff] }
  0x4e   :  { %738 = vmatpush.bf16.msra.mxu0 %v11828_v4 }
  0x4f   :  { %810 = vmatpush.bf16.msra.mxu1 %v11480_v12  ;;  %v788_v12 = vld [vmem:[#allocation1 + $0x9] sm:$0xff] }
  0x50   :  { %823 = vmatpush.bf16.msra.mxu2 %v11485_v13  ;;  %v789_v13 = vld [vmem:[#allocation1 + $0x12] sm:$0xff] }
  0x51   :  { %836 = vmatpush.bf16.msra.mxu3 %v11492_v14  ;;  %v791_v14 = vld [vmem:[#allocation1 + $0x24] sm:$0xff] }
  0x52   :  { %739 = vmatpush.bf16.msra.mxu0 %v11837_v5 }
  0x53   :  { %811 = vmatpush.bf16.msra.mxu1 %v11504_v16  ;;  %v794_v16 = vld [vmem:[#allocation1 + $0x3f] sm:$0xff] }
  0x54   :  { %824 = vmatpush.bf16.msra.mxu2 %v11509_v17  ;;  %v19186_v17 = vld [vmem:[#allocation5_spill] sm:$0xff] }
  0x55   :  { %837 = vmatpush.bf16.msra.mxu3 %v11516_v18  ;;  %v19187_v18 = vld [vmem:[#allocation6_spill] sm:$0xff] }
  0x56   :  { %740 = vmatpush.bf16.msra.mxu0 %v11846_v6 }
  0x57   :  { %812 = vmatpush.bf16.msra.mxu1 %v11529_v21  ;;  %v19189_v21 = vld [vmem:[#allocation8_spill] sm:$0xff] }
  0x58   :  { %825 = vmatpush.bf16.msra.mxu2 %v11536_v22  ;;  %v19190_v22 = vld [vmem:[#allocation9_spill] sm:$0xff] }
  0x59   :  { %838 = vmatpush.bf16.msra.mxu3 %v11543_v23  ;;  %v19191_v23 = vld [vmem:[#allocation10_spill] sm:$0xff] }
  0x5a   :  { %741 = vmatpush.bf16.msra.mxu0 %v11855_v8 }
  0x5b   :  { %813 = vmatpush.bf16.msra.mxu1 %v11555_v25  ;;  %v11926_v25 = vld [vmem:[%s19016_s2] ss:$0 sm:$0xff] }
  0x5c   :  { %826 = vmatpush.bf16.msra.mxu2 %v11560_v26 }
  0x5d   :  { %839 = vmatpush.bf16.msra.mxu3 %v11567_v27 }
  0x5e   :  { %742 = vmatpush.bf16.msra.mxu0 %v11864_v9 }
  0x5f   :  { %814 = vmatpush.bf16.msra.mxu1 %v11579_v29 }
  0x60   :  { %827 = vmatpush.bf16.msra.mxu2 %v11584_v30 }
  0x61   :  { %840 = vmatpush.bf16.msra.mxu3 %v11601_v33  ;;  %743 = vmatmul.bf16.vlgmr.msra.gmra.mxu0 %v189_v1  ;;  %v10334_v1 = vld [vmem:[%s19017_s3 + $0x1a4] sm:$0xf] }
  0x62   :  { %846 = vmatpush.bf16.msrb.mxu0 %v11425_v3  ;;  %815 = vmatmul.bf16.vlgmr.msra.gmra.mxu1 %v787_v10  ;;  %v792_v3 = vld [vmem:[#allocation1 + $0x2d] sm:$0xff] }
  0x63   :  { %859 = vmatpush.bf16.msrb.mxu1 %v11591_v31  ;;  %828 = vmatmul.bf16.vlgmr.msra.gmra.mxu2 %v788_v12 }
  0x64   :  { %872 = vmatpush.bf16.msrb.mxu2 %v11596_v32  ;;  %841 = vmatmul.bf16.vlgmr.msra.gmra.mxu3 %v789_v13 }
  0x65   :  { %885 = vmatpush.bf16.msrb.mxu3 %v11611_v35 }
  0x66   :  { %847 = vmatpush.bf16.msrb.mxu0 %v11449_v7  ;;  %v790_v7 = vld [vmem:[#allocation1 + $0x1b] sm:$0xff] }
  0x67   :  { %860 = vmatpush.bf16.msrb.mxu1 %v11623_v37 }
  0x68   :  { %873 = vmatpush.bf16.msrb.mxu2 %v11630_v38 }
  0x69   :  { %886 = vmatpush.bf16.msrb.mxu3 %v11637_v41 }
  0x6a   :  { %848 = vmatpush.bf16.msrb.mxu0 %v11473_v11  ;;  %v793_v11 = vld [vmem:[#allocation1 + $0x36] sm:$0xff] }
  0x6b   :  { %861 = vmatpush.bf16.msrb.mxu1 %v11651_v45  ;;  %v7672_v45 = vld [vmem:[%s19017_s3 + $0x1e0] sm:$0xf] }
  0x6c   :  { %874 = vmatpush.bf16.msrb.mxu2 %v11656_v46  ;;  %v10344_v46 = vld [vmem:[%s19017_s3 + $0x1ec] sm:$0xf0] }
  0x6d   :  { %887 = vmatpush.bf16.msrb.mxu3 %v11663_v47  ;;  %v7656_v47 = vld [vmem:[%s19017_s3 + $0x1c0] sm:$0xf] }
  0x6e   :  { %849 = vmatpush.bf16.msrb.mxu0 %v11497_v15  ;;  %v7525_v15 = vld [vmem:[%s19014_s0 + $0x11] sm:$0x1] }
  0x6f   :  { %862 = vmatpush.bf16.msrb.mxu1 %v11675_v49  ;;  %796 = vst [vmem:[#allocation1] ss:$9 sm:$0xff] %v7525_v15  ;;  %v10340_v49 = vld [vmem:[%s19017_s3 + $0x1cc] sm:$0xf0]  ;;  %v10339_v15 = vld [vmem:[%s19017_s3 + $0x1cc] sm:$0xf] }
  0x70   :  { %875 = vmatpush.bf16.msrb.mxu2 %v11680_v50  ;;  %v10342_v50 = vld [vmem:[%s19017_s3 + $0x1e4] sm:$0xf] }
  0x71   :  { %888 = vmatpush.bf16.msrb.mxu3 %v11687_v51  ;;  %v7674_v51 = vld [vmem:[%s19017_s3 + $0x1f0] sm:$0xf0] }
  0x72   :  { %850 = vmatpush.bf16.msrb.mxu0 %v11521_v19  ;;  %v19188_v19 = vld [vmem:[#allocation7_spill] sm:$0xff] }
  0x73   :  { %863 = vmatpush.bf16.msrb.mxu1 %v11699_v53  ;;  %v7677_v53 = vor.u32 %v10342_v50, %v7674_v51  ;;  %v7632_v50 = vld [vmem:[%s19017_s3 + $0x188] sm:$0xf]  ;;  %v10333_v51 = vld [vmem:[%s19017_s3 + $0x194] sm:$0xf0] }
  0x74   :  { %876 = vmatpush.bf16.msrb.mxu2 %v11704_v54  ;;  %v10338_v54 = vld [vmem:[%s19017_s3 + $0x1c4] sm:$0xf] }
  0x75   :  { %889 = vmatpush.bf16.msrb.mxu3 %v11711_v55  ;;  %v7657_v55 = vor.u32 %v10340_v49, %v7656_v47  ;;  %v7576_v47 = vld [vmem:[%s19017_s3 + $0x120] sm:$0xf] }
  0x76   :  { %851 = vmatpush.bf16.msrb.mxu0 %v11548_v24  ;;  %v797_v24 = vld [vmem:[#allocation1] sm:$0xff] }
  0x77   :  { %864 = vmatpush.bf16.msrb.mxu1 %v11723_v57  ;;  %v7640_v57 = vld [vmem:[%s19017_s3 + $0x1a0] sm:$0xf] }
  0x78   :  { %877 = vmatpush.bf16.msrb.mxu2 %v11728_v58  ;;  %v10336_v58 = vld [vmem:[%s19017_s3 + $0x1ac] sm:$0xf0] }
  0x79   :  { %890 = vmatpush.bf16.msrb.mxu3 %v11733_v59 }
  0x7a   :  { %852 = vmatpush.bf16.msrb.mxu0 %v11572_v28 }
  0x7b   :  { %865 = vmatpush.bf16.msrb.mxu1 %v11750_v40 }
  0x7c   :  { %878 = vmatpush.bf16.msrb.mxu2 %v11755_v43 }
  0x7d   :  { %891 = vmatpush.bf16.msrb.mxu3 %v11762_v44  ;;  %v7641_v44 = vor.u32 %v10336_v58, %v7640_v57  ;;  %v10322_v57 = vld [vmem:[%s19017_s3 + $0x144] sm:$0xf]  ;;  %v7594_v58 = vld [vmem:[%s19017_s3 + $0x150] sm:$0xf0] }
  0x7e   :  { %853 = vmatpush.bf16.msrb.mxu0 %v11606_v34 }
  0x7f   :  { %866 = vmatpush.bf16.msrb.mxu1 %v11774_v39  ;;  %v7624_v39 = vld [vmem:[%s19017_s3 + $0x180] sm:$0xf] }
  0x80   :  { %879 = vmatpush.bf16.msrb.mxu2 %v11779_v60  ;;  %v7680_v60 = vld [vmem:[%s19017_s3 + $0x1e8] sm:$0xf] }
  0x81   :  { %892 = vmatpush.bf16.msrb.mxu3 %v11791_v48  ;;  %854 = vmatmul.bf16.vlgmr.msrb.gmra.mxu0 %v790_v7  ;;  %v7673_v48 = vor.u32 %v10344_v46, %v7672_v45  ;;  %v7681_v63 = vor.u32 %v10345_v61, %v7680_v60  ;;  %v7645_v7 = vor.u32 %v10334_v1, %v7642_v2  ;;  %v10327_v1 = vld [vmem:[%s19017_s3 + $0x16c] sm:$0xf] }
  0x82   :  { %898 = vmatpush.bf16.msra.mxu0 %v11616_v36  ;;  %867 = vmatmul.bf16.vlgmr.msrb.gmra.mxu1 %v791_v14  ;;  %v10341_v14 = vld [vmem:[%s19017_s3 + $0x1d4] sm:$0xf0] }
  0x83   :  { %911 = vmatpush.bf16.msra.mxu1 %v11784_v52  ;;  %880 = vmatmul.bf16.vlgmr.msrb.gmra.mxu2 %v792_v3  ;;  %v10332_v3 = vld [vmem:[%s19017_s3 + $0x18c] sm:$0xf0] }
  0x84   :  { %893 = vmatmul.bf16.vlgmr.msrb.gmra.mxu3 %v793_v11  ;;  %1119 = vmatpush.bf16.msra.mxu2 %v7673_v48  ;;  %v7664_v11 = vld [vmem:[%s19017_s3 + $0x1c8] sm:$0xf]  ;;  %v10320_v48 = vld [vmem:[%s19017_s3 + $0x12c] sm:$0xf0] }
  0x85   :  { %1132 = vmatpush.bf16.msra.mxu3 %v7677_v53  ;;  %v7577_v49 = vor.u32 %v10320_v48, %v7576_v47  ;;  %v7633_v53 = vor.u32 %v10333_v51, %v7632_v50  ;;  %v7786_v48 = vld [vmem:[%s19017_s3 + $0xd0] sm:$0xf0]  ;;  %v10300_v50 = vld [vmem:[%s19017_s3 + $0x8c] sm:$0xf0] }
  0x86   :  { %899 = vmatpush.bf16.msra.mxu0 %v19186_v17  ;;  %v7666_v17 = vld [vmem:[%s19017_s3 + $0x1d8] sm:$0xf0] }
  0x87   :  { %912 = vmatpush.bf16.msra.mxu1 %v11805_v56  ;;  %v7658_v56 = vld [vmem:[%s19017_s3 + $0x1d0] sm:$0xf0] }
  0x88   :  { %v7661_v59 = vor.u32 %v10338_v54, %v7658_v56  ;;  %1120 = vmatpush.bf16.msra.mxu2 %v7657_v55  ;;  %v7634_v54 = vld [vmem:[%s19017_s3 + $0x198] sm:$0xf0] }
  0x8a   :  { %900 = vmatpush.bf16.msra.mxu0 %v19187_v18  ;;  %1133 = vmatpush.bf16.msra.mxu3 %v7661_v59  ;;  %v10330_v18 = vld [vmem:[%s19017_s3 + $0x184] sm:$0xf]  ;;  %v7560_v59 = vld [vmem:[%s19017_s3 + $0x100] sm:$0xf] }
  0x8b   :  { %913 = vmatpush.bf16.msra.mxu1 %v11816_v0  ;;  %v7685_v0 = vor.u32 %v10343_v62, %v7682_v20  ;;  %v7597_v62 = vor.u32 %v10322_v57, %v7594_v58  ;;  %v7570_v57 = vld [vmem:[%s19017_s3 + $0x118] sm:$0xf0]  ;;  %v7808_v58 = vld [vmem:[%s19017_s3 + $0xe8] sm:$0xf] }
  0x8c   :  { %1121 = vmatpush.bf16.msra.mxu2 %v7641_v44 }
  0x8e   :  { %901 = vmatpush.bf16.msra.mxu0 %v19188_v19  ;;  %1134 = vmatpush.bf16.msra.mxu3 %v7645_v7 }
  0x8f   :  { %914 = vmatpush.bf16.msra.mxu1 %v11828_v4 }
  0x92   :  { %902 = vmatpush.bf16.msra.mxu0 %v19189_v21  ;;  %v7669_v21 = vor.u32 %v10339_v15, %v7666_v17  ;;  %v7600_v17 = vld [vmem:[%s19017_s3 + $0x148] sm:$0xf] }
  0x93   :  { %915 = vmatpush.bf16.msra.mxu1 %v11837_v5 }
  0x96   :  { %903 = vmatpush.bf16.msra.mxu0 %v19190_v22  ;;  %v7626_v22 = vld [vmem:[%s19017_s3 + $0x190] sm:$0xf0] }
  0x97   :  { %916 = vmatpush.bf16.msra.mxu1 %v11846_v6 }
  0x9a   :  { %904 = vmatpush.bf16.msra.mxu0 %v19191_v23  ;;  %v7625_v23 = vor.u32 %v10332_v3, %v7624_v39  ;;  %v7616_v39 = vld [vmem:[%s19017_s3 + $0x168] sm:$0xf] }
  0x9b   :  { %917 = vmatpush.bf16.msra.mxu1 %v11855_v8 }
  0x9c   :  { %1122 = vmatpush.bf16.msra.mxu2 %v7625_v23 }
  0x9e   :  { %905 = vmatpush.bf16.msra.mxu0 %v11796_v42  ;;  %v640_v26 = vpop.f32.mrf.mxu0 }
  0x9f   :  { %918 = vmatpush.bf16.msra.mxu1 %v11864_v9  ;;  %v653_v27 = vpop.f32.mrf.mxu1  ;;  %v641_v28 = vadd.f32 %v11926_v25, %v640_v26  ;;  %v10328_v26 = vld [vmem:[%s19017_s3 + $0x16c] sm:$0xf0] }
  0xa1   :  { %906 = vmatmul.bf16.vlgmr.msra.gmra.mxu0 %v794_v16  ;;  %v654_v29 = vadd.f32 %v653_v27, %v641_v28  ;;  %v7665_v16 = vor.u32 %v10341_v14, %v7664_v11  ;;  %v7629_v27 = vor.u32 %v10330_v18, %v7626_v22  ;;  %v7648_v28 = vld [vmem:[%s19017_s3 + $0x1a8] sm:$0xf]  ;;  %v7784_v11 = vld [vmem:[%s19017_s3 + $0xc0] sm:$0xf]  ;;  %v10308_v14 = vld [vmem:[%s19017_s3 + $0xcc] sm:$0xf0] }
  0xa2   :  { %919 = vmatmul.bf16.vlgmr.msra.gmra.mxu1 %v797_v24  ;;  %1145 = vmatpush.bf16.msrb.mxu0 %v7681_v63  ;;  %v7608_v24 = vld [vmem:[%s19017_s3 + $0x160] sm:$0xf]  ;;  %v10316_v63 = vld [vmem:[%s19017_s3 + $0x10c] sm:$0xf0]  ;;  %v7785_v15 = vor.u32 %v10308_v14, %v7784_v11  ;;  %v10325_v18 = vld [vmem:[%s19017_s3 + $0x154] sm:$0xf0] }
  0xa3   :  { %1158 = vmatpush.bf16.msrb.mxu1 %v7685_v0  ;;  %1135 = vmatpush.bf16.msra.mxu3 %v7629_v27  ;;  %v7561_v20 = vor.u32 %v10316_v63, %v7560_v59  ;;  %v10329_v0 = vld [vmem:[%s19017_s3 + $0x174] sm:$0xf0]  ;;  %v7601_v23 = vor.u32 %v10325_v18, %v7600_v17  ;;  %v7562_v27 = vld [vmem:[%s19017_s3 + $0x110] sm:$0xf0]  ;;  %v10307_v11 = vld [vmem:[%s19017_s3 + $0xcc] sm:$0xf] }
  0xa4   :  { %v7617_v2 = vor.u32 %v10329_v0, %v7616_v39  ;;  %v10313_v59 = vld [vmem:[%s19017_s3 + $0xf4] sm:$0xf0]  ;;  %v7794_v14 = vld [vmem:[%s19017_s3 + $0xd8] sm:$0xf0] }
  0xa5   :  { %v7809_v63 = vor.u32 %v10313_v59, %v7808_v58  ;;  %v7797_v18 = vor.u32 %v10307_v11, %v7794_v14  ;;  %v7744_v58 = vld [vmem:[%s19017_s3 + $0x68] sm:$0xf]  ;;  %v10297_v59 = vld [vmem:[%s19017_s3 + $0x74] sm:$0xf0]  ;;  %v7690_v11 = vld [vmem:[%s19017_s3 + $0x10] sm:$0xf0] }
  0xa6   :  { %v666_v30 = vpop.f32.mrf.mxu2  ;;  %v642_v33 = vpop.f32.mrf.mxu0  ;;  %1146 = vmatpush.bf16.msrb.mxu0 %v7665_v16 }
  0xa7   :  { %v679_v31 = vpop.f32.mrf.mxu3  ;;  %v667_v32 = vadd.f32 %v666_v30, %v654_v29  ;;  %v655_v34 = vpop.f32.mrf.mxu1  ;;  %v10337_v29 = vld [vmem:[%s19017_s3 + $0x1b4] sm:$0xf0]  ;;  %v10335_v30 = vld [vmem:[%s19017_s3 + $0x1ac] sm:$0xf]  ;;  %1159 = vmatpush.bf16.msrb.mxu1 %v7669_v21  ;;  %v10326_v33 = vld [vmem:[%s19017_s3 + $0x164] sm:$0xf] }
  0xa8   :  { %v7610_v34 = vld [vmem:[%s19017_s3 + $0x170] sm:$0xf0] }
  0xa9   :  { %v680_v35 = vadd.f32 %v679_v31, %v667_v32  ;;  %v7649_v31 = vor.u32 %v10337_v29, %v7648_v28  ;;  %v7650_v32 = vld [vmem:[%s19017_s3 + $0x1b8] sm:$0xf0]  ;;  %v7613_v45 = vor.u32 %v10326_v33, %v7610_v34  ;;  %v7768_v33 = vld [vmem:[%s19017_s3 + $0xa0] sm:$0xf] }
  0xab   :  { %1147 = vmatpush.bf16.msrb.mxu0 %v7649_v31  ;;  %1136 = vmatpush.bf16.msra.mxu3 %v7613_v45  ;;  %v10310_v31 = vld [vmem:[%s19017_s3 + $0xe4] sm:$0xf]  ;;  %v7586_v45 = vld [vmem:[%s19017_s3 + $0x138] sm:$0xf0] }
  0xae   :  { %v668_v36 = vpop.f32.mrf.mxu2 }
  0xaf   :  { %v681_v37 = vpop.f32.mrf.mxu3  ;;  %1148 = vmatpush.bf16.msrb.mxu0 %v7633_v53  ;;  %1137 = vmatpush.bf16.msra.mxu3 %v7597_v62  ;;  %v7568_v53 = vld [vmem:[%s19017_s3 + $0x108] sm:$0xf] }
  0xb3   :  { %1149 = vmatpush.bf16.msrb.mxu0 %v7617_v2  ;;  %v7736_v2 = vld [vmem:[%s19017_s3 + $0x60] sm:$0xf] }
  0xb7   :  { %1150 = vmatpush.bf16.msrb.mxu0 %v7601_v23  ;;  %v7720_v23 = vld [vmem:[%s19017_s3 + $0x40] sm:$0xf] }
  0xbe   :  { %v692_v38 = vpop.f32.mrf.mxu0 }
  0xbf   :  { %v705_v41 = vpop.f32.mrf.mxu1  ;;  %v693_v42 = vadd.f32 %v692_v38, %v680_v35  ;;  %v7653_v35 = vor.u32 %v10335_v30, %v7650_v32  ;;  %v7609_v38 = vor.u32 %v10328_v26, %v7608_v24  ;;  %v7602_v24 = vld [vmem:[%s19017_s3 + $0x158] sm:$0xf0]  ;;  %v10314_v26 = vld [vmem:[%s19017_s3 + $0x104] sm:$0xf]  ;;  %v7802_v32 = vld [vmem:[%s19017_s3 + $0xf0] sm:$0xf0] }
  0xc0   :  { %v7565_v30 = vor.u32 %v10314_v26, %v7562_v27  ;;  %v7805_v34 = vor.u32 %v10310_v31, %v7802_v32  ;;  %v7776_v27 = vld [vmem:[%s19017_s3 + $0xa8] sm:$0xf]  ;;  %v7778_v31 = vld [vmem:[%s19017_s3 + $0xb8] sm:$0xf0]  ;;  %v10294_v32 = vld [vmem:[%s19017_s3 + $0x64] sm:$0xf] }
  0xc1   :  { %v706_v52 = vadd.f32 %v705_v41, %v693_v42  ;;  %v7592_v41 = vld [vmem:[%s19017_s3 + $0x140] sm:$0xf]  ;;  %v10324_v42 = vld [vmem:[%s19017_s3 + $0x14c] sm:$0xf0]  ;;  %1160 = vmatpush.bf16.msrb.mxu1 %v7653_v35  ;;  %1123 = vmatpush.bf16.msra.mxu2 %v7609_v38 }
  0xc2   :  { %v7593_v46 = vor.u32 %v10324_v42, %v7592_v41  ;;  %v10304_v35 = vld [vmem:[%s19017_s3 + $0xac] sm:$0xf0]  ;;  %v10319_v42 = vld [vmem:[%s19017_s3 + $0x12c] sm:$0xf] }
  0xc3   :  { %v7769_v38 = vor.u32 %v10304_v35, %v7768_v33  ;;  %v7589_v47 = vor.u32 %v10319_v42, %v7586_v45  ;;  %v7738_v33 = vld [vmem:[%s19017_s3 + $0x70] sm:$0xf0]  ;;  %v7760_v42 = vld [vmem:[%s19017_s3 + $0x88] sm:$0xf]  ;;  %v10301_v45 = vld [vmem:[%s19017_s3 + $0x94] sm:$0xf0] }
  0xc4   :  { %v7741_v35 = vor.u32 %v10294_v32, %v7738_v33  ;;  %v7698_v33 = vld [vmem:[%s19017_s3 + $0x18] sm:$0xf0] }
  0xc5   :  { %1124 = vmatpush.bf16.msra.mxu2 %v7593_v46  ;;  %v10306_v46 = vld [vmem:[%s19017_s3 + $0xc4] sm:$0xf] }
  0xc6   :  { %v718_v40 = vpop.f32.mrf.mxu2  ;;  %v694_v12 = vpop.f32.mrf.mxu0  ;;  %v7789_v51 = vor.u32 %v10306_v46, %v7786_v48  ;;  %v10299_v46 = vld [vmem:[%s19017_s3 + $0x8c] sm:$0xf]  ;;  %v7761_v48 = vor.u32 %v10301_v45, %v7760_v42 }
  0xc7   :  { %v731_v43 = vpop.f32.mrf.mxu3  ;;  %v719_v10 = vadd.f32 %v718_v40, %v706_v52  ;;  %v707_v13 = vpop.f32.mrf.mxu1  ;;  %v10331_v52 = vld [vmem:[%s19017_s3 + $0x18c] sm:$0xf]  ;;  %v7800_v40 = vld [vmem:[%s19017_s3 + $0xe0] sm:$0xf]  ;;  %v10318_v12 = vld [vmem:[%s19017_s3 + $0x124] sm:$0xf] }
  0xc8   :  { %v7637_v56 = vor.u32 %v10331_v52, %v7634_v54  ;;  %v7578_v13 = vld [vmem:[%s19017_s3 + $0x130] sm:$0xf0]  ;;  %v10317_v54 = vld [vmem:[%s19017_s3 + $0x114] sm:$0xf0] }
  0xc9   :  { %v732_v19 = vadd.f32 %v731_v43, %v719_v10  ;;  %1125 = vmatpush.bf16.msra.mxu2 %v7577_v49  ;;  %v10312_v43 = vld [vmem:[%s19017_s3 + $0xec] sm:$0xf0]  ;;  %v7618_v10 = vld [vmem:[%s19017_s3 + $0x178] sm:$0xf0]  ;;  %v7581_v7 = vor.u32 %v10318_v12, %v7578_v13  ;;  %v7752_v49 = vld [vmem:[%s19017_s3 + $0x80] sm:$0xf] }
  0xca   :  { %1161 = vmatpush.bf16.msrb.mxu1 %v7637_v56  ;;  %v7801_v44 = vor.u32 %v10312_v43, %v7800_v40  ;;  %v7621_v3 = vor.u32 %v10327_v1, %v7618_v10  ;;  %v7753_v52 = vor.u32 %v10300_v50, %v7752_v49  ;;  %v7569_v56 = vor.u32 %v10317_v54, %v7568_v53  ;;  %v7810_v40 = vld [vmem:[%s19017_s3 + $0xf8] sm:$0xf0]  ;;  %v10302_v43 = vld [vmem:[%s19017_s3 + $0xa4] sm:$0xf]  ;;  %v7770_v1 = vld [vmem:[%s19017_s3 + $0xb0] sm:$0xf0] }
  0xcb   :  { %1138 = vmatpush.bf16.msra.mxu3 %v7581_v7  ;;  %v10296_v10 = vld [vmem:[%s19017_s3 + $0x6c] sm:$0xf0]  ;;  %v7773_v12 = vor.u32 %v10302_v43, %v7770_v1  ;;  %v10309_v7 = vld [vmem:[%s19017_s3 + $0xd4] sm:$0xf0]  ;;  %v7762_v49 = vld [vmem:[%s19017_s3 + $0x98] sm:$0xf0] }
  0xcc   :  { %v7737_v13 = vor.u32 %v10296_v10, %v7736_v2  ;;  %v10290_v50 = vld [vmem:[%s19017_s3 + $0x44] sm:$0xf]  ;;  %v7688_v54 = vld [vmem:[%s19017_s3] sm:$0xf]  ;;  %v7728_v10 = vld [vmem:[%s19017_s3 + $0x48] sm:$0xf] }
  0xcd   :  { %1126 = vmatpush.bf16.msra.mxu2 %v7561_v20  ;;  %v10311_v20 = vld [vmem:[%s19017_s3 + $0xec] sm:$0xf] }
  0xce   :  { %v720_v36 = vpop.f32.mrf.mxu2  ;;  %1162 = vmatpush.bf16.msrb.mxu1 %v7621_v3  ;;  %v7813_v0 = vor.u32 %v10311_v20, %v7810_v40  ;;  %v7792_v3 = vld [vmem:[%s19017_s3 + $0xc8] sm:$0xf]  ;;  %v7706_v20 = vld [vmem:[%s19017_s3 + $0x30] sm:$0xf0] }
  0xcf   :  { %v733_v37 = vpop.f32.mrf.mxu3  ;;  %v7584_v36 = vld [vmem:[%s19017_s3 + $0x128] sm:$0xf]  ;;  %1139 = vmatpush.bf16.msra.mxu3 %v7565_v30  ;;  %v7793_v17 = vor.u32 %v10309_v7, %v7792_v3  ;;  %v7730_v3 = vld [vmem:[%s19017_s3 + $0x58] sm:$0xf0]  ;;  %v10282_v7 = vld [vmem:[%s19017_s3 + $0x4] sm:$0xf] }
  0xd0   :  { %v10321_v37 = vld [vmem:[%s19017_s3 + $0x134] sm:$0xf0] }
  0xd1   :  { %1331 = vmatpush.bf16.msrb.mxu2 %v7801_v44  ;;  %v7585_v41 = vor.u32 %v10321_v37, %v7584_v36  ;;  %v7704_v36 = vld [vmem:[%s19017_s3 + $0x20] sm:$0xf]  ;;  %v10288_v37 = vld [vmem:[%s19017_s3 + $0x2c] sm:$0xf0] }
  0xd3   :  { %1344 = vmatpush.bf16.msrb.mxu3 %v7805_v34  ;;  %1151 = vmatpush.bf16.msrb.mxu0 %v7585_v41 }
  0xd5   :  { %1332 = vmatpush.bf16.msrb.mxu2 %v7785_v15  ;;  %v7754_v15 = vld [vmem:[%s19017_s3 + $0x90] sm:$0xf0] }
  0xd7   :  { %1345 = vmatpush.bf16.msrb.mxu3 %v7789_v51  ;;  %1152 = vmatpush.bf16.msrb.mxu0 %v7569_v56  ;;  %v7722_v51 = vld [vmem:[%s19017_s3 + $0x50] sm:$0xf0] }
  0xd8   :  { %v7725_v53 = vor.u32 %v10290_v50, %v7722_v51  ;;  %v12334_v51 = vld [vmem:[%s19015_s1 + $0x78] sm:$0xff] }
  0xd9   :  { %1333 = vmatpush.bf16.msrb.mxu2 %v7769_v38  ;;  %v7705_v38 = vor.u32 %v10288_v37, %v7704_v36 }
  0xdb   :  { %1357 = vmatpush.bf16.msra.mxu0 %v7809_v63  ;;  %1346 = vmatpush.bf16.msrb.mxu3 %v7773_v12  ;;  %v7745_v63 = vor.u32 %v10297_v59, %v7744_v58  ;;  %v10293_v12 = vld [vmem:[%s19017_s3 + $0x54] sm:$0xf0]  ;;  %v12377_v59 = vld [vmem:[%s19015_s1 + $0x28] sm:$0xff] }
  0xdd   :  { %1334 = vmatpush.bf16.msrb.mxu2 %v7753_v52  ;;  %v7765_v52 = vor.u32 %v10299_v46, %v7762_v49 }
  0xde   :  { %v744_v55 = vpop.f32.mrf.mxu0 }
  0xdf   :  { %v12058_v60 = vadd.f32 %v744_v55, %v732_v19  ;;  %v12060_v61 = vpop.f32.mrf.mxu1  ;;  %v10323_v19 = vld [vmem:[%s19017_s3 + $0x14c] sm:$0xf]  ;;  %1358 = vmatpush.bf16.msra.mxu0 %v7793_v17  ;;  %v7712_v17 = vld [vmem:[%s19017_s3 + $0x28] sm:$0xf] }
  0xe0   :  { %v7605_v29 = vor.u32 %v10323_v19, %v7602_v24  ;;  %v10315_v55 = vld [vmem:[%s19017_s3 + $0x10c] sm:$0xf]  ;;  %v10292_v24 = vld [vmem:[%s19017_s3 + $0x4c] sm:$0xf0] }
  0xe1   :  { %v7573_v62 = vor.u32 %v10315_v55, %v7570_v57  ;;  %1335 = vmatpush.bf16.msrb.mxu2 %v7737_v13  ;;  %v7721_v26 = vor.u32 %v10292_v24, %v7720_v23  ;;  %v10284_v55 = vld [vmem:[%s19017_s3 + $0xc] sm:$0xf0]  ;;  %v817_v57 = vadd.f32 %v11926_v25, %v12060_v61  ;;  %v7746_v25 = vld [vmem:[%s19017_s3 + $0x78] sm:$0xf0]  ;;  %v10286_v61 = vld [vmem:[%s19017_s3 + $0x24] sm:$0xf]  ;;  %v7729_v13 = vor.u32 %v10293_v12, %v7728_v10 }
  0xe2   :  { %1163 = vmatpush.bf16.msrb.mxu1 %v7605_v29  ;;  %v10303_v29 = vld [vmem:[%s19017_s3 + $0xac] sm:$0xf]  ;;  %v7689_v56 = vor.u32 %v10284_v55, %v7688_v54  ;;  %v12352_v54 = vld [vmem:[%s19015_s1 + $0x30] sm:$0xff]  ;;  %v748_v58 = vmax.f32 %v12058_v60, 0.0 }
  0xe3   :  { %v7781_v34 = vor.u32 %v10303_v29, %v7778_v31  ;;  %v7696_v29 = vld [vmem:[%s19017_s3 + $0x8] sm:$0xf]  ;;  %v10283_v31 = vld [vmem:[%s19017_s3 + $0xc] sm:$0xf]  ;;  %v12358_v55 = vld [vmem:[%s19015_s1 + $0x70] sm:$0xff] }
  0xe4   :  { %v12392_v60 = vld [vmem:[%s19015_s1 + $0xa8] sm:$0xff]  ;;  %v12452_v10 = vld [vmem:[%s19015_s1 + $0x10] sm:$0xff] }
  0xe5   :  { %1336 = vmatpush.bf16.msrb.mxu2 %v7721_v26  ;;  %v12458_v12 = vld [vmem:[%s19015_s1 + $0x50] sm:$0xff] }
  0xe6   :  { %v746_v16 = vpop.f32.mrf.mxu0  ;;  %v12104_v21 = vpop.f32.mrf.mxu2  ;;  %1164 = vmatpush.bf16.msrb.mxu1 %v7589_v47 }
  0xe7   :  { %v12106_v22 = vpop.f32.mrf.mxu3  ;;  %v818_v28 = vpop.f32.mrf.mxu1  ;;  %v10298_v16 = vld [vmem:[%s19017_s3 + $0x84] sm:$0xf]  ;;  %v830_v40 = vadd.f32 %v12104_v21, %v817_v57  ;;  %v10291_v21 = vld [vmem:[%s19017_s3 + $0x4c] sm:$0xf]  ;;  %v12370_v57 = vld [vmem:[%s19015_s1 + $0xf0] sm:$0xff] }
  0xe8   :  { %v7757_v19 = vor.u32 %v10298_v16, %v7754_v15  ;;  %v10305_v28 = vld [vmem:[%s19017_s3 + $0xb4] sm:$0xf0]  ;;  %v7733_v16 = vor.u32 %v10291_v21, %v7730_v3  ;;  %v7693_v15 = vor.u32 %v10282_v7, %v7690_v11  ;;  %v12464_v21 = vld [vmem:[%s19015_s1 + $0x90] sm:$0xff]  ;;  %v12476_v3 = vld [vmem:[%s19015_s1 + $0x8] sm:$0xff] }
  0xe9   :  { %v7777_v30 = vor.u32 %v10305_v28, %v7776_v27  ;;  %1337 = vmatpush.bf16.msrb.mxu2 %v7705_v38  ;;  %v843_v14 = vadd.f32 %v12106_v22, %v830_v40  ;;  %v7714_v22 = vld [vmem:[%s19017_s3 + $0x38] sm:$0xf0]  ;;  %v12410_v40 = vld [vmem:[%s19015_s1 + $0x60] sm:$0xff]  ;;  %v12482_v7 = vld [vmem:[%s19015_s1 + $0x48] sm:$0xff] }
  0xea   :  { %1165 = vmatpush.bf16.msrb.mxu1 %v7573_v62  ;;  %1347 = vmatpush.bf16.msrb.mxu3 %v7757_v19  ;;  %v10295_v62 = vld [vmem:[%s19017_s3 + $0x6c] sm:$0xf] }
  0xeb   :  { %1359 = vmatpush.bf16.msra.mxu0 %v7777_v30  ;;  %v10287_v19 = vld [vmem:[%s19017_s3 + $0x2c] sm:$0xf]  ;;  %v10285_v30 = vld [vmem:[%s19017_s3 + $0x14] sm:$0xf0] }
  0xec   :  { %v7717_v26 = vor.u32 %v10287_v19, %v7714_v22  ;;  %v7697_v32 = vor.u32 %v10285_v30, %v7696_v29  ;;  %v12488_v11 = vld [vmem:[%s19015_s1 + $0x88] sm:$0xff]  ;;  %v12524_v22 = vld [vmem:[%s19015_s1 + $0x80] sm:$0xff]  ;;  %v12548_v30 = vld [vmem:[%s19015_s1 + $0x130] sm:$0xff] }
  0xed   :  { %1338 = vmatpush.bf16.msrb.mxu2 %v7689_v56  ;;  %v12364_v56 = vld [vmem:[%s19015_s1 + $0xb0] sm:$0xff] }
  0xee   :  { %v831_v44 = vpop.f32.mrf.mxu2  ;;  %1370 = vmatpush.bf16.msra.mxu1 %v7813_v0  ;;  %1348 = vmatpush.bf16.msrb.mxu3 %v7741_v35  ;;  %v7701_v35 = vor.u32 %v10283_v31, %v7698_v33  ;;  %v12554_v31 = vld [vmem:[%s19015_s1 + $0x170] sm:$0xff] }
  0xef   :  { %v844_v39 = vpop.f32.mrf.mxu3  ;;  %1360 = vmatpush.bf16.msra.mxu0 %v7761_v48  ;;  %v7749_v44 = vor.u32 %v10295_v62, %v7746_v25  ;;  %v12383_v62 = vld [vmem:[%s19015_s1 + $0x68] sm:$0xff]  ;;  %v12566_v33 = vld [vmem:[%s19015_s1 + $0x1f0] sm:$0xff] }
  0xf0   :  { %v7709_v39 = vor.u32 %v10286_v61, %v7706_v20  ;;  %v12398_v25 = vld [vmem:[%s19015_s1 + $0xe8] sm:$0xff]  ;;  %v749_v61 = vpack.c.bf16 %v748_v58, %v748_v58  ;;  %v12404_v20 = vld [vmem:[%s19015_s1 + $0x20] sm:$0xff] }
  0xf2   :  { %1371 = vmatpush.bf16.msra.mxu1 %v7797_v18  ;;  %1349 = vmatpush.bf16.msrb.mxu3 %v7725_v53  ;;  %v10289_v18 = vld [vmem:[%s19017_s3 + $0x34] sm:$0xf0] }
  0xf3   :  { %1361 = vmatpush.bf16.msra.mxu0 %v7745_v63  ;;  %v7713_v23 = vor.u32 %v10289_v18, %v7712_v17  ;;  %v12346_v53 = vld [vmem:[%s19015_s1 + $0xf8] sm:$0xff] }
  0xf4   :  { %v7814_v63 = vld [vmem:[%s19014_s0 + $0x12] sm:$0xff] }
  0xf5   :  { %1387 = vst [vmem:[#allocation1] ss:$9 sm:$0xff] %v7814_v63  ;;  %v12512_v17 = vld [vmem:[%s19015_s1 + $0x138] sm:$0xff] }
  0xf6   :  { %1372 = vmatpush.bf16.msra.mxu1 %v7781_v34  ;;  %1350 = vmatpush.bf16.msrb.mxu3 %v7709_v39  ;;  %v12428_v39 = vld [vmem:[%s19015_s1 + $0x18] sm:$0xff] }
  0xf7   :  { %1362 = vmatpush.bf16.msra.mxu0 %v7729_v13  ;;  %v12470_v13 = vld [vmem:[%s19015_s1 + $0xd0] sm:$0xff]  ;;  %v12518_v18 = vld [vmem:[%s19015_s1 + $0x178] sm:$0xff] }
  0xfa   :  { %1373 = vmatpush.bf16.msra.mxu1 %v7765_v52  ;;  %1351 = vmatpush.bf16.msrb.mxu3 %v7693_v15  ;;  %v12340_v52 = vld [vmem:[%s19015_s1 + $0xb8] sm:$0xff]  ;;  %v12506_v15 = vld [vmem:[%s19015_s1 + $0x40] sm:$0xff] }
  0xfb   :  { %1363 = vmatpush.bf16.msra.mxu0 %v7713_v23 }
  0xfc   :  { %v1388_v19 = vld [vmem:[#allocation1] sm:$0xff]  ;;  %v1389_v23 = vld [vmem:[#allocation1 + $0x9] sm:$0xff] }
  0xfd   :  { %v1391_v29 = vld [vmem:[#allocation1 + $0x1b] sm:$0xff]  ;;  %v1392_v58 = vld [vmem:[#allocation1 + $0x24] sm:$0xff]  ;;  %v1393_v63 = vld [vmem:[#allocation1 + $0x2d] sm:$0xff] }
  0xfe   :  { %v855_v41 = vpop.f32.mrf.mxu0  ;;  %1374 = vmatpush.bf16.msra.mxu1 %v7749_v44  ;;  %v12422_v44 = vld [vmem:[%s19015_s1 + $0xe0] sm:$0xff] }
  0xff   :  { %v868_v47 = vpop.f32.mrf.mxu1  ;;  %v856_v24 = vadd.f32 %v855_v41, %v843_v14  ;;  %1364 = vmatpush.bf16.msra.mxu0 %v7697_v32  ;;  %v12494_v14 = vld [vmem:[%s19015_s1 + $0xc8] sm:$0xff]  ;;  %v12560_v32 = vld [vmem:[%s19015_s1 + $0x1b0] sm:$0xff] }
 0x101   :  { %v869_v34 = vadd.f32 %v868_v47, %v856_v24  ;;  %v12328_v47 = vld [vmem:[%s19015_s1 + $0x38] sm:$0xff]  ;;  %v12530_v24 = vld [vmem:[%s19015_s1 + $0xc0] sm:$0xff] }
 0x102   :  { %1375 = vmatpush.bf16.msra.mxu1 %v7733_v16  ;;  %19192 = vst [vmem:[#allocation5_spill] sm:$0xff] %v12328_v47  ;;  %v12500_v16 = vld [vmem:[%s19015_s1] sm:$0xff] }
 0x106   :  { %v857_v43 = vpop.f32.mrf.mxu0  ;;  %v881_v0 = vpop.f32.mrf.mxu2  ;;  %1376 = vmatpush.bf16.msra.mxu1 %v7717_v26  ;;  %v12536_v26 = vld [vmem:[%s19015_s1 + $0x1b8] sm:$0xff] }
 0x107   :  { %v894_v1 = vpop.f32.mrf.mxu3  ;;  %v870_v2 = vpop.f32.mrf.mxu1  ;;  %v882_v36 = vadd.f32 %v881_v0, %v869_v34  ;;  %v12416_v43 = vld [vmem:[%s19015_s1 + $0xa0] sm:$0xff]  ;;  %v12434_v0 = vld [vmem:[%s19015_s1 + $0x58] sm:$0xff]  ;;  %v12572_v34 = vld [vmem:[%s19015_s1 + $0x128] sm:$0xff] }
 0x108   :  { %v12446_v2 = vld [vmem:[%s19015_s1 + $0xd8] sm:$0xff] }
 0x109   :  { %v895_v37 = vadd.f32 %v894_v1, %v882_v36  ;;  %v12440_v1 = vld [vmem:[%s19015_s1 + $0x98] sm:$0xff]  ;;  %v12584_v36 = vld [vmem:[%s19015_s1 + $0x1a8] sm:$0xff] }
 0x10a   :  { %1377 = vmatpush.bf16.msra.mxu1 %v7701_v35  ;;  %v12578_v35 = vld [vmem:[%s19015_s1 + $0x168] sm:$0xff] }
 0x10e   :  { %v883_v27 = vpop.f32.mrf.mxu2 }
 0x10f   :  { %v896_v28 = vpop.f32.mrf.mxu3  ;;  %v12542_v27 = vld [vmem:[%s19015_s1 + $0x1f8] sm:$0xff] }
 0x110   :  { %v1390_v28 = vld [vmem:[#allocation1 + $0x12] sm:$0xff] }
 0x11e   :  { %v907_v38 = vpop.f32.mrf.mxu0 }
 0x11f   :  { %v920_v41 = vpop.f32.mrf.mxu1  ;;  %v908_v42 = vadd.f32 %v907_v38, %v895_v37  ;;  %v12590_v37 = vld [vmem:[%s19015_s1 + $0x1e8] sm:$0xff]  ;;  %v12596_v38 = vld [vmem:[%s19015_s1 + $0x120] sm:$0xff] }
 0x120   :  { %19193 = vst [vmem:[#allocation6_spill] sm:$0xff] %v12596_v38 }
 0x121   :  { %v921_v45 = vadd.f32 %v920_v41, %v908_v42  ;;  %v12602_v41 = vld [vmem:[%s19015_s1 + $0x160] sm:$0xff] }
 0x122   :  { %19194 = vst [vmem:[#allocation7_spill] sm:$0xff] %v12602_v41  ;;  %v12608_v42 = vld [vmem:[%s19015_s1 + $0x1a0] sm:$0xff] }
 0x123   :  { %v924_v46 = vmax.f32 %v921_v45, 0.0  ;;  %19195 = vst [vmem:[#allocation8_spill] sm:$0xff] %v12608_v42  ;;  %v12614_v45 = vld [vmem:[%s19015_s1 + $0x1e0] sm:$0xff] }
 0x124   :  { %19196 = vst [vmem:[#allocation9_spill] sm:$0xff] %v12614_v45 }
 0x125   :  { %v925_v48 = vpack.c.bf16 %v924_v46, %v924_v46  ;;  %v12620_v46 = vld [vmem:[%s19015_s1 + $0x118] sm:$0xff] }
 0x126   :  { %v909_v49 = vpop.f32.mrf.mxu0  ;;  %19197 = vst [vmem:[#allocation10_spill] sm:$0xff] %v12620_v46 }
 0x127   :  { %v922_v50 = vpop.f32.mrf.mxu1  ;;  %1127 = vmatmul.bf16.vlgmr.msra.gmra.mxu2 %v925_v48  ;;  %1140 = vmatmul.bf16.vlgmr.msra.gmra.mxu3 %v925_v48  ;;  %v12632_v49 = vld [vmem:[%s19015_s1 + $0x198] sm:$0xff] }
 0x128   :  { %1153 = vmatmul.bf16.vlgmr.msrb.gmra.mxu0 %v925_v48  ;;  %1166 = vmatmul.bf16.vlgmr.msrb.gmra.mxu1 %v925_v48  ;;  %v12626_v48 = vld [vmem:[%s19015_s1 + $0x158] sm:$0xff]  ;;  %19199 = vst [vmem:[#allocation12_spill] sm:$0xff] %v12632_v49 }
 0x129   :  { %1408 = vmatpush.bf16.msra.mxu2 %v12328_v47  ;;  %1421 = vmatpush.bf16.msra.mxu3 %v12334_v51  ;;  %19198 = vst [vmem:[#allocation11_spill] sm:$0xff] %v12626_v48  ;;  %v12638_v50 = vld [vmem:[%s19015_s1 + $0x1d8] sm:$0xff] }
 0x12a   :  { %1434 = vmatpush.bf16.msrb.mxu0 %v12340_v52  ;;  %1447 = vmatpush.bf16.msrb.mxu1 %v12346_v53  ;;  %19200 = vst [vmem:[#allocation13_spill] sm:$0xff] %v12638_v50 }
 0x12d   :  { %1409 = vmatpush.bf16.msra.mxu2 %v12352_v54  ;;  %1422 = vmatpush.bf16.msra.mxu3 %v12358_v55 }
 0x12e   :  { %1435 = vmatpush.bf16.msrb.mxu0 %v12364_v56  ;;  %1448 = vmatpush.bf16.msrb.mxu1 %v12370_v57 }
 0x131   :  { %1410 = vmatpush.bf16.msra.mxu2 %v12377_v59  ;;  %1423 = vmatpush.bf16.msra.mxu3 %v12383_v62 }
 0x132   :  { %1436 = vmatpush.bf16.msrb.mxu0 %v12392_v60  ;;  %1449 = vmatpush.bf16.msrb.mxu1 %v12398_v25 }
 0x135   :  { %1411 = vmatpush.bf16.msra.mxu2 %v12404_v20  ;;  %1424 = vmatpush.bf16.msra.mxu3 %v12410_v40 }
 0x136   :  { %1437 = vmatpush.bf16.msrb.mxu0 %v12416_v43  ;;  %1450 = vmatpush.bf16.msrb.mxu1 %v12422_v44 }
 0x137   :  { %1339 = vmatmul.bf16.vlgmr.msrb.gmra.mxu2 %v749_v61  ;;  %1352 = vmatmul.bf16.vlgmr.msrb.gmra.mxu3 %v749_v61 }
 0x138   :  { %1365 = vmatmul.bf16.vlgmr.msra.gmra.mxu0 %v749_v61  ;;  %1378 = vmatmul.bf16.vlgmr.msra.gmra.mxu1 %v749_v61  ;;  %v1394_v61 = vld [vmem:[#allocation1 + $0x36] sm:$0xff] }
 0x139   :  { %1412 = vmatpush.bf16.msra.mxu2 %v12428_v39  ;;  %1425 = vmatpush.bf16.msra.mxu3 %v12434_v0 }
 0x13a   :  { %1438 = vmatpush.bf16.msrb.mxu0 %v12440_v1  ;;  %1451 = vmatpush.bf16.msrb.mxu1 %v12446_v2 }
 0x13d   :  { %1413 = vmatpush.bf16.msra.mxu2 %v12452_v10  ;;  %1426 = vmatpush.bf16.msra.mxu3 %v12458_v12 }
 0x13e   :  { %1439 = vmatpush.bf16.msrb.mxu0 %v12464_v21  ;;  %1452 = vmatpush.bf16.msrb.mxu1 %v12470_v13 }
 0x141   :  { %1414 = vmatpush.bf16.msra.mxu2 %v12476_v3  ;;  %1427 = vmatpush.bf16.msra.mxu3 %v12482_v7 }
 0x142   :  { %1440 = vmatpush.bf16.msrb.mxu0 %v12488_v11  ;;  %1453 = vmatpush.bf16.msrb.mxu1 %v12494_v14 }
 0x145   :  { %1415 = vmatpush.bf16.msra.mxu2 %v12500_v16  ;;  %1428 = vmatpush.bf16.msra.mxu3 %v12506_v15 }
 0x146   :  { %1441 = vmatpush.bf16.msrb.mxu0 %v12524_v22  ;;  %1454 = vmatpush.bf16.msrb.mxu1 %v12530_v24 }
 0x148   :  { %1416 = vmatmul.bf16.vlgmr.msra.gmra.mxu2 %v1388_v19  ;;  %1429 = vmatmul.bf16.vlgmr.msra.gmra.mxu3 %v1389_v23  ;;  %v1395_v19 = vld [vmem:[#allocation1 + $0x3f] sm:$0xff]  ;;  %v7815_v23 = vld [vmem:[%s19014_s0 + $0x1a] sm:$0x1] }
 0x149   :  { %1460 = vmatpush.bf16.msrb.mxu2 %v12512_v17  ;;  %1473 = vmatpush.bf16.msrb.mxu3 %v12518_v18  ;;  %1397 = vst [vmem:[#allocation1] ss:$9 sm:$0xff] %v7815_v23  ;;  %v12677_v23 = vld [vmem:[%s19015_s1 + $0x148] sm:$0xff] }
 0x14a   :  { %1486 = vmatpush.bf16.msra.mxu0 %v12536_v26  ;;  %1499 = vmatpush.bf16.msra.mxu1 %v12542_v27  ;;  %19206 = vst [vmem:[#allocation19_spill] sm:$0xff] %v12677_v23 }
 0x14b   :  { %1442 = vmatmul.bf16.vlgmr.msrb.gmra.mxu0 %v1390_v28  ;;  %1455 = vmatmul.bf16.vlgmr.msrb.gmra.mxu1 %v1391_v29  ;;  %v12647_v28 = vld [vmem:[%s19015_s1 + $0x110] sm:$0xff] }
 0x14c   :  { %19201 = vst [vmem:[#allocation14_spill] sm:$0xff] %v12647_v28  ;;  %v12653_v29 = vld [vmem:[%s19015_s1 + $0x150] sm:$0xff] }
 0x14d   :  { %1461 = vmatpush.bf16.msrb.mxu2 %v12548_v30  ;;  %1474 = vmatpush.bf16.msrb.mxu3 %v12554_v31  ;;  %19202 = vst [vmem:[#allocation15_spill] sm:$0xff] %v12653_v29 }
 0x14e   :  { %1487 = vmatpush.bf16.msra.mxu0 %v12560_v32  ;;  %1500 = vmatpush.bf16.msra.mxu1 %v12566_v33 }
 0x151   :  { %1462 = vmatpush.bf16.msrb.mxu2 %v12572_v34  ;;  %1475 = vmatpush.bf16.msrb.mxu3 %v12578_v35 }
 0x152   :  { %1488 = vmatpush.bf16.msra.mxu0 %v12584_v36  ;;  %1501 = vmatpush.bf16.msra.mxu1 %v12590_v37 }
 0x155   :  { %1463 = vmatpush.bf16.msrb.mxu2 %v12596_v38  ;;  %1476 = vmatpush.bf16.msrb.mxu3 %v12602_v41 }
 0x156   :  { %1489 = vmatpush.bf16.msra.mxu0 %v12608_v42  ;;  %1502 = vmatpush.bf16.msra.mxu1 %v12614_v45  ;;  %v7938_v45 = vld [vmem:[%s19017_s3 + $0x2a8] sm:$0xf] }
 0x159   :  { %1464 = vmatpush.bf16.msrb.mxu2 %v12620_v46  ;;  %1477 = vmatpush.bf16.msrb.mxu3 %v12626_v48  ;;  %v12665_v48 = vld [vmem:[%s19015_s1 + $0x1d0] sm:$0xff] }
 0x15a   :  { %1490 = vmatpush.bf16.msra.mxu0 %v12632_v49  ;;  %1503 = vmatpush.bf16.msra.mxu1 %v12638_v50  ;;  %v12659_v49 = vld [vmem:[%s19015_s1 + $0x190] sm:$0xff]  ;;  %19204 = vst [vmem:[#allocation17_spill] sm:$0xff] %v12665_v48 }
 0x15b   :  { %19203 = vst [vmem:[#allocation16_spill] sm:$0xff] %v12659_v49 }
 0x15d   :  { %1465 = vmatpush.bf16.msrb.mxu2 %v12647_v28  ;;  %1478 = vmatpush.bf16.msrb.mxu3 %v12653_v29  ;;  %v12671_v28 = vld [vmem:[%s19015_s1 + $0x108] sm:$0xff] }
 0x15e   :  { %1491 = vmatpush.bf16.msra.mxu0 %v12659_v49  ;;  %1504 = vmatpush.bf16.msra.mxu1 %v12665_v48  ;;  %19205 = vst [vmem:[#allocation18_spill] sm:$0xff] %v12671_v28  ;;  %v12683_v49 = vld [vmem:[%s19015_s1 + $0x188] sm:$0xff] }
 0x15f   :  { %19207 = vst [vmem:[#allocation20_spill] sm:$0xff] %v12683_v49  ;;  %v12689_v29 = vld [vmem:[%s19015_s1 + $0x1c8] sm:$0xff] }
 0x160   :  { %19208 = vst [vmem:[#allocation21_spill] sm:$0xff] %v12689_v29 }
 0x161   :  { %1466 = vmatpush.bf16.msrb.mxu2 %v12671_v28  ;;  %1479 = vmatpush.bf16.msrb.mxu3 %v12677_v23  ;;  %v12695_v28 = vld [vmem:[%s19015_s1 + $0x100] sm:$0xff] }
 0x162   :  { %1492 = vmatpush.bf16.msra.mxu0 %v12683_v49  ;;  %1505 = vmatpush.bf16.msra.mxu1 %v12689_v29  ;;  %19209 = vst [vmem:[#allocation22_spill] sm:$0xff] %v12695_v28  ;;  %v12701_v23 = vld [vmem:[%s19015_s1 + $0x140] sm:$0xff]  ;;  %v12707_v49 = vld [vmem:[%s19015_s1 + $0x238] sm:$0xff] }
 0x163   :  { %19210 = vst [vmem:[#allocation23_spill] sm:$0xff] %v12701_v23  ;;  %v12713_v29 = vld [vmem:[%s19015_s1 + $0x180] sm:$0xff] }
 0x164   :  { %19211 = vst [vmem:[#allocation24_spill] sm:$0xff] %v12707_v49 }
 0x165   :  { %1467 = vmatpush.bf16.msrb.mxu2 %v12695_v28  ;;  %1480 = vmatpush.bf16.msrb.mxu3 %v12701_v23  ;;  %19212 = vst [vmem:[#allocation25_spill] sm:$0xff] %v12713_v29  ;;  %v12719_v28 = vld [vmem:[%s19015_s1 + $0x1c0] sm:$0xff]  ;;  %v12725_v23 = vld [vmem:[%s19015_s1 + $0x230] sm:$0xff] }
 0x166   :  { %1493 = vmatpush.bf16.msra.mxu0 %v12713_v29  ;;  %19213 = vst [vmem:[#allocation26_spill] sm:$0xff] %v12719_v28  ;;  %1506 = vmatpush.bf16.msra.mxu1 %v12719_v28  ;;  %v12731_v29 = vld [vmem:[%s19015_s1 + $0x228] sm:$0xff] }
 0x167   :  { %19214 = vst [vmem:[#allocation27_spill] sm:$0xff] %v12725_v23 }
 0x168   :  { %1468 = vmatmul.bf16.vlgmr.msrb.gmra.mxu2 %v1392_v58  ;;  %1481 = vmatmul.bf16.vlgmr.msrb.gmra.mxu3 %v1393_v63  ;;  %19215 = vst [vmem:[#allocation28_spill] sm:$0xff] %v12731_v29  ;;  %v1398_v58 = vld [vmem:[#allocation1] sm:$0xff] }
 0x169   :  { %1512 = vmatpush.bf16.msra.mxu2 %v12707_v49  ;;  %1494 = vmatmul.bf16.vlgmr.msra.gmra.mxu0 %v1394_v61  ;;  %v7962_v63 = vld [vmem:[%s19017_s3 + $0x2e0] sm:$0xf]  ;;  %v10376_v61 = vld [vmem:[%s19017_s3 + $0x2ec] sm:$0xf0] }
 0x16a   :  { %1507 = vmatmul.bf16.vlgmr.msra.gmra.mxu1 %v1395_v19 }
 0x16d   :  { %1513 = vmatpush.bf16.msra.mxu2 %v12725_v23 }
 0x171   :  { %1514 = vmatpush.bf16.msra.mxu2 %v12731_v29  ;;  %v10368_v29 = vld [vmem:[%s19017_s3 + $0x2ac] sm:$0xf0] }
 0x175   :  { %1515 = vmatpush.bf16.msra.mxu2 %v11828_v4  ;;  %v7946_v4 = vld [vmem:[%s19017_s3 + $0x2c0] sm:$0xf] }
 0x179   :  { %1516 = vmatpush.bf16.msra.mxu2 %v11837_v5  ;;  %v7963_v5 = vor.u32 %v10376_v61, %v7962_v63 }
 0x17b   :  { %1720 = vmatpush.bf16.msra.mxu3 %v7963_v5  ;;  %v7972_v5 = vld [vmem:[%s19017_s3 + $0x2f8] sm:$0xf0] }
 0x17d   :  { %1517 = vmatpush.bf16.msra.mxu2 %v11846_v6  ;;  %v10372_v6 = vld [vmem:[%s19017_s3 + $0x2cc] sm:$0xf0] }
 0x17e   :  { %v7947_v19 = vor.u32 %v10372_v6, %v7946_v4  ;;  %v10375_v4 = vld [vmem:[%s19017_s3 + $0x2ec] sm:$0xf]  ;;  %v7914_v6 = vld [vmem:[%s19017_s3 + $0x280] sm:$0xf] }
 0x180   :  { %1721 = vmatpush.bf16.msra.mxu3 %v7947_v19  ;;  %v10364_v19 = vld [vmem:[%s19017_s3 + $0x28c] sm:$0xf0] }
 0x181   :  { %1518 = vmatpush.bf16.msra.mxu2 %v11855_v8 }
 0x185   :  { %1519 = vmatpush.bf16.msra.mxu2 %v11864_v9 }
 0x188   :  { %1520 = vmatmul.bf16.vlgmr.msra.gmra.mxu2 %v1398_v58  ;;  %v7930_v58 = vld [vmem:[%s19017_s3 + $0x2a0] sm:$0xf] }
 0x189   :  { %v7931_v23 = vor.u32 %v10368_v29, %v7930_v58  ;;  %v7975_v29 = vor.u32 %v10375_v4, %v7972_v5  ;;  %v7915_v58 = vor.u32 %v10364_v19, %v7914_v6  ;;  %v7970_v4 = vld [vmem:[%s19017_s3 + $0x2e8] sm:$0xf]  ;;  %v10377_v5 = vld [vmem:[%s19017_s3 + $0x2f4] sm:$0xf0]  ;;  %v10371_v6 = vld [vmem:[%s19017_s3 + $0x2cc] sm:$0xf] }
 0x18a   :  { %v7971_v50 = vor.u32 %v10377_v5, %v7970_v4  ;;  %v7954_v5 = vld [vmem:[%s19017_s3 + $0x2c8] sm:$0xf] }
 0x18b   :  { %1722 = vmatpush.bf16.msra.mxu3 %v7931_v23  ;;  %v7964_v23 = vld [vmem:[%s19017_s3 + $0x2f0] sm:$0xf0]  ;;  %1759 = vmatpush.bf16.msrb.mxu2 %v7975_v29  ;;  %v7956_v29 = vld [vmem:[%s19017_s3 + $0x2d8] sm:$0xf0] }
 0x18c   :  { %1746 = vmatpush.bf16.msrb.mxu1 %v7971_v50  ;;  %v7940_v50 = vld [vmem:[%s19017_s3 + $0x2b8] sm:$0xf0] }
 0x18f   :  { %1723 = vmatpush.bf16.msra.mxu3 %v7915_v58  ;;  %v7898_v58 = vld [vmem:[%s19017_s3 + $0x260] sm:$0xf] }
 0x1a5   :  { %v1154_v8 = vpop.f32.mrf.mxu0  ;;  %v1167_v9 = vpop.f32.mrf.mxu1 }
 0x1aa   :  { %v12757_v49 = vpop.f32.mrf.mxu2  ;;  %v12759_v63 = vpop.f32.mrf.mxu3 }
 0x1ad   :  { %v1156_v61 = vpop.f32.mrf.mxu0  ;;  %v1169_v28 = vpop.f32.mrf.mxu1 }
 0x1ae   :  { %v10374_v28 = vld [vmem:[%s19017_s3 + $0x2e4] sm:$0xf] }
 0x1af   :  { %v7967_v61 = vor.u32 %v10374_v28, %v7964_v23  ;;  %v10360_v28 = vld [vmem:[%s19017_s3 + $0x26c] sm:$0xf0]  ;;  %v7959_v23 = vor.u32 %v10371_v6, %v7956_v29  ;;  %v10367_v6 = vld [vmem:[%s19017_s3 + $0x2ac] sm:$0xf] }
 0x1b0   :  { %v7899_v46 = vor.u32 %v10360_v28, %v7898_v58 }
 0x1b1   :  { %1733 = vmatpush.bf16.msrb.mxu0 %v7967_v61  ;;  %v7948_v61 = vld [vmem:[%s19017_s3 + $0x2d0] sm:$0xf0]  ;;  %1760 = vmatpush.bf16.msrb.mxu2 %v7959_v23  ;;  %v7943_v23 = vor.u32 %v10367_v6, %v7940_v50  ;;  %v10362_v50 = vld [vmem:[%s19017_s3 + $0x284] sm:$0xf] }
 0x1b2   :  { %v1130_v19 = vpop.f32.mrf.mxu2  ;;  %v1143_v48 = vpop.f32.mrf.mxu3  ;;  %1724 = vmatpush.bf16.msra.mxu3 %v7899_v46 }
 0x1b3   :  { %v10370_v48 = vld [vmem:[%s19017_s3 + $0x2c4] sm:$0xf]  ;;  %v10373_v19 = vld [vmem:[%s19017_s3 + $0x2d4] sm:$0xf0] }
 0x1b4   :  { %v7951_v4 = vor.u32 %v10370_v48, %v7948_v61  ;;  %v7955_v28 = vor.u32 %v10373_v19, %v7954_v5  ;;  %v7882_v48 = vld [vmem:[%s19017_s3 + $0x240] sm:$0xf]  ;;  %v10356_v61 = vld [vmem:[%s19017_s3 + $0x24c] sm:$0xf0]  ;;  %v10366_v5 = vld [vmem:[%s19017_s3 + $0x2a4] sm:$0xf] }
 0x1b5   :  { %v1366_v29 = vpop.f32.mrf.mxu0  ;;  %v1379_v58 = vpop.f32.mrf.mxu1  ;;  %v7883_v46 = vor.u32 %v10356_v61, %v7882_v48  ;;  %v7932_v19 = vld [vmem:[%s19017_s3 + $0x2b0] sm:$0xf0]  ;;  %1761 = vmatpush.bf16.msrb.mxu2 %v7943_v23 }
 0x1b6   :  { %v12821_v42 = vadd.f32 %v1366_v29, %v1154_v8  ;;  %v12823_v41 = vadd.f32 %v1379_v58, %v1167_v9  ;;  %1734 = vmatpush.bf16.msrb.mxu0 %v7951_v4  ;;  %v7935_v38 = vor.u32 %v10366_v5, %v7932_v19  ;;  %v10369_v8 = vld [vmem:[%s19017_s3 + $0x2b4] sm:$0xf0]  ;;  %v10363_v9 = vld [vmem:[%s19017_s3 + $0x28c] sm:$0xf]  ;;  %v7924_v4 = vld [vmem:[%s19017_s3 + $0x298] sm:$0xf0]  ;;  %1747 = vmatpush.bf16.msrb.mxu1 %v7955_v28 }
 0x1b7   :  { %v7939_v6 = vor.u32 %v10369_v8, %v7938_v45  ;;  %v7866_v29 = vld [vmem:[%s19017_s3 + $0x220] sm:$0xf]  ;;  %v10352_v58 = vld [vmem:[%s19017_s3 + $0x22c] sm:$0xf0]  ;;  %1725 = vmatpush.bf16.msra.mxu3 %v7883_v46  ;;  %v7927_v48 = vor.u32 %v10363_v9, %v7924_v4  ;;  %v7916_v45 = vld [vmem:[%s19017_s3 + $0x290] sm:$0xf0] }
 0x1b8   :  { %19216 = vst [vmem:[#allocation29_spill] sm:$0xff] %v12821_v42  ;;  %v7867_v61 = vor.u32 %v10352_v58, %v7866_v29  ;;  %v7919_v19 = vor.u32 %v10362_v50, %v7916_v45  ;;  %v7850_v58 = vld [vmem:[%s19017_s3 + $0x200] sm:$0xf]  ;;  %v10348_v50 = vld [vmem:[%s19017_s3 + $0x20c] sm:$0xf0] }
 0x1b9   :  { %19217 = vst [vmem:[#allocation30_spill] sm:$0xff] %v12823_v41  ;;  %1762 = vmatpush.bf16.msrb.mxu2 %v7927_v48  ;;  %v10358_v45 = vld [vmem:[%s19017_s3 + $0x264] sm:$0xf] }
 0x1ba   :  { %v1340_v28 = vpop.f32.mrf.mxu2  ;;  %v1353_v5 = vpop.f32.mrf.mxu3  ;;  %1735 = vmatpush.bf16.msrb.mxu0 %v7935_v38  ;;  %1748 = vmatpush.bf16.msrb.mxu1 %v7939_v6  ;;  %v7922_v38 = vld [vmem:[%s19017_s3 + $0x288] sm:$0xf]  ;;  %v7908_v6 = vld [vmem:[%s19017_s3 + $0x278] sm:$0xf0] }
 0x1bb   :  { %v12856_v8 = vadd.f32 %v1340_v28, %v12757_v49  ;;  %v12859_v41 = vadd.f32 %v1353_v5, %v12759_v63  ;;  %1726 = vmatpush.bf16.msra.mxu3 %v7867_v61  ;;  %v10365_v49 = vld [vmem:[%s19017_s3 + $0x294] sm:$0xf0]  ;;  %v7851_v61 = vor.u32 %v10348_v50, %v7850_v58  ;;  %v7900_v28 = vld [vmem:[%s19017_s3 + $0x270] sm:$0xf0] }
 0x1bc   :  { %v7923_v63 = vor.u32 %v10365_v49, %v7922_v38  ;;  %v10355_v38 = vld [vmem:[%s19017_s3 + $0x24c] sm:$0xf]  ;;  %v7884_v58 = vld [vmem:[%s19017_s3 + $0x250] sm:$0xf0] }
 0x1bd   :  { %19218 = vst [vmem:[#allocation31_spill] sm:$0xff] %v12856_v8  ;;  %v1368_v42 = vpop.f32.mrf.mxu0  ;;  %v1381_v23 = vpop.f32.mrf.mxu1 }
 0x1be   :  { %1736 = vmatpush.bf16.msrb.mxu0 %v7919_v19  ;;  %v10359_v42 = vld [vmem:[%s19017_s3 + $0x26c] sm:$0xf]  ;;  %1749 = vmatpush.bf16.msrb.mxu1 %v7923_v63  ;;  %v7903_v23 = vor.u32 %v10358_v45, %v7900_v28  ;;  %v7890_v45 = vld [vmem:[%s19017_s3 + $0x248] sm:$0xf]  ;;  %v10357_v28 = vld [vmem:[%s19017_s3 + $0x254] sm:$0xf0] }
 0x1bf   :  { %v7911_v48 = vor.u32 %v10359_v42, %v7908_v6  ;;  %1727 = vmatpush.bf16.msra.mxu3 %v7851_v61  ;;  %v7892_v42 = vld [vmem:[%s19017_s3 + $0x258] sm:$0xf0]  ;;  %v10354_v6 = vld [vmem:[%s19017_s3 + $0x244] sm:$0xf] }
 0x1c0   :  { %v7895_v63 = vor.u32 %v10355_v38, %v7892_v42  ;;  %v7887_v61 = vor.u32 %v10354_v6, %v7884_v58  ;;  %v10350_v38 = vld [vmem:[%s19017_s3 + $0x224] sm:$0xf]  ;;  %v10353_v58 = vld [vmem:[%s19017_s3 + $0x234] sm:$0xf0] }
 0x1c1   :  { %1763 = vmatpush.bf16.msrb.mxu2 %v7911_v48 }
 0x1c2   :  { %v1342_v46 = vpop.f32.mrf.mxu2  ;;  %v1355_v9 = vpop.f32.mrf.mxu3  ;;  %1737 = vmatpush.bf16.msrb.mxu0 %v7903_v23  ;;  %v10351_v23 = vld [vmem:[%s19017_s3 + $0x22c] sm:$0xf] }
 0x1c3   :  { %v7906_v46 = vld [vmem:[%s19017_s3 + $0x268] sm:$0xf]  ;;  %v10361_v9 = vld [vmem:[%s19017_s3 + $0x274] sm:$0xf0]  ;;  %1801 = vmatpush.bf16.msrb.mxu3 %v12328_v47 }
 0x1c4   :  { %v7907_v49 = vor.u32 %v10361_v9, %v7906_v46  ;;  %v7891_v46 = vor.u32 %v10357_v28, %v7890_v45  ;;  %v7876_v9 = vld [vmem:[%s19017_s3 + $0x238] sm:$0xf0] }
 0x1c5   :  { %1764 = vmatpush.bf16.msrb.mxu2 %v7895_v63  ;;  %v7879_v42 = vor.u32 %v10351_v23, %v7876_v9  ;;  %v7874_v63 = vld [vmem:[%s19017_s3 + $0x228] sm:$0xf] }
 0x1c6   :  { %1750 = vmatpush.bf16.msrb.mxu1 %v7907_v49  ;;  %v7868_v49 = vld [vmem:[%s19017_s3 + $0x230] sm:$0xf0]  ;;  %1738 = vmatpush.bf16.msrb.mxu0 %v7887_v61  ;;  %v7875_v23 = vor.u32 %v10353_v58, %v7874_v63  ;;  %v19238_v63 = vld [vmem:[#allocation23_spill] sm:$0xff]  ;;  %v19239_v58 = vld [vmem:[#allocation25_spill] sm:$0xff] }
 0x1c7   :  { %1802 = vmatpush.bf16.msrb.mxu3 %v12352_v54  ;;  %v7871_v6 = vor.u32 %v10350_v38, %v7868_v49  ;;  %v10346_v54 = vld [vmem:[%s19017_s3 + $0x204] sm:$0xf]  ;;  %v7852_v61 = vld [vmem:[%s19017_s3 + $0x210] sm:$0xf0]  ;;  %v7858_v38 = vld [vmem:[%s19017_s3 + $0x208] sm:$0xf] }
 0x1c8   :  { %v12861_v4 = vpop.f32.mrf.mxu0  ;;  %v12863_v29 = vpop.f32.mrf.mxu1  ;;  %v10349_v49 = vld [vmem:[%s19017_s3 + $0x214] sm:$0xf0]  ;;  %v7855_v47 = vor.u32 %v10346_v54, %v7852_v61  ;;  %v13039_v54 = vld [vmem:[%s19015_s1 + $0x220] sm:$0xff] }
 0x1c9   :  { %1765 = vmatpush.bf16.msrb.mxu2 %v7879_v42  ;;  %v7859_v8 = vor.u32 %v10349_v49, %v7858_v38  ;;  %v19236_v42 = vld [vmem:[#allocation26_spill] sm:$0xff]  ;;  %v8124_v38 = vld [vmem:[%s19017_s3 + $0x3e0] sm:$0xf] }
 0x1ca   :  { %1751 = vmatpush.bf16.msrb.mxu1 %v7891_v46  ;;  %1739 = vmatpush.bf16.msrb.mxu0 %v7871_v6  ;;  %v19235_v46 = vld [vmem:[#allocation22_spill] sm:$0xff]  ;;  %v19237_v6 = vld [vmem:[#allocation24_spill] sm:$0xff] }
 0x1cb   :  { %v12889_v5 = vpop.f32.mrf.mxu2  ;;  %v12891_v19 = vpop.f32.mrf.mxu3  ;;  %1803 = vmatpush.bf16.msrb.mxu3 %v12377_v59  ;;  %v13045_v61 = vld [vmem:[%s19015_s1 + $0x218] sm:$0xff]  ;;  %v10408_v49 = vld [vmem:[%s19017_s3 + $0x3ec] sm:$0xf0] }
 0x1ce   :  { %1752 = vmatpush.bf16.msrb.mxu1 %v7875_v23  ;;  %1740 = vmatpush.bf16.msrb.mxu0 %v7855_v47  ;;  %v13063_v23 = vld [vmem:[%s19015_s1 + $0x200] sm:$0xff] }
 0x1cf   :  { %1804 = vmatpush.bf16.msrb.mxu3 %v12404_v20 }
 0x1d0   :  { %v1445_v50 = vpop.f32.mrf.mxu0  ;;  %v1458_v48 = vpop.f32.mrf.mxu1 }
 0x1d1   :  { %v10347_v50 = vld [vmem:[%s19017_s3 + $0x20c] sm:$0xf]  ;;  %v7860_v48 = vld [vmem:[%s19017_s3 + $0x218] sm:$0xf0] }
 0x1d2   :  { %v7863_v9 = vor.u32 %v10347_v50, %v7860_v48  ;;  %1814 = vmatpush.bf16.msra.mxu0 %v12334_v51  ;;  %1753 = vmatpush.bf16.msrb.mxu1 %v7859_v8  ;;  %v12974_v51 = vld [vmem:[%s19016_s2] ss:$0 sm:$0xff]  ;;  %v19230_v8 = vld [vmem:[#allocation16_spill] sm:$0xff] }
 0x1d3   :  { %v1419_v45 = vpop.f32.mrf.mxu2  ;;  %v1432_v28 = vpop.f32.mrf.mxu3  ;;  %1805 = vmatpush.bf16.msrb.mxu3 %v12428_v39  ;;  %v19240_v50 = vld [vmem:[#allocation27_spill] sm:$0xff]  ;;  %v19241_v48 = vld [vmem:[#allocation28_spill] sm:$0xff] }
 0x1d4   :  { %1766 = vmatpush.bf16.msrb.mxu2 %v7863_v9  ;;  %v13051_v45 = vld [vmem:[%s19015_s1 + $0x210] sm:$0xff]  ;;  %v13057_v28 = vld [vmem:[%s19015_s1 + $0x208] sm:$0xff] }
 0x1d6   :  { %1827 = vmatpush.bf16.msra.mxu1 %v12340_v52  ;;  %1815 = vmatpush.bf16.msra.mxu0 %v12358_v55  ;;  %v1418_v52 = vadd.f32 %v12974_v51, %v12889_v5  ;;  %v19233_v5 = vld [vmem:[#allocation19_spill] sm:$0xff] }
 0x1d7   :  { %1806 = vmatpush.bf16.msrb.mxu3 %v12452_v10 }
 0x1d8   :  { %1840 = vmatpush.bf16.msra.mxu2 %v12346_v53 }
 0x1da   :  { %1828 = vmatpush.bf16.msra.mxu1 %v12364_v56  ;;  %1816 = vmatpush.bf16.msra.mxu0 %v12383_v62 }
 0x1db   :  { %1807 = vmatpush.bf16.msrb.mxu3 %v12476_v3 }
 0x1dc   :  { %1841 = vmatpush.bf16.msra.mxu2 %v12370_v57  ;;  %v1431_v57 = vadd.f32 %v12891_v19, %v1418_v52  ;;  %v19234_v19 = vld [vmem:[#allocation20_spill] sm:$0xff]  ;;  %v10409_v52 = vld [vmem:[%s19017_s3 + $0x3f4] sm:$0xf0] }
 0x1de   :  { %1829 = vmatpush.bf16.msra.mxu1 %v12392_v60  ;;  %1817 = vmatpush.bf16.msra.mxu0 %v12410_v40  ;;  %v1444_v60 = vadd.f32 %v12861_v4, %v1431_v57  ;;  %v19231_v4 = vld [vmem:[#allocation18_spill] sm:$0xff] }
 0x1df   :  { %1808 = vmatpush.bf16.msrb.mxu3 %v12500_v16  ;;  %v10404_v57 = vld [vmem:[%s19017_s3 + $0x3cc] sm:$0xf0] }
 0x1e0   :  { %1842 = vmatpush.bf16.msra.mxu2 %v12398_v25  ;;  %v1457_v40 = vadd.f32 %v12863_v29, %v1444_v60  ;;  %v19232_v29 = vld [vmem:[#allocation21_spill] sm:$0xff] }
 0x1e2   :  { %1830 = vmatpush.bf16.msra.mxu1 %v12416_v43  ;;  %1818 = vmatpush.bf16.msra.mxu0 %v12434_v0 }
 0x1e4   :  { %1843 = vmatpush.bf16.msra.mxu2 %v12422_v44  ;;  %v7976_v44 = vld [vmem:[%s19014_s0 + $0x1b] sm:$0xff] }
 0x1e5   :  { %1780 = vst [vmem:[#allocation1] ss:$9 sm:$0xff] %v7976_v44 }
 0x1e6   :  { %v1495_v47 = vpop.f32.mrf.mxu0  ;;  %1831 = vmatpush.bf16.msra.mxu1 %v12440_v1  ;;  %1819 = vmatpush.bf16.msra.mxu0 %v12458_v12 }
 0x1e7   :  { %v1508_v53 = vpop.f32.mrf.mxu1 }
 0x1e8   :  { %1844 = vmatpush.bf16.msra.mxu2 %v12446_v2 }
 0x1ea   :  { %1832 = vmatpush.bf16.msra.mxu1 %v12464_v21  ;;  %1820 = vmatpush.bf16.msra.mxu0 %v12482_v7 }
 0x1eb   :  { %v1469_v55 = vpop.f32.mrf.mxu2  ;;  %v1482_v56 = vpop.f32.mrf.mxu3 }
 0x1ec   :  { %1845 = vmatpush.bf16.msra.mxu2 %v12470_v13  ;;  %v1470_v43 = vadd.f32 %v1469_v55, %v1457_v40  ;;  %v1781_v3 = vld [vmem:[#allocation1] sm:$0xff]  ;;  %v1782_v7 = vld [vmem:[#allocation1 + $0x9] sm:$0xff]  ;;  %v8126_v40 = vld [vmem:[%s19017_s3 + $0x3f0] sm:$0xf0] }
 0x1ed   :  { %v1784_v16 = vld [vmem:[#allocation1 + $0x1b] sm:$0xff] }
 0x1ee   :  { %v1497_v59 = vpop.f32.mrf.mxu0  ;;  %1833 = vmatpush.bf16.msra.mxu1 %v12488_v11  ;;  %1821 = vmatpush.bf16.msra.mxu0 %v12506_v15  ;;  %v1483_v39 = vadd.f32 %v1482_v56, %v1470_v43  ;;  %v19219_v11 = vld [vmem:[#allocation6_spill] sm:$0xff]  ;;  %v8108_v55 = vld [vmem:[%s19017_s3 + $0x3c0] sm:$0xf]  ;;  %v8116_v43 = vld [vmem:[%s19017_s3 + $0x3c8] sm:$0xf] }
 0x1ef   :  { %v1510_v62 = vpop.f32.mrf.mxu1  ;;  %v1783_v15 = vld [vmem:[#allocation1 + $0x12] sm:$0xff]  ;;  %v10407_v59 = vld [vmem:[%s19017_s3 + $0x3ec] sm:$0xf]  ;;  %v8109_v60 = vor.u32 %v10404_v57, %v8108_v55 }
 0x1f0   :  { %1846 = vmatpush.bf16.msra.mxu2 %v12494_v14  ;;  %v1496_v0 = vadd.f32 %v1495_v47, %v1483_v39  ;;  %v19220_v14 = vld [vmem:[#allocation9_spill] sm:$0xff]  ;;  %v8125_v47 = vor.u32 %v10408_v49, %v8124_v38  ;;  %v8134_v62 = vld [vmem:[%s19017_s3 + $0x3f8] sm:$0xf0]  ;;  %v10405_v39 = vld [vmem:[%s19017_s3 + $0x3d4] sm:$0xf0] }
 0x1f1   :  { %v10391_v38 = vld [vmem:[%s19017_s3 + $0x36c] sm:$0xf]  ;;  %v8070_v49 = vld [vmem:[%s19017_s3 + $0x378] sm:$0xf0]  ;;  %v8062_v57 = vld [vmem:[%s19017_s3 + $0x370] sm:$0xf0] }
 0x1f2   :  { %1834 = vmatpush.bf16.msra.mxu1 %v12524_v22  ;;  %v1509_v1 = vadd.f32 %v1508_v53, %v1496_v0  ;;  %v19223_v22 = vld [vmem:[#allocation10_spill] sm:$0xff]  ;;  %v8132_v53 = vld [vmem:[%s19017_s3 + $0x3e8] sm:$0xf]  ;;  %v8092_v0 = vld [vmem:[%s19017_s3 + $0x3a0] sm:$0xf] }
 0x1f3   :  { %v1471_v25 = vpop.f32.mrf.mxu2  ;;  %v1484_v20 = vpop.f32.mrf.mxu3  ;;  %v8133_v56 = vor.u32 %v10409_v52, %v8132_v53 }
 0x1f4   :  { %1847 = vmatpush.bf16.msra.mxu2 %v12530_v24  ;;  %v19224_v24 = vld [vmem:[#allocation13_spill] sm:$0xff]  ;;  %v8137_v25 = vor.u32 %v10407_v59, %v8134_v62  ;;  %v10406_v20 = vld [vmem:[%s19017_s3 + $0x3e4] sm:$0xf]  ;;  %v10389_v62 = vld [vmem:[%s19017_s3 + $0x354] sm:$0xf0] }
 0x1f5   :  { %v8129_v44 = vor.u32 %v10406_v20, %v8126_v40  ;;  %v8052_v59 = vld [vmem:[%s19017_s3 + $0x348] sm:$0xf]  ;;  %v8028_v20 = vld [vmem:[%s19017_s3 + $0x320] sm:$0xf]  ;;  %v10384_v40 = vld [vmem:[%s19017_s3 + $0x32c] sm:$0xf0] }
 0x20b   :  { %v1521_v2 = vpop.f32.mrf.mxu2 }
 0x20c   :  { %v1522_v10 = vadd.f32 %v1521_v2, %v1509_v1  ;;  %v10400_v1 = vld [vmem:[%s19017_s3 + $0x3ac] sm:$0xf0]  ;;  %v8117_v2 = vor.u32 %v10405_v39, %v8116_v43  ;;  %v10387_v43 = vld [vmem:[%s19017_s3 + $0x34c] sm:$0xf]  ;;  %v8054_v39 = vld [vmem:[%s19017_s3 + $0x358] sm:$0xf0] }
 0x20e   :  { %v1525_v12 = vmax.f32 %v1522_v10, 0.0  ;;  %v10403_v10 = vld [vmem:[%s19017_s3 + $0x3cc] sm:$0xf] }
 0x210   :  { %v1526_v21 = vpack.c.bf16 %v1525_v12, %v1525_v12  ;;  %v8118_v12 = vld [vmem:[%s19017_s3 + $0x3d8] sm:$0xf0] }
 0x212   :  { %1728 = vmatmul.bf16.vlgmr.msra.gmra.mxu3 %v1526_v21  ;;  %1741 = vmatmul.bf16.vlgmr.msrb.gmra.mxu0 %v1526_v21 }
 0x213   :  { %1754 = vmatmul.bf16.vlgmr.msrb.gmra.mxu1 %v1526_v21  ;;  %1767 = vmatmul.bf16.vlgmr.msrb.gmra.mxu2 %v1526_v21  ;;  %v1523_v13 = vpop.f32.mrf.mxu2  ;;  %v8121_v21 = vor.u32 %v10403_v10, %v8118_v12  ;;  %v19243_v10 = vld [vmem:[#allocation31_spill] sm:$0xff] }
 0x214   :  { %1853 = vmatpush.bf16.msra.mxu3 %v12512_v17  ;;  %1892 = vmatpush.bf16.msrb.mxu2 %v12542_v27  ;;  %v19221_v17 = vld [vmem:[#allocation7_spill] sm:$0xff]  ;;  %v19226_v27 = vld [vmem:[#allocation12_spill] sm:$0xff]  ;;  %v8093_v13 = vor.u32 %v10400_v1, %v8092_v0  ;;  %v8057_v0 = vor.u32 %v10387_v43, %v8054_v39  ;;  %v8029_v1 = vor.u32 %v10384_v40, %v8028_v20 }
 0x215   :  { %1866 = vmatpush.bf16.msrb.mxu0 %v12518_v18  ;;  %1879 = vmatpush.bf16.msrb.mxu1 %v12536_v26  ;;  %v19222_v18 = vld [vmem:[#allocation8_spill] sm:$0xff]  ;;  %v19225_v26 = vld [vmem:[#allocation11_spill] sm:$0xff] }
 0x216   :  { %v13328_v20 = vld [vmem:[%s19015_s1 + $0xa8] sm:$0xff]  ;;  %v13334_v40 = vld [vmem:[%s19015_s1 + $0x20] sm:$0xff] }
 0x217   :  { %v13340_v43 = vld [vmem:[%s19015_s1 + $0xe8] sm:$0xff]  ;;  %v13352_v39 = vld [vmem:[%s19015_s1 + $0xa0] sm:$0xff] }
 0x218   :  { %1854 = vmatpush.bf16.msra.mxu3 %v12548_v30  ;;  %1893 = vmatpush.bf16.msrb.mxu2 %v12566_v33  ;;  %v1785_v30 = vld [vmem:[#allocation1 + $0x24] sm:$0xff]  ;;  %v1787_v33 = vld [vmem:[#allocation1 + $0x36] sm:$0xff] }
 0x219   :  { %1867 = vmatpush.bf16.msrb.mxu0 %v12554_v31  ;;  %1880 = vmatpush.bf16.msrb.mxu1 %v12560_v32  ;;  %v1788_v31 = vld [vmem:[#allocation1 + $0x3f] sm:$0xff]  ;;  %v1786_v32 = vld [vmem:[#allocation1 + $0x2d] sm:$0xff] }
 0x21c   :  { %1855 = vmatpush.bf16.msra.mxu3 %v12572_v34  ;;  %1894 = vmatpush.bf16.msrb.mxu2 %v12590_v37  ;;  %v7977_v34 = vld [vmem:[%s19014_s0 + $0x23] sm:$0x1]  ;;  %v19229_v37 = vld [vmem:[#allocation15_spill] sm:$0xff] }
 0x21d   :  { %1868 = vmatpush.bf16.msrb.mxu0 %v12578_v35  ;;  %1881 = vmatpush.bf16.msrb.mxu1 %v12584_v36  ;;  %v19227_v35 = vld [vmem:[#allocation14_spill] sm:$0xff]  ;;  %v19228_v36 = vld [vmem:[#allocation17_spill] sm:$0xff]  ;;  %1790 = vst [vmem:[#allocation1] ss:$9 sm:$0xff] %v7977_v34 }
 0x21e   :  { %v10397_v34 = vld [vmem:[%s19017_s3 + $0x394] sm:$0xf0] }
 0x220   :  { %1856 = vmatpush.bf16.msra.mxu3 %v19219_v11  ;;  %1895 = vmatpush.bf16.msrb.mxu2 %v19220_v14  ;;  %v8100_v11 = vld [vmem:[%s19017_s3 + $0x3a8] sm:$0xf] }
 0x221   :  { %1869 = vmatpush.bf16.msrb.mxu0 %v19221_v17  ;;  %1882 = vmatpush.bf16.msrb.mxu1 %v19222_v18  ;;  %v10396_v17 = vld [vmem:[%s19017_s3 + $0x38c] sm:$0xf0] }
 0x222   :  { %1809 = vmatmul.bf16.vlgmr.msrb.gmra.mxu3 %v1781_v3  ;;  %1822 = vmatmul.bf16.vlgmr.msra.gmra.mxu0 %v1782_v7  ;;  %v10402_v3 = vld [vmem:[%s19017_s3 + $0x3c4] sm:$0xf]  ;;  %v8110_v7 = vld [vmem:[%s19017_s3 + $0x3d0] sm:$0xf0] }
 0x223   :  { %1848 = vmatmul.bf16.vlgmr.msra.gmra.mxu2 %v1784_v16  ;;  %1835 = vmatmul.bf16.vlgmr.msra.gmra.mxu1 %v1783_v15  ;;  %v8113_v14 = vor.u32 %v10402_v3, %v8110_v7  ;;  %v10401_v16 = vld [vmem:[%s19017_s3 + $0x3b4] sm:$0xf0]  ;;  %v8076_v15 = vld [vmem:[%s19017_s3 + $0x380] sm:$0xf] }
 0x224   :  { %1857 = vmatpush.bf16.msra.mxu3 %v19223_v22  ;;  %1896 = vmatpush.bf16.msrb.mxu2 %v19224_v24  ;;  %v1791_v9 = vld [vmem:[#allocation1] sm:$0xff]  ;;  %v8101_v18 = vor.u32 %v10401_v16, %v8100_v11  ;;  %v8077_v22 = vor.u32 %v10396_v17, %v8076_v15  ;;  %v10399_v24 = vld [vmem:[%s19017_s3 + $0x3ac] sm:$0xf]  ;;  %v8036_v16 = vld [vmem:[%s19017_s3 + $0x328] sm:$0xf] }
 0x225   :  { %1870 = vmatpush.bf16.msrb.mxu0 %v19225_v26  ;;  %1883 = vmatpush.bf16.msrb.mxu1 %v19226_v27  ;;  %v8102_v26 = vld [vmem:[%s19017_s3 + $0x3b8] sm:$0xf0]  ;;  %v10386_v11 = vld [vmem:[%s19017_s3 + $0x344] sm:$0xf] }
 0x226   :  { %v8105_v27 = vor.u32 %v10399_v24, %v8102_v26  ;;  %v10380_v24 = vld [vmem:[%s19017_s3 + $0x30c] sm:$0xf0] }
 0x228   :  { %1858 = vmatpush.bf16.msra.mxu3 %v19227_v35  ;;  %1897 = vmatpush.bf16.msrb.mxu2 %v19228_v36  ;;  %v8060_v35 = vld [vmem:[%s19017_s3 + $0x360] sm:$0xf]  ;;  %v10392_v36 = vld [vmem:[%s19017_s3 + $0x36c] sm:$0xf0] }
 0x229   :  { %1871 = vmatpush.bf16.msrb.mxu0 %v19229_v37  ;;  %1884 = vmatpush.bf16.msrb.mxu1 %v19230_v8  ;;  %v8061_v8 = vor.u32 %v10392_v36, %v8060_v35  ;;  %v8020_v35 = vld [vmem:[%s19017_s3 + $0x308] sm:$0xf] }
 0x22c   :  { %1859 = vmatpush.bf16.msra.mxu3 %v19231_v4  ;;  %1898 = vmatpush.bf16.msrb.mxu2 %v19232_v29  ;;  %v10395_v4 = vld [vmem:[%s19017_s3 + $0x38c] sm:$0xf]  ;;  %v8086_v29 = vld [vmem:[%s19017_s3 + $0x398] sm:$0xf0] }
 0x22d   :  { %1872 = vmatpush.bf16.msrb.mxu0 %v19233_v5  ;;  %1885 = vmatpush.bf16.msrb.mxu1 %v19234_v19  ;;  %v8089_v5 = vor.u32 %v10395_v4, %v8086_v29  ;;  %v10394_v19 = vld [vmem:[%s19017_s3 + $0x384] sm:$0xf]  ;;  %v19245_v4 = vld [vmem:[#allocation5_spill] sm:$0xff] }
 0x230   :  { %1860 = vmatpush.bf16.msra.mxu3 %v19235_v46  ;;  %1899 = vmatpush.bf16.msrb.mxu2 %v19236_v42  ;;  %v8078_v46 = vld [vmem:[%s19017_s3 + $0x390] sm:$0xf0]  ;;  %v8068_v42 = vld [vmem:[%s19017_s3 + $0x368] sm:$0xf] }
 0x231   :  { %1873 = vmatpush.bf16.msrb.mxu0 %v19238_v63  ;;  %1886 = vmatpush.bf16.msrb.mxu1 %v19239_v58  ;;  %v10393_v63 = vld [vmem:[%s19017_s3 + $0x374] sm:$0xf0]  ;;  %v8044_v58 = vld [vmem:[%s19017_s3 + $0x340] sm:$0xf] }
 0x233   :  { %1861 = vmatmul.bf16.vlgmr.msra.gmra.mxu3 %v1785_v30  ;;  %1900 = vmatmul.bf16.vlgmr.msrb.gmra.mxu2 %v1788_v31  ;;  %v10398_v30 = vld [vmem:[%s19017_s3 + $0x3a4] sm:$0xf]  ;;  %v8094_v31 = vld [vmem:[%s19017_s3 + $0x3b0] sm:$0xf0] }
 0x234   :  { %1905 = vmatpush.bf16.msrb.mxu3 %v19237_v6  ;;  %1874 = vmatmul.bf16.vlgmr.msrb.gmra.mxu0 %v1786_v32  ;;  %v8084_v32 = vld [vmem:[%s19017_s3 + $0x388] sm:$0xf]  ;;  %v8081_v6 = vor.u32 %v10394_v19, %v8078_v46  ;;  %v8022_v19 = vld [vmem:[%s19017_s3 + $0x318] sm:$0xf0] }
 0x235   :  { %1887 = vmatmul.bf16.vlgmr.msrb.gmra.mxu1 %v1787_v33  ;;  %2113 = vmatpush.bf16.msra.mxu0 %v8125_v47  ;;  %v8097_v33 = vor.u32 %v10398_v30, %v8094_v31  ;;  %v8085_v37 = vor.u32 %v10397_v34, %v8084_v32  ;;  %v10390_v47 = vld [vmem:[%s19017_s3 + $0x364] sm:$0xf]  ;;  %v10383_v30 = vld [vmem:[%s19017_s3 + $0x32c] sm:$0xf]  ;;  %v8038_v31 = vld [vmem:[%s19017_s3 + $0x338] sm:$0xf0] }
 0x236   :  { %2139 = vmatpush.bf16.msra.mxu2 %v8133_v56  ;;  %2126 = vmatpush.bf16.msra.mxu1 %v8129_v44  ;;  %v8073_v56 = vor.u32 %v10391_v38, %v8070_v49  ;;  %v8053_v44 = vor.u32 %v10389_v62, %v8052_v59  ;;  %v8041_v32 = vor.u32 %v10383_v30, %v8038_v31  ;;  %v8030_v34 = vld [vmem:[%s19017_s3 + $0x330] sm:$0xf0]  ;;  %v13290_v49 = vld [vmem:[%s19015_s1 + $0xf8] sm:$0xff]  ;;  %v13425_v31 = vld [vmem:[%s19015_s1 + $0x88] sm:$0xff] }
 0x237   :  { %v13284_v38 = vld [vmem:[%s19015_s1 + $0x30] sm:$0xff] }
 0x238   :  { %1906 = vmatpush.bf16.msrb.mxu3 %v19240_v50  ;;  %v10388_v50 = vld [vmem:[%s19017_s3 + $0x34c] sm:$0xf0] }
 0x239   :  { %2114 = vmatpush.bf16.msra.mxu0 %v8109_v60  ;;  %v8045_v55 = vor.u32 %v10388_v50, %v8044_v58  ;;  %v19242_v60 = vld [vmem:[#allocation29_spill] sm:$0xff] }
 0x23a   :  { %2140 = vmatpush.bf16.msra.mxu2 %v8117_v2  ;;  %2127 = vmatpush.bf16.msra.mxu1 %v8113_v14  ;;  %v8046_v14 = vld [vmem:[%s19017_s3 + $0x350] sm:$0xf0] }
 0x23b   :  { %v8049_v17 = vor.u32 %v10386_v11, %v8046_v14  ;;  %v13382_v11 = vld [vmem:[%s19015_s1 + $0x10] sm:$0xff]  ;;  %v13388_v14 = vld [vmem:[%s19015_s1 + $0xd8] sm:$0xff] }
 0x23c   :  { %1907 = vmatpush.bf16.msrb.mxu3 %v19241_v48  ;;  %v13419_v30 = vld [vmem:[%s19015_s1 + $0x50] sm:$0xff] }
 0x23d   :  { %2115 = vmatpush.bf16.msra.mxu0 %v8093_v13  ;;  %v19244_v13 = vld [vmem:[#allocation30_spill] sm:$0xff] }
 0x23e   :  { %2141 = vmatpush.bf16.msra.mxu2 %v8101_v18  ;;  %2128 = vmatpush.bf16.msra.mxu1 %v8097_v33  ;;  %v10385_v18 = vld [vmem:[%s19017_s3 + $0x334] sm:$0xf0]  ;;  %v10382_v33 = vld [vmem:[%s19017_s3 + $0x324] sm:$0xf] }
 0x23f   :  { %v8037_v26 = vor.u32 %v10385_v18, %v8036_v16  ;;  %v8033_v36 = vor.u32 %v10382_v33, %v8030_v34  ;;  %v13406_v18 = vld [vmem:[%s19015_s1 + $0x8] sm:$0xff] }
 0x240   :  { %1908 = vmatpush.bf16.msrb.mxu3 %v13039_v54  ;;  %v13437_v33 = vld [vmem:[%s19015_s1 + $0xc8] sm:$0xff] }
 0x241   :  { %2116 = vmatpush.bf16.msra.mxu0 %v8077_v22  ;;  %v8012_v22 = vld [vmem:[%s19017_s3 + $0x300] sm:$0xf] }
 0x242   :  { %2142 = vmatpush.bf16.msra.mxu2 %v8085_v37  ;;  %2129 = vmatpush.bf16.msra.mxu1 %v8081_v6  ;;  %v10381_v37 = vld [vmem:[%s19017_s3 + $0x314] sm:$0xf0]  ;;  %v10378_v6 = vld [vmem:[%s19017_s3 + $0x304] sm:$0xf] }
 0x243   :  { %v8021_v29 = vor.u32 %v10381_v37, %v8020_v35  ;;  %v13450_v37 = vld [vmem:[%s19015_s1 + $0x80] sm:$0xff] }
 0x244   :  { %1909 = vmatpush.bf16.msrb.mxu3 %v13045_v61 }
 0x245   :  { %2117 = vmatpush.bf16.msra.mxu0 %v8061_v8 }
 0x248   :  { %1910 = vmatpush.bf16.msrb.mxu3 %v13051_v45 }
 0x249   :  { %2118 = vmatpush.bf16.msra.mxu0 %v8045_v55 }
 0x24c   :  { %1911 = vmatpush.bf16.msrb.mxu3 %v13057_v28 }
 0x24d   :  { %2119 = vmatpush.bf16.msra.mxu0 %v8029_v1  ;;  %v13358_v1 = vld [vmem:[%s19015_s1 + $0x18] sm:$0xff] }
 0x250   :  { %1912 = vmatpush.bf16.msrb.mxu3 %v13063_v23 }
 0x253   :  { %1913 = vmatmul.bf16.vlgmr.msrb.gmra.mxu3 %v1791_v9  ;;  %v8069_v9 = vor.u32 %v10393_v63, %v8068_v42  ;;  %v8014_v63 = vld [vmem:[%s19017_s3 + $0x310] sm:$0xf0] }
 0x254   :  { %2152 = vmatpush.bf16.msra.mxu3 %v8137_v25  ;;  %v8017_v50 = vor.u32 %v10378_v6, %v8014_v63 }
 0x255   :  { %2143 = vmatpush.bf16.msra.mxu2 %v8069_v9  ;;  %v13278_v9 = vld [vmem:[%s19015_s1 + $0xb8] sm:$0xff] }
 0x258   :  { %2153 = vmatpush.bf16.msra.mxu3 %v8121_v21 }
 0x259   :  { %2144 = vmatpush.bf16.msra.mxu2 %v8053_v44  ;;  %v13346_v44 = vld [vmem:[%s19015_s1 + $0x68] sm:$0xff] }
 0x25c   :  { %2154 = vmatpush.bf16.msra.mxu3 %v8105_v27  ;;  %v8013_v27 = vor.u32 %v10380_v24, %v8012_v22  ;;  %v13412_v22 = vld [vmem:[%s19015_s1 + $0xd0] sm:$0xff] }
 0x25d   :  { %2145 = vmatpush.bf16.msra.mxu2 %v8037_v26 }
 0x25e   :  { %2120 = vmatpush.bf16.msra.mxu0 %v8013_v27 }
 0x260   :  { %2155 = vmatpush.bf16.msra.mxu3 %v8089_v5  ;;  %v10379_v5 = vld [vmem:[%s19017_s3 + $0x30c] sm:$0xf] }
 0x261   :  { %v8025_v42 = vor.u32 %v10379_v5, %v8022_v19  ;;  %2146 = vmatpush.bf16.msra.mxu2 %v8021_v29  ;;  %v13463_v19 = vld [vmem:[%s19015_s1 + $0x40] sm:$0xff] }
 0x262   :  { %2194 = vmatpush.bf16.msrb.mxu0 %v19245_v4 }
 0x264   :  { %2156 = vmatpush.bf16.msra.mxu3 %v8073_v56  ;;  %v13308_v56 = vld [vmem:[%s19015_s1 + $0x28] sm:$0xff] }
 0x265   :  { %2220 = vmatpush.bf16.msrb.mxu2 %v13278_v9 }
 0x266   :  { %2195 = vmatpush.bf16.msrb.mxu0 %v13284_v38 }
 0x268   :  { %2157 = vmatpush.bf16.msra.mxu3 %v8057_v0 }
 0x26a   :  { %2196 = vmatpush.bf16.msrb.mxu0 %v13308_v56 }
 0x26c   :  { %2158 = vmatpush.bf16.msra.mxu3 %v8041_v32 }
 0x26e   :  { %2197 = vmatpush.bf16.msrb.mxu0 %v13334_v40 }
 0x270   :  { %2159 = vmatpush.bf16.msra.mxu3 %v8025_v42  ;;  %v8138_v42 = vld [vmem:[%s19014_s0 + $0x24] sm:$0xff] }
 0x271   :  { %2173 = vst [vmem:[#allocation1] ss:$9 sm:$0xff] %v8138_v42  ;;  %v13545_v42 = vld [vmem:[%s19015_s1 + $0x120] sm:$0xff] }
 0x272   :  { %2198 = vmatpush.bf16.msrb.mxu0 %v13358_v1 }
 0x274   :  { %2233 = vmatpush.bf16.msrb.mxu3 %v13290_v49 }
 0x276   :  { %2199 = vmatpush.bf16.msrb.mxu0 %v13382_v11 }
 0x27a   :  { %2200 = vmatpush.bf16.msrb.mxu0 %v13406_v18 }
 0x28f   :  { %v1742_v48 = vpop.f32.mrf.mxu0 }
 0x290   :  { %v13190_v53 = vadd.f32 %v1742_v48, %v12859_v41  ;;  %v1755_v52 = vpop.f32.mrf.mxu1  ;;  %v8065_v41 = vor.u32 %v10390_v47, %v8062_v57  ;;  %v13296_v47 = vld [vmem:[%s19015_s1 + $0x78] sm:$0xff]  ;;  %v13314_v57 = vld [vmem:[%s19015_s1 + $0xf0] sm:$0xff] }
 0x291   :  { %v13202_v25 = vadd.f32 %v1755_v52, %v19242_v60  ;;  %v13302_v52 = vld [vmem:[%s19015_s1 + $0xb0] sm:$0xff]  ;;  %2234 = vmatpush.bf16.msrb.mxu3 %v13314_v57 }
 0x292   :  { %2130 = vmatpush.bf16.msra.mxu1 %v8065_v41  ;;  %2221 = vmatpush.bf16.msrb.mxu2 %v13302_v52  ;;  %v13322_v60 = vld [vmem:[%s19015_s1 + $0x70] sm:$0xff] }
 0x295   :  { %v1729_v2 = vpop.f32.mrf.mxu3  ;;  %2235 = vmatpush.bf16.msrb.mxu3 %v13340_v43 }
 0x296   :  { %v13217_v12 = vadd.f32 %v1729_v2, %v19243_v10  ;;  %v1768_v21 = vpop.f32.mrf.mxu2  ;;  %2131 = vmatpush.bf16.msra.mxu1 %v8049_v17  ;;  %2222 = vmatpush.bf16.msrb.mxu2 %v13328_v20  ;;  %v13364_v2 = vld [vmem:[%s19015_s1 + $0xe0] sm:$0xff]  ;;  %v13400_v17 = vld [vmem:[%s19015_s1 + $0x90] sm:$0xff] }
 0x297   :  { %v13220_v3 = vadd.f32 %v1768_v21, %v19244_v13  ;;  %v1744_v7 = vpop.f32.mrf.mxu0  ;;  %v13370_v21 = vld [vmem:[%s19015_s1 + $0x60] sm:$0xff]  ;;  %v13376_v13 = vld [vmem:[%s19015_s1 + $0x98] sm:$0xff] }
 0x298   :  { %v1757_v15 = vpop.f32.mrf.mxu1 }
 0x299   :  { %2236 = vmatpush.bf16.msrb.mxu3 %v13364_v2  ;;  %v13394_v15 = vld [vmem:[%s19015_s1 + $0x58] sm:$0xff] }
 0x29a   :  { %2132 = vmatpush.bf16.msra.mxu1 %v8033_v36  ;;  %2223 = vmatpush.bf16.msrb.mxu2 %v13352_v39  ;;  %v13444_v36 = vld [vmem:[%s19015_s1 + $0x48] sm:$0xff] }
 0x29d   :  { %v1731_v8 = vpop.f32.mrf.mxu3  ;;  %2237 = vmatpush.bf16.msrb.mxu3 %v13388_v14 }
 0x29e   :  { %v1770_v46 = vpop.f32.mrf.mxu2  ;;  %2133 = vmatpush.bf16.msra.mxu1 %v8017_v50  ;;  %2224 = vmatpush.bf16.msrb.mxu2 %v13376_v13  ;;  %v13456_v8 = vld [vmem:[%s19015_s1 + $0xc0] sm:$0xff] }
 0x29f   :  { %v13271_v58 = vpop.f32.mrf.mxu0 }
 0x2a0   :  { %v13273_v48 = vpop.f32.mrf.mxu1 }
 0x2a1   :  { %2238 = vmatpush.bf16.msrb.mxu3 %v13412_v22 }
 0x2a2   :  { %2207 = vmatpush.bf16.msrb.mxu1 %v13296_v47  ;;  %2225 = vmatpush.bf16.msrb.mxu2 %v13400_v17 }
 0x2a5   :  { %v1810_v55 = vpop.f32.mrf.mxu3  ;;  %2239 = vmatpush.bf16.msrb.mxu3 %v13437_v33 }
 0x2a6   :  { %v13317_v59 = vpop.f32.mrf.mxu2  ;;  %2208 = vmatpush.bf16.msrb.mxu1 %v13322_v60  ;;  %v1811_v24 = vadd.f32 %v12974_v51, %v1810_v55  ;;  %2226 = vmatpush.bf16.msrb.mxu2 %v13425_v31  ;;  %v13431_v51 = vld [vmem:[%s19015_s1] sm:$0xff] }
 0x2a7   :  { %v1825_v62 = vpop.f32.mrf.mxu0  ;;  %2201 = vmatpush.bf16.msrb.mxu0 %v13431_v51 }
 0x2a8   :  { %v1838_v41 = vpop.f32.mrf.mxu1  ;;  %v1824_v34 = vadd.f32 %v13271_v58, %v1811_v24  ;;  %v13497_v24 = vld [vmem:[%s19015_s1 + $0x130] sm:$0xff] }
 0x2a9   :  { %2240 = vmatpush.bf16.msrb.mxu3 %v13456_v8 }
 0x2aa   :  { %2209 = vmatpush.bf16.msrb.mxu1 %v13346_v44  ;;  %2227 = vmatpush.bf16.msrb.mxu2 %v13450_v37  ;;  %v1837_v4 = vadd.f32 %v13273_v48, %v1824_v34  ;;  %v13521_v34 = vld [vmem:[%s19015_s1 + $0x128] sm:$0xff] }
 0x2ac   :  { %v1850_v46 = vadd.f32 %v13317_v59, %v1837_v4  ;;  %v13473_v59 = vld [vmem:[%s19015_s1 + $0x138] sm:$0xff]  ;;  %v13533_v4 = vld [vmem:[%s19015_s1 + $0x1e8] sm:$0xff] }
 0x2ad   :  { %v1812_v0 = vpop.f32.mrf.mxu3 }
 0x2ae   :  { %v1851_v10 = vpop.f32.mrf.mxu2  ;;  %2210 = vmatpush.bf16.msrb.mxu1 %v13370_v21 }
 0x2af   :  { %v13479_v10 = vld [vmem:[%s19015_s1 + $0x1b8] sm:$0xff] }
 0x2b1   :  { %v1875_v7 = vpop.f32.mrf.mxu0 }
 0x2b2   :  { %v1888_v16 = vpop.f32.mrf.mxu1  ;;  %2211 = vmatpush.bf16.msrb.mxu1 %v13394_v15 }
 0x2b6   :  { %v1862_v26 = vpop.f32.mrf.mxu3  ;;  %v1901_v27 = vpop.f32.mrf.mxu2  ;;  %2212 = vmatpush.bf16.msrb.mxu1 %v13419_v30 }
 0x2b7   :  { %v1863_v6 = vadd.f32 %v1862_v26, %v1850_v46  ;;  %v13503_v26 = vld [vmem:[%s19015_s1 + $0x1b0] sm:$0xff] }
 0x2b8   :  { %v2175_v46 = vld [vmem:[#allocation1 + $0x9] sm:$0xff] }
 0x2b9   :  { %v1877_v32 = vpop.f32.mrf.mxu0  ;;  %v1876_v63 = vadd.f32 %v1875_v7, %v1863_v6  ;;  %v13485_v7 = vld [vmem:[%s19015_s1 + $0x1f8] sm:$0xff]  ;;  %v13551_v6 = vld [vmem:[%s19015_s1 + $0x1a0] sm:$0xff] }
 0x2ba   :  { %v1890_v35 = vpop.f32.mrf.mxu1  ;;  %2213 = vmatpush.bf16.msrb.mxu1 %v13444_v36  ;;  %v13515_v32 = vld [vmem:[%s19015_s1 + $0x170] sm:$0xff] }
 0x2bb   :  { %v1889_v58 = vadd.f32 %v1888_v16, %v1876_v63  ;;  %v13491_v16 = vld [vmem:[%s19015_s1 + $0x178] sm:$0xff]  ;;  %v13527_v35 = vld [vmem:[%s19015_s1 + $0x1a8] sm:$0xff] }
 0x2bc   :  { %v2176_v63 = vld [vmem:[#allocation1 + $0x12] sm:$0xff] }
 0x2bd   :  { %v1902_v50 = vadd.f32 %v1901_v27, %v1889_v58  ;;  %v13509_v27 = vld [vmem:[%s19015_s1 + $0x1f0] sm:$0xff]  ;;  %v2177_v58 = vld [vmem:[#allocation1 + $0x1b] sm:$0xff] }
 0x2be   :  { %v1864_v29 = vpop.f32.mrf.mxu3  ;;  %v1903_v5 = vpop.f32.mrf.mxu2  ;;  %2214 = vmatpush.bf16.msrb.mxu1 %v13463_v19 }
 0x2bf   :  { %v13539_v29 = vld [vmem:[%s19015_s1 + $0x168] sm:$0xff]  ;;  %v2174_v5 = vld [vmem:[#allocation1] sm:$0xff] }
 0x2d6   :  { %v1914_v48 = vpop.f32.mrf.mxu3 }
 0x2d7   :  { %v1915_v55 = vadd.f32 %v1914_v48, %v1902_v50  ;;  %v13557_v50 = vld [vmem:[%s19015_s1 + $0x1e0] sm:$0xff] }
 0x2d8   :  { %19246 = vst [vmem:[#allocation6_spill] sm:$0xff] %v13557_v50  ;;  %v13563_v48 = vld [vmem:[%s19015_s1 + $0x160] sm:$0xff] }
 0x2d9   :  { %v1918_v62 = vmax.f32 %v1915_v55, 0.0  ;;  %v13569_v55 = vld [vmem:[%s19015_s1 + $0x118] sm:$0xff] }
 0x2da   :  { %19247 = vst [vmem:[#allocation9_spill] sm:$0xff] %v13569_v55 }
 0x2db   :  { %v1919_v41 = vpack.c.bf16 %v1918_v62, %v1918_v62  ;;  %v13575_v62 = vld [vmem:[%s19015_s1 + $0x198] sm:$0xff] }
 0x2dc   :  { %19248 = vst [vmem:[#allocation7_spill] sm:$0xff] %v13575_v62 }
 0x2dd   :  { %2121 = vmatmul.bf16.vlgmr.msra.gmra.mxu0 %v1919_v41  ;;  %2134 = vmatmul.bf16.vlgmr.msra.gmra.mxu1 %v1919_v41 }
 0x2de   :  { %2147 = vmatmul.bf16.vlgmr.msra.gmra.mxu2 %v1919_v41  ;;  %2160 = vmatmul.bf16.vlgmr.msra.gmra.mxu3 %v1919_v41  ;;  %v1916_v0 = vpop.f32.mrf.mxu3  ;;  %v13581_v41 = vld [vmem:[%s19015_s1 + $0x1d8] sm:$0xff] }
 0x2df   :  { %2246 = vmatpush.bf16.msra.mxu0 %v13473_v59  ;;  %2272 = vmatpush.bf16.msra.mxu2 %v13479_v10  ;;  %19249 = vst [vmem:[#allocation8_spill] sm:$0xff] %v13581_v41  ;;  %v13587_v0 = vld [vmem:[%s19015_s1 + $0x158] sm:$0xff] }
 0x2e0   :  { %2285 = vmatpush.bf16.msra.mxu3 %v13485_v7  ;;  %2259 = vmatpush.bf16.msra.mxu1 %v13491_v16  ;;  %19250 = vst [vmem:[#allocation10_spill] sm:$0xff] %v13587_v0 }
 0x2e3   :  { %2247 = vmatpush.bf16.msra.mxu0 %v13497_v24  ;;  %2273 = vmatpush.bf16.msra.mxu2 %v13503_v26 }
 0x2e4   :  { %2286 = vmatpush.bf16.msra.mxu3 %v13509_v27  ;;  %2260 = vmatpush.bf16.msra.mxu1 %v13515_v32 }
 0x2e7   :  { %2248 = vmatpush.bf16.msra.mxu0 %v13521_v34  ;;  %2274 = vmatpush.bf16.msra.mxu2 %v13527_v35 }
 0x2e8   :  { %2287 = vmatpush.bf16.msra.mxu3 %v13533_v4  ;;  %2261 = vmatpush.bf16.msra.mxu1 %v13539_v29 }
 0x2eb   :  { %2249 = vmatpush.bf16.msra.mxu0 %v13545_v42  ;;  %2275 = vmatpush.bf16.msra.mxu2 %v13551_v6 }
 0x2ec   :  { %2288 = vmatpush.bf16.msra.mxu3 %v13557_v50  ;;  %2262 = vmatpush.bf16.msra.mxu1 %v13563_v48  ;;  %v13614_v50 = vld [vmem:[%s19015_s1 + $0x150] sm:$0xff] }
 0x2ed   :  { %2202 = vmatmul.bf16.vlgmr.msrb.gmra.mxu0 %v2174_v5  ;;  %2215 = vmatmul.bf16.vlgmr.msrb.gmra.mxu1 %v2175_v46  ;;  %v2180_v5 = vld [vmem:[#allocation1 + $0x36] sm:$0xff]  ;;  %v2178_v46 = vld [vmem:[#allocation1 + $0x24] sm:$0xff]  ;;  %19254 = vst [vmem:[#allocation14_spill] sm:$0xff] %v13614_v50 }
 0x2ee   :  { %2228 = vmatmul.bf16.vlgmr.msrb.gmra.mxu2 %v2176_v63  ;;  %2241 = vmatmul.bf16.vlgmr.msrb.gmra.mxu3 %v2177_v58  ;;  %v2181_v63 = vld [vmem:[#allocation1 + $0x3f] sm:$0xff]  ;;  %v2179_v58 = vld [vmem:[#allocation1 + $0x2d] sm:$0xff] }
 0x2ef   :  { %2250 = vmatpush.bf16.msra.mxu0 %v13569_v55  ;;  %2276 = vmatpush.bf16.msra.mxu2 %v13575_v62  ;;  %v8139_v62 = vld [vmem:[%s19014_s0 + $0x2c] sm:$0x1]  ;;  %v13596_v55 = vld [vmem:[%s19015_s1 + $0x110] sm:$0xff] }
 0x2f0   :  { %2289 = vmatpush.bf16.msra.mxu3 %v13581_v41  ;;  %2263 = vmatpush.bf16.msra.mxu1 %v13587_v0  ;;  %19251 = vst [vmem:[#allocation13_spill] sm:$0xff] %v13596_v55  ;;  %v13602_v41 = vld [vmem:[%s19015_s1 + $0x190] sm:$0xff] }
 0x2f1   :  { %19252 = vst [vmem:[#allocation11_spill] sm:$0xff] %v13602_v41  ;;  %v13608_v0 = vld [vmem:[%s19015_s1 + $0x1d0] sm:$0xff] }
 0x2f2   :  { %2183 = vst [vmem:[#allocation1] ss:$9 sm:$0xff] %v8139_v62  ;;  %v13626_v62 = vld [vmem:[%s19015_s1 + $0x188] sm:$0xff] }
 0x2f3   :  { %2251 = vmatpush.bf16.msra.mxu0 %v13596_v55  ;;  %2277 = vmatpush.bf16.msra.mxu2 %v13602_v41  ;;  %19253 = vst [vmem:[#allocation12_spill] sm:$0xff] %v13608_v0  ;;  %v13620_v55 = vld [vmem:[%s19015_s1 + $0x108] sm:$0xff] }
 0x2f4   :  { %2290 = vmatpush.bf16.msra.mxu3 %v13608_v0  ;;  %2264 = vmatpush.bf16.msra.mxu1 %v13614_v50  ;;  %19255 = vst [vmem:[#allocation17_spill] sm:$0xff] %v13620_v55  ;;  %v13632_v0 = vld [vmem:[%s19015_s1 + $0x1c8] sm:$0xff] }
 0x2f5   :  { %19256 = vst [vmem:[#allocation15_spill] sm:$0xff] %v13626_v62  ;;  %v13638_v41 = vld [vmem:[%s19015_s1 + $0x148] sm:$0xff] }
 0x2f6   :  { %19257 = vst [vmem:[#allocation16_spill] sm:$0xff] %v13632_v0 }
 0x2f7   :  { %2252 = vmatpush.bf16.msra.mxu0 %v13620_v55  ;;  %2278 = vmatpush.bf16.msra.mxu2 %v13626_v62  ;;  %19258 = vst [vmem:[#allocation18_spill] sm:$0xff] %v13638_v41  ;;  %v13644_v55 = vld [vmem:[%s19015_s1 + $0x100] sm:$0xff] }
 0x2f8   :  { %2291 = vmatpush.bf16.msra.mxu3 %v13632_v0  ;;  %2265 = vmatpush.bf16.msra.mxu1 %v13638_v41  ;;  %19259 = vst [vmem:[#allocation21_spill] sm:$0xff] %v13644_v55  ;;  %v13650_v62 = vld [vmem:[%s19015_s1 + $0x180] sm:$0xff]  ;;  %v13656_v0 = vld [vmem:[%s19015_s1 + $0x238] sm:$0xff] }
 0x2f9   :  { %19260 = vst [vmem:[#allocation19_spill] sm:$0xff] %v13650_v62  ;;  %v13662_v41 = vld [vmem:[%s19015_s1 + $0x1c0] sm:$0xff] }
 0x2fa   :  { %19261 = vst [vmem:[#allocation20_spill] sm:$0xff] %v13656_v0 }
 0x2fb   :  { %2253 = vmatpush.bf16.msra.mxu0 %v13644_v55  ;;  %2279 = vmatpush.bf16.msra.mxu2 %v13650_v62  ;;  %19262 = vst [vmem:[#allocation22_spill] sm:$0xff] %v13662_v41  ;;  %v13668_v55 = vld [vmem:[%s19015_s1 + $0x140] sm:$0xff]  ;;  %v13674_v62 = vld [vmem:[%s19015_s1 + $0x230] sm:$0xff] }
 0x2fc   :  { %2292 = vmatpush.bf16.msra.mxu3 %v13662_v41  ;;  %19263 = vst [vmem:[#allocation26_spill] sm:$0xff] %v13668_v55  ;;  %2266 = vmatpush.bf16.msra.mxu1 %v13668_v55  ;;  %v13680_v41 = vld [vmem:[%s19015_s1 + $0x228] sm:$0xff] }
 0x2fd   :  { %19264 = vst [vmem:[#allocation24_spill] sm:$0xff] %v13674_v62  ;;  %v8246_v55 = vld [vmem:[%s19017_s3 + $0x488] sm:$0xf] }
 0x2fe   :  { %2280 = vmatmul.bf16.vlgmr.msra.gmra.mxu2 %v2180_v5  ;;  %2254 = vmatmul.bf16.vlgmr.msra.gmra.mxu0 %v2178_v46  ;;  %19265 = vst [vmem:[#allocation23_spill] sm:$0xff] %v13680_v41  ;;  %v2184_v5 = vld [vmem:[#allocation1] sm:$0xff] }
 0x2ff   :  { %2298 = vmatpush.bf16.msrb.mxu0 %v13656_v0  ;;  %2293 = vmatmul.bf16.vlgmr.msra.gmra.mxu3 %v2181_v63  ;;  %v8286_v46 = vld [vmem:[%s19017_s3 + $0x4e0] sm:$0xf]  ;;  %v10440_v63 = vld [vmem:[%s19017_s3 + $0x4ec] sm:$0xf0]  ;;  %v8296_v0 = vld [vmem:[%s19017_s3 + $0x4f8] sm:$0xf0] }
 0x300   :  { %2267 = vmatmul.bf16.vlgmr.msra.gmra.mxu1 %v2179_v58 }
 0x303   :  { %2299 = vmatpush.bf16.msrb.mxu0 %v13674_v62  ;;  %v10434_v62 = vld [vmem:[%s19017_s3 + $0x4c4] sm:$0xf] }
 0x307   :  { %2300 = vmatpush.bf16.msrb.mxu0 %v13680_v41  ;;  %v8270_v41 = vld [vmem:[%s19017_s3 + $0x4c0] sm:$0xf] }
 0x30b   :  { %2301 = vmatpush.bf16.msrb.mxu0 %v13039_v54  ;;  %v10438_v54 = vld [vmem:[%s19017_s3 + $0x4e4] sm:$0xf] }
 0x30f   :  { %2302 = vmatpush.bf16.msrb.mxu0 %v13045_v61  ;;  %v8287_v61 = vor.u32 %v10440_v63, %v8286_v46  ;;  %v10436_v46 = vld [vmem:[%s19017_s3 + $0x4cc] sm:$0xf0] }
 0x310   :  { %v8271_v63 = vor.u32 %v10436_v46, %v8270_v41  ;;  %v10437_v41 = vld [vmem:[%s19017_s3 + $0x4d4] sm:$0xf0] }
 0x311   :  { %2506 = vmatpush.bf16.msrb.mxu1 %v8287_v61  ;;  %v8254_v61 = vld [vmem:[%s19017_s3 + $0x4a0] sm:$0xf] }
 0x313   :  { %2303 = vmatpush.bf16.msrb.mxu0 %v13051_v45  ;;  %v8288_v45 = vld [vmem:[%s19017_s3 + $0x4f0] sm:$0xf0] }
 0x314   :  { %v8291_v58 = vor.u32 %v10438_v54, %v8288_v45  ;;  %v8272_v54 = vld [vmem:[%s19017_s3 + $0x4d0] sm:$0xf0] }
 0x315   :  { %v8275_v45 = vor.u32 %v10434_v62, %v8272_v54  ;;  %2507 = vmatpush.bf16.msrb.mxu1 %v8271_v63  ;;  %v10430_v62 = vld [vmem:[%s19017_s3 + $0x4a4] sm:$0xf]  ;;  %v8262_v54 = vld [vmem:[%s19017_s3 + $0x4a8] sm:$0xf] }
 0x316   :  { %2519 = vmatpush.bf16.msrb.mxu2 %v8291_v58  ;;  %v10432_v58 = vld [vmem:[%s19017_s3 + $0x4ac] sm:$0xf0] }
 0x317   :  { %2304 = vmatpush.bf16.msrb.mxu0 %v13057_v28  ;;  %v8294_v28 = vld [vmem:[%s19017_s3 + $0x4e8] sm:$0xf]  ;;  %v8255_v46 = vor.u32 %v10432_v58, %v8254_v61  ;;  %v8238_v61 = vld [vmem:[%s19017_s3 + $0x480] sm:$0xf]  ;;  %v10428_v58 = vld [vmem:[%s19017_s3 + $0x48c] sm:$0xf0] }
 0x319   :  { %2508 = vmatpush.bf16.msrb.mxu1 %v8255_v46  ;;  %v10435_v46 = vld [vmem:[%s19017_s3 + $0x4cc] sm:$0xf] }
 0x31a   :  { %2520 = vmatpush.bf16.msrb.mxu2 %v8275_v45  ;;  %v10433_v45 = vld [vmem:[%s19017_s3 + $0x4b4] sm:$0xf0] }
 0x31b   :  { %2305 = vmatpush.bf16.msrb.mxu0 %v13063_v23  ;;  %v10441_v23 = vld [vmem:[%s19017_s3 + $0x4f4] sm:$0xf0] }
 0x31e   :  { %2306 = vmatmul.bf16.vlgmr.msrb.gmra.mxu0 %v2184_v5  ;;  %v8295_v5 = vor.u32 %v10441_v23, %v8294_v28  ;;  %v8278_v28 = vld [vmem:[%s19017_s3 + $0x4c8] sm:$0xf] }
 0x31f   :  { %v8279_v23 = vor.u32 %v10437_v41, %v8278_v28  ;;  %v10439_v28 = vld [vmem:[%s19017_s3 + $0x4ec] sm:$0xf]  ;;  %v8263_v41 = vor.u32 %v10433_v45, %v8262_v54  ;;  %v8240_v54 = vld [vmem:[%s19017_s3 + $0x490] sm:$0xf0] }
 0x320   :  { %2532 = vmatpush.bf16.msrb.mxu3 %v8295_v5  ;;  %v8256_v5 = vld [vmem:[%s19017_s3 + $0x4b0] sm:$0xf0] }
 0x321   :  { %v8259_v63 = vor.u32 %v10430_v62, %v8256_v5  ;;  %v8299_v62 = vor.u32 %v10439_v28, %v8296_v0  ;;  %v8239_v5 = vor.u32 %v10428_v58, %v8238_v61  ;;  %v10429_v0 = vld [vmem:[%s19017_s3 + $0x494] sm:$0xf0]  ;;  %v10424_v61 = vld [vmem:[%s19017_s3 + $0x46c] sm:$0xf0] }
 0x322   :  { %v8247_v28 = vor.u32 %v10429_v0, %v8246_v55  ;;  %v8224_v55 = vld [vmem:[%s19017_s3 + $0x470] sm:$0xf0]  ;;  %v10431_v0 = vld [vmem:[%s19017_s3 + $0x4ac] sm:$0xf] }
 0x323   :  { %2521 = vmatpush.bf16.msrb.mxu2 %v8259_v63  ;;  %2545 = vmatpush.bf16.msra.mxu0 %v8299_v62  ;;  %v8280_v63 = vld [vmem:[%s19017_s3 + $0x4d8] sm:$0xf0] }
 0x324   :  { %2533 = vmatpush.bf16.msrb.mxu3 %v8279_v23  ;;  %v10426_v23 = vld [vmem:[%s19017_s3 + $0x484] sm:$0xf]  ;;  %2509 = vmatpush.bf16.msrb.mxu1 %v8239_v5  ;;  %v8283_v58 = vor.u32 %v10435_v46, %v8280_v63  ;;  %v8206_v63 = vld [vmem:[%s19017_s3 + $0x440] sm:$0xf] }
 0x325   :  { %v8243_v45 = vor.u32 %v10426_v23, %v8240_v54  ;;  %v10422_v5 = vld [vmem:[%s19017_s3 + $0x464] sm:$0xf]  ;;  %v8230_v54 = vld [vmem:[%s19017_s3 + $0x468] sm:$0xf] }
 0x326   :  { %v8227_v23 = vor.u32 %v10422_v5, %v8224_v55 }
 0x327   :  { %2522 = vmatpush.bf16.msrb.mxu2 %v8243_v45  ;;  %v10425_v45 = vld [vmem:[%s19017_s3 + $0x474] sm:$0xf0]  ;;  %2546 = vmatpush.bf16.msra.mxu0 %v8283_v58  ;;  %v10418_v58 = vld [vmem:[%s19017_s3 + $0x444] sm:$0xf] }
 0x328   :  { %2534 = vmatpush.bf16.msrb.mxu3 %v8263_v41  ;;  %v8222_v41 = vld [vmem:[%s19017_s3 + $0x460] sm:$0xf]  ;;  %v8231_v46 = vor.u32 %v10425_v45, %v8230_v54  ;;  %v8214_v54 = vld [vmem:[%s19017_s3 + $0x448] sm:$0xf]  ;;  %v10427_v45 = vld [vmem:[%s19017_s3 + $0x48c] sm:$0xf] }
 0x329   :  { %v8223_v62 = vor.u32 %v10424_v61, %v8222_v41  ;;  %v10420_v41 = vld [vmem:[%s19017_s3 + $0x44c] sm:$0xf0] }
 0x32a   :  { %v8207_v5 = vor.u32 %v10420_v41, %v8206_v63  ;;  %v8190_v41 = vld [vmem:[%s19017_s3 + $0x420] sm:$0xf] }
 0x32b   :  { %2510 = vmatpush.bf16.msrb.mxu1 %v8223_v62  ;;  %2523 = vmatpush.bf16.msrb.mxu2 %v8227_v23  ;;  %v8208_v62 = vld [vmem:[%s19017_s3 + $0x450] sm:$0xf0]  ;;  %v10421_v23 = vld [vmem:[%s19017_s3 + $0x454] sm:$0xf0] }
 0x32c   :  { %2535 = vmatpush.bf16.msrb.mxu3 %v8247_v28  ;;  %v8264_v28 = vld [vmem:[%s19017_s3 + $0x4b8] sm:$0xf0]  ;;  %v8211_v55 = vor.u32 %v10418_v58, %v8208_v62  ;;  %v8215_v63 = vor.u32 %v10421_v23, %v8214_v54  ;;  %v10414_v54 = vld [vmem:[%s19017_s3 + $0x424] sm:$0xf]  ;;  %v8192_v23 = vld [vmem:[%s19017_s3 + $0x430] sm:$0xf0] }
 0x32d   :  { %v8267_v61 = vor.u32 %v10431_v0, %v8264_v28  ;;  %v8195_v50 = vor.u32 %v10414_v54, %v8192_v23 }
 0x32f   :  { %2547 = vmatpush.bf16.msra.mxu0 %v8267_v61  ;;  %2511 = vmatpush.bf16.msrb.mxu1 %v8207_v5  ;;  %v10416_v61 = vld [vmem:[%s19017_s3 + $0x42c] sm:$0xf0] }
 0x330   :  { %2536 = vmatpush.bf16.msrb.mxu3 %v8231_v46  ;;  %2524 = vmatpush.bf16.msrb.mxu2 %v8211_v55  ;;  %v8248_v46 = vld [vmem:[%s19017_s3 + $0x498] sm:$0xf0]  ;;  %v8191_v55 = vor.u32 %v10416_v61, %v8190_v41 }
 0x331   :  { %v8251_v62 = vor.u32 %v10427_v45, %v8248_v46  ;;  %v10423_v45 = vld [vmem:[%s19017_s3 + $0x46c] sm:$0xf]  ;;  %v10412_v46 = vld [vmem:[%s19017_s3 + $0x40c] sm:$0xf0] }
 0x333   :  { %2548 = vmatpush.bf16.msra.mxu0 %v8251_v62  ;;  %2512 = vmatpush.bf16.msrb.mxu1 %v8191_v55  ;;  %v10410_v62 = vld [vmem:[%s19017_s3 + $0x404] sm:$0xf]  ;;  %v8176_v55 = vld [vmem:[%s19017_s3 + $0x410] sm:$0xf0] }
 0x334   :  { %2537 = vmatpush.bf16.msrb.mxu3 %v8215_v63  ;;  %v8174_v63 = vld [vmem:[%s19017_s3 + $0x400] sm:$0xf]  ;;  %2525 = vmatpush.bf16.msrb.mxu2 %v8195_v50  ;;  %v8179_v54 = vor.u32 %v10410_v62, %v8176_v55  ;;  %v8182_v50 = vld [vmem:[%s19017_s3 + $0x408] sm:$0xf]  ;;  %v8216_v62 = vld [vmem:[%s19017_s3 + $0x458] sm:$0xf0] }
 0x335   :  { %v8175_v61 = vor.u32 %v10412_v46, %v8174_v63  ;;  %v8200_v55 = vld [vmem:[%s19017_s3 + $0x438] sm:$0xf0] }
 0x337   :  { %2513 = vmatpush.bf16.msrb.mxu1 %v8175_v61 }
 0x338   :  { %2526 = vmatpush.bf16.msrb.mxu2 %v8179_v54 }
 0x33c   :  { %2600 = vmatpush.bf16.msra.mxu2 %v13296_v47  ;;  %v10411_v47 = vld [vmem:[%s19017_s3 + $0x40c] sm:$0xf] }
 0x340   :  { %2601 = vmatpush.bf16.msra.mxu2 %v13322_v60 }
 0x344   :  { %2602 = vmatpush.bf16.msra.mxu2 %v13346_v44 }
 0x348   :  { %2603 = vmatpush.bf16.msra.mxu2 %v13370_v21 }
 0x34c   :  { %2604 = vmatpush.bf16.msra.mxu2 %v13394_v15 }
 0x350   :  { %2605 = vmatpush.bf16.msra.mxu2 %v13419_v30 }
 0x354   :  { %2606 = vmatpush.bf16.msra.mxu2 %v13444_v36 }
 0x358   :  { %2607 = vmatpush.bf16.msra.mxu2 %v13463_v19 }
 0x35a   :  { %v2122_v0 = vpop.f32.mrf.mxu0  ;;  %v2135_v28 = vpop.f32.mrf.mxu1 }
 0x35b   :  { %v13827_v5 = vadd.f32 %v2122_v0, %v13217_v12  ;;  %v13830_v58 = vadd.f32 %v2135_v28, %v13190_v53  ;;  %v8198_v12 = vld [vmem:[%s19017_s3 + $0x428] sm:$0xf]  ;;  %v10417_v53 = vld [vmem:[%s19017_s3 + $0x434] sm:$0xf0]  ;;  %v8232_v28 = vld [vmem:[%s19017_s3 + $0x478] sm:$0xf0] }
 0x35c   :  { %v8199_v0 = vor.u32 %v10417_v53, %v8198_v12  ;;  %v8235_v41 = vor.u32 %v10423_v45, %v8232_v28  ;;  %v10413_v53 = vld [vmem:[%s19017_s3 + $0x414] sm:$0xf0]  ;;  %v10419_v45 = vld [vmem:[%s19017_s3 + $0x44c] sm:$0xf] }
 0x35d   :  { %v8183_v61 = vor.u32 %v10413_v53, %v8182_v50 }
 0x35e   :  { %2538 = vmatpush.bf16.msrb.mxu3 %v8199_v0  ;;  %2549 = vmatpush.bf16.msra.mxu0 %v8235_v41  ;;  %v13880_v41 = vld [vmem:[%s19015_s1 + $0x38] sm:$0xff] }
 0x35f   :  { %2587 = vmatpush.bf16.msra.mxu1 %v13880_v41 }
 0x361   :  { %v2148_v23 = vpop.f32.mrf.mxu2  ;;  %v2161_v12 = vpop.f32.mrf.mxu3 }
 0x362   :  { %v13872_v28 = vadd.f32 %v2148_v23, %v13202_v25  ;;  %v13875_v0 = vadd.f32 %v2161_v12, %v13220_v3  ;;  %v2124_v63 = vpop.f32.mrf.mxu0  ;;  %v2137_v46 = vpop.f32.mrf.mxu1  ;;  %v8219_v25 = vor.u32 %v10419_v45, %v8216_v62  ;;  %2539 = vmatpush.bf16.msrb.mxu3 %v8183_v61  ;;  %v10415_v3 = vld [vmem:[%s19017_s3 + $0x42c] sm:$0xf]  ;;  %v8184_v23 = vld [vmem:[%s19017_s3 + $0x418] sm:$0xf0]  ;;  %v19274_v62 = vld [vmem:[#allocation12_spill] sm:$0xff] }
 0x363   :  { %v8203_v54 = vor.u32 %v10415_v3, %v8200_v55  ;;  %2588 = vmatpush.bf16.msra.mxu1 %v13284_v38  ;;  %v8187_v53 = vor.u32 %v10411_v47, %v8184_v23  ;;  %v19273_v61 = vld [vmem:[#allocation11_spill] sm:$0xff]  ;;  %v19276_v3 = vld [vmem:[#allocation18_spill] sm:$0xff]  ;;  %v19279_v47 = vld [vmem:[#allocation21_spill] sm:$0xff] }
 0x364   :  { %2550 = vmatpush.bf16.msra.mxu0 %v8219_v25  ;;  %v19275_v25 = vld [vmem:[#allocation17_spill] sm:$0xff]  ;;  %v19277_v55 = vld [vmem:[#allocation15_spill] sm:$0xff]  ;;  %v19280_v23 = vld [vmem:[#allocation26_spill] sm:$0xff] }
 0x366   :  { %2613 = vmatpush.bf16.msra.mxu3 %v13278_v9 }
 0x367   :  { %2589 = vmatpush.bf16.msra.mxu1 %v13308_v56 }
 0x368   :  { %2551 = vmatpush.bf16.msra.mxu0 %v8203_v54  ;;  %v19278_v54 = vld [vmem:[#allocation16_spill] sm:$0xff] }
 0x369   :  { %v2150_v12 = vpop.f32.mrf.mxu2  ;;  %v2163_v50 = vpop.f32.mrf.mxu3 }
 0x36a   :  { %2614 = vmatpush.bf16.msra.mxu3 %v13302_v52  ;;  %v2203_v9 = vpop.f32.mrf.mxu0  ;;  %v2216_v45 = vpop.f32.mrf.mxu1  ;;  %v19281_v12 = vld [vmem:[#allocation20_spill] sm:$0xff]  ;;  %v19282_v50 = vld [vmem:[#allocation19_spill] sm:$0xff] }
 0x36b   :  { %2590 = vmatpush.bf16.msra.mxu1 %v13334_v40 }
 0x36c   :  { %2552 = vmatpush.bf16.msra.mxu0 %v8187_v53  ;;  %v19283_v53 = vld [vmem:[#allocation22_spill] sm:$0xff] }
 0x36e   :  { %2615 = vmatpush.bf16.msra.mxu3 %v13328_v20 }
 0x36f   :  { %2591 = vmatpush.bf16.msra.mxu1 %v13358_v1 }
 0x370   :  { %2626 = vmatpush.bf16.msrb.mxu0 %v13290_v49 }
 0x371   :  { %v2229_v60 = vpop.f32.mrf.mxu2  ;;  %v2242_v63 = vpop.f32.mrf.mxu3 }
 0x372   :  { %2616 = vmatpush.bf16.msra.mxu3 %v13352_v39  ;;  %v2205_v52 = vpop.f32.mrf.mxu0  ;;  %v2218_v46 = vpop.f32.mrf.mxu1 }
 0x373   :  { %2592 = vmatpush.bf16.msra.mxu1 %v13382_v11  ;;  %v13991_v52 = vld [vmem:[%s19015_s1 + $0x210] sm:$0xff]  ;;  %v13997_v46 = vld [vmem:[%s19015_s1 + $0x208] sm:$0xff] }
 0x374   :  { %2627 = vmatpush.bf16.msrb.mxu0 %v13314_v57  ;;  %v13923_v57 = vld [vmem:[%s19016_s2] ss:$0 sm:$0xff] }
 0x375   :  { %v2204_v20 = vadd.f32 %v13923_v57, %v2203_v9  ;;  %v19284_v9 = vld [vmem:[#allocation24_spill] sm:$0xff] }
 0x376   :  { %2617 = vmatpush.bf16.msra.mxu3 %v13376_v13 }
 0x377   :  { %2593 = vmatpush.bf16.msra.mxu1 %v13406_v18  ;;  %v2217_v44 = vadd.f32 %v2216_v45, %v2204_v20  ;;  %v19285_v45 = vld [vmem:[#allocation23_spill] sm:$0xff] }
 0x378   :  { %2628 = vmatpush.bf16.msrb.mxu0 %v13340_v43  ;;  %v8448_v20 = vld [vmem:[%s19017_s3 + $0x5e0] sm:$0xf] }
 0x379   :  { %v2231_v49 = vpop.f32.mrf.mxu2  ;;  %v2244_v56 = vpop.f32.mrf.mxu3 }
 0x37a   :  { %2618 = vmatpush.bf16.msra.mxu3 %v13400_v17  ;;  %v14003_v49 = vld [vmem:[%s19015_s1 + $0x200] sm:$0xff] }
 0x37b   :  { %v2255_v40 = vpop.f32.mrf.mxu0  ;;  %2594 = vmatpush.bf16.msra.mxu1 %v13431_v51 }
 0x37c   :  { %2629 = vmatpush.bf16.msrb.mxu0 %v13364_v2  ;;  %v2230_v2 = vadd.f32 %v2229_v60, %v2217_v44  ;;  %v13979_v60 = vld [vmem:[%s19015_s1 + $0x220] sm:$0xff] }
 0x37d   :  { %v2268_v43 = vpop.f32.mrf.mxu1  ;;  %v8432_v44 = vld [vmem:[%s19017_s3 + $0x5c0] sm:$0xf] }
 0x37e   :  { %2619 = vmatpush.bf16.msra.mxu3 %v13425_v31  ;;  %v2243_v11 = vadd.f32 %v2242_v63, %v2230_v2  ;;  %v13985_v63 = vld [vmem:[%s19015_s1 + $0x218] sm:$0xff]  ;;  %v10470_v2 = vld [vmem:[%s19017_s3 + $0x5e4] sm:$0xf] }
 0x380   :  { %2630 = vmatpush.bf16.msrb.mxu0 %v13388_v14  ;;  %v8300_v14 = vld [vmem:[%s19014_s0 + $0x2d] sm:$0xff]  ;;  %v2256_v18 = vadd.f32 %v2255_v40, %v2243_v11 }
 0x381   :  { %v2281_v39 = vpop.f32.mrf.mxu2  ;;  %2566 = vst [vmem:[#allocation1] ss:$9 sm:$0xff] %v8300_v14  ;;  %v10472_v40 = vld [vmem:[%s19017_s3 + $0x5ec] sm:$0xf0] }
 0x382   :  { %2620 = vmatpush.bf16.msra.mxu3 %v13450_v37  ;;  %v2294_v1 = vpop.f32.mrf.mxu3  ;;  %v2269_v30 = vadd.f32 %v2268_v43, %v2256_v18  ;;  %v8449_v43 = vor.u32 %v10472_v40, %v8448_v20  ;;  %v10464_v14 = vld [vmem:[%s19017_s3 + $0x5ac] sm:$0xf0]  ;;  %v8434_v18 = vld [vmem:[%s19017_s3 + $0x5d0] sm:$0xf0] }
 0x383   :  { %v2257_v21 = vpop.f32.mrf.mxu0 }
 0x384   :  { %2631 = vmatpush.bf16.msrb.mxu0 %v13412_v22  ;;  %v2282_v31 = vadd.f32 %v2281_v39, %v2269_v30  ;;  %v10468_v39 = vld [vmem:[%s19017_s3 + $0x5cc] sm:$0xf0]  ;;  %v8450_v21 = vld [vmem:[%s19017_s3 + $0x5f0] sm:$0xf0]  ;;  %v8400_v30 = vld [vmem:[%s19017_s3 + $0x580] sm:$0xf] }
 0x385   :  { %v2270_v13 = vpop.f32.mrf.mxu1  ;;  %v8453_v11 = vor.u32 %v10470_v2, %v8450_v21  ;;  %v8370_v2 = vld [vmem:[%s19017_s3 + $0x550] sm:$0xf0]  ;;  %v8408_v21 = vld [vmem:[%s19017_s3 + $0x588] sm:$0xf] }
 0x386   :  { %v2295_v51 = vadd.f32 %v2294_v1, %v2282_v31  ;;  %v8433_v1 = vor.u32 %v10468_v39, %v8432_v44  ;;  %v8416_v13 = vld [vmem:[%s19017_s3 + $0x5a0] sm:$0xf]  ;;  %v8426_v44 = vld [vmem:[%s19017_s3 + $0x5b8] sm:$0xf0] }
 0x388   :  { %2632 = vmatpush.bf16.msrb.mxu0 %v13437_v33 }
 0x389   :  { %v2283_v15 = vpop.f32.mrf.mxu2 }
 0x38a   :  { %v2296_v17 = vpop.f32.mrf.mxu3  ;;  %v8417_v15 = vor.u32 %v10464_v14, %v8416_v13  ;;  %v10444_v14 = vld [vmem:[%s19017_s3 + $0x50c] sm:$0xf0] }
 0x38b   :  { %v10466_v17 = vld [vmem:[%s19017_s3 + $0x5c4] sm:$0xf] }
 0x38c   :  { %2633 = vmatpush.bf16.msrb.mxu0 %v13456_v8  ;;  %v2568_v8 = vld [vmem:[#allocation1 + $0x9] sm:$0xff]  ;;  %v8437_v31 = vor.u32 %v10466_v17, %v8434_v18 }
 0x38d   :  { %v10459_v18 = vld [vmem:[%s19017_s3 + $0x58c] sm:$0xf] }
 0x39b   :  { %v2307_v22 = vpop.f32.mrf.mxu0 }
 0x39c   :  { %v2308_v36 = vadd.f32 %v2307_v22, %v2295_v51  ;;  %v10460_v51 = vld [vmem:[%s19017_s3 + $0x58c] sm:$0xf0] }
 0x39d   :  { %v8401_v22 = vor.u32 %v10460_v51, %v8400_v30  ;;  %v8410_v30 = vld [vmem:[%s19017_s3 + $0x598] sm:$0xf0] }
 0x39e   :  { %v2311_v37 = vmax.f32 %v2308_v36, 0.0  ;;  %v10462_v36 = vld [vmem:[%s19017_s3 + $0x5a4] sm:$0xf]  ;;  %v8413_v51 = vor.u32 %v10459_v18, %v8410_v30  ;;  %v14271_v18 = vld [vmem:[%s19015_s1 + $0xb0] sm:$0xff] }
 0x39f   :  { %v14277_v30 = vld [vmem:[%s19015_s1 + $0x10] sm:$0xff] }
 0x3a0   :  { %v2312_v19 = vpack.c.bf16 %v2311_v37, %v2311_v37  ;;  %v8418_v37 = vld [vmem:[%s19017_s3 + $0x5b0] sm:$0xf0] }
 0x3a2   :  { %2514 = vmatmul.bf16.vlgmr.msrb.gmra.mxu1 %v2312_v19  ;;  %2527 = vmatmul.bf16.vlgmr.msrb.gmra.mxu2 %v2312_v19 }
 0x3a3   :  { %2540 = vmatmul.bf16.vlgmr.msrb.gmra.mxu3 %v2312_v19  ;;  %2553 = vmatmul.bf16.vlgmr.msra.gmra.mxu0 %v2312_v19  ;;  %v2309_v33 = vpop.f32.mrf.mxu0  ;;  %v8456_v19 = vld [vmem:[%s19017_s3 + $0x5e8] sm:$0xf] }
 0x3a4   :  { %2639 = vmatpush.bf16.msrb.mxu1 %v13473_v59  ;;  %2652 = vmatpush.bf16.msrb.mxu2 %v13491_v16  ;;  %v2567_v59 = vld [vmem:[#allocation1] sm:$0xff]  ;;  %v19266_v16 = vld [vmem:[#allocation6_spill] sm:$0xff]  ;;  %v8421_v33 = vor.u32 %v10462_v36, %v8418_v37 }
 0x3a5   :  { %2665 = vmatpush.bf16.msrb.mxu3 %v13479_v10  ;;  %2678 = vmatpush.bf16.msra.mxu0 %v13485_v7  ;;  %v2569_v10 = vld [vmem:[#allocation1 + $0x12] sm:$0xff]  ;;  %v2570_v7 = vld [vmem:[#allocation1 + $0x1b] sm:$0xff]  ;;  %v10446_v37 = vld [vmem:[%s19017_s3 + $0x524] sm:$0xf] }
 0x3a8   :  { %2640 = vmatpush.bf16.msrb.mxu1 %v13497_v24  ;;  %2653 = vmatpush.bf16.msrb.mxu2 %v13515_v32  ;;  %v19267_v24 = vld [vmem:[#allocation9_spill] sm:$0xff]  ;;  %v19270_v32 = vld [vmem:[#allocation8_spill] sm:$0xff] }
 0x3a9   :  { %2666 = vmatpush.bf16.msrb.mxu3 %v13503_v26  ;;  %2679 = vmatpush.bf16.msra.mxu0 %v13509_v27  ;;  %v19268_v26 = vld [vmem:[#allocation10_spill] sm:$0xff]  ;;  %v19269_v27 = vld [vmem:[#allocation7_spill] sm:$0xff] }
 0x3ac   :  { %2641 = vmatpush.bf16.msrb.mxu1 %v13521_v34  ;;  %2654 = vmatpush.bf16.msrb.mxu2 %v13539_v29  ;;  %v2572_v34 = vld [vmem:[#allocation1 + $0x2d] sm:$0xff]  ;;  %v2574_v29 = vld [vmem:[#allocation1 + $0x3f] sm:$0xff] }
 0x3ad   :  { %2667 = vmatpush.bf16.msrb.mxu3 %v13527_v35  ;;  %2680 = vmatpush.bf16.msra.mxu0 %v13533_v4  ;;  %v2573_v35 = vld [vmem:[#allocation1 + $0x36] sm:$0xff]  ;;  %v2571_v4 = vld [vmem:[#allocation1 + $0x24] sm:$0xff] }
 0x3b0   :  { %2642 = vmatpush.bf16.msrb.mxu1 %v13545_v42  ;;  %2655 = vmatpush.bf16.msrb.mxu2 %v13563_v48  ;;  %v8301_v42 = vld [vmem:[%s19014_s0 + $0x35] sm:$0x1] }
 0x3b1   :  { %2668 = vmatpush.bf16.msrb.mxu3 %v13551_v6  ;;  %2681 = vmatpush.bf16.msra.mxu0 %v19266_v16  ;;  %v19271_v6 = vld [vmem:[#allocation13_spill] sm:$0xff]  ;;  %v19272_v48 = vld [vmem:[#allocation14_spill] sm:$0xff]  ;;  %2576 = vst [vmem:[#allocation1] ss:$9 sm:$0xff] %v8301_v42  ;;  %v8368_v42 = vld [vmem:[%s19017_s3 + $0x540] sm:$0xf] }
 0x3b2   :  { %2608 = vmatmul.bf16.vlgmr.msra.gmra.mxu2 %v2568_v8  ;;  %2595 = vmatmul.bf16.vlgmr.msra.gmra.mxu1 %v2567_v59  ;;  %v10473_v8 = vld [vmem:[%s19017_s3 + $0x5f4] sm:$0xf0]  ;;  %v8384_v59 = vld [vmem:[%s19017_s3 + $0x560] sm:$0xf] }
 0x3b3   :  { %2621 = vmatmul.bf16.vlgmr.msra.gmra.mxu3 %v2569_v10  ;;  %2634 = vmatmul.bf16.vlgmr.msrb.gmra.mxu0 %v2570_v7  ;;  %v10456_v10 = vld [vmem:[%s19017_s3 + $0x56c] sm:$0xf0]  ;;  %v8457_v7 = vor.u32 %v10473_v8, %v8456_v19  ;;  %v8354_v19 = vld [vmem:[%s19017_s3 + $0x530] sm:$0xf0] }
 0x3b4   :  { %2643 = vmatpush.bf16.msrb.mxu1 %v19267_v24  ;;  %2656 = vmatpush.bf16.msrb.mxu2 %v19268_v26  ;;  %v8385_v16 = vor.u32 %v10456_v10, %v8384_v59  ;;  %v10471_v24 = vld [vmem:[%s19017_s3 + $0x5ec] sm:$0xf]  ;;  %v8458_v26 = vld [vmem:[%s19017_s3 + $0x5f8] sm:$0xf0]  ;;  %v8357_v59 = vor.u32 %v10446_v37, %v8354_v19  ;;  %v10457_v10 = vld [vmem:[%s19017_s3 + $0x574] sm:$0xf0] }
 0x3b5   :  { %2669 = vmatpush.bf16.msrb.mxu3 %v19269_v27  ;;  %2682 = vmatpush.bf16.msra.mxu0 %v19270_v32  ;;  %v8461_v27 = vor.u32 %v10471_v24, %v8458_v26  ;;  %v10458_v32 = vld [vmem:[%s19017_s3 + $0x584] sm:$0xf]  ;;  %v10455_v24 = vld [vmem:[%s19017_s3 + $0x56c] sm:$0xf]  ;;  %v14289_v37 = vld [vmem:[%s19015_s1 + $0x58] sm:$0xff] }
 0x3b6   :  { %v14295_v19 = vld [vmem:[%s19015_s1 + $0xa8] sm:$0xff] }
 0x3b8   :  { %2644 = vmatpush.bf16.msrb.mxu1 %v19271_v6  ;;  %2657 = vmatpush.bf16.msrb.mxu2 %v19272_v48  ;;  %v2577_v56 = vld [vmem:[#allocation1] sm:$0xff]  ;;  %v10452_v6 = vld [vmem:[%s19017_s3 + $0x54c] sm:$0xf0] }
 0x3b9   :  { %2670 = vmatpush.bf16.msrb.mxu3 %v19273_v61  ;;  %2683 = vmatpush.bf16.msra.mxu0 %v19274_v62  ;;  %v8369_v61 = vor.u32 %v10452_v6, %v8368_v42  ;;  %v10467_v62 = vld [vmem:[%s19017_s3 + $0x5cc] sm:$0xf] }
 0x3bc   :  { %2645 = vmatpush.bf16.msrb.mxu1 %v19275_v25  ;;  %2658 = vmatpush.bf16.msrb.mxu2 %v19276_v3  ;;  %v8442_v25 = vld [vmem:[%s19017_s3 + $0x5d8] sm:$0xf0] }
 0x3bd   :  { %2671 = vmatpush.bf16.msrb.mxu3 %v19277_v55  ;;  %2684 = vmatpush.bf16.msra.mxu0 %v19278_v54  ;;  %v8445_v3 = vor.u32 %v10467_v62, %v8442_v25  ;;  %v10454_v55 = vld [vmem:[%s19017_s3 + $0x564] sm:$0xf]  ;;  %v8386_v54 = vld [vmem:[%s19017_s3 + $0x570] sm:$0xf0]  ;;  %v8362_v25 = vld [vmem:[%s19017_s3 + $0x538] sm:$0xf0] }
 0x3c0   :  { %2646 = vmatpush.bf16.msrb.mxu1 %v19279_v47  ;;  %2659 = vmatpush.bf16.msrb.mxu2 %v19280_v23  ;;  %v8424_v47 = vld [vmem:[%s19017_s3 + $0x5a8] sm:$0xf] }
 0x3c1   :  { %2672 = vmatpush.bf16.msrb.mxu3 %v19282_v50  ;;  %2685 = vmatpush.bf16.msra.mxu0 %v19283_v53  ;;  %v10465_v50 = vld [vmem:[%s19017_s3 + $0x5b4] sm:$0xf0]  ;;  %v8352_v53 = vld [vmem:[%s19017_s3 + $0x520] sm:$0xf] }
 0x3c2   :  { %v8425_v20 = vor.u32 %v10465_v50, %v8424_v47  ;;  %v8344_v50 = vld [vmem:[%s19017_s3 + $0x508] sm:$0xf] }
 0x3c3   :  { %2660 = vmatmul.bf16.vlgmr.msrb.gmra.mxu2 %v2572_v34  ;;  %2647 = vmatmul.bf16.vlgmr.msrb.gmra.mxu1 %v2571_v4  ;;  %v8402_v34 = vld [vmem:[%s19017_s3 + $0x590] sm:$0xf0] }
 0x3c4   :  { %2691 = vmatpush.bf16.msra.mxu1 %v19281_v12  ;;  %2673 = vmatmul.bf16.vlgmr.msrb.gmra.mxu3 %v2573_v35  ;;  %v8440_v35 = vld [vmem:[%s19017_s3 + $0x5c8] sm:$0xf]  ;;  %v8405_v4 = vor.u32 %v10458_v32, %v8402_v34  ;;  %v8389_v12 = vor.u32 %v10454_v55, %v8386_v54  ;;  %v14203_v55 = vld [vmem:[%s19015_s1 + $0x78] sm:$0xff] }
 0x3c5   :  { %2686 = vmatmul.bf16.vlgmr.msra.gmra.mxu0 %v2574_v29  ;;  %2899 = vmatpush.bf16.msra.mxu2 %v8449_v43  ;;  %v10469_v29 = vld [vmem:[%s19017_s3 + $0x5d4] sm:$0xf0]  ;;  %v10463_v43 = vld [vmem:[%s19017_s3 + $0x5ac] sm:$0xf]  ;;  %v8376_v32 = vld [vmem:[%s19017_s3 + $0x548] sm:$0xf] }
 0x3c6   :  { %2912 = vmatpush.bf16.msra.mxu3 %v8453_v11  ;;  %2925 = vmatpush.bf16.msrb.mxu0 %v8457_v7  ;;  %v8441_v48 = vor.u32 %v10469_v29, %v8440_v35  ;;  %v8336_v11 = vld [vmem:[%s19017_s3 + $0x500] sm:$0xf]  ;;  %v10453_v35 = vld [vmem:[%s19017_s3 + $0x554] sm:$0xf0]  ;;  %v8378_v29 = vld [vmem:[%s19017_s3 + $0x558] sm:$0xf0] }
 0x3c7   :  { %v8337_v17 = vor.u32 %v10444_v14, %v8336_v11  ;;  %v8377_v42 = vor.u32 %v10453_v35, %v8376_v32  ;;  %v14253_v14 = vld [vmem:[%s19015_s1 + $0x18] sm:$0xff] }
 0x3c8   :  { %2692 = vmatpush.bf16.msra.mxu1 %v19284_v9  ;;  %v10448_v9 = vld [vmem:[%s19017_s3 + $0x52c] sm:$0xf0] }
 0x3c9   :  { %2900 = vmatpush.bf16.msra.mxu2 %v8433_v1  ;;  %v8353_v40 = vor.u32 %v10448_v9, %v8352_v53  ;;  %v8429_v1 = vor.u32 %v10463_v43, %v8426_v44  ;;  %v10445_v53 = vld [vmem:[%s19017_s3 + $0x514] sm:$0xf0]  ;;  %v14235_v44 = vld [vmem:[%s19015_s1 + $0x20] sm:$0xff] }
 0x3ca   :  { %2913 = vmatpush.bf16.msra.mxu3 %v8437_v31  ;;  %2926 = vmatpush.bf16.msrb.mxu0 %v8441_v48  ;;  %v8360_v48 = vld [vmem:[%s19017_s3 + $0x528] sm:$0xf]  ;;  %v8345_v43 = vor.u32 %v10445_v53, %v8344_v50  ;;  %v14390_v50 = vld [vmem:[%s19015_s1 + $0x80] sm:$0xff] }
 0x3cc   :  { %2693 = vmatpush.bf16.msra.mxu1 %v19285_v45 }
 0x3cd   :  { %2901 = vmatpush.bf16.msra.mxu2 %v8417_v15 }
 0x3ce   :  { %2914 = vmatpush.bf16.msra.mxu3 %v8421_v33  ;;  %2927 = vmatpush.bf16.msrb.mxu0 %v8425_v20  ;;  %v8392_v33 = vld [vmem:[%s19017_s3 + $0x568] sm:$0xf]  ;;  %v8346_v20 = vld [vmem:[%s19017_s3 + $0x518] sm:$0xf0] }
 0x3d0   :  { %2694 = vmatpush.bf16.msra.mxu1 %v13979_v60 }
 0x3d1   :  { %2902 = vmatpush.bf16.msra.mxu2 %v8401_v22 }
 0x3d2   :  { %2915 = vmatpush.bf16.msra.mxu3 %v8405_v4  ;;  %v10451_v4 = vld [vmem:[%s19017_s3 + $0x54c] sm:$0xf] }
 0x3d3   :  { %v8381_v6 = vor.u32 %v10451_v4, %v8378_v29  ;;  %v14350_v29 = vld [vmem:[%s19015_s1 + $0xd8] sm:$0xff] }
 0x3d4   :  { %2695 = vmatpush.bf16.msra.mxu1 %v13985_v63 }
 0x3d5   :  { %2903 = vmatpush.bf16.msra.mxu2 %v8385_v16  ;;  %v8393_v16 = vor.u32 %v10457_v10, %v8392_v33  ;;  %v14308_v10 = vld [vmem:[%s19015_s1 + $0xe8] sm:$0xff] }
 0x3d6   :  { %2916 = vmatpush.bf16.msra.mxu3 %v8389_v12 }
 0x3d8   :  { %2696 = vmatpush.bf16.msra.mxu1 %v13991_v52 }
 0x3d9   :  { %2904 = vmatpush.bf16.msra.mxu2 %v8369_v61  ;;  %v10447_v61 = vld [vmem:[%s19017_s3 + $0x52c] sm:$0xf] }
 0x3da   :  { %v8365_v12 = vor.u32 %v10447_v61, %v8362_v25  ;;  %v14369_v61 = vld [vmem:[%s19015_s1 + $0xd0] sm:$0xff] }
 0x3dc   :  { %2697 = vmatpush.bf16.msra.mxu1 %v13997_v46 }
 0x3dd   :  { %2905 = vmatpush.bf16.msra.mxu2 %v8353_v40  ;;  %v14229_v40 = vld [vmem:[%s19015_s1 + $0x70] sm:$0xff] }
 0x3e0   :  { %2698 = vmatpush.bf16.msra.mxu1 %v14003_v49 }
 0x3e1   :  { %2906 = vmatpush.bf16.msra.mxu2 %v8337_v17  ;;  %v14265_v17 = vld [vmem:[%s19015_s1 + $0x60] sm:$0xff] }
 0x3e3   :  { %2699 = vmatmul.bf16.vlgmr.msra.gmra.mxu1 %v2577_v56 }
 0x3e4   :  { %2938 = vmatpush.bf16.msrb.mxu1 %v8461_v27  ;;  %v8338_v27 = vld [vmem:[%s19017_s3 + $0x510] sm:$0xf0] }
 0x3e5   :  { %2980 = vmatpush.bf16.msrb.mxu2 %v13880_v41  ;;  %v10442_v41 = vld [vmem:[%s19017_s3 + $0x504] sm:$0xf] }
 0x3e6   :  { %v8341_v34 = vor.u32 %v10442_v41, %v8338_v27  ;;  %v14338_v27 = vld [vmem:[%s19015_s1 + $0x48] sm:$0xff] }
 0x3e8   :  { %2939 = vmatpush.bf16.msrb.mxu1 %v8445_v3 }
 0x3e9   :  { %2981 = vmatpush.bf16.msrb.mxu2 %v13284_v38  ;;  %v10449_v38 = vld [vmem:[%s19017_s3 + $0x534] sm:$0xf0] }
 0x3ea   :  { %v8361_v54 = vor.u32 %v10449_v38, %v8360_v48  ;;  %v14362_v48 = vld [vmem:[%s19015_s1 + $0x90] sm:$0xff] }
 0x3ec   :  { %2940 = vmatpush.bf16.msrb.mxu1 %v8429_v1 }
 0x3f0   :  { %2941 = vmatpush.bf16.msrb.mxu1 %v8413_v51 }
 0x41f   :  { %v2515_v23 = vpop.f32.mrf.mxu1 }
 0x420   :  { %v14109_v45 = vadd.f32 %v2515_v23, %v13827_v5  ;;  %v2554_v56 = vpop.f32.mrf.mxu0  ;;  %v10450_v5 = vld [vmem:[%s19017_s3 + $0x544] sm:$0xf]  ;;  %v14209_v23 = vld [vmem:[%s19015_s1 + $0x28] sm:$0xff] }
 0x421   :  { %v14118_v39 = vadd.f32 %v2554_v56, %v13875_v0  ;;  %v8373_v13 = vor.u32 %v10450_v5, %v8370_v2  ;;  %v10461_v0 = vld [vmem:[%s19017_s3 + $0x594] sm:$0xf0]  ;;  %2982 = vmatpush.bf16.msrb.mxu2 %v14209_v23  ;;  %v10443_v56 = vld [vmem:[%s19017_s3 + $0x50c] sm:$0xf] }
 0x422   :  { %v8409_v15 = vor.u32 %v10461_v0, %v8408_v21  ;;  %v8349_v1 = vor.u32 %v10443_v56, %v8346_v20  ;;  %v14241_v21 = vld [vmem:[%s19015_s1 + $0x68] sm:$0xff]  ;;  %v14247_v0 = vld [vmem:[%s19015_s1 + $0xb8] sm:$0xff] }
 0x423   :  { %2917 = vmatpush.bf16.msra.mxu3 %v8373_v13 }
 0x424   :  { %2928 = vmatpush.bf16.msrb.mxu0 %v8409_v15  ;;  %v14259_v15 = vld [vmem:[%s19015_s1 + $0xf8] sm:$0xff] }
 0x425   :  { %v2528_v31 = vpop.f32.mrf.mxu2  ;;  %2983 = vmatpush.bf16.msrb.mxu2 %v14235_v44 }
 0x426   :  { %v14145_v22 = vadd.f32 %v2528_v31, %v13830_v58  ;;  %v2541_v36 = vpop.f32.mrf.mxu3  ;;  %v14283_v31 = vld [vmem:[%s19015_s1 + $0xf0] sm:$0xff] }
 0x427   :  { %v14157_v8 = vadd.f32 %v2541_v36, %v13872_v28  ;;  %v2517_v58 = vpop.f32.mrf.mxu1  ;;  %v8394_v28 = vld [vmem:[%s19017_s3 + $0x578] sm:$0xf0]  ;;  %2918 = vmatpush.bf16.msra.mxu3 %v8357_v59  ;;  %v14302_v59 = vld [vmem:[%s19015_s1 + $0x8] sm:$0xff] }
 0x428   :  { %v2556_v7 = vpop.f32.mrf.mxu0  ;;  %v8397_v26 = vor.u32 %v10455_v24, %v8394_v28  ;;  %2929 = vmatpush.bf16.msrb.mxu0 %v8393_v16  ;;  %v14320_v16 = vld [vmem:[%s19015_s1 + $0xa0] sm:$0xff] }
 0x429   :  { %2984 = vmatpush.bf16.msrb.mxu2 %v14253_v14  ;;  %v14326_v28 = vld [vmem:[%s19015_s1] sm:$0xff] }
 0x42a   :  { %2942 = vmatpush.bf16.msrb.mxu1 %v8397_v26  ;;  %v14332_v26 = vld [vmem:[%s19015_s1 + $0xe0] sm:$0xff] }
 0x42b   :  { %2919 = vmatpush.bf16.msra.mxu3 %v8341_v34  ;;  %v14344_v34 = vld [vmem:[%s19015_s1 + $0x98] sm:$0xff] }
 0x42c   :  { %2930 = vmatpush.bf16.msrb.mxu0 %v8377_v42 }
 0x42d   :  { %v2530_v62 = vpop.f32.mrf.mxu2  ;;  %2985 = vmatpush.bf16.msrb.mxu2 %v14277_v30 }
 0x42e   :  { %v2543_v3 = vpop.f32.mrf.mxu3  ;;  %2943 = vmatpush.bf16.msrb.mxu1 %v8381_v6  ;;  %v14356_v6 = vld [vmem:[%s19015_s1 + $0x40] sm:$0xff] }
 0x42f   :  { %2993 = vmatpush.bf16.msrb.mxu3 %v14203_v55  ;;  %v2596_v47 = vpop.f32.mrf.mxu1  ;;  %v14375_v3 = vld [vmem:[%s19015_s1 + $0x88] sm:$0xff] }
 0x430   :  { %v14218_v9 = vpop.f32.mrf.mxu0  ;;  %2931 = vmatpush.bf16.msrb.mxu0 %v8361_v54  ;;  %v2597_v33 = vadd.f32 %v13923_v57, %v2596_v47  ;;  %v14314_v57 = vld [vmem:[%s19015_s1 + $0x50] sm:$0xff]  ;;  %v14381_v47 = vld [vmem:[%s19015_s1 + $0xc8] sm:$0xff] }
 0x431   :  { %2986 = vmatpush.bf16.msrb.mxu2 %v14302_v59 }
 0x432   :  { %2944 = vmatpush.bf16.msrb.mxu1 %v8365_v12  ;;  %v8462_v12 = vld [vmem:[%s19014_s0 + $0x36] sm:$0xff] }
 0x433   :  { %2994 = vmatpush.bf16.msrb.mxu3 %v14229_v40  ;;  %2959 = vst [vmem:[#allocation1] ss:$9 sm:$0xff] %v8462_v12 }
 0x434   :  { %2932 = vmatpush.bf16.msrb.mxu0 %v8345_v43 }
 0x435   :  { %v2609_v5 = vpop.f32.mrf.mxu2  ;;  %2987 = vmatpush.bf16.msrb.mxu2 %v14326_v28 }
 0x436   :  { %v2622_v2 = vpop.f32.mrf.mxu3  ;;  %2945 = vmatpush.bf16.msrb.mxu1 %v8349_v1  ;;  %v2610_v24 = vadd.f32 %v2609_v5, %v2597_v33  ;;  %v14420_v33 = vld [vmem:[%s19015_s1 + $0x1f8] sm:$0xff] }
 0x437   :  { %2995 = vmatpush.bf16.msrb.mxu3 %v14241_v21  ;;  %v2598_v13 = vpop.f32.mrf.mxu1 }
 0x438   :  { %3006 = vmatpush.bf16.msra.mxu0 %v14247_v0  ;;  %v2637_v11 = vpop.f32.mrf.mxu0  ;;  %v2623_v35 = vadd.f32 %v2622_v2, %v2610_v24  ;;  %v14438_v24 = vld [vmem:[%s19015_s1 + $0x1b0] sm:$0xff] }
 0x439   :  { %v14402_v11 = vld [vmem:[%s19015_s1 + $0x138] sm:$0xff] }
 0x43a   :  { %3019 = vmatpush.bf16.msra.mxu1 %v14259_v15  ;;  %v2636_v38 = vadd.f32 %v14218_v9, %v2623_v35  ;;  %v14396_v9 = vld [vmem:[%s19015_s1 + $0xc0] sm:$0xff]  ;;  %v14456_v35 = vld [vmem:[%s19015_s1 + $0x168] sm:$0xff]  ;;  %v2962_v12 = vld [vmem:[#allocation1 + $0x12] sm:$0xff] }
 0x43b   :  { %2996 = vmatpush.bf16.msrb.mxu3 %v14265_v17 }
 0x43c   :  { %3007 = vmatpush.bf16.msra.mxu0 %v14271_v18 }
 0x43d   :  { %v2611_v51 = vpop.f32.mrf.mxu2 }
 0x43e   :  { %3020 = vmatpush.bf16.msra.mxu1 %v14283_v31  ;;  %v2624_v36 = vpop.f32.mrf.mxu3  ;;  %v14408_v51 = vld [vmem:[%s19015_s1 + $0x178] sm:$0xff] }
 0x43f   :  { %2997 = vmatpush.bf16.msrb.mxu3 %v14289_v37  ;;  %v14414_v36 = vld [vmem:[%s19015_s1 + $0x1b8] sm:$0xff] }
 0x440   :  { %3008 = vmatpush.bf16.msra.mxu0 %v14295_v19  ;;  %v2648_v58 = vpop.f32.mrf.mxu1 }
 0x441   :  { %v2649_v54 = vadd.f32 %v2648_v58, %v2636_v38  ;;  %v14426_v58 = vld [vmem:[%s19015_s1 + $0x130] sm:$0xff]  ;;  %v2960_v38 = vld [vmem:[#allocation1] sm:$0xff] }
 0x442   :  { %3021 = vmatpush.bf16.msra.mxu1 %v14308_v10  ;;  %v2687_v7 = vpop.f32.mrf.mxu0 }
 0x443   :  { %2998 = vmatpush.bf16.msrb.mxu3 %v14314_v57 }
 0x444   :  { %3009 = vmatpush.bf16.msra.mxu0 %v14320_v16 }
 0x446   :  { %3022 = vmatpush.bf16.msra.mxu1 %v14332_v26  ;;  %v2661_v41 = vpop.f32.mrf.mxu2 }
 0x447   :  { %2999 = vmatpush.bf16.msrb.mxu3 %v14338_v27  ;;  %v2674_v32 = vpop.f32.mrf.mxu3  ;;  %v2662_v53 = vadd.f32 %v2661_v41, %v2649_v54  ;;  %v14444_v41 = vld [vmem:[%s19015_s1 + $0x1f0] sm:$0xff]  ;;  %v14480_v54 = vld [vmem:[%s19015_s1 + $0x160] sm:$0xff] }
 0x448   :  { %3010 = vmatpush.bf16.msra.mxu0 %v14344_v34  ;;  %v2650_v4 = vpop.f32.mrf.mxu1  ;;  %19286 = vst [vmem:[#allocation25_spill] sm:$0xff] %v14480_v54 }
 0x449   :  { %v2675_v56 = vadd.f32 %v2674_v32, %v2662_v53  ;;  %v14450_v32 = vld [vmem:[%s19015_s1 + $0x128] sm:$0xff]  ;;  %v2963_v53 = vld [vmem:[#allocation1 + $0x1b] sm:$0xff] }
 0x44a   :  { %3023 = vmatpush.bf16.msra.mxu1 %v14350_v29  ;;  %v2689_v42 = vpop.f32.mrf.mxu0  ;;  %v14462_v4 = vld [vmem:[%s19015_s1 + $0x1a8] sm:$0xff] }
 0x44b   :  { %3000 = vmatpush.bf16.msrb.mxu3 %v14356_v6  ;;  %v2688_v20 = vadd.f32 %v2687_v7, %v2675_v56  ;;  %v14432_v7 = vld [vmem:[%s19015_s1 + $0x170] sm:$0xff]  ;;  %v14468_v42 = vld [vmem:[%s19015_s1 + $0x1e8] sm:$0xff]  ;;  %v14486_v56 = vld [vmem:[%s19015_s1 + $0x1a0] sm:$0xff] }
 0x44c   :  { %3011 = vmatpush.bf16.msra.mxu0 %v14362_v48  ;;  %19287 = vst [vmem:[#allocation27_spill] sm:$0xff] %v14486_v56 }
 0x44e   :  { %3024 = vmatpush.bf16.msra.mxu1 %v14369_v61  ;;  %v2663_v62 = vpop.f32.mrf.mxu2 }
 0x44f   :  { %v2676_v25 = vpop.f32.mrf.mxu3  ;;  %v2961_v62 = vld [vmem:[#allocation1 + $0x9] sm:$0xff] }
 0x450   :  { %3012 = vmatpush.bf16.msra.mxu0 %v14375_v3  ;;  %v14474_v25 = vld [vmem:[%s19015_s1 + $0x120] sm:$0xff] }
 0x452   :  { %3025 = vmatpush.bf16.msra.mxu1 %v14381_v47 }
 0x454   :  { %3013 = vmatpush.bf16.msra.mxu0 %v14390_v50 }
 0x456   :  { %3026 = vmatpush.bf16.msra.mxu1 %v14396_v9 }
 0x460   :  { %v2700_v43 = vpop.f32.mrf.mxu1 }
 0x461   :  { %v2701_v1 = vadd.f32 %v2700_v43, %v2688_v20  ;;  %v14492_v20 = vld [vmem:[%s19015_s1 + $0x1e0] sm:$0xff]  ;;  %v14498_v43 = vld [vmem:[%s19015_s1 + $0x118] sm:$0xff] }
 0x462   :  { %19288 = vst [vmem:[#allocation28_spill] sm:$0xff] %v14492_v20 }
 0x463   :  { %v2704_v5 = vmax.f32 %v2701_v1, 0.0  ;;  %19289 = vst [vmem:[#allocation29_spill] sm:$0xff] %v14498_v43  ;;  %v14504_v1 = vld [vmem:[%s19015_s1 + $0x158] sm:$0xff] }
 0x464   :  { %19290 = vst [vmem:[#allocation31_spill] sm:$0xff] %v14504_v1 }
 0x465   :  { %v2705_v2 = vpack.c.bf16 %v2704_v5, %v2704_v5  ;;  %v14510_v5 = vld [vmem:[%s19015_s1 + $0x198] sm:$0xff] }
 0x466   :  { %19291 = vst [vmem:[#allocation30_spill] sm:$0xff] %v14510_v5 }
 0x467   :  { %2907 = vmatmul.bf16.vlgmr.msra.gmra.mxu2 %v2705_v2  ;;  %2920 = vmatmul.bf16.vlgmr.msra.gmra.mxu3 %v2705_v2 }
 0x468   :  { %2933 = vmatmul.bf16.vlgmr.msrb.gmra.mxu0 %v2705_v2  ;;  %2946 = vmatmul.bf16.vlgmr.msrb.gmra.mxu1 %v2705_v2  ;;  %v2702_v13 = vpop.f32.mrf.mxu1  ;;  %v14516_v2 = vld [vmem:[%s19015_s1 + $0x1d8] sm:$0xff] }
 0x469   :  { %3032 = vmatpush.bf16.msra.mxu2 %v14402_v11  ;;  %3045 = vmatpush.bf16.msra.mxu3 %v14408_v51  ;;  %19292 = vst [vmem:[#allocation5_spill] sm:$0xff] %v14516_v2  ;;  %v2964_v13 = vld [vmem:[#allocation1 + $0x24] sm:$0xff] }
 0x46a   :  { %3058 = vmatpush.bf16.msrb.mxu0 %v14414_v36  ;;  %3071 = vmatpush.bf16.msrb.mxu1 %v14420_v33 }
 0x46d   :  { %3033 = vmatpush.bf16.msra.mxu2 %v14426_v58  ;;  %3046 = vmatpush.bf16.msra.mxu3 %v14432_v7 }
 0x46e   :  { %3059 = vmatpush.bf16.msrb.mxu0 %v14438_v24  ;;  %3072 = vmatpush.bf16.msrb.mxu1 %v14444_v41 }
 0x471   :  { %3034 = vmatpush.bf16.msra.mxu2 %v14450_v32  ;;  %3047 = vmatpush.bf16.msra.mxu3 %v14456_v35 }
 0x472   :  { %3060 = vmatpush.bf16.msrb.mxu0 %v14462_v4  ;;  %3073 = vmatpush.bf16.msrb.mxu1 %v14468_v42 }
 0x475   :  { %3035 = vmatpush.bf16.msra.mxu2 %v14474_v25  ;;  %3048 = vmatpush.bf16.msra.mxu3 %v14480_v54 }
 0x476   :  { %3061 = vmatpush.bf16.msrb.mxu0 %v14486_v56  ;;  %3074 = vmatpush.bf16.msrb.mxu1 %v14492_v20 }
 0x477   :  { %2988 = vmatmul.bf16.vlgmr.msrb.gmra.mxu2 %v2960_v38  ;;  %3001 = vmatmul.bf16.vlgmr.msrb.gmra.mxu3 %v2961_v62  ;;  %v2965_v38 = vld [vmem:[#allocation1 + $0x2d] sm:$0xff]  ;;  %v2966_v62 = vld [vmem:[#allocation1 + $0x36] sm:$0xff] }
 0x478   :  { %3014 = vmatmul.bf16.vlgmr.msra.gmra.mxu0 %v2962_v12  ;;  %3027 = vmatmul.bf16.vlgmr.msra.gmra.mxu1 %v2963_v53  ;;  %v2967_v12 = vld [vmem:[#allocation1 + $0x3f] sm:$0xff]  ;;  %v8463_v53 = vld [vmem:[%s19014_s0 + $0x3e] sm:$0x1] }
 0x479   :  { %3036 = vmatpush.bf16.msra.mxu2 %v14498_v43  ;;  %3049 = vmatpush.bf16.msra.mxu3 %v14504_v1  ;;  %v14525_v1 = vld [vmem:[%s19015_s1 + $0x110] sm:$0xff]  ;;  %2969 = vst [vmem:[#allocation1] ss:$9 sm:$0xff] %v8463_v53  ;;  %v14555_v53 = vld [vmem:[%s19015_s1 + $0x148] sm:$0xff] }
 0x47a   :  { %3062 = vmatpush.bf16.msrb.mxu0 %v14510_v5  ;;  %3075 = vmatpush.bf16.msrb.mxu1 %v14516_v2  ;;  %19293 = vst [vmem:[#allocation6_spill] sm:$0xff] %v14525_v1  ;;  %v14531_v5 = vld [vmem:[%s19015_s1 + $0x150] sm:$0xff] }
 0x47b   :  { %19294 = vst [vmem:[#allocation9_spill] sm:$0xff] %v14531_v5  ;;  %v14537_v2 = vld [vmem:[%s19015_s1 + $0x190] sm:$0xff] }
 0x47c   :  { %19295 = vst [vmem:[#allocation10_spill] sm:$0xff] %v14537_v2  ;;  %v14543_v43 = vld [vmem:[%s19015_s1 + $0x1d0] sm:$0xff] }
 0x47d   :  { %3037 = vmatpush.bf16.msra.mxu2 %v14525_v1  ;;  %3050 = vmatpush.bf16.msra.mxu3 %v14531_v5  ;;  %19296 = vst [vmem:[#allocation7_spill] sm:$0xff] %v14543_v43  ;;  %v14549_v1 = vld [vmem:[%s19015_s1 + $0x108] sm:$0xff] }
 0x47e   :  { %3063 = vmatpush.bf16.msrb.mxu0 %v14537_v2  ;;  %3076 = vmatpush.bf16.msrb.mxu1 %v14543_v43  ;;  %19297 = vst [vmem:[#allocation8_spill] sm:$0xff] %v14549_v1  ;;  %v14561_v2 = vld [vmem:[%s19015_s1 + $0x188] sm:$0xff] }
 0x47f   :  { %19298 = vst [vmem:[#allocation13_spill] sm:$0xff] %v14555_v53  ;;  %v14567_v5 = vld [vmem:[%s19015_s1 + $0x1c8] sm:$0xff] }
 0x480   :  { %19299 = vst [vmem:[#allocation14_spill] sm:$0xff] %v14561_v2 }
 0x481   :  { %3038 = vmatpush.bf16.msra.mxu2 %v14549_v1  ;;  %3051 = vmatpush.bf16.msra.mxu3 %v14555_v53  ;;  %19300 = vst [vmem:[#allocation11_spill] sm:$0xff] %v14567_v5  ;;  %v14573_v1 = vld [vmem:[%s19015_s1 + $0x100] sm:$0xff] }
 0x482   :  { %3064 = vmatpush.bf16.msrb.mxu0 %v14561_v2  ;;  %3077 = vmatpush.bf16.msrb.mxu1 %v14567_v5  ;;  %19301 = vst [vmem:[#allocation12_spill] sm:$0xff] %v14573_v1  ;;  %v14579_v53 = vld [vmem:[%s19015_s1 + $0x140] sm:$0xff]  ;;  %v14585_v2 = vld [vmem:[%s19015_s1 + $0x238] sm:$0xff] }
 0x483   :  { %19302 = vst [vmem:[#allocation17_spill] sm:$0xff] %v14579_v53  ;;  %v14591_v5 = vld [vmem:[%s19015_s1 + $0x180] sm:$0xff] }
 0x484   :  { %19303 = vst [vmem:[#allocation18_spill] sm:$0xff] %v14585_v2 }
 0x485   :  { %3039 = vmatpush.bf16.msra.mxu2 %v14573_v1  ;;  %3052 = vmatpush.bf16.msra.mxu3 %v14579_v53  ;;  %19304 = vst [vmem:[#allocation15_spill] sm:$0xff] %v14591_v5  ;;  %v14597_v1 = vld [vmem:[%s19015_s1 + $0x1c0] sm:$0xff]  ;;  %v14603_v53 = vld [vmem:[%s19015_s1 + $0x230] sm:$0xff] }
 0x486   :  { %3065 = vmatpush.bf16.msrb.mxu0 %v14591_v5  ;;  %19305 = vst [vmem:[#allocation16_spill] sm:$0xff] %v14597_v1  ;;  %3078 = vmatpush.bf16.msrb.mxu1 %v14597_v1  ;;  %v14609_v5 = vld [vmem:[%s19015_s1 + $0x228] sm:$0xff] }
 0x487   :  { %19306 = vst [vmem:[#allocation21_spill] sm:$0xff] %v14603_v53 }
 0x488   :  { %3040 = vmatmul.bf16.vlgmr.msra.gmra.mxu2 %v2964_v13  ;;  %3053 = vmatmul.bf16.vlgmr.msra.gmra.mxu3 %v2965_v38  ;;  %19307 = vst [vmem:[#allocation26_spill] sm:$0xff] %v14609_v5  ;;  %v2970_v13 = vld [vmem:[#allocation1] sm:$0xff] }
 0x489   :  { %3084 = vmatpush.bf16.msrb.mxu2 %v14585_v2  ;;  %3066 = vmatmul.bf16.vlgmr.msrb.gmra.mxu0 %v2966_v62  ;;  %v8610_v38 = vld [vmem:[%s19017_s3 + $0x6e0] sm:$0xf]  ;;  %v10504_v62 = vld [vmem:[%s19017_s3 + $0x6ec] sm:$0xf0]  ;;  %v8602_v2 = vld [vmem:[%s19017_s3 + $0x6c8] sm:$0xf] }
 0x48a   :  { %3079 = vmatmul.bf16.vlgmr.msrb.gmra.mxu1 %v2967_v12  ;;  %v10496_v12 = vld [vmem:[%s19017_s3 + $0x6ac] sm:$0xf0] }
 0x48d   :  { %3085 = vmatpush.bf16.msrb.mxu2 %v14603_v53 }
 0x491   :  { %3086 = vmatpush.bf16.msrb.mxu2 %v14609_v5 }
 0x495   :  { %3087 = vmatpush.bf16.msrb.mxu2 %v13979_v60  ;;  %v8594_v60 = vld [vmem:[%s19017_s3 + $0x6c0] sm:$0xf] }
 0x499   :  { %3088 = vmatpush.bf16.msrb.mxu2 %v13985_v63  ;;  %v8611_v63 = vor.u32 %v10504_v62, %v8610_v38  ;;  %v10503_v38 = vld [vmem:[%s19017_s3 + $0x6ec] sm:$0xf]  ;;  %v8620_v62 = vld [vmem:[%s19017_s3 + $0x6f8] sm:$0xf0] }
 0x49b   :  { %3292 = vmatpush.bf16.msrb.mxu3 %v8611_v63  ;;  %v8623_v63 = vor.u32 %v10503_v38, %v8620_v62  ;;  %v8618_v38 = vld [vmem:[%s19017_s3 + $0x6e8] sm:$0xf]  ;;  %v10505_v62 = vld [vmem:[%s19017_s3 + $0x6f4] sm:$0xf0] }
 0x49d   :  { %3089 = vmatpush.bf16.msrb.mxu2 %v13991_v52  ;;  %v10500_v52 = vld [vmem:[%s19017_s3 + $0x6cc] sm:$0xf0] }
 0x4a1   :  { %3090 = vmatpush.bf16.msrb.mxu2 %v13997_v46  ;;  %v8595_v46 = vor.u32 %v10500_v52, %v8594_v60  ;;  %v8562_v60 = vld [vmem:[%s19017_s3 + $0x680] sm:$0xf]  ;;  %v10492_v52 = vld [vmem:[%s19017_s3 + $0x68c] sm:$0xf0] }
 0x4a3   :  { %3293 = vmatpush.bf16.msrb.mxu3 %v8595_v46  ;;  %v8563_v46 = vor.u32 %v10492_v52, %v8562_v60  ;;  %v8619_v60 = vor.u32 %v10505_v62, %v8618_v38  ;;  %v8604_v52 = vld [vmem:[%s19017_s3 + $0x6d8] sm:$0xf0]  ;;  %v8596_v38 = vld [vmem:[%s19017_s3 + $0x6d0] sm:$0xf0] }
 0x4a5   :  { %3091 = vmatpush.bf16.msrb.mxu2 %v14003_v49  ;;  %v8578_v49 = vld [vmem:[%s19017_s3 + $0x6a0] sm:$0xf]  ;;  %3318 = vmatpush.bf16.msra.mxu1 %v8619_v60 }
 0x4a6   :  { %v8530_v60 = vld [vmem:[%s19017_s3 + $0x640] sm:$0xf] }
 0x4a8   :  { %3092 = vmatmul.bf16.vlgmr.msrb.gmra.mxu2 %v2970_v13  ;;  %v8579_v13 = vor.u32 %v10496_v12, %v8578_v49  ;;  %v10502_v49 = vld [vmem:[%s19017_s3 + $0x6e4] sm:$0xf]  ;;  %v8612_v12 = vld [vmem:[%s19017_s3 + $0x6f0] sm:$0xf0] }
 0x4a9   :  { %3331 = vmatpush.bf16.msra.mxu2 %v8623_v63  ;;  %v8615_v5 = vor.u32 %v10502_v49, %v8612_v12  ;;  %v8546_v63 = vld [vmem:[%s19017_s3 + $0x660] sm:$0xf]  ;;  %v10488_v49 = vld [vmem:[%s19017_s3 + $0x66c] sm:$0xf0] }
 0x4aa   :  { %3294 = vmatpush.bf16.msrb.mxu3 %v8579_v13  ;;  %v10499_v13 = vld [vmem:[%s19017_s3 + $0x6cc] sm:$0xf]  ;;  %v8547_v53 = vor.u32 %v10488_v49, %v8546_v63  ;;  %v8588_v63 = vld [vmem:[%s19017_s3 + $0x6b8] sm:$0xf0]  ;;  %v10484_v49 = vld [vmem:[%s19017_s3 + $0x64c] sm:$0xf0] }
 0x4ab   :  { %3305 = vmatpush.bf16.msra.mxu0 %v8615_v5  ;;  %v8607_v12 = vor.u32 %v10499_v13, %v8604_v52  ;;  %v10498_v5 = vld [vmem:[%s19017_s3 + $0x6c4] sm:$0xf]  ;;  %v10495_v13 = vld [vmem:[%s19017_s3 + $0x6ac] sm:$0xf]  ;;  %v8531_v43 = vor.u32 %v10484_v49, %v8530_v60  ;;  %v8514_v60 = vld [vmem:[%s19017_s3 + $0x620] sm:$0xf] }
 0x4ac   :  { %v8599_v62 = vor.u32 %v10498_v5, %v8596_v38  ;;  %v8591_v5 = vor.u32 %v10495_v13, %v8588_v63  ;;  %v10494_v38 = vld [vmem:[%s19017_s3 + $0x6a4] sm:$0xf]  ;;  %v10491_v13 = vld [vmem:[%s19017_s3 + $0x68c] sm:$0xf]  ;;  %v8572_v63 = vld [vmem:[%s19017_s3 + $0x698] sm:$0xf0] }
 0x4ad   :  { %3332 = vmatpush.bf16.msra.mxu2 %v8607_v12  ;;  %v8586_v12 = vld [vmem:[%s19017_s3 + $0x6a8] sm:$0xf]  ;;  %v10480_v49 = vld [vmem:[%s19017_s3 + $0x62c] sm:$0xf0] }
 0x4ae   :  { %3295 = vmatpush.bf16.msrb.mxu3 %v8563_v46  ;;  %v10501_v46 = vld [vmem:[%s19017_s3 + $0x6d4] sm:$0xf0] }
 0x4af   :  { %v8603_v52 = vor.u32 %v10501_v46, %v8602_v2  ;;  %3306 = vmatpush.bf16.msra.mxu0 %v8599_v62  ;;  %v8580_v2 = vld [vmem:[%s19017_s3 + $0x6b0] sm:$0xf0]  ;;  %v10497_v62 = vld [vmem:[%s19017_s3 + $0x6b4] sm:$0xf0] }
 0x4b0   :  { %v8583_v56 = vor.u32 %v10494_v38, %v8580_v2  ;;  %v10490_v38 = vld [vmem:[%s19017_s3 + $0x684] sm:$0xf] }
 0x4b1   :  { %3319 = vmatpush.bf16.msra.mxu1 %v8603_v52  ;;  %3333 = vmatpush.bf16.msra.mxu2 %v8591_v5  ;;  %v8515_v52 = vor.u32 %v10480_v49, %v8514_v60  ;;  %v8570_v5 = vld [vmem:[%s19017_s3 + $0x688] sm:$0xf]  ;;  %v10476_v60 = vld [vmem:[%s19017_s3 + $0x60c] sm:$0xf0] }
 0x4b2   :  { %3296 = vmatpush.bf16.msrb.mxu3 %v8547_v53  ;;  %v8587_v53 = vor.u32 %v10497_v62, %v8586_v12 }
 0x4b3   :  { %3307 = vmatpush.bf16.msra.mxu0 %v8583_v56  ;;  %v10493_v56 = vld [vmem:[%s19017_s3 + $0x694] sm:$0xf0] }
 0x4b5   :  { %3320 = vmatpush.bf16.msra.mxu1 %v8587_v53  ;;  %v8498_v53 = vld [vmem:[%s19017_s3 + $0x600] sm:$0xf] }
 0x4b6   :  { %3297 = vmatpush.bf16.msrb.mxu3 %v8531_v43  ;;  %v10487_v43 = vld [vmem:[%s19017_s3 + $0x66c] sm:$0xf] }
 0x4ba   :  { %3298 = vmatpush.bf16.msrb.mxu3 %v8515_v52  ;;  %v8554_v52 = vld [vmem:[%s19017_s3 + $0x668] sm:$0xf] }
 0x4e5   :  { %v2934_v46 = vpop.f32.mrf.mxu0  ;;  %v2947_v1 = vpop.f32.mrf.mxu1 }
 0x4e6   :  { %v14714_v54 = vadd.f32 %v2934_v46, %v14157_v8  ;;  %v14717_v20 = vadd.f32 %v2947_v1, %v14118_v39  ;;  %v8575_v8 = vor.u32 %v10491_v13, %v8572_v63  ;;  %v8564_v39 = vld [vmem:[%s19017_s3 + $0x690] sm:$0xf0]  ;;  %v8571_v63 = vor.u32 %v10493_v56, %v8570_v5  ;;  %v8540_v56 = vld [vmem:[%s19017_s3 + $0x658] sm:$0xf0] }
 0x4e7   :  { %v8567_v1 = vor.u32 %v10490_v38, %v8564_v39  ;;  %v8499_v38 = vor.u32 %v10476_v60, %v8498_v53  ;;  %v8548_v39 = vld [vmem:[%s19017_s3 + $0x670] sm:$0xf0] }
 0x4e8   :  { %19308 = vst [vmem:[#allocation20_spill] sm:$0xff] %v14717_v20  ;;  %3334 = vmatpush.bf16.msra.mxu2 %v8575_v8  ;;  %v10486_v8 = vld [vmem:[%s19017_s3 + $0x664] sm:$0xf]  ;;  %3321 = vmatpush.bf16.msra.mxu1 %v8571_v63  ;;  %v8532_v53 = vld [vmem:[%s19017_s3 + $0x650] sm:$0xf0] }
 0x4e9   :  { %3308 = vmatpush.bf16.msra.mxu0 %v8567_v1  ;;  %v8551_v1 = vor.u32 %v10486_v8, %v8548_v39  ;;  %3299 = vmatpush.bf16.msrb.mxu3 %v8499_v38  ;;  %v10485_v38 = vld [vmem:[%s19017_s3 + $0x654] sm:$0xf0]  ;;  %v10479_v8 = vld [vmem:[%s19017_s3 + $0x62c] sm:$0xf] }
 0x4ea   :  { %v2908_v2 = vpop.f32.mrf.mxu2  ;;  %v2921_v12 = vpop.f32.mrf.mxu3 }
 0x4eb   :  { %v14732_v46 = vadd.f32 %v2908_v2, %v14109_v45  ;;  %v14735_v62 = vadd.f32 %v2921_v12, %v14145_v22  ;;  %v8556_v22 = vld [vmem:[%s19017_s3 + $0x678] sm:$0xf0]  ;;  %v10489_v2 = vld [vmem:[%s19017_s3 + $0x674] sm:$0xf0]  ;;  %v10483_v12 = vld [vmem:[%s19017_s3 + $0x64c] sm:$0xf] }
 0x4ec   :  { %v8559_v49 = vor.u32 %v10487_v43, %v8556_v22  ;;  %v8555_v5 = vor.u32 %v10489_v2, %v8554_v52  ;;  %v8543_v63 = vor.u32 %v10483_v12, %v8540_v56  ;;  %v10482_v22 = vld [vmem:[%s19017_s3 + $0x644] sm:$0xf]  ;;  %v8516_v2 = vld [vmem:[%s19017_s3 + $0x630] sm:$0xf0] }
 0x4ed   :  { %19309 = vst [vmem:[#allocation19_spill] sm:$0xff] %v14732_v46  ;;  %v2936_v13 = vpop.f32.mrf.mxu0  ;;  %v2949_v45 = vpop.f32.mrf.mxu1  ;;  %3309 = vmatpush.bf16.msra.mxu0 %v8551_v1  ;;  %v8535_v60 = vor.u32 %v10482_v22, %v8532_v53  ;;  %v8524_v1 = vld [vmem:[%s19017_s3 + $0x638] sm:$0xf0]  ;;  %v10478_v52 = vld [vmem:[%s19017_s3 + $0x624] sm:$0xf]  ;;  %v14819_v53 = vld [vmem:[%s19015_s1 + $0x30] sm:$0xff] }
 0x4ee   :  { %3335 = vmatpush.bf16.msra.mxu2 %v8559_v49  ;;  %v14776_v45 = vld [vmem:[%s19015_s1 + $0x38] sm:$0xff]  ;;  %3322 = vmatpush.bf16.msra.mxu1 %v8555_v5  ;;  %v8538_v49 = vld [vmem:[%s19017_s3 + $0x648] sm:$0xf]  ;;  %v8527_v56 = vor.u32 %v10479_v8, %v8524_v1  ;;  %v10475_v22 = vld [vmem:[%s19017_s3 + $0x60c] sm:$0xf]  ;;  %19311 = vst [vmem:[#allocation24_spill] sm:$0xff] %v14819_v53 }
 0x4ef   :  { %19310 = vst [vmem:[#allocation22_spill] sm:$0xff] %v14776_v45  ;;  %3373 = vmatpush.bf16.msra.mxu3 %v14776_v45  ;;  %v8539_v39 = vor.u32 %v10485_v38, %v8538_v49  ;;  %v10474_v49 = vld [vmem:[%s19017_s3 + $0x604] sm:$0xf]  ;;  %v8500_v38 = vld [vmem:[%s19017_s3 + $0x610] sm:$0xf0] }
 0x4f1   :  { %3310 = vmatpush.bf16.msra.mxu0 %v8535_v60  ;;  %v8508_v60 = vld [vmem:[%s19017_s3 + $0x618] sm:$0xf0] }
 0x4f2   :  { %v2910_v43 = vpop.f32.mrf.mxu2  ;;  %v2923_v13 = vpop.f32.mrf.mxu3  ;;  %3336 = vmatpush.bf16.msra.mxu2 %v8543_v63  ;;  %v10481_v63 = vld [vmem:[%s19017_s3 + $0x634] sm:$0xf0]  ;;  %3323 = vmatpush.bf16.msra.mxu1 %v8539_v39  ;;  %v8511_v1 = vor.u32 %v10475_v22, %v8508_v60 }
 0x4f3   :  { %v8519_v43 = vor.u32 %v10478_v52, %v8516_v2  ;;  %v8522_v13 = vld [vmem:[%s19017_s3 + $0x628] sm:$0xf]  ;;  %3374 = vmatpush.bf16.msra.mxu3 %v14819_v53  ;;  %v10477_v2 = vld [vmem:[%s19017_s3 + $0x614] sm:$0xf0]  ;;  %v8503_v53 = vor.u32 %v10474_v49, %v8500_v38 }
 0x4f4   :  { %v8523_v8 = vor.u32 %v10481_v63, %v8522_v13  ;;  %v8506_v52 = vld [vmem:[%s19017_s3 + $0x608] sm:$0xf]  ;;  %v19329_v22 = vld [vmem:[#allocation18_spill] sm:$0xff]  ;;  %v19331_v60 = vld [vmem:[#allocation15_spill] sm:$0xff] }
 0x4f5   :  { %v14803_v12 = vpop.f32.mrf.mxu0  ;;  %v14805_v5 = vpop.f32.mrf.mxu1  ;;  %3311 = vmatpush.bf16.msra.mxu0 %v8519_v43  ;;  %v8507_v46 = vor.u32 %v10477_v2, %v8506_v52  ;;  %v19328_v63 = vld [vmem:[#allocation16_spill] sm:$0xff]  ;;  %v19332_v49 = vld [vmem:[#allocation21_spill] sm:$0xff]  ;;  %v19333_v38 = vld [vmem:[#allocation26_spill] sm:$0xff] }
 0x4f6   :  { %3337 = vmatpush.bf16.msra.mxu2 %v8527_v56  ;;  %3324 = vmatpush.bf16.msra.mxu1 %v8523_v8  ;;  %v14919_v8 = vld [vmem:[%s19015_s1 + $0x220] sm:$0xff]  ;;  %v14931_v52 = vld [vmem:[%s19015_s1 + $0x210] sm:$0xff]  ;;  %v14937_v2 = vld [vmem:[%s19015_s1 + $0x208] sm:$0xff] }
 0x4f7   :  { %3375 = vmatpush.bf16.msra.mxu3 %v14209_v23 }
 0x4f9   :  { %3312 = vmatpush.bf16.msra.mxu0 %v8503_v53  ;;  %v19330_v53 = vld [vmem:[#allocation17_spill] sm:$0xff] }
 0x4fa   :  { %v2989_v45 = vpop.f32.mrf.mxu2  ;;  %v3002_v20 = vpop.f32.mrf.mxu3  ;;  %3338 = vmatpush.bf16.msra.mxu2 %v8511_v1  ;;  %3325 = vmatpush.bf16.msra.mxu1 %v8507_v46  ;;  %v19324_v46 = vld [vmem:[#allocation11_spill] sm:$0xff] }
 0x4fb   :  { %3376 = vmatpush.bf16.msra.mxu3 %v14235_v44  ;;  %v14925_v1 = vld [vmem:[%s19015_s1 + $0x218] sm:$0xff] }
 0x4fd   :  { %v3017_v39 = vpop.f32.mrf.mxu0  ;;  %v3030_v56 = vpop.f32.mrf.mxu1  ;;  %3386 = vmatpush.bf16.msrb.mxu0 %v14203_v55 }
 0x4fe   :  { %3412 = vmatpush.bf16.msrb.mxu2 %v14259_v15  ;;  %3399 = vmatpush.bf16.msrb.mxu1 %v14247_v0  ;;  %v14943_v39 = vld [vmem:[%s19015_s1 + $0x200] sm:$0xff] }
 0x4ff   :  { %3377 = vmatpush.bf16.msra.mxu3 %v14253_v14 }
 0x501   :  { %3387 = vmatpush.bf16.msrb.mxu0 %v14229_v40  ;;  %v14856_v40 = vld [vmem:[%s19016_s2] ss:$0 sm:$0xff] }
 0x502   :  { %3413 = vmatpush.bf16.msrb.mxu2 %v14283_v31  ;;  %v2991_v43 = vpop.f32.mrf.mxu2  ;;  %v3004_v13 = vpop.f32.mrf.mxu3  ;;  %3400 = vmatpush.bf16.msrb.mxu1 %v14271_v18  ;;  %v2990_v44 = vadd.f32 %v14856_v40, %v2989_v45  ;;  %v19325_v45 = vld [vmem:[#allocation13_spill] sm:$0xff] }
 0x503   :  { %3378 = vmatpush.bf16.msra.mxu3 %v14277_v30  ;;  %v8772_v43 = vld [vmem:[%s19017_s3 + $0x7e0] sm:$0xf]  ;;  %v10536_v13 = vld [vmem:[%s19017_s3 + $0x7ec] sm:$0xf0] }
 0x504   :  { %v3003_v15 = vadd.f32 %v3002_v20, %v2990_v44  ;;  %v19323_v20 = vld [vmem:[#allocation8_spill] sm:$0xff]  ;;  %v10537_v44 = vld [vmem:[%s19017_s3 + $0x7f4] sm:$0xf0] }
 0x505   :  { %3388 = vmatpush.bf16.msrb.mxu0 %v14241_v21 }
 0x506   :  { %3414 = vmatpush.bf16.msrb.mxu2 %v14308_v10  ;;  %v3067_v23 = vpop.f32.mrf.mxu0  ;;  %3401 = vmatpush.bf16.msrb.mxu1 %v14295_v19  ;;  %v3016_v18 = vadd.f32 %v14803_v12, %v3003_v15  ;;  %v19326_v12 = vld [vmem:[#allocation14_spill] sm:$0xff]  ;;  %v10535_v15 = vld [vmem:[%s19017_s3 + $0x7ec] sm:$0xf] }
 0x507   :  { %v3080_v55 = vpop.f32.mrf.mxu1  ;;  %3379 = vmatpush.bf16.msra.mxu3 %v14302_v59  ;;  %v8624_v59 = vld [vmem:[%s19014_s0 + $0x3f] sm:$0xff] }
 0x508   :  { %3352 = vst [vmem:[#allocation1] ss:$9 sm:$0xff] %v8624_v59 }
 0x509   :  { %3389 = vmatpush.bf16.msrb.mxu0 %v14265_v17 }
 0x50a   :  { %3415 = vmatpush.bf16.msrb.mxu2 %v14332_v26  ;;  %3402 = vmatpush.bf16.msrb.mxu1 %v14320_v16 }
 0x50b   :  { %v3041_v0 = vpop.f32.mrf.mxu2  ;;  %v3054_v14 = vpop.f32.mrf.mxu3  ;;  %3380 = vmatpush.bf16.msra.mxu3 %v14326_v28 }
 0x50d   :  { %3390 = vmatpush.bf16.msrb.mxu0 %v14289_v37  ;;  %v3029_v37 = vadd.f32 %v14805_v5, %v3016_v18  ;;  %v19327_v5 = vld [vmem:[#allocation12_spill] sm:$0xff] }
 0x50e   :  { %3416 = vmatpush.bf16.msrb.mxu2 %v14350_v29  ;;  %v3069_v21 = vpop.f32.mrf.mxu0  ;;  %3403 = vmatpush.bf16.msrb.mxu1 %v14344_v34 }
 0x50f   :  { %v3082_v17 = vpop.f32.mrf.mxu1  ;;  %v3042_v19 = vadd.f32 %v3041_v0, %v3029_v37  ;;  %v8756_v0 = vld [vmem:[%s19017_s3 + $0x7c0] sm:$0xf]  ;;  %v10532_v21 = vld [vmem:[%s19017_s3 + $0x7cc] sm:$0xf0]  ;;  %v8774_v37 = vld [vmem:[%s19017_s3 + $0x7f0] sm:$0xf0] }
 0x510   :  { %v8782_v17 = vld [vmem:[%s19017_s3 + $0x7f8] sm:$0xf0]  ;;  %v8757_v18 = vor.u32 %v10532_v21, %v8756_v0 }
 0x511   :  { %3391 = vmatpush.bf16.msrb.mxu0 %v14314_v57  ;;  %v3055_v10 = vadd.f32 %v3054_v14, %v3042_v19  ;;  %v8764_v19 = vld [vmem:[%s19017_s3 + $0x7c8] sm:$0xf] }
 0x512   :  { %3417 = vmatpush.bf16.msrb.mxu2 %v14369_v61  ;;  %3404 = vmatpush.bf16.msrb.mxu1 %v14362_v48  ;;  %v3354_v48 = vld [vmem:[#allocation1 + $0x9] sm:$0xff] }
 0x513   :  { %v3043_v30 = vpop.f32.mrf.mxu2  ;;  %v3056_v31 = vpop.f32.mrf.mxu3  ;;  %v3068_v57 = vadd.f32 %v3067_v23, %v3055_v10  ;;  %v19312_v61 = vld [vmem:[#allocation28_spill] sm:$0xff]  ;;  %v8773_v23 = vor.u32 %v10536_v13, %v8772_v43  ;;  %v10533_v10 = vld [vmem:[%s19017_s3 + $0x7d4] sm:$0xf0]  ;;  %v10519_v13 = vld [vmem:[%s19017_s3 + $0x76c] sm:$0xf] }
 0x514   :  { %v8785_v30 = vor.u32 %v10535_v15, %v8782_v17  ;;  %v10534_v31 = vld [vmem:[%s19017_s3 + $0x7e4] sm:$0xf]  ;;  %v8710_v15 = vld [vmem:[%s19017_s3 + $0x770] sm:$0xf0]  ;;  %v8700_v17 = vld [vmem:[%s19017_s3 + $0x748] sm:$0xf] }
 0x515   :  { %3392 = vmatpush.bf16.msrb.mxu0 %v14338_v27  ;;  %v3081_v16 = vadd.f32 %v3080_v55, %v3068_v57  ;;  %v8780_v55 = vld [vmem:[%s19017_s3 + $0x7e8] sm:$0xf]  ;;  %v8777_v59 = vor.u32 %v10534_v31, %v8774_v37  ;;  %v8740_v57 = vld [vmem:[%s19017_s3 + $0x7a0] sm:$0xf]  ;;  %v10512_v37 = vld [vmem:[%s19017_s3 + $0x72c] sm:$0xf0] }
 0x516   :  { %3418 = vmatpush.bf16.msrb.mxu2 %v14381_v47  ;;  %3405 = vmatpush.bf16.msrb.mxu1 %v14375_v3  ;;  %v3356_v3 = vld [vmem:[#allocation1 + $0x1b] sm:$0xff]  ;;  %v3355_v47 = vld [vmem:[#allocation1 + $0x12] sm:$0xff]  ;;  %v8781_v14 = vor.u32 %v10537_v44, %v8780_v55  ;;  %v10518_v55 = vld [vmem:[%s19017_s3 + $0x764] sm:$0xf] }
 0x517   :  { %v8676_v31 = vld [vmem:[%s19017_s3 + $0x720] sm:$0xf] }
 0x519   :  { %3393 = vmatpush.bf16.msrb.mxu0 %v14356_v6  ;;  %v3353_v6 = vld [vmem:[#allocation1] sm:$0xff] }
 0x51a   :  { %3419 = vmatpush.bf16.msrb.mxu2 %v14396_v9  ;;  %3406 = vmatpush.bf16.msrb.mxu1 %v14390_v50  ;;  %v19313_v50 = vld [vmem:[#allocation25_spill] sm:$0xff]  ;;  %v19314_v9 = vld [vmem:[#allocation27_spill] sm:$0xff] }
 0x52b   :  { %v3093_v28 = vpop.f32.mrf.mxu2 }
 0x52c   :  { %v3094_v26 = vadd.f32 %v3093_v28, %v3081_v16  ;;  %v10528_v16 = vld [vmem:[%s19017_s3 + $0x7ac] sm:$0xf0]  ;;  %v8765_v28 = vor.u32 %v10533_v10, %v8764_v19  ;;  %v10515_v19 = vld [vmem:[%s19017_s3 + $0x74c] sm:$0xf] }
 0x52e   :  { %v3097_v27 = vmax.f32 %v3094_v26, 0.0  ;;  %v10531_v26 = vld [vmem:[%s19017_s3 + $0x7cc] sm:$0xf] }
 0x530   :  { %v3098_v34 = vpack.c.bf16 %v3097_v27, %v3097_v27  ;;  %v8766_v27 = vld [vmem:[%s19017_s3 + $0x7d8] sm:$0xf0] }
 0x532   :  { %3300 = vmatmul.bf16.vlgmr.msrb.gmra.mxu3 %v3098_v34  ;;  %3313 = vmatmul.bf16.vlgmr.msra.gmra.mxu0 %v3098_v34 }
 0x533   :  { %3326 = vmatmul.bf16.vlgmr.msra.gmra.mxu1 %v3098_v34  ;;  %3339 = vmatmul.bf16.vlgmr.msra.gmra.mxu2 %v3098_v34  ;;  %v3095_v29 = vpop.f32.mrf.mxu2  ;;  %v8769_v34 = vor.u32 %v10531_v26, %v8766_v27 }
 0x534   :  { %3425 = vmatpush.bf16.msrb.mxu3 %v14402_v11  ;;  %3464 = vmatpush.bf16.msra.mxu2 %v14420_v33  ;;  %v19315_v11 = vld [vmem:[#allocation29_spill] sm:$0xff]  ;;  %v19318_v33 = vld [vmem:[#allocation30_spill] sm:$0xff]  ;;  %v8741_v29 = vor.u32 %v10528_v16, %v8740_v57  ;;  %v8677_v57 = vor.u32 %v10512_v37, %v8676_v31  ;;  %v15209_v37 = vld [vmem:[%s19015_s1 + $0x20] sm:$0xff] }
 0x535   :  { %3438 = vmatpush.bf16.msra.mxu0 %v14408_v51  ;;  %3451 = vmatpush.bf16.msra.mxu1 %v14414_v36  ;;  %v19316_v51 = vld [vmem:[#allocation5_spill] sm:$0xff]  ;;  %v19317_v36 = vld [vmem:[#allocation31_spill] sm:$0xff] }
 0x536   :  { %v15203_v31 = vld [vmem:[%s19015_s1 + $0xa8] sm:$0xff] }
 0x538   :  { %3426 = vmatpush.bf16.msrb.mxu3 %v14426_v58  ;;  %3465 = vmatpush.bf16.msra.mxu2 %v14444_v41  ;;  %v3357_v58 = vld [vmem:[#allocation1 + $0x24] sm:$0xff]  ;;  %v3359_v41 = vld [vmem:[#allocation1 + $0x36] sm:$0xff] }
 0x539   :  { %3439 = vmatpush.bf16.msra.mxu0 %v14432_v7  ;;  %3452 = vmatpush.bf16.msra.mxu1 %v14438_v24  ;;  %v3360_v7 = vld [vmem:[#allocation1 + $0x3f] sm:$0xff]  ;;  %v3358_v24 = vld [vmem:[#allocation1 + $0x2d] sm:$0xff] }
 0x53c   :  { %3427 = vmatpush.bf16.msrb.mxu3 %v14450_v32  ;;  %3466 = vmatpush.bf16.msra.mxu2 %v14468_v42  ;;  %v8625_v32 = vld [vmem:[%s19014_s0 + $0x47] sm:$0x1]  ;;  %v19321_v42 = vld [vmem:[#allocation9_spill] sm:$0xff] }
 0x53d   :  { %3440 = vmatpush.bf16.msra.mxu0 %v14456_v35  ;;  %3453 = vmatpush.bf16.msra.mxu1 %v14462_v4  ;;  %v19319_v35 = vld [vmem:[#allocation6_spill] sm:$0xff]  ;;  %v19320_v4 = vld [vmem:[#allocation7_spill] sm:$0xff]  ;;  %3362 = vst [vmem:[#allocation1] ss:$9 sm:$0xff] %v8625_v32 }
 0x540   :  { %3428 = vmatpush.bf16.msrb.mxu3 %v14474_v25  ;;  %3467 = vmatpush.bf16.msra.mxu2 %v19312_v61  ;;  %v19322_v25 = vld [vmem:[#allocation10_spill] sm:$0xff]  ;;  %v8748_v61 = vld [vmem:[%s19017_s3 + $0x7a8] sm:$0xf] }
 0x541   :  { %3441 = vmatpush.bf16.msra.mxu0 %v19313_v50  ;;  %3454 = vmatpush.bf16.msra.mxu1 %v19314_v9  ;;  %v8724_v50 = vld [vmem:[%s19017_s3 + $0x780] sm:$0xf]  ;;  %v10524_v9 = vld [vmem:[%s19017_s3 + $0x78c] sm:$0xf0] }
 0x542   :  { %3381 = vmatmul.bf16.vlgmr.msra.gmra.mxu3 %v3353_v6  ;;  %3394 = vmatmul.bf16.vlgmr.msrb.gmra.mxu0 %v3354_v48  ;;  %v10530_v6 = vld [vmem:[%s19017_s3 + $0x7c4] sm:$0xf]  ;;  %v8758_v48 = vld [vmem:[%s19017_s3 + $0x7d0] sm:$0xf0] }
 0x543   :  { %3420 = vmatmul.bf16.vlgmr.msrb.gmra.mxu2 %v3356_v3  ;;  %3407 = vmatmul.bf16.vlgmr.msrb.gmra.mxu1 %v3355_v47  ;;  %v8761_v3 = vor.u32 %v10530_v6, %v8758_v48  ;;  %v10529_v47 = vld [vmem:[%s19017_s3 + $0x7b4] sm:$0xf0]  ;;  %v10514_v48 = vld [vmem:[%s19017_s3 + $0x744] sm:$0xf] }
 0x544   :  { %3429 = vmatpush.bf16.msrb.mxu3 %v19315_v11  ;;  %3468 = vmatpush.bf16.msra.mxu2 %v19316_v51  ;;  %v3363_v56 = vld [vmem:[#allocation1] sm:$0xff]  ;;  %v8749_v11 = vor.u32 %v10529_v47, %v8748_v61  ;;  %v8725_v51 = vor.u32 %v10524_v9, %v8724_v50  ;;  %v8694_v61 = vld [vmem:[%s19017_s3 + $0x750] sm:$0xf0]  ;;  %v10513_v9 = vld [vmem:[%s19017_s3 + $0x734] sm:$0xf0] }
 0x545   :  { %3442 = vmatpush.bf16.msra.mxu0 %v19317_v36  ;;  %3455 = vmatpush.bf16.msra.mxu1 %v19318_v33  ;;  %v10527_v36 = vld [vmem:[%s19017_s3 + $0x7ac] sm:$0xf]  ;;  %v8750_v33 = vld [vmem:[%s19017_s3 + $0x7b8] sm:$0xf0]  ;;  %v8697_v50 = vor.u32 %v10514_v48, %v8694_v61  ;;  %v15257_v48 = vld [vmem:[%s19015_s1 + $0x10] sm:$0xff] }
 0x546   :  { %v15263_v61 = vld [vmem:[%s19015_s1 + $0xd8] sm:$0xff] }
 0x548   :  { %3430 = vmatpush.bf16.msrb.mxu3 %v19319_v35  ;;  %3469 = vmatpush.bf16.msra.mxu2 %v19320_v4  ;;  %v10525_v35 = vld [vmem:[%s19017_s3 + $0x794] sm:$0xf0]  ;;  %v8708_v4 = vld [vmem:[%s19017_s3 + $0x760] sm:$0xf] }
 0x549   :  { %3443 = vmatpush.bf16.msra.mxu0 %v19321_v42  ;;  %3456 = vmatpush.bf16.msra.mxu1 %v19322_v25  ;;  %v10520_v42 = vld [vmem:[%s19017_s3 + $0x76c] sm:$0xf0] }
 0x54c   :  { %3431 = vmatpush.bf16.msrb.mxu3 %v19323_v20  ;;  %3470 = vmatpush.bf16.msra.mxu2 %v19324_v46  ;;  %v8709_v20 = vor.u32 %v10520_v42, %v8708_v4  ;;  %v10523_v46 = vld [vmem:[%s19017_s3 + $0x78c] sm:$0xf]  ;;  %v10509_v42 = vld [vmem:[%s19017_s3 + $0x714] sm:$0xf0] }
 0x54d   :  { %3444 = vmatpush.bf16.msra.mxu0 %v19325_v45  ;;  %3457 = vmatpush.bf16.msra.mxu1 %v19326_v12  ;;  %v8734_v45 = vld [vmem:[%s19017_s3 + $0x798] sm:$0xf0] }
 0x54e   :  { %v8737_v12 = vor.u32 %v10523_v46, %v8734_v45  ;;  %v10507_v45 = vld [vmem:[%s19017_s3 + $0x70c] sm:$0xf] }
 0x550   :  { %3432 = vmatpush.bf16.msrb.mxu3 %v19327_v5  ;;  %3471 = vmatpush.bf16.msra.mxu2 %v19328_v63  ;;  %v10522_v5 = vld [vmem:[%s19017_s3 + $0x784] sm:$0xf]  ;;  %v8726_v63 = vld [vmem:[%s19017_s3 + $0x790] sm:$0xf0] }
 0x551   :  { %3445 = vmatpush.bf16.msra.mxu0 %v19330_v53  ;;  %3458 = vmatpush.bf16.msra.mxu1 %v19331_v60  ;;  %v8729_v53 = vor.u32 %v10522_v5, %v8726_v63  ;;  %v10521_v60 = vld [vmem:[%s19017_s3 + $0x774] sm:$0xf0] }
 0x553   :  { %3433 = vmatmul.bf16.vlgmr.msrb.gmra.mxu3 %v3357_v58  ;;  %3472 = vmatmul.bf16.vlgmr.msra.gmra.mxu2 %v3360_v7  ;;  %v8753_v58 = vor.u32 %v10527_v36, %v8750_v33  ;;  %v10526_v7 = vld [vmem:[%s19017_s3 + $0x7a4] sm:$0xf] }
 0x554   :  { %3477 = vmatpush.bf16.msra.mxu3 %v19329_v22  ;;  %3446 = vmatmul.bf16.vlgmr.msra.gmra.mxu0 %v3358_v24  ;;  %v8742_v24 = vld [vmem:[%s19017_s3 + $0x7b0] sm:$0xf0]  ;;  %v8716_v22 = vld [vmem:[%s19017_s3 + $0x768] sm:$0xf] }
 0x555   :  { %3459 = vmatmul.bf16.vlgmr.msra.gmra.mxu1 %v3359_v41  ;;  %3685 = vmatpush.bf16.msrb.mxu0 %v8773_v23  ;;  %v8732_v41 = vld [vmem:[%s19017_s3 + $0x788] sm:$0xf]  ;;  %v8745_v32 = vor.u32 %v10526_v7, %v8742_v24  ;;  %v8717_v43 = vor.u32 %v10521_v60, %v8716_v22  ;;  %v8718_v23 = vld [vmem:[%s19017_s3 + $0x778] sm:$0xf0]  ;;  %v10506_v22 = vld [vmem:[%s19017_s3 + $0x704] sm:$0xf] }
 0x556   :  { %3711 = vmatpush.bf16.msrb.mxu2 %v8781_v14  ;;  %3698 = vmatpush.bf16.msrb.mxu1 %v8777_v59  ;;  %v8733_v25 = vor.u32 %v10525_v35, %v8732_v41  ;;  %v8721_v21 = vor.u32 %v10519_v13, %v8718_v23  ;;  %v8686_v7 = vld [vmem:[%s19017_s3 + $0x738] sm:$0xf0]  ;;  %v10510_v41 = vld [vmem:[%s19017_s3 + $0x724] sm:$0xf]  ;;  %v8668_v35 = vld [vmem:[%s19017_s3 + $0x708] sm:$0xf] }
 0x557   :  { %v8669_v46 = vor.u32 %v10509_v42, %v8668_v35  ;;  %v15165_v13 = vld [vmem:[%s19015_s1 + $0xf8] sm:$0xff]  ;;  %v15325_v42 = vld [vmem:[%s19015_s1 + $0x80] sm:$0xff] }
 0x558   :  { %3478 = vmatpush.bf16.msra.mxu3 %v19332_v49  ;;  %v8692_v49 = vld [vmem:[%s19017_s3 + $0x740] sm:$0xf]  ;;  %v15171_v23 = vld [vmem:[%s19015_s1 + $0x78] sm:$0xff] }
 0x559   :  { %3686 = vmatpush.bf16.msrb.mxu0 %v8757_v18  ;;  %v10517_v18 = vld [vmem:[%s19017_s3 + $0x754] sm:$0xf0] }
 0x55a   :  { %3712 = vmatpush.bf16.msrb.mxu2 %v8765_v28  ;;  %3699 = vmatpush.bf16.msrb.mxu1 %v8761_v3  ;;  %v8701_v59 = vor.u32 %v10517_v18, %v8700_v17  ;;  %v19334_v28 = vld [vmem:[#allocation19_spill] sm:$0xff]  ;;  %v8684_v3 = vld [vmem:[%s19017_s3 + $0x728] sm:$0xf]  ;;  %v15197_v18 = vld [vmem:[%s19015_s1 + $0x70] sm:$0xff] }
 0x55b   :  { %v8685_v36 = vor.u32 %v10513_v9, %v8684_v3  ;;  %v15281_v9 = vld [vmem:[%s19015_s1 + $0x8] sm:$0xff] }
 0x55c   :  { %3479 = vmatpush.bf16.msra.mxu3 %v19333_v38  ;;  %v10516_v38 = vld [vmem:[%s19017_s3 + $0x74c] sm:$0xf0] }
 0x55d   :  { %3687 = vmatpush.bf16.msrb.mxu0 %v8741_v29  ;;  %v8693_v14 = vor.u32 %v10516_v38, %v8692_v49 }
 0x55e   :  { %3713 = vmatpush.bf16.msrb.mxu2 %v8749_v11  ;;  %3700 = vmatpush.bf16.msrb.mxu1 %v8745_v32  ;;  %v8660_v11 = vld [vmem:[%s19017_s3 + $0x700] sm:$0xf]  ;;  %v8678_v32 = vld [vmem:[%s19017_s3 + $0x730] sm:$0xf0] }
 0x55f   :  { %v8681_v4 = vor.u32 %v10510_v41, %v8678_v32  ;;  %v15312_v41 = vld [vmem:[%s19015_s1 + $0xc8] sm:$0xff] }
 0x560   :  { %3480 = vmatpush.bf16.msra.mxu3 %v14919_v8 }
 0x561   :  { %3688 = vmatpush.bf16.msrb.mxu0 %v8725_v51  ;;  %v10508_v51 = vld [vmem:[%s19017_s3 + $0x70c] sm:$0xf0] }
 0x562   :  { %3714 = vmatpush.bf16.msrb.mxu2 %v8733_v25  ;;  %3701 = vmatpush.bf16.msrb.mxu1 %v8729_v53  ;;  %v8661_v33 = vor.u32 %v10508_v51, %v8660_v11  ;;  %v8662_v53 = vld [vmem:[%s19017_s3 + $0x710] sm:$0xf0] }
 0x563   :  { %v8665_v49 = vor.u32 %v10506_v22, %v8662_v53  ;;  %v15287_v11 = vld [vmem:[%s19015_s1 + $0xd0] sm:$0xff] }
 0x564   :  { %3481 = vmatpush.bf16.msra.mxu3 %v14925_v1 }
 0x565   :  { %3689 = vmatpush.bf16.msrb.mxu0 %v8709_v20  ;;  %v19336_v20 = vld [vmem:[#allocation22_spill] sm:$0xff] }
 0x566   :  { %3715 = vmatpush.bf16.msrb.mxu2 %v8717_v43  ;;  %v19337_v43 = vld [vmem:[#allocation24_spill] sm:$0xff] }
 0x568   :  { %3482 = vmatpush.bf16.msra.mxu3 %v14931_v52 }
 0x569   :  { %3690 = vmatpush.bf16.msrb.mxu0 %v8693_v14  ;;  %v15183_v14 = vld [vmem:[%s19015_s1 + $0x28] sm:$0xff] }
 0x56a   :  { %3716 = vmatpush.bf16.msrb.mxu2 %v8701_v59  ;;  %v15221_v59 = vld [vmem:[%s19015_s1 + $0x68] sm:$0xff] }
 0x56c   :  { %3483 = vmatpush.bf16.msra.mxu3 %v14937_v2 }
 0x56d   :  { %3691 = vmatpush.bf16.msrb.mxu0 %v8677_v57  ;;  %v15233_v57 = vld [vmem:[%s19015_s1 + $0x18] sm:$0xff] }
 0x56e   :  { %3717 = vmatpush.bf16.msrb.mxu2 %v8685_v36 }
 0x570   :  { %3484 = vmatpush.bf16.msra.mxu3 %v14943_v39 }
 0x571   :  { %3692 = vmatpush.bf16.msrb.mxu0 %v8661_v33 }
 0x572   :  { %3718 = vmatpush.bf16.msrb.mxu2 %v8669_v46 }
 0x573   :  { %3485 = vmatmul.bf16.vlgmr.msra.gmra.mxu3 %v3363_v56 }
 0x574   :  { %3724 = vmatpush.bf16.msrb.mxu3 %v8785_v30 }
 0x575   :  { %3766 = vmatpush.bf16.msra.mxu0 %v19336_v20 }
 0x578   :  { %3725 = vmatpush.bf16.msrb.mxu3 %v8769_v34  ;;  %v19335_v34 = vld [vmem:[#allocation20_spill] sm:$0xff] }
 0x579   :  { %3767 = vmatpush.bf16.msra.mxu0 %v19337_v43 }
 0x57c   :  { %3726 = vmatpush.bf16.msrb.mxu3 %v8753_v58  ;;  %v10511_v58 = vld [vmem:[%s19017_s3 + $0x72c] sm:$0xf] }
 0x57d   :  { %v8689_v24 = vor.u32 %v10511_v58, %v8686_v7  ;;  %3768 = vmatpush.bf16.msra.mxu0 %v15183_v14  ;;  %v15294_v58 = vld [vmem:[%s19015_s1 + $0x50] sm:$0xff]  ;;  %v15300_v7 = vld [vmem:[%s19015_s1 + $0x88] sm:$0xff] }
 0x580   :  { %3727 = vmatpush.bf16.msrb.mxu3 %v8737_v12  ;;  %v8670_v12 = vld [vmem:[%s19017_s3 + $0x718] sm:$0xf0] }
 0x581   :  { %v8673_v63 = vor.u32 %v10507_v45, %v8670_v12  ;;  %3769 = vmatpush.bf16.msra.mxu0 %v15209_v37  ;;  %v15338_v12 = vld [vmem:[%s19015_s1 + $0x40] sm:$0xff] }
 0x584   :  { %3728 = vmatpush.bf16.msrb.mxu3 %v8721_v21  ;;  %v15189_v21 = vld [vmem:[%s19015_s1 + $0xf0] sm:$0xff] }
 0x585   :  { %3770 = vmatpush.bf16.msra.mxu0 %v15233_v57 }
 0x589   :  { %3771 = vmatpush.bf16.msra.mxu0 %v15257_v48 }
 0x58d   :  { %3772 = vmatpush.bf16.msra.mxu0 %v15281_v9 }
 0x5af   :  { %v3314_v56 = vpop.f32.mrf.mxu0 }
 0x5b0   :  { %v15070_v44 = vadd.f32 %v3314_v56, %v14735_v62  ;;  %v3327_v0 = vpop.f32.mrf.mxu1  ;;  %v8713_v62 = vor.u32 %v10518_v55, %v8710_v15  ;;  %v15158_v56 = vld [vmem:[%s19015_s1 + $0xb8] sm:$0xff]  ;;  %v15177_v55 = vld [vmem:[%s19015_s1 + $0xb0] sm:$0xff] }
 0x5b1   :  { %v15082_v30 = vadd.f32 %v3327_v0, %v14714_v54  ;;  %v8702_v54 = vld [vmem:[%s19017_s3 + $0x758] sm:$0xf0]  ;;  %3792 = vmatpush.bf16.msra.mxu2 %v15158_v56 }
 0x5b2   :  { %v8705_v10 = vor.u32 %v10515_v19, %v8702_v54  ;;  %3702 = vmatpush.bf16.msrb.mxu1 %v8713_v62  ;;  %v15215_v19 = vld [vmem:[%s19015_s1 + $0xe8] sm:$0xff]  ;;  %v15227_v54 = vld [vmem:[%s19015_s1 + $0xa0] sm:$0xff] }
 0x5b4   :  { %3729 = vmatpush.bf16.msrb.mxu3 %v8705_v10 }
 0x5b5   :  { %v3301_v16 = vpop.f32.mrf.mxu3  ;;  %3793 = vmatpush.bf16.msra.mxu2 %v15177_v55 }
 0x5b6   :  { %v15097_v26 = vadd.f32 %v3301_v16, %v19334_v28  ;;  %v3340_v27 = vpop.f32.mrf.mxu2  ;;  %3703 = vmatpush.bf16.msrb.mxu1 %v8697_v50  ;;  %v15239_v16 = vld [vmem:[%s19015_s1 + $0xe0] sm:$0xff]  ;;  %v15275_v50 = vld [vmem:[%s19015_s1 + $0x90] sm:$0xff] }
 0x5b7   :  { %v15100_v29 = vadd.f32 %v3340_v27, %v19335_v34  ;;  %v3316_v6 = vpop.f32.mrf.mxu0  ;;  %v15245_v27 = vld [vmem:[%s19015_s1 + $0x60] sm:$0xff]  ;;  %v15251_v34 = vld [vmem:[%s19015_s1 + $0x98] sm:$0xff] }
 0x5b8   :  { %v3329_v47 = vpop.f32.mrf.mxu1  ;;  %3730 = vmatpush.bf16.msrb.mxu3 %v8689_v24 }
 0x5b9   :  { %3794 = vmatpush.bf16.msra.mxu2 %v15203_v31  ;;  %v15269_v47 = vld [vmem:[%s19015_s1 + $0x58] sm:$0xff] }
 0x5ba   :  { %3704 = vmatpush.bf16.msrb.mxu1 %v8681_v4  ;;  %v15319_v4 = vld [vmem:[%s19015_s1 + $0x48] sm:$0xff] }
 0x5bc   :  { %3731 = vmatpush.bf16.msrb.mxu3 %v8673_v63  ;;  %v8786_v63 = vld [vmem:[%s19014_s0 + $0x48] sm:$0xff] }
 0x5bd   :  { %v3303_v25 = vpop.f32.mrf.mxu3  ;;  %3795 = vmatpush.bf16.msra.mxu2 %v15227_v54  ;;  %3745 = vst [vmem:[#allocation1] ss:$9 sm:$0xff] %v8786_v63  ;;  %v15426_v63 = vld [vmem:[%s19015_s1 + $0x1a0] sm:$0xff] }
 0x5be   :  { %v3342_v5 = vpop.f32.mrf.mxu2  ;;  %3705 = vmatpush.bf16.msrb.mxu1 %v8665_v49  ;;  %v15331_v25 = vld [vmem:[%s19015_s1 + $0xc0] sm:$0xff] }
 0x5bf   :  { %v15151_v60 = vpop.f32.mrf.mxu0 }
 0x5c0   :  { %v15153_v38 = vpop.f32.mrf.mxu1  ;;  %3805 = vmatpush.bf16.msra.mxu3 %v15165_v13 }
 0x5c1   :  { %3796 = vmatpush.bf16.msra.mxu2 %v15251_v34 }
 0x5c2   :  { %3779 = vmatpush.bf16.msra.mxu1 %v15171_v23 }
 0x5c4   :  { %3806 = vmatpush.bf16.msra.mxu3 %v15189_v21 }
 0x5c5   :  { %v3382_v0 = vpop.f32.mrf.mxu3  ;;  %3797 = vmatpush.bf16.msra.mxu2 %v15275_v50 }
 0x5c6   :  { %v15192_v15 = vpop.f32.mrf.mxu2  ;;  %3780 = vmatpush.bf16.msra.mxu1 %v15197_v18  ;;  %v3383_v51 = vadd.f32 %v14856_v40, %v3382_v0  ;;  %v15306_v40 = vld [vmem:[%s19015_s1] sm:$0xff] }
 0x5c7   :  { %v3397_v17 = vpop.f32.mrf.mxu0  ;;  %3773 = vmatpush.bf16.msra.mxu0 %v15306_v40 }
 0x5c8   :  { %v3410_v62 = vpop.f32.mrf.mxu1  ;;  %3807 = vmatpush.bf16.msra.mxu3 %v15215_v19  ;;  %v3396_v32 = vadd.f32 %v15151_v60, %v3383_v51  ;;  %v15378_v51 = vld [vmem:[%s19015_s1 + $0x1b0] sm:$0xff] }
 0x5c9   :  { %3798 = vmatpush.bf16.msra.mxu2 %v15300_v7 }
 0x5ca   :  { %3781 = vmatpush.bf16.msra.mxu1 %v15221_v59  ;;  %v3409_v20 = vadd.f32 %v15153_v38, %v3396_v32  ;;  %v15402_v32 = vld [vmem:[%s19015_s1 + $0x1a8] sm:$0xff] }
 0x5cc   :  { %3808 = vmatpush.bf16.msra.mxu3 %v15239_v16  ;;  %v3422_v5 = vadd.f32 %v15192_v15, %v3409_v20  ;;  %v15348_v15 = vld [vmem:[%s19015_s1 + $0x138] sm:$0xff]  ;;  %v15414_v20 = vld [vmem:[%s19015_s1 + $0x168] sm:$0xff] }
 0x5cd   :  { %v3384_v10 = vpop.f32.mrf.mxu3  ;;  %3799 = vmatpush.bf16.msra.mxu2 %v15325_v42 }
 0x5ce   :  { %v3423_v28 = vpop.f32.mrf.mxu2  ;;  %3782 = vmatpush.bf16.msra.mxu1 %v15245_v27  ;;  %v15354_v10 = vld [vmem:[%s19015_s1 + $0x1b8] sm:$0xff] }
 0x5cf   :  { %v15360_v28 = vld [vmem:[%s19015_s1 + $0x1f8] sm:$0xff] }
 0x5d0   :  { %3809 = vmatpush.bf16.msra.mxu3 %v15263_v61 }
 0x5d1   :  { %v3447_v6 = vpop.f32.mrf.mxu0 }
 0x5d2   :  { %v3460_v3 = vpop.f32.mrf.mxu1  ;;  %3783 = vmatpush.bf16.msra.mxu1 %v15269_v47 }
 0x5d4   :  { %3810 = vmatpush.bf16.msra.mxu3 %v15287_v11 }
 0x5d6   :  { %v3434_v36 = vpop.f32.mrf.mxu3  ;;  %v3473_v33 = vpop.f32.mrf.mxu2  ;;  %3784 = vmatpush.bf16.msra.mxu1 %v15294_v58 }
 0x5d7   :  { %v3435_v22 = vadd.f32 %v3434_v36, %v3422_v5  ;;  %v15384_v36 = vld [vmem:[%s19015_s1 + $0x1f0] sm:$0xff]  ;;  %v15420_v5 = vld [vmem:[%s19015_s1 + $0x120] sm:$0xff] }
 0x5d8   :  { %3811 = vmatpush.bf16.msra.mxu3 %v15312_v41 }
 0x5d9   :  { %v3449_v24 = vpop.f32.mrf.mxu0  ;;  %v3448_v53 = vadd.f32 %v3447_v6, %v3435_v22  ;;  %v15366_v6 = vld [vmem:[%s19015_s1 + $0x178] sm:$0xff] }
 0x5da   :  { %v3462_v35 = vpop.f32.mrf.mxu1  ;;  %3785 = vmatpush.bf16.msra.mxu1 %v15319_v4  ;;  %v15396_v24 = vld [vmem:[%s19015_s1 + $0x128] sm:$0xff]  ;;  %v3748_v22 = vld [vmem:[#allocation1 + $0x12] sm:$0xff] }
 0x5db   :  { %v3461_v60 = vadd.f32 %v3460_v3, %v3448_v53  ;;  %v15372_v3 = vld [vmem:[%s19015_s1 + $0x130] sm:$0xff]  ;;  %v15408_v35 = vld [vmem:[%s19015_s1 + $0x1e8] sm:$0xff]  ;;  %v3749_v53 = vld [vmem:[#allocation1 + $0x1b] sm:$0xff] }
 0x5dc   :  { %3812 = vmatpush.bf16.msra.mxu3 %v15331_v25 }
 0x5dd   :  { %v3474_v49 = vadd.f32 %v3473_v33, %v3461_v60  ;;  %v15390_v33 = vld [vmem:[%s19015_s1 + $0x170] sm:$0xff]  ;;  %v15432_v60 = vld [vmem:[%s19015_s1 + $0x1e0] sm:$0xff] }
 0x5de   :  { %v3436_v46 = vpop.f32.mrf.mxu3  ;;  %v3475_v45 = vpop.f32.mrf.mxu2  ;;  %3786 = vmatpush.bf16.msra.mxu1 %v15338_v12 }
 0x5df   :  { %v3746_v46 = vld [vmem:[#allocation1] sm:$0xff]  ;;  %v3747_v45 = vld [vmem:[#allocation1 + $0x9] sm:$0xff] }
 0x5f6   :  { %v3486_v38 = vpop.f32.mrf.mxu3 }
 0x5f7   :  { %v3487_v43 = vadd.f32 %v3486_v38, %v3474_v49  ;;  %v15438_v49 = vld [vmem:[%s19015_s1 + $0x160] sm:$0xff]  ;;  %v15444_v38 = vld [vmem:[%s19015_s1 + $0x118] sm:$0xff] }
 0x5f8   :  { %19338 = vst [vmem:[#allocation23_spill] sm:$0xff] %v15444_v38 }
 0x5f9   :  { %v3490_v0 = vmax.f32 %v3487_v43, 0.0  ;;  %v15450_v43 = vld [vmem:[%s19015_s1 + $0x198] sm:$0xff] }
 0x5fa   :  { %19339 = vst [vmem:[#allocation28_spill] sm:$0xff] %v15450_v43 }
 0x5fb   :  { %v3491_v17 = vpack.c.bf16 %v3490_v0, %v3490_v0  ;;  %v15456_v0 = vld [vmem:[%s19015_s1 + $0x1d8] sm:$0xff] }
 0x5fc   :  { %19340 = vst [vmem:[#allocation25_spill] sm:$0xff] %v15456_v0 }
 0x5fd   :  { %3693 = vmatmul.bf16.vlgmr.msrb.gmra.mxu0 %v3491_v17  ;;  %3706 = vmatmul.bf16.vlgmr.msrb.gmra.mxu1 %v3491_v17 }
 0x5fe   :  { %3719 = vmatmul.bf16.vlgmr.msrb.gmra.mxu2 %v3491_v17  ;;  %3732 = vmatmul.bf16.vlgmr.msrb.gmra.mxu3 %v3491_v17  ;;  %v3488_v62 = vpop.f32.mrf.mxu3  ;;  %v15462_v17 = vld [vmem:[%s19015_s1 + $0x158] sm:$0xff] }
 0x5ff   :  { %3818 = vmatpush.bf16.msrb.mxu0 %v15348_v15  ;;  %3844 = vmatpush.bf16.msrb.mxu2 %v15354_v10  ;;  %19341 = vst [vmem:[#allocation27_spill] sm:$0xff] %v15462_v17  ;;  %v3752_v62 = vld [vmem:[#allocation1 + $0x36] sm:$0xff] }
 0x600   :  { %3857 = vmatpush.bf16.msrb.mxu3 %v15360_v28  ;;  %3831 = vmatpush.bf16.msrb.mxu1 %v15366_v6 }
 0x603   :  { %3819 = vmatpush.bf16.msrb.mxu0 %v15372_v3  ;;  %3845 = vmatpush.bf16.msrb.mxu2 %v15378_v51 }
 0x604   :  { %3858 = vmatpush.bf16.msrb.mxu3 %v15384_v36  ;;  %3832 = vmatpush.bf16.msrb.mxu1 %v15390_v33 }
 0x607   :  { %3820 = vmatpush.bf16.msrb.mxu0 %v15396_v24  ;;  %3846 = vmatpush.bf16.msrb.mxu2 %v15402_v32 }
 0x608   :  { %3859 = vmatpush.bf16.msrb.mxu3 %v15408_v35  ;;  %3833 = vmatpush.bf16.msrb.mxu1 %v15414_v20 }
 0x60b   :  { %3821 = vmatpush.bf16.msrb.mxu0 %v15420_v5  ;;  %3847 = vmatpush.bf16.msrb.mxu2 %v15426_v63 }
 0x60c   :  { %3860 = vmatpush.bf16.msrb.mxu3 %v15432_v60  ;;  %3834 = vmatpush.bf16.msrb.mxu1 %v15438_v49 }
 0x60d   :  { %3774 = vmatmul.bf16.vlgmr.msra.gmra.mxu0 %v3746_v46  ;;  %3787 = vmatmul.bf16.vlgmr.msra.gmra.mxu1 %v3747_v45  ;;  %v3750_v46 = vld [vmem:[#allocation1 + $0x24] sm:$0xff] }
 0x60e   :  { %3800 = vmatmul.bf16.vlgmr.msra.gmra.mxu2 %v3748_v22  ;;  %3813 = vmatmul.bf16.vlgmr.msra.gmra.mxu3 %v3749_v53  ;;  %v3753_v45 = vld [vmem:[#allocation1 + $0x3f] sm:$0xff]  ;;  %v3751_v22 = vld [vmem:[#allocation1 + $0x2d] sm:$0xff] }
 0x60f   :  { %3822 = vmatpush.bf16.msrb.mxu0 %v15444_v38  ;;  %3848 = vmatpush.bf16.msrb.mxu2 %v15450_v43  ;;  %v8787_v53 = vld [vmem:[%s19014_s0 + $0x50] sm:$0x1] }
 0x610   :  { %3861 = vmatpush.bf16.msrb.mxu3 %v15456_v0  ;;  %3835 = vmatpush.bf16.msrb.mxu1 %v15462_v17  ;;  %v15471_v43 = vld [vmem:[%s19015_s1 + $0x110] sm:$0xff]  ;;  %3755 = vst [vmem:[#allocation1] ss:$9 sm:$0xff] %v8787_v53  ;;  %v15501_v53 = vld [vmem:[%s19015_s1 + $0x188] sm:$0xff] }
 0x611   :  { %19342 = vst [vmem:[#allocation29_spill] sm:$0xff] %v15471_v43  ;;  %v15477_v0 = vld [vmem:[%s19015_s1 + $0x190] sm:$0xff] }
 0x612   :  { %19343 = vst [vmem:[#allocation5_spill] sm:$0xff] %v15477_v0  ;;  %v15483_v17 = vld [vmem:[%s19015_s1 + $0x1d0] sm:$0xff] }
 0x613   :  { %3823 = vmatpush.bf16.msrb.mxu0 %v15471_v43  ;;  %3849 = vmatpush.bf16.msrb.mxu2 %v15477_v0  ;;  %19344 = vst [vmem:[#allocation31_spill] sm:$0xff] %v15483_v17  ;;  %v15489_v38 = vld [vmem:[%s19015_s1 + $0x150] sm:$0xff]  ;;  %v15495_v43 = vld [vmem:[%s19015_s1 + $0x108] sm:$0xff] }
 0x614   :  { %3862 = vmatpush.bf16.msrb.mxu3 %v15483_v17  ;;  %19345 = vst [vmem:[#allocation30_spill] sm:$0xff] %v15489_v38  ;;  %3836 = vmatpush.bf16.msrb.mxu1 %v15489_v38  ;;  %v15507_v17 = vld [vmem:[%s19015_s1 + $0x1c8] sm:$0xff] }
 0x615   :  { %19346 = vst [vmem:[#allocation6_spill] sm:$0xff] %v15495_v43  ;;  %v15513_v0 = vld [vmem:[%s19015_s1 + $0x148] sm:$0xff] }
 0x616   :  { %19347 = vst [vmem:[#allocation7_spill] sm:$0xff] %v15501_v53 }
 0x617   :  { %3824 = vmatpush.bf16.msrb.mxu0 %v15495_v43  ;;  %3850 = vmatpush.bf16.msrb.mxu2 %v15501_v53  ;;  %19348 = vst [vmem:[#allocation9_spill] sm:$0xff] %v15507_v17  ;;  %v15519_v43 = vld [vmem:[%s19015_s1 + $0x100] sm:$0xff] }
 0x618   :  { %3863 = vmatpush.bf16.msrb.mxu3 %v15507_v17  ;;  %19349 = vst [vmem:[#allocation10_spill] sm:$0xff] %v15513_v0  ;;  %3837 = vmatpush.bf16.msrb.mxu1 %v15513_v0  ;;  %v15525_v53 = vld [vmem:[%s19015_s1 + $0x180] sm:$0xff]  ;;  %v15531_v17 = vld [vmem:[%s19015_s1 + $0x238] sm:$0xff] }
 0x619   :  { %19350 = vst [vmem:[#allocation8_spill] sm:$0xff] %v15519_v43  ;;  %v15537_v0 = vld [vmem:[%s19015_s1 + $0x1c0] sm:$0xff] }
 0x61a   :  { %19351 = vst [vmem:[#allocation11_spill] sm:$0xff] %v15525_v53 }
 0x61b   :  { %3825 = vmatpush.bf16.msrb.mxu0 %v15519_v43  ;;  %3851 = vmatpush.bf16.msrb.mxu2 %v15525_v53  ;;  %19352 = vst [vmem:[#allocation13_spill] sm:$0xff] %v15531_v17  ;;  %v15543_v43 = vld [vmem:[%s19015_s1 + $0x140] sm:$0xff]  ;;  %v15549_v53 = vld [vmem:[%s19015_s1 + $0x230] sm:$0xff] }
 0x61c   :  { %19353 = vst [vmem:[#allocation14_spill] sm:$0xff] %v15537_v0  ;;  %3864 = vmatpush.bf16.msrb.mxu3 %v15537_v0  ;;  %3838 = vmatpush.bf16.msrb.mxu1 %v15543_v43  ;;  %v15555_v0 = vld [vmem:[%s19015_s1 + $0x228] sm:$0xff] }
 0x61d   :  { %19354 = vst [vmem:[#allocation12_spill] sm:$0xff] %v15543_v43  ;;  %v8894_v43 = vld [vmem:[%s19017_s3 + $0x888] sm:$0xf] }
 0x61e   :  { %3852 = vmatmul.bf16.vlgmr.msrb.gmra.mxu2 %v3752_v62  ;;  %3826 = vmatmul.bf16.vlgmr.msrb.gmra.mxu0 %v3750_v46  ;;  %19355 = vst [vmem:[#allocation16_spill] sm:$0xff] %v15549_v53  ;;  %v3756_v62 = vld [vmem:[#allocation1] sm:$0xff] }
 0x61f   :  { %3870 = vmatpush.bf16.msra.mxu0 %v15531_v17  ;;  %3865 = vmatmul.bf16.vlgmr.msrb.gmra.mxu3 %v3753_v45  ;;  %19356 = vst [vmem:[#allocation18_spill] sm:$0xff] %v15555_v0  ;;  %v8934_v46 = vld [vmem:[%s19017_s3 + $0x8e0] sm:$0xf]  ;;  %v10568_v45 = vld [vmem:[%s19017_s3 + $0x8ec] sm:$0xf0] }
 0x620   :  { %3839 = vmatmul.bf16.vlgmr.msrb.gmra.mxu1 %v3751_v22  ;;  %v8944_v17 = vld [vmem:[%s19017_s3 + $0x8f8] sm:$0xf0] }
 0x623   :  { %3871 = vmatpush.bf16.msra.mxu0 %v15549_v53  ;;  %v10562_v53 = vld [vmem:[%s19017_s3 + $0x8c4] sm:$0xf] }
 0x627   :  { %3872 = vmatpush.bf16.msra.mxu0 %v15555_v0  ;;  %v8918_v0 = vld [vmem:[%s19017_s3 + $0x8c0] sm:$0xf] }
 0x62b   :  { %3873 = vmatpush.bf16.msra.mxu0 %v14919_v8  ;;  %v10566_v8 = vld [vmem:[%s19017_s3 + $0x8e4] sm:$0xf] }
 0x62f   :  { %3874 = vmatpush.bf16.msra.mxu0 %v14925_v1  ;;  %v8935_v1 = vor.u32 %v10568_v45, %v8934_v46  ;;  %v10564_v46 = vld [vmem:[%s19017_s3 + $0x8cc] sm:$0xf0] }
 0x630   :  { %v8919_v45 = vor.u32 %v10564_v46, %v8918_v0  ;;  %v10565_v0 = vld [vmem:[%s19017_s3 + $0x8d4] sm:$0xf0] }
 0x631   :  { %4078 = vmatpush.bf16.msra.mxu1 %v8935_v1  ;;  %v8902_v1 = vld [vmem:[%s19017_s3 + $0x8a0] sm:$0xf] }
 0x633   :  { %3875 = vmatpush.bf16.msra.mxu0 %v14931_v52  ;;  %v8936_v52 = vld [vmem:[%s19017_s3 + $0x8f0] sm:$0xf0] }
 0x634   :  { %v8939_v22 = vor.u32 %v10566_v8, %v8936_v52  ;;  %v8920_v8 = vld [vmem:[%s19017_s3 + $0x8d0] sm:$0xf0] }
 0x635   :  { %v8923_v52 = vor.u32 %v10562_v53, %v8920_v8  ;;  %4079 = vmatpush.bf16.msra.mxu1 %v8919_v45  ;;  %v10558_v53 = vld [vmem:[%s19017_s3 + $0x8a4] sm:$0xf]  ;;  %v8910_v8 = vld [vmem:[%s19017_s3 + $0x8a8] sm:$0xf] }
 0x636   :  { %4091 = vmatpush.bf16.msra.mxu2 %v8939_v22  ;;  %v10560_v22 = vld [vmem:[%s19017_s3 + $0x8ac] sm:$0xf0] }
 0x637   :  { %3876 = vmatpush.bf16.msra.mxu0 %v14937_v2  ;;  %v8942_v2 = vld [vmem:[%s19017_s3 + $0x8e8] sm:$0xf]  ;;  %v8903_v46 = vor.u32 %v10560_v22, %v8902_v1  ;;  %v8886_v1 = vld [vmem:[%s19017_s3 + $0x880] sm:$0xf]  ;;  %v10556_v22 = vld [vmem:[%s19017_s3 + $0x88c] sm:$0xf0] }
 0x639   :  { %4080 = vmatpush.bf16.msra.mxu1 %v8903_v46  ;;  %v10563_v46 = vld [vmem:[%s19017_s3 + $0x8cc] sm:$0xf] }
 0x63a   :  { %4092 = vmatpush.bf16.msra.mxu2 %v8923_v52  ;;  %v10561_v52 = vld [vmem:[%s19017_s3 + $0x8b4] sm:$0xf0] }
 0x63b   :  { %3877 = vmatpush.bf16.msra.mxu0 %v14943_v39  ;;  %v10569_v39 = vld [vmem:[%s19017_s3 + $0x8f4] sm:$0xf0] }
 0x63e   :  { %3878 = vmatmul.bf16.vlgmr.msra.gmra.mxu0 %v3756_v62  ;;  %v8943_v62 = vor.u32 %v10569_v39, %v8942_v2  ;;  %v8926_v2 = vld [vmem:[%s19017_s3 + $0x8c8] sm:$0xf] }
 0x63f   :  { %v8927_v39 = vor.u32 %v10565_v0, %v8926_v2  ;;  %v10567_v2 = vld [vmem:[%s19017_s3 + $0x8ec] sm:$0xf]  ;;  %v8911_v0 = vor.u32 %v10561_v52, %v8910_v8  ;;  %v8888_v8 = vld [vmem:[%s19017_s3 + $0x890] sm:$0xf0] }
 0x640   :  { %4104 = vmatpush.bf16.msra.mxu3 %v8943_v62  ;;  %v8904_v62 = vld [vmem:[%s19017_s3 + $0x8b0] sm:$0xf0] }
 0x641   :  { %v8907_v45 = vor.u32 %v10558_v53, %v8904_v62  ;;  %v8947_v53 = vor.u32 %v10567_v2, %v8944_v17  ;;  %v8887_v62 = vor.u32 %v10556_v22, %v8886_v1  ;;  %v10557_v17 = vld [vmem:[%s19017_s3 + $0x894] sm:$0xf0]  ;;  %v10552_v1 = vld [vmem:[%s19017_s3 + $0x86c] sm:$0xf0] }
 0x642   :  { %v8895_v2 = vor.u32 %v10557_v17, %v8894_v43  ;;  %v8872_v43 = vld [vmem:[%s19017_s3 + $0x870] sm:$0xf0]  ;;  %v10559_v17 = vld [vmem:[%s19017_s3 + $0x8ac] sm:$0xf] }
 0x643   :  { %4093 = vmatpush.bf16.msra.mxu2 %v8907_v45  ;;  %4117 = vmatpush.bf16.msrb.mxu0 %v8947_v53  ;;  %v8928_v45 = vld [vmem:[%s19017_s3 + $0x8d8] sm:$0xf0] }
 0x644   :  { %4105 = vmatpush.bf16.msra.mxu3 %v8927_v39  ;;  %v10554_v39 = vld [vmem:[%s19017_s3 + $0x884] sm:$0xf]  ;;  %4081 = vmatpush.bf16.msra.mxu1 %v8887_v62  ;;  %v8931_v22 = vor.u32 %v10563_v46, %v8928_v45  ;;  %v8854_v45 = vld [vmem:[%s19017_s3 + $0x840] sm:$0xf] }
 0x645   :  { %v8891_v52 = vor.u32 %v10554_v39, %v8888_v8  ;;  %v10550_v62 = vld [vmem:[%s19017_s3 + $0x864] sm:$0xf]  ;;  %v8878_v8 = vld [vmem:[%s19017_s3 + $0x868] sm:$0xf] }
 0x646   :  { %v8875_v39 = vor.u32 %v10550_v62, %v8872_v43 }
 0x647   :  { %4094 = vmatpush.bf16.msra.mxu2 %v8891_v52  ;;  %v10553_v52 = vld [vmem:[%s19017_s3 + $0x874] sm:$0xf0]  ;;  %4118 = vmatpush.bf16.msrb.mxu0 %v8931_v22  ;;  %v10546_v22 = vld [vmem:[%s19017_s3 + $0x844] sm:$0xf] }
 0x648   :  { %4106 = vmatpush.bf16.msra.mxu3 %v8911_v0  ;;  %v8870_v0 = vld [vmem:[%s19017_s3 + $0x860] sm:$0xf]  ;;  %v8879_v46 = vor.u32 %v10553_v52, %v8878_v8  ;;  %v8862_v8 = vld [vmem:[%s19017_s3 + $0x848] sm:$0xf]  ;;  %v10555_v52 = vld [vmem:[%s19017_s3 + $0x88c] sm:$0xf] }
 0x649   :  { %v8871_v53 = vor.u32 %v10552_v1, %v8870_v0  ;;  %v10548_v0 = vld [vmem:[%s19017_s3 + $0x84c] sm:$0xf0] }
 0x64a   :  { %v8855_v62 = vor.u32 %v10548_v0, %v8854_v45  ;;  %v8838_v0 = vld [vmem:[%s19017_s3 + $0x820] sm:$0xf] }
 0x64b   :  { %4082 = vmatpush.bf16.msra.mxu1 %v8871_v53  ;;  %4095 = vmatpush.bf16.msra.mxu2 %v8875_v39  ;;  %v8856_v53 = vld [vmem:[%s19017_s3 + $0x850] sm:$0xf0]  ;;  %v10549_v39 = vld [vmem:[%s19017_s3 + $0x854] sm:$0xf0] }
 0x64c   :  { %4107 = vmatpush.bf16.msra.mxu3 %v8895_v2  ;;  %v8912_v2 = vld [vmem:[%s19017_s3 + $0x8b8] sm:$0xf0]  ;;  %v8859_v43 = vor.u32 %v10546_v22, %v8856_v53  ;;  %v8863_v45 = vor.u32 %v10549_v39, %v8862_v8  ;;  %v10542_v8 = vld [vmem:[%s19017_s3 + $0x824] sm:$0xf]  ;;  %v8840_v39 = vld [vmem:[%s19017_s3 + $0x830] sm:$0xf0] }
 0x64d   :  { %v8915_v1 = vor.u32 %v10559_v17, %v8912_v2  ;;  %v8843_v38 = vor.u32 %v10542_v8, %v8840_v39 }
 0x64f   :  { %4119 = vmatpush.bf16.msrb.mxu0 %v8915_v1  ;;  %4083 = vmatpush.bf16.msra.mxu1 %v8855_v62  ;;  %v10544_v1 = vld [vmem:[%s19017_s3 + $0x82c] sm:$0xf0] }
 0x650   :  { %4108 = vmatpush.bf16.msra.mxu3 %v8879_v46  ;;  %4096 = vmatpush.bf16.msra.mxu2 %v8859_v43  ;;  %v8896_v46 = vld [vmem:[%s19017_s3 + $0x898] sm:$0xf0]  ;;  %v8839_v43 = vor.u32 %v10544_v1, %v8838_v0 }
 0x651   :  { %v8899_v53 = vor.u32 %v10555_v52, %v8896_v46  ;;  %v10551_v52 = vld [vmem:[%s19017_s3 + $0x86c] sm:$0xf]  ;;  %v10540_v46 = vld [vmem:[%s19017_s3 + $0x80c] sm:$0xf0] }
 0x653   :  { %4120 = vmatpush.bf16.msrb.mxu0 %v8899_v53  ;;  %4084 = vmatpush.bf16.msra.mxu1 %v8839_v43  ;;  %v10538_v53 = vld [vmem:[%s19017_s3 + $0x804] sm:$0xf]  ;;  %v8824_v43 = vld [vmem:[%s19017_s3 + $0x810] sm:$0xf0] }
 0x654   :  { %4109 = vmatpush.bf16.msra.mxu3 %v8863_v45  ;;  %v8822_v45 = vld [vmem:[%s19017_s3 + $0x800] sm:$0xf]  ;;  %4097 = vmatpush.bf16.msra.mxu2 %v8843_v38  ;;  %v8827_v8 = vor.u32 %v10538_v53, %v8824_v43  ;;  %v8830_v38 = vld [vmem:[%s19017_s3 + $0x808] sm:$0xf]  ;;  %v8864_v53 = vld [vmem:[%s19017_s3 + $0x858] sm:$0xf0] }
 0x655   :  { %v8823_v1 = vor.u32 %v10540_v46, %v8822_v45  ;;  %v8848_v43 = vld [vmem:[%s19017_s3 + $0x838] sm:$0xf0] }
 0x657   :  { %4085 = vmatpush.bf16.msra.mxu1 %v8823_v1 }
 0x658   :  { %4098 = vmatpush.bf16.msra.mxu2 %v8827_v8 }
 0x65c   :  { %4172 = vmatpush.bf16.msrb.mxu2 %v15171_v23  ;;  %v10539_v23 = vld [vmem:[%s19017_s3 + $0x80c] sm:$0xf] }
 0x660   :  { %4173 = vmatpush.bf16.msrb.mxu2 %v15197_v18 }
 0x664   :  { %4174 = vmatpush.bf16.msrb.mxu2 %v15221_v59 }
 0x668   :  { %4175 = vmatpush.bf16.msrb.mxu2 %v15245_v27 }
 0x66c   :  { %4176 = vmatpush.bf16.msrb.mxu2 %v15269_v47 }
 0x670   :  { %4177 = vmatpush.bf16.msrb.mxu2 %v15294_v58 }
 0x674   :  { %4178 = vmatpush.bf16.msrb.mxu2 %v15319_v4 }
 0x678   :  { %4179 = vmatpush.bf16.msrb.mxu2 %v15338_v12 }
 0x67a   :  { %v3694_v17 = vpop.f32.mrf.mxu0  ;;  %v3707_v2 = vpop.f32.mrf.mxu1 }
 0x67b   :  { %v15702_v62 = vadd.f32 %v3694_v17, %v15097_v26  ;;  %v15705_v22 = vadd.f32 %v3707_v2, %v15070_v44  ;;  %v8846_v26 = vld [vmem:[%s19017_s3 + $0x828] sm:$0xf]  ;;  %v10545_v44 = vld [vmem:[%s19017_s3 + $0x834] sm:$0xf0]  ;;  %v8880_v2 = vld [vmem:[%s19017_s3 + $0x878] sm:$0xf0] }
 0x67c   :  { %v8847_v17 = vor.u32 %v10545_v44, %v8846_v26  ;;  %v8883_v0 = vor.u32 %v10551_v52, %v8880_v2  ;;  %v10541_v44 = vld [vmem:[%s19017_s3 + $0x814] sm:$0xf0]  ;;  %v10547_v52 = vld [vmem:[%s19017_s3 + $0x84c] sm:$0xf] }
 0x67d   :  { %v8831_v1 = vor.u32 %v10541_v44, %v8830_v38 }
 0x67e   :  { %4110 = vmatpush.bf16.msra.mxu3 %v8847_v17  ;;  %4121 = vmatpush.bf16.msrb.mxu0 %v8883_v0  ;;  %v15755_v0 = vld [vmem:[%s19015_s1 + $0x38] sm:$0xff] }
 0x67f   :  { %4159 = vmatpush.bf16.msrb.mxu1 %v15755_v0 }
 0x681   :  { %v3720_v39 = vpop.f32.mrf.mxu2  ;;  %v3733_v26 = vpop.f32.mrf.mxu3 }
 0x682   :  { %v15747_v2 = vadd.f32 %v3720_v39, %v15082_v30  ;;  %v15750_v17 = vadd.f32 %v3733_v26, %v15100_v29  ;;  %v3696_v45 = vpop.f32.mrf.mxu0  ;;  %v3709_v46 = vpop.f32.mrf.mxu1  ;;  %v8867_v30 = vor.u32 %v10547_v52, %v8864_v53  ;;  %4111 = vmatpush.bf16.msra.mxu3 %v8831_v1  ;;  %v10543_v29 = vld [vmem:[%s19017_s3 + $0x82c] sm:$0xf]  ;;  %v15772_v39 = vld [vmem:[%s19015_s1 + $0x30] sm:$0xff]  ;;  %v8832_v26 = vld [vmem:[%s19017_s3 + $0x818] sm:$0xf0] }
 0x683   :  { %v8851_v8 = vor.u32 %v10543_v29, %v8848_v43  ;;  %4160 = vmatpush.bf16.msrb.mxu1 %v15772_v39  ;;  %v8835_v44 = vor.u32 %v10539_v23, %v8832_v26  ;;  %v19365_v53 = vld [vmem:[#allocation6_spill] sm:$0xff]  ;;  %v19367_v29 = vld [vmem:[#allocation7_spill] sm:$0xff]  ;;  %v19368_v43 = vld [vmem:[#allocation9_spill] sm:$0xff] }
 0x684   :  { %4122 = vmatpush.bf16.msrb.mxu0 %v8867_v30  ;;  %v19366_v30 = vld [vmem:[#allocation10_spill] sm:$0xff]  ;;  %v19370_v23 = vld [vmem:[#allocation12_spill] sm:$0xff]  ;;  %v19371_v26 = vld [vmem:[#allocation13_spill] sm:$0xff] }
 0x686   :  { %4185 = vmatpush.bf16.msrb.mxu3 %v15158_v56 }
 0x687   :  { %4161 = vmatpush.bf16.msrb.mxu1 %v15183_v14 }
 0x688   :  { %4123 = vmatpush.bf16.msrb.mxu0 %v8851_v8  ;;  %v19369_v8 = vld [vmem:[#allocation8_spill] sm:$0xff] }
 0x689   :  { %v3722_v38 = vpop.f32.mrf.mxu2  ;;  %v3735_v56 = vpop.f32.mrf.mxu3 }
 0x68a   :  { %4186 = vmatpush.bf16.msrb.mxu3 %v15177_v55  ;;  %v3775_v52 = vpop.f32.mrf.mxu0  ;;  %v3788_v45 = vpop.f32.mrf.mxu1  ;;  %v19372_v38 = vld [vmem:[#allocation11_spill] sm:$0xff]  ;;  %v19373_v56 = vld [vmem:[#allocation14_spill] sm:$0xff] }
 0x68b   :  { %4162 = vmatpush.bf16.msrb.mxu1 %v15209_v37 }
 0x68c   :  { %4124 = vmatpush.bf16.msrb.mxu0 %v8835_v44  ;;  %v19374_v44 = vld [vmem:[#allocation16_spill] sm:$0xff] }
 0x68e   :  { %4187 = vmatpush.bf16.msrb.mxu3 %v15203_v31 }
 0x68f   :  { %4163 = vmatpush.bf16.msrb.mxu1 %v15233_v57 }
 0x690   :  { %4198 = vmatpush.bf16.msra.mxu0 %v15165_v13 }
 0x691   :  { %v3801_v18 = vpop.f32.mrf.mxu2  ;;  %v3814_v46 = vpop.f32.mrf.mxu3 }
 0x692   :  { %4188 = vmatpush.bf16.msrb.mxu3 %v15227_v54  ;;  %v3777_v55 = vpop.f32.mrf.mxu0  ;;  %v3790_v1 = vpop.f32.mrf.mxu1 }
 0x693   :  { %4164 = vmatpush.bf16.msrb.mxu1 %v15257_v48  ;;  %v15877_v55 = vld [vmem:[%s19015_s1 + $0x208] sm:$0xff]  ;;  %v15883_v1 = vld [vmem:[%s19015_s1 + $0x200] sm:$0xff] }
 0x694   :  { %4199 = vmatpush.bf16.msra.mxu0 %v15189_v21  ;;  %v15803_v21 = vld [vmem:[%s19016_s2] ss:$0 sm:$0xff] }
 0x695   :  { %v3776_v31 = vadd.f32 %v15803_v21, %v3775_v52  ;;  %v19375_v52 = vld [vmem:[#allocation18_spill] sm:$0xff] }
 0x696   :  { %4189 = vmatpush.bf16.msrb.mxu3 %v15251_v34 }
 0x697   :  { %4165 = vmatpush.bf16.msrb.mxu1 %v15281_v9  ;;  %v3789_v59 = vadd.f32 %v3788_v45, %v3776_v31  ;;  %v15859_v45 = vld [vmem:[%s19015_s1 + $0x220] sm:$0xff]  ;;  %v10600_v31 = vld [vmem:[%s19017_s3 + $0x9ec] sm:$0xf0] }
 0x698   :  { %4200 = vmatpush.bf16.msra.mxu0 %v15215_v19 }
 0x699   :  { %v3803_v13 = vpop.f32.mrf.mxu2  ;;  %v3816_v14 = vpop.f32.mrf.mxu3 }
 0x69a   :  { %4190 = vmatpush.bf16.msrb.mxu3 %v15275_v50  ;;  %v9096_v14 = vld [vmem:[%s19017_s3 + $0x9e0] sm:$0xf] }
 0x69b   :  { %v3827_v37 = vpop.f32.mrf.mxu0  ;;  %4166 = vmatpush.bf16.msrb.mxu1 %v15306_v40 }
 0x69c   :  { %4201 = vmatpush.bf16.msra.mxu0 %v15239_v16  ;;  %v3802_v16 = vadd.f32 %v3801_v18, %v3789_v59  ;;  %v15865_v18 = vld [vmem:[%s19015_s1 + $0x218] sm:$0xff]  ;;  %v10596_v59 = vld [vmem:[%s19017_s3 + $0x9cc] sm:$0xf0] }
 0x69d   :  { %v3840_v19 = vpop.f32.mrf.mxu1 }
 0x69e   :  { %4191 = vmatpush.bf16.msrb.mxu3 %v15300_v7  ;;  %v3815_v48 = vadd.f32 %v3814_v46, %v3802_v16  ;;  %v15871_v46 = vld [vmem:[%s19015_s1 + $0x210] sm:$0xff] }
 0x69f   :  { %v9098_v16 = vld [vmem:[%s19017_s3 + $0x9f0] sm:$0xf0] }
 0x6a0   :  { %4202 = vmatpush.bf16.msra.mxu0 %v15263_v61  ;;  %v8948_v61 = vld [vmem:[%s19014_s0 + $0x51] sm:$0xff]  ;;  %v3828_v9 = vadd.f32 %v3827_v37, %v3815_v48  ;;  %v9097_v37 = vor.u32 %v10600_v31, %v9096_v14 }
 0x6a1   :  { %v3853_v54 = vpop.f32.mrf.mxu2  ;;  %4138 = vst [vmem:[#allocation1] ss:$9 sm:$0xff] %v8948_v61  ;;  %v10592_v48 = vld [vmem:[%s19017_s3 + $0x9ac] sm:$0xf0] }
 0x6a2   :  { %4192 = vmatpush.bf16.msrb.mxu3 %v15325_v42  ;;  %v3866_v57 = vpop.f32.mrf.mxu3  ;;  %v3841_v58 = vadd.f32 %v3840_v19, %v3828_v9  ;;  %v9080_v19 = vld [vmem:[%s19017_s3 + $0x9c0] sm:$0xf] }
 0x6a3   :  { %v3829_v27 = vpop.f32.mrf.mxu0  ;;  %v9048_v9 = vld [vmem:[%s19017_s3 + $0x980] sm:$0xf] }
 0x6a4   :  { %4203 = vmatpush.bf16.msra.mxu0 %v15287_v11  ;;  %v3854_v7 = vadd.f32 %v3853_v54, %v3841_v58  ;;  %v9081_v54 = vor.u32 %v10596_v59, %v9080_v19  ;;  %v9064_v27 = vld [vmem:[%s19017_s3 + $0x9a0] sm:$0xf]  ;;  %v9074_v19 = vld [vmem:[%s19017_s3 + $0x9b8] sm:$0xf0] }
 0x6a5   :  { %v3842_v34 = vpop.f32.mrf.mxu1  ;;  %v9065_v61 = vor.u32 %v10592_v48, %v9064_v27  ;;  %v10572_v48 = vld [vmem:[%s19017_s3 + $0x90c] sm:$0xf0] }
 0x6a6   :  { %v3867_v40 = vadd.f32 %v3866_v57, %v3854_v7  ;;  %v10598_v57 = vld [vmem:[%s19017_s3 + $0x9e4] sm:$0xf]  ;;  %v10588_v7 = vld [vmem:[%s19017_s3 + $0x98c] sm:$0xf0] }
 0x6a7   :  { %v9101_v34 = vor.u32 %v10598_v57, %v9098_v16  ;;  %v9018_v57 = vld [vmem:[%s19017_s3 + $0x950] sm:$0xf0]  ;;  %v9056_v16 = vld [vmem:[%s19017_s3 + $0x988] sm:$0xf] }
 0x6a8   :  { %4204 = vmatpush.bf16.msra.mxu0 %v15312_v41 }
 0x6a9   :  { %v3855_v47 = vpop.f32.mrf.mxu2 }
 0x6aa   :  { %v3868_v50 = vpop.f32.mrf.mxu3  ;;  %v10594_v47 = vld [vmem:[%s19017_s3 + $0x9c4] sm:$0xf] }
 0x6ab   :  { %v9082_v50 = vld [vmem:[%s19017_s3 + $0x9d0] sm:$0xf0] }
 0x6ac   :  { %4205 = vmatpush.bf16.msra.mxu0 %v15331_v25  ;;  %v4140_v25 = vld [vmem:[#allocation1 + $0x9] sm:$0xff]  ;;  %v9085_v58 = vor.u32 %v10594_v47, %v9082_v50 }
 0x6ad   :  { %v10587_v50 = vld [vmem:[%s19017_s3 + $0x98c] sm:$0xf] }
 0x6bb   :  { %v3879_v11 = vpop.f32.mrf.mxu0 }
 0x6bc   :  { %v3880_v4 = vadd.f32 %v3879_v11, %v3867_v40  ;;  %v9049_v40 = vor.u32 %v10588_v7, %v9048_v9  ;;  %v10590_v11 = vld [vmem:[%s19017_s3 + $0x9a4] sm:$0xf]  ;;  %v9058_v9 = vld [vmem:[%s19017_s3 + $0x998] sm:$0xf0] }
 0x6bd   :  { %v9061_v7 = vor.u32 %v10587_v50, %v9058_v9  ;;  %v16151_v50 = vld [vmem:[%s19015_s1 + $0xb0] sm:$0xff] }
 0x6be   :  { %v3883_v42 = vmax.f32 %v3880_v4, 0.0  ;;  %v9066_v4 = vld [vmem:[%s19017_s3 + $0x9b0] sm:$0xf0] }
 0x6bf   :  { %v16157_v9 = vld [vmem:[%s19015_s1 + $0x10] sm:$0xff] }
 0x6c0   :  { %v3884_v12 = vpack.c.bf16 %v3883_v42, %v3883_v42  ;;  %v9104_v42 = vld [vmem:[%s19017_s3 + $0x9e8] sm:$0xf] }
 0x6c2   :  { %4086 = vmatmul.bf16.vlgmr.msra.gmra.mxu1 %v3884_v12  ;;  %4099 = vmatmul.bf16.vlgmr.msra.gmra.mxu2 %v3884_v12 }
 0x6c3   :  { %4112 = vmatmul.bf16.vlgmr.msra.gmra.mxu3 %v3884_v12  ;;  %4125 = vmatmul.bf16.vlgmr.msrb.gmra.mxu0 %v3884_v12  ;;  %v3881_v41 = vpop.f32.mrf.mxu0  ;;  %v9069_v12 = vor.u32 %v10590_v11, %v9066_v4  ;;  %v10574_v4 = vld [vmem:[%s19017_s3 + $0x924] sm:$0xf] }
 0x6c4   :  { %4211 = vmatpush.bf16.msra.mxu1 %v15348_v15  ;;  %4224 = vmatpush.bf16.msra.mxu2 %v15366_v6  ;;  %v4139_v15 = vld [vmem:[#allocation1] sm:$0xff]  ;;  %v10601_v41 = vld [vmem:[%s19017_s3 + $0x9f4] sm:$0xf0] }
 0x6c5   :  { %4237 = vmatpush.bf16.msra.mxu3 %v15354_v10  ;;  %4250 = vmatpush.bf16.msrb.mxu0 %v15360_v28  ;;  %v4141_v10 = vld [vmem:[#allocation1 + $0x12] sm:$0xff]  ;;  %v4142_v28 = vld [vmem:[#allocation1 + $0x1b] sm:$0xff] }
 0x6c6   :  { %v19357_v6 = vld [vmem:[#allocation23_spill] sm:$0xff] }
 0x6c8   :  { %4212 = vmatpush.bf16.msra.mxu1 %v15372_v3  ;;  %4225 = vmatpush.bf16.msra.mxu2 %v15390_v33  ;;  %v19358_v3 = vld [vmem:[#allocation27_spill] sm:$0xff]  ;;  %v4144_v33 = vld [vmem:[#allocation1 + $0x2d] sm:$0xff] }
 0x6c9   :  { %4238 = vmatpush.bf16.msra.mxu3 %v15378_v51  ;;  %4251 = vmatpush.bf16.msrb.mxu0 %v15384_v36  ;;  %v19359_v51 = vld [vmem:[#allocation28_spill] sm:$0xff]  ;;  %v19360_v36 = vld [vmem:[#allocation25_spill] sm:$0xff] }
 0x6cc   :  { %4213 = vmatpush.bf16.msra.mxu1 %v15396_v24  ;;  %4226 = vmatpush.bf16.msra.mxu2 %v15414_v20  ;;  %v4145_v24 = vld [vmem:[#allocation1 + $0x36] sm:$0xff] }
 0x6cd   :  { %4239 = vmatpush.bf16.msra.mxu3 %v15402_v32  ;;  %4252 = vmatpush.bf16.msrb.mxu0 %v15408_v35  ;;  %v4143_v32 = vld [vmem:[#allocation1 + $0x24] sm:$0xff]  ;;  %v8949_v20 = vld [vmem:[%s19014_s0 + $0x59] sm:$0x1] }
 0x6ce   :  { %v4146_v35 = vld [vmem:[#allocation1 + $0x3f] sm:$0xff] }
 0x6cf   :  { %4148 = vst [vmem:[#allocation1] ss:$9 sm:$0xff] %v8949_v20  ;;  %v9016_v20 = vld [vmem:[%s19017_s3 + $0x940] sm:$0xf] }
 0x6d0   :  { %4214 = vmatpush.bf16.msra.mxu1 %v15420_v5  ;;  %4227 = vmatpush.bf16.msra.mxu2 %v15438_v49  ;;  %v19361_v5 = vld [vmem:[#allocation29_spill] sm:$0xff]  ;;  %v19364_v49 = vld [vmem:[#allocation31_spill] sm:$0xff] }
 0x6d1   :  { %4240 = vmatpush.bf16.msra.mxu3 %v15426_v63  ;;  %4253 = vmatpush.bf16.msrb.mxu0 %v15432_v60  ;;  %v19362_v63 = vld [vmem:[#allocation30_spill] sm:$0xff]  ;;  %v19363_v60 = vld [vmem:[#allocation5_spill] sm:$0xff] }
 0x6d2   :  { %4180 = vmatmul.bf16.vlgmr.msrb.gmra.mxu2 %v4140_v25  ;;  %4167 = vmatmul.bf16.vlgmr.msrb.gmra.mxu1 %v4139_v15  ;;  %v9032_v25 = vld [vmem:[%s19017_s3 + $0x960] sm:$0xf]  ;;  %v10584_v15 = vld [vmem:[%s19017_s3 + $0x96c] sm:$0xf0] }
 0x6d3   :  { %4193 = vmatmul.bf16.vlgmr.msrb.gmra.mxu3 %v4141_v10  ;;  %4206 = vmatmul.bf16.vlgmr.msra.gmra.mxu0 %v4142_v28  ;;  %v9105_v10 = vor.u32 %v10601_v41, %v9104_v42  ;;  %v9033_v28 = vor.u32 %v10584_v15, %v9032_v25  ;;  %v9002_v42 = vld [vmem:[%s19017_s3 + $0x930] sm:$0xf0]  ;;  %v10585_v15 = vld [vmem:[%s19017_s3 + $0x974] sm:$0xf0] }
 0x6d4   :  { %4215 = vmatpush.bf16.msra.mxu1 %v19357_v6  ;;  %4228 = vmatpush.bf16.msra.mxu2 %v19358_v3  ;;  %v10599_v6 = vld [vmem:[%s19017_s3 + $0x9ec] sm:$0xf]  ;;  %v9106_v3 = vld [vmem:[%s19017_s3 + $0x9f8] sm:$0xf0]  ;;  %v9005_v25 = vor.u32 %v10574_v4, %v9002_v42 }
 0x6d5   :  { %4241 = vmatpush.bf16.msra.mxu3 %v19359_v51  ;;  %4254 = vmatpush.bf16.msrb.mxu0 %v19360_v36  ;;  %v9109_v51 = vor.u32 %v10599_v6, %v9106_v3  ;;  %v10586_v36 = vld [vmem:[%s19017_s3 + $0x984] sm:$0xf]  ;;  %v10583_v6 = vld [vmem:[%s19017_s3 + $0x96c] sm:$0xf]  ;;  %v16169_v4 = vld [vmem:[%s19015_s1 + $0x58] sm:$0xff] }
 0x6d6   :  { %v4149_v13 = vld [vmem:[#allocation1] sm:$0xff]  ;;  %v16175_v42 = vld [vmem:[%s19015_s1 + $0xa8] sm:$0xff] }
 0x6d8   :  { %4216 = vmatpush.bf16.msra.mxu1 %v19361_v5  ;;  %4229 = vmatpush.bf16.msra.mxu2 %v19362_v63  ;;  %v10580_v5 = vld [vmem:[%s19017_s3 + $0x94c] sm:$0xf0] }
 0x6d9   :  { %4242 = vmatpush.bf16.msra.mxu3 %v19363_v60  ;;  %4255 = vmatpush.bf16.msrb.mxu0 %v19364_v49  ;;  %v9017_v60 = vor.u32 %v10580_v5, %v9016_v20  ;;  %v10595_v49 = vld [vmem:[%s19017_s3 + $0x9cc] sm:$0xf] }
 0x6dc   :  { %4217 = vmatpush.bf16.msra.mxu1 %v19365_v53  ;;  %4230 = vmatpush.bf16.msra.mxu2 %v19366_v30  ;;  %v9090_v53 = vld [vmem:[%s19017_s3 + $0x9d8] sm:$0xf0] }
 0x6dd   :  { %4243 = vmatpush.bf16.msra.mxu3 %v19367_v29  ;;  %4256 = vmatpush.bf16.msrb.mxu0 %v19368_v43  ;;  %v9093_v30 = vor.u32 %v10595_v49, %v9090_v53  ;;  %v10582_v29 = vld [vmem:[%s19017_s3 + $0x964] sm:$0xf]  ;;  %v9034_v43 = vld [vmem:[%s19017_s3 + $0x970] sm:$0xf0]  ;;  %v9010_v53 = vld [vmem:[%s19017_s3 + $0x938] sm:$0xf0] }
 0x6e0   :  { %4218 = vmatpush.bf16.msra.mxu1 %v19369_v8  ;;  %4231 = vmatpush.bf16.msra.mxu2 %v19370_v23  ;;  %v9072_v8 = vld [vmem:[%s19017_s3 + $0x9a8] sm:$0xf] }
 0x6e1   :  { %4244 = vmatpush.bf16.msra.mxu3 %v19372_v38  ;;  %4257 = vmatpush.bf16.msrb.mxu0 %v19373_v56  ;;  %v10593_v38 = vld [vmem:[%s19017_s3 + $0x9b4] sm:$0xf0]  ;;  %v9000_v56 = vld [vmem:[%s19017_s3 + $0x920] sm:$0xf] }
 0x6e2   :  { %v9073_v14 = vor.u32 %v10593_v38, %v9072_v8  ;;  %v8992_v38 = vld [vmem:[%s19017_s3 + $0x908] sm:$0xf] }
 0x6e3   :  { %4232 = vmatmul.bf16.vlgmr.msra.gmra.mxu2 %v4144_v33  ;;  %4219 = vmatmul.bf16.vlgmr.msra.gmra.mxu1 %v4143_v32  ;;  %v9050_v33 = vld [vmem:[%s19017_s3 + $0x990] sm:$0xf0] }
 0x6e4   :  { %4263 = vmatpush.bf16.msrb.mxu1 %v19371_v26  ;;  %4245 = vmatmul.bf16.vlgmr.msra.gmra.mxu3 %v4145_v24  ;;  %v9088_v24 = vld [vmem:[%s19017_s3 + $0x9c8] sm:$0xf]  ;;  %v9053_v32 = vor.u32 %v10586_v36, %v9050_v33  ;;  %v9037_v26 = vor.u32 %v10582_v29, %v9034_v43  ;;  %v16083_v29 = vld [vmem:[%s19015_s1 + $0x78] sm:$0xff] }
 0x6e5   :  { %4258 = vmatmul.bf16.vlgmr.msrb.gmra.mxu0 %v4146_v35  ;;  %4471 = vmatpush.bf16.msrb.mxu2 %v9097_v37  ;;  %v10597_v35 = vld [vmem:[%s19017_s3 + $0x9d4] sm:$0xf0]  ;;  %v10591_v37 = vld [vmem:[%s19017_s3 + $0x9ac] sm:$0xf]  ;;  %v9024_v36 = vld [vmem:[%s19017_s3 + $0x948] sm:$0xf] }
 0x6e6   :  { %4484 = vmatpush.bf16.msrb.mxu3 %v9101_v34  ;;  %4497 = vmatpush.bf16.msra.mxu0 %v9105_v10  ;;  %v9089_v63 = vor.u32 %v10597_v35, %v9088_v24  ;;  %v8984_v34 = vld [vmem:[%s19017_s3 + $0x900] sm:$0xf]  ;;  %v10581_v24 = vld [vmem:[%s19017_s3 + $0x954] sm:$0xf0]  ;;  %v9026_v35 = vld [vmem:[%s19017_s3 + $0x958] sm:$0xf0] }
 0x6e7   :  { %v8985_v47 = vor.u32 %v10572_v48, %v8984_v34  ;;  %v9025_v20 = vor.u32 %v10581_v24, %v9024_v36  ;;  %v16133_v48 = vld [vmem:[%s19015_s1 + $0x18] sm:$0xff] }
 0x6e8   :  { %4264 = vmatpush.bf16.msrb.mxu1 %v19374_v44  ;;  %v10576_v44 = vld [vmem:[%s19017_s3 + $0x92c] sm:$0xf0] }
 0x6e9   :  { %4472 = vmatpush.bf16.msrb.mxu2 %v9081_v54  ;;  %v9001_v31 = vor.u32 %v10576_v44, %v9000_v56  ;;  %v9077_v54 = vor.u32 %v10591_v37, %v9074_v19  ;;  %v10573_v56 = vld [vmem:[%s19017_s3 + $0x914] sm:$0xf0]  ;;  %v16115_v19 = vld [vmem:[%s19015_s1 + $0x20] sm:$0xff] }
 0x6ea   :  { %4485 = vmatpush.bf16.msrb.mxu3 %v9085_v58  ;;  %4498 = vmatpush.bf16.msra.mxu0 %v9089_v63  ;;  %v9008_v63 = vld [vmem:[%s19017_s3 + $0x928] sm:$0xf]  ;;  %v8993_v37 = vor.u32 %v10573_v56, %v8992_v38  ;;  %v16270_v38 = vld [vmem:[%s19015_s1 + $0x80] sm:$0xff] }
 0x6ec   :  { %4265 = vmatpush.bf16.msrb.mxu1 %v19375_v52 }
 0x6ed   :  { %4473 = vmatpush.bf16.msrb.mxu2 %v9065_v61 }
 0x6ee   :  { %4486 = vmatpush.bf16.msrb.mxu3 %v9069_v12  ;;  %4499 = vmatpush.bf16.msra.mxu0 %v9073_v14  ;;  %v9040_v12 = vld [vmem:[%s19017_s3 + $0x968] sm:$0xf]  ;;  %v8994_v14 = vld [vmem:[%s19017_s3 + $0x918] sm:$0xf0] }
 0x6f0   :  { %4266 = vmatpush.bf16.msrb.mxu1 %v15859_v45 }
 0x6f1   :  { %4474 = vmatpush.bf16.msrb.mxu2 %v9049_v40 }
 0x6f2   :  { %4487 = vmatpush.bf16.msrb.mxu3 %v9053_v32  ;;  %v10579_v32 = vld [vmem:[%s19017_s3 + $0x94c] sm:$0xf] }
 0x6f3   :  { %v9029_v5 = vor.u32 %v10579_v32, %v9026_v35  ;;  %v16230_v35 = vld [vmem:[%s19015_s1 + $0xd8] sm:$0xff] }
 0x6f4   :  { %4267 = vmatpush.bf16.msrb.mxu1 %v15865_v18 }
 0x6f5   :  { %4475 = vmatpush.bf16.msrb.mxu2 %v9033_v28  ;;  %v9041_v28 = vor.u32 %v10585_v15, %v9040_v12  ;;  %v16188_v15 = vld [vmem:[%s19015_s1 + $0xe8] sm:$0xff] }
 0x6f6   :  { %4488 = vmatpush.bf16.msrb.mxu3 %v9037_v26 }
 0x6f8   :  { %4268 = vmatpush.bf16.msrb.mxu1 %v15871_v46 }
 0x6f9   :  { %4476 = vmatpush.bf16.msrb.mxu2 %v9017_v60  ;;  %v10575_v60 = vld [vmem:[%s19017_s3 + $0x92c] sm:$0xf] }
 0x6fa   :  { %v9013_v26 = vor.u32 %v10575_v60, %v9010_v53  ;;  %v16249_v60 = vld [vmem:[%s19015_s1 + $0xd0] sm:$0xff] }
 0x6fc   :  { %4269 = vmatpush.bf16.msrb.mxu1 %v15877_v55 }
 0x6fd   :  { %4477 = vmatpush.bf16.msrb.mxu2 %v9001_v31  ;;  %v16109_v31 = vld [vmem:[%s19015_s1 + $0x70] sm:$0xff] }
 0x700   :  { %4270 = vmatpush.bf16.msrb.mxu1 %v15883_v1 }
 0x701   :  { %4478 = vmatpush.bf16.msrb.mxu2 %v8985_v47  ;;  %v16145_v47 = vld [vmem:[%s19015_s1 + $0x60] sm:$0xff] }
 0x703   :  { %4271 = vmatmul.bf16.vlgmr.msrb.gmra.mxu1 %v4149_v13 }
 0x704   :  { %4510 = vmatpush.bf16.msra.mxu1 %v9109_v51  ;;  %v8986_v51 = vld [vmem:[%s19017_s3 + $0x910] sm:$0xf0] }
 0x705   :  { %4552 = vmatpush.bf16.msra.mxu2 %v15755_v0  ;;  %v10570_v0 = vld [vmem:[%s19017_s3 + $0x904] sm:$0xf] }
 0x706   :  { %v8989_v33 = vor.u32 %v10570_v0, %v8986_v51  ;;  %v16218_v51 = vld [vmem:[%s19015_s1 + $0x48] sm:$0xff] }
 0x708   :  { %4511 = vmatpush.bf16.msra.mxu1 %v9093_v30 }
 0x709   :  { %4553 = vmatpush.bf16.msra.mxu2 %v15772_v39  ;;  %v10577_v39 = vld [vmem:[%s19017_s3 + $0x934] sm:$0xf0] }
 0x70a   :  { %v9009_v43 = vor.u32 %v10577_v39, %v9008_v63  ;;  %v16242_v63 = vld [vmem:[%s19015_s1 + $0x90] sm:$0xff] }
 0x70c   :  { %4512 = vmatpush.bf16.msra.mxu1 %v9077_v54 }
 0x710   :  { %4513 = vmatpush.bf16.msra.mxu1 %v9061_v7 }
 0x73f   :  { %v4087_v23 = vpop.f32.mrf.mxu1 }
 0x740   :  { %v15989_v52 = vadd.f32 %v4087_v23, %v15702_v62  ;;  %v4126_v13 = vpop.f32.mrf.mxu0  ;;  %v10578_v62 = vld [vmem:[%s19017_s3 + $0x944] sm:$0xf]  ;;  %v16089_v23 = vld [vmem:[%s19015_s1 + $0x28] sm:$0xff] }
 0x741   :  { %v15998_v59 = vadd.f32 %v4126_v13, %v15750_v17  ;;  %v9021_v27 = vor.u32 %v10578_v62, %v9018_v57  ;;  %v10589_v17 = vld [vmem:[%s19017_s3 + $0x994] sm:$0xf0]  ;;  %4554 = vmatpush.bf16.msra.mxu2 %v16089_v23  ;;  %v10571_v13 = vld [vmem:[%s19017_s3 + $0x90c] sm:$0xf] }
 0x742   :  { %v9057_v61 = vor.u32 %v10589_v17, %v9056_v16  ;;  %v8997_v54 = vor.u32 %v10571_v13, %v8994_v14  ;;  %v16121_v16 = vld [vmem:[%s19015_s1 + $0x68] sm:$0xff]  ;;  %v16127_v17 = vld [vmem:[%s19015_s1 + $0xb8] sm:$0xff] }
 0x743   :  { %4489 = vmatpush.bf16.msrb.mxu3 %v9021_v27 }
 0x744   :  { %4500 = vmatpush.bf16.msra.mxu0 %v9057_v61  ;;  %v16139_v61 = vld [vmem:[%s19015_s1 + $0xf8] sm:$0xff] }
 0x745   :  { %v4100_v58 = vpop.f32.mrf.mxu2  ;;  %4555 = vmatpush.bf16.msra.mxu2 %v16115_v19 }
 0x746   :  { %v16025_v40 = vadd.f32 %v4100_v58, %v15705_v22  ;;  %v4113_v11 = vpop.f32.mrf.mxu3  ;;  %v16163_v58 = vld [vmem:[%s19015_s1 + $0xf0] sm:$0xff] }
 0x747   :  { %v16037_v41 = vadd.f32 %v4113_v11, %v15747_v2  ;;  %v4089_v22 = vpop.f32.mrf.mxu1  ;;  %v9042_v2 = vld [vmem:[%s19017_s3 + $0x978] sm:$0xf0]  ;;  %4490 = vmatpush.bf16.msrb.mxu3 %v9005_v25  ;;  %v16182_v25 = vld [vmem:[%s19015_s1 + $0x8] sm:$0xff] }
 0x748   :  { %v4128_v10 = vpop.f32.mrf.mxu0  ;;  %v9045_v3 = vor.u32 %v10583_v6, %v9042_v2  ;;  %4501 = vmatpush.bf16.msra.mxu0 %v9041_v28  ;;  %v16200_v28 = vld [vmem:[%s19015_s1 + $0xa0] sm:$0xff] }
 0x749   :  { %4556 = vmatpush.bf16.msra.mxu2 %v16133_v48  ;;  %v16206_v2 = vld [vmem:[%s19015_s1] sm:$0xff] }
 0x74a   :  { %4514 = vmatpush.bf16.msra.mxu1 %v9045_v3  ;;  %v16212_v3 = vld [vmem:[%s19015_s1 + $0xe0] sm:$0xff] }
 0x74b   :  { %4491 = vmatpush.bf16.msrb.mxu3 %v8989_v33  ;;  %v16224_v33 = vld [vmem:[%s19015_s1 + $0x98] sm:$0xff] }
 0x74c   :  { %4502 = vmatpush.bf16.msra.mxu0 %v9025_v20 }
 0x74d   :  { %v4102_v49 = vpop.f32.mrf.mxu2  ;;  %4557 = vmatpush.bf16.msra.mxu2 %v16157_v9 }
 0x74e   :  { %v4115_v30 = vpop.f32.mrf.mxu3  ;;  %4515 = vmatpush.bf16.msra.mxu1 %v9029_v5  ;;  %v16236_v5 = vld [vmem:[%s19015_s1 + $0x40] sm:$0xff] }
 0x74f   :  { %4565 = vmatpush.bf16.msra.mxu3 %v16083_v29  ;;  %v4168_v8 = vpop.f32.mrf.mxu1  ;;  %v16255_v30 = vld [vmem:[%s19015_s1 + $0x88] sm:$0xff] }
 0x750   :  { %v16098_v44 = vpop.f32.mrf.mxu0  ;;  %4503 = vmatpush.bf16.msra.mxu0 %v9009_v43  ;;  %v4169_v12 = vadd.f32 %v15803_v21, %v4168_v8  ;;  %v16194_v21 = vld [vmem:[%s19015_s1 + $0x50] sm:$0xff]  ;;  %v16261_v8 = vld [vmem:[%s19015_s1 + $0xc8] sm:$0xff] }
 0x751   :  { %4558 = vmatpush.bf16.msra.mxu2 %v16182_v25 }
 0x752   :  { %4516 = vmatpush.bf16.msra.mxu1 %v9013_v26  ;;  %v9110_v26 = vld [vmem:[%s19014_s0 + $0x5a] sm:$0xff] }
 0x753   :  { %4566 = vmatpush.bf16.msra.mxu3 %v16109_v31  ;;  %4531 = vst [vmem:[#allocation1] ss:$9 sm:$0xff] %v9110_v26 }
 0x754   :  { %4504 = vmatpush.bf16.msra.mxu0 %v8993_v37 }
 0x755   :  { %v4181_v62 = vpop.f32.mrf.mxu2  ;;  %4559 = vmatpush.bf16.msra.mxu2 %v16206_v2 }
 0x756   :  { %v4194_v57 = vpop.f32.mrf.mxu3  ;;  %4517 = vmatpush.bf16.msra.mxu1 %v8997_v54  ;;  %v4182_v6 = vadd.f32 %v4181_v62, %v4169_v12  ;;  %v16300_v12 = vld [vmem:[%s19015_s1 + $0x1f8] sm:$0xff] }
 0x757   :  { %4567 = vmatpush.bf16.msra.mxu3 %v16121_v16  ;;  %v4170_v27 = vpop.f32.mrf.mxu1 }
 0x758   :  { %4578 = vmatpush.bf16.msrb.mxu0 %v16127_v17  ;;  %v4209_v34 = vpop.f32.mrf.mxu0  ;;  %v4195_v24 = vadd.f32 %v4194_v57, %v4182_v6  ;;  %v16318_v6 = vld [vmem:[%s19015_s1 + $0x1b0] sm:$0xff] }
 0x759   :  { %v16282_v34 = vld [vmem:[%s19015_s1 + $0x138] sm:$0xff] }
 0x75a   :  { %4591 = vmatpush.bf16.msrb.mxu1 %v16139_v61  ;;  %v4208_v39 = vadd.f32 %v16098_v44, %v4195_v24  ;;  %v16276_v44 = vld [vmem:[%s19015_s1 + $0xc0] sm:$0xff]  ;;  %v16336_v24 = vld [vmem:[%s19015_s1 + $0x168] sm:$0xff]  ;;  %v4534_v26 = vld [vmem:[#allocation1 + $0x12] sm:$0xff] }
 0x75b   :  { %4568 = vmatpush.bf16.msra.mxu3 %v16145_v47 }
 0x75c   :  { %4579 = vmatpush.bf16.msrb.mxu0 %v16151_v50 }
 0x75d   :  { %v4183_v7 = vpop.f32.mrf.mxu2 }
 0x75e   :  { %4592 = vmatpush.bf16.msrb.mxu1 %v16163_v58  ;;  %v4196_v11 = vpop.f32.mrf.mxu3  ;;  %v16288_v7 = vld [vmem:[%s19015_s1 + $0x178] sm:$0xff] }
 0x75f   :  { %4569 = vmatpush.bf16.msra.mxu3 %v16169_v4  ;;  %v16294_v11 = vld [vmem:[%s19015_s1 + $0x1b8] sm:$0xff] }
 0x760   :  { %4580 = vmatpush.bf16.msrb.mxu0 %v16175_v42  ;;  %v4220_v22 = vpop.f32.mrf.mxu1 }
 0x761   :  { %v4221_v43 = vadd.f32 %v4220_v22, %v4208_v39  ;;  %v16306_v22 = vld [vmem:[%s19015_s1 + $0x130] sm:$0xff]  ;;  %v4532_v39 = vld [vmem:[#allocation1] sm:$0xff] }
 0x762   :  { %4593 = vmatpush.bf16.msrb.mxu1 %v16188_v15  ;;  %v4259_v10 = vpop.f32.mrf.mxu0 }
 0x763   :  { %4570 = vmatpush.bf16.msra.mxu3 %v16194_v21 }
 0x764   :  { %4581 = vmatpush.bf16.msrb.mxu0 %v16200_v28 }
 0x766   :  { %4594 = vmatpush.bf16.msrb.mxu1 %v16212_v3  ;;  %v4233_v0 = vpop.f32.mrf.mxu2 }
 0x767   :  { %4571 = vmatpush.bf16.msra.mxu3 %v16218_v51  ;;  %v4246_v36 = vpop.f32.mrf.mxu3  ;;  %v4234_v56 = vadd.f32 %v4233_v0, %v4221_v43  ;;  %v16324_v0 = vld [vmem:[%s19015_s1 + $0x1f0] sm:$0xff]  ;;  %v16360_v43 = vld [vmem:[%s19015_s1 + $0x160] sm:$0xff] }
 0x768   :  { %4582 = vmatpush.bf16.msrb.mxu0 %v16224_v33  ;;  %v4222_v32 = vpop.f32.mrf.mxu1  ;;  %19376 = vst [vmem:[#allocation17_spill] sm:$0xff] %v16360_v43 }
 0x769   :  { %v4247_v13 = vadd.f32 %v4246_v36, %v4234_v56  ;;  %v16330_v36 = vld [vmem:[%s19015_s1 + $0x128] sm:$0xff]  ;;  %v4535_v56 = vld [vmem:[#allocation1 + $0x1b] sm:$0xff] }
 0x76a   :  { %4595 = vmatpush.bf16.msrb.mxu1 %v16230_v35  ;;  %v4261_v20 = vpop.f32.mrf.mxu0  ;;  %v16342_v32 = vld [vmem:[%s19015_s1 + $0x1a8] sm:$0xff] }
 0x76b   :  { %4572 = vmatpush.bf16.msra.mxu3 %v16236_v5  ;;  %v4260_v14 = vadd.f32 %v4259_v10, %v4247_v13  ;;  %v16312_v10 = vld [vmem:[%s19015_s1 + $0x170] sm:$0xff]  ;;  %v16348_v20 = vld [vmem:[%s19015_s1 + $0x1e8] sm:$0xff]  ;;  %v16366_v13 = vld [vmem:[%s19015_s1 + $0x1a0] sm:$0xff] }
 0x76c   :  { %4583 = vmatpush.bf16.msrb.mxu0 %v16242_v63  ;;  %19377 = vst [vmem:[#allocation15_spill] sm:$0xff] %v16366_v13 }
 0x76e   :  { %4596 = vmatpush.bf16.msrb.mxu1 %v16249_v60  ;;  %v4235_v49 = vpop.f32.mrf.mxu2 }
 0x76f   :  { %v4248_v53 = vpop.f32.mrf.mxu3  ;;  %v4533_v49 = vld [vmem:[#allocation1 + $0x9] sm:$0xff] }
 0x770   :  { %4584 = vmatpush.bf16.msrb.mxu0 %v16255_v30  ;;  %v16354_v53 = vld [vmem:[%s19015_s1 + $0x120] sm:$0xff] }
 0x772   :  { %4597 = vmatpush.bf16.msrb.mxu1 %v16261_v8 }
 0x774   :  { %4585 = vmatpush.bf16.msrb.mxu0 %v16270_v38 }
 0x776   :  { %4598 = vmatpush.bf16.msrb.mxu1 %v16276_v44 }
 0x780   :  { %v4272_v37 = vpop.f32.mrf.mxu1 }
 0x781   :  { %v4273_v54 = vadd.f32 %v4272_v37, %v4260_v14  ;;  %v16372_v14 = vld [vmem:[%s19015_s1 + $0x1e0] sm:$0xff]  ;;  %v16378_v37 = vld [vmem:[%s19015_s1 + $0x118] sm:$0xff] }
 0x782   :  { %19378 = vst [vmem:[#allocation21_spill] sm:$0xff] %v16372_v14 }
 0x783   :  { %v4276_v62 = vmax.f32 %v4273_v54, 0.0  ;;  %19379 = vst [vmem:[#allocation26_spill] sm:$0xff] %v16378_v37  ;;  %v16384_v54 = vld [vmem:[%s19015_s1 + $0x158] sm:$0xff] }
 0x784   :  { %19380 = vst [vmem:[#allocation19_spill] sm:$0xff] %v16384_v54 }
 0x785   :  { %v4277_v57 = vpack.c.bf16 %v4276_v62, %v4276_v62  ;;  %v16390_v62 = vld [vmem:[%s19015_s1 + $0x198] sm:$0xff] }
 0x786   :  { %19381 = vst [vmem:[#allocation20_spill] sm:$0xff] %v16390_v62 }
 0x787   :  { %4479 = vmatmul.bf16.vlgmr.msrb.gmra.mxu2 %v4277_v57  ;;  %4492 = vmatmul.bf16.vlgmr.msrb.gmra.mxu3 %v4277_v57 }
 0x788   :  { %4505 = vmatmul.bf16.vlgmr.msra.gmra.mxu0 %v4277_v57  ;;  %4518 = vmatmul.bf16.vlgmr.msra.gmra.mxu1 %v4277_v57  ;;  %v4274_v27 = vpop.f32.mrf.mxu1  ;;  %v16396_v57 = vld [vmem:[%s19015_s1 + $0x1d8] sm:$0xff] }
 0x789   :  { %4604 = vmatpush.bf16.msrb.mxu2 %v16282_v34  ;;  %4617 = vmatpush.bf16.msrb.mxu3 %v16288_v7  ;;  %19382 = vst [vmem:[#allocation22_spill] sm:$0xff] %v16396_v57  ;;  %v4536_v27 = vld [vmem:[#allocation1 + $0x24] sm:$0xff] }
 0x78a   :  { %4630 = vmatpush.bf16.msra.mxu0 %v16294_v11  ;;  %4643 = vmatpush.bf16.msra.mxu1 %v16300_v12 }
 0x78d   :  { %4605 = vmatpush.bf16.msrb.mxu2 %v16306_v22  ;;  %4618 = vmatpush.bf16.msrb.mxu3 %v16312_v10 }
 0x78e   :  { %4631 = vmatpush.bf16.msra.mxu0 %v16318_v6  ;;  %4644 = vmatpush.bf16.msra.mxu1 %v16324_v0 }
 0x791   :  { %4606 = vmatpush.bf16.msrb.mxu2 %v16330_v36  ;;  %4619 = vmatpush.bf16.msrb.mxu3 %v16336_v24 }
 0x792   :  { %4632 = vmatpush.bf16.msra.mxu0 %v16342_v32  ;;  %4645 = vmatpush.bf16.msra.mxu1 %v16348_v20 }
 0x795   :  { %4607 = vmatpush.bf16.msrb.mxu2 %v16354_v53  ;;  %4620 = vmatpush.bf16.msrb.mxu3 %v16360_v43 }
 0x796   :  { %4633 = vmatpush.bf16.msra.mxu0 %v16366_v13  ;;  %4646 = vmatpush.bf16.msra.mxu1 %v16372_v14 }
 0x797   :  { %4560 = vmatmul.bf16.vlgmr.msra.gmra.mxu2 %v4532_v39  ;;  %4573 = vmatmul.bf16.vlgmr.msra.gmra.mxu3 %v4533_v49  ;;  %v4537_v39 = vld [vmem:[#allocation1 + $0x2d] sm:$0xff]  ;;  %v4538_v49 = vld [vmem:[#allocation1 + $0x36] sm:$0xff] }
 0x798   :  { %4586 = vmatmul.bf16.vlgmr.msrb.gmra.mxu0 %v4534_v26  ;;  %4599 = vmatmul.bf16.vlgmr.msrb.gmra.mxu1 %v4535_v56  ;;  %v4539_v26 = vld [vmem:[#allocation1 + $0x3f] sm:$0xff] }
 0x799   :  { %4608 = vmatpush.bf16.msrb.mxu2 %v16378_v37  ;;  %4621 = vmatpush.bf16.msrb.mxu3 %v16384_v54  ;;  %v9111_v56 = vld [vmem:[%s19014_s0 + $0x62] sm:$0x1]  ;;  %v16405_v54 = vld [vmem:[%s19015_s1 + $0x110] sm:$0xff] }
 0x79a   :  { %4634 = vmatpush.bf16.msra.mxu0 %v16390_v62  ;;  %4647 = vmatpush.bf16.msra.mxu1 %v16396_v57  ;;  %19383 = vst [vmem:[#allocation24_spill] sm:$0xff] %v16405_v54  ;;  %v16411_v62 = vld [vmem:[%s19015_s1 + $0x150] sm:$0xff] }
 0x79b   :  { %19384 = vst [vmem:[#allocation23_spill] sm:$0xff] %v16411_v62  ;;  %v16417_v57 = vld [vmem:[%s19015_s1 + $0x190] sm:$0xff] }
 0x79c   :  { %4541 = vst [vmem:[#allocation1] ss:$9 sm:$0xff] %v9111_v56  ;;  %v16423_v37 = vld [vmem:[%s19015_s1 + $0x1d0] sm:$0xff]  ;;  %v16435_v56 = vld [vmem:[%s19015_s1 + $0x148] sm:$0xff] }
 0x79d   :  { %4609 = vmatpush.bf16.msrb.mxu2 %v16405_v54  ;;  %4622 = vmatpush.bf16.msrb.mxu3 %v16411_v62  ;;  %19385 = vst [vmem:[#allocation27_spill] sm:$0xff] %v16417_v57  ;;  %v16429_v54 = vld [vmem:[%s19015_s1 + $0x108] sm:$0xff] }
 0x79e   :  { %4635 = vmatpush.bf16.msra.mxu0 %v16417_v57  ;;  %19386 = vst [vmem:[#allocation28_spill] sm:$0xff] %v16423_v37  ;;  %4648 = vmatpush.bf16.msra.mxu1 %v16423_v37  ;;  %v16441_v57 = vld [vmem:[%s19015_s1 + $0x188] sm:$0xff] }
 0x79f   :  { %19387 = vst [vmem:[#allocation25_spill] sm:$0xff] %v16429_v54  ;;  %v16447_v62 = vld [vmem:[%s19015_s1 + $0x1c8] sm:$0xff] }
 0x7a0   :  { %19388 = vst [vmem:[#allocation29_spill] sm:$0xff] %v16435_v56 }
 0x7a1   :  { %4610 = vmatpush.bf16.msrb.mxu2 %v16429_v54  ;;  %4623 = vmatpush.bf16.msrb.mxu3 %v16435_v56  ;;  %19389 = vst [vmem:[#allocation30_spill] sm:$0xff] %v16441_v57  ;;  %v16453_v54 = vld [vmem:[%s19015_s1 + $0x100] sm:$0xff] }
 0x7a2   :  { %4636 = vmatpush.bf16.msra.mxu0 %v16441_v57  ;;  %19390 = vst [vmem:[#allocation5_spill] sm:$0xff] %v16447_v62  ;;  %4649 = vmatpush.bf16.msra.mxu1 %v16447_v62  ;;  %v16459_v56 = vld [vmem:[%s19015_s1 + $0x140] sm:$0xff]  ;;  %v16465_v57 = vld [vmem:[%s19015_s1 + $0x238] sm:$0xff] }
 0x7a3   :  { %19391 = vst [vmem:[#allocation31_spill] sm:$0xff] %v16453_v54  ;;  %v16471_v62 = vld [vmem:[%s19015_s1 + $0x180] sm:$0xff] }
 0x7a4   :  { %19392 = vst [vmem:[#allocation6_spill] sm:$0xff] %v16459_v56 }
 0x7a5   :  { %4611 = vmatpush.bf16.msrb.mxu2 %v16453_v54  ;;  %4624 = vmatpush.bf16.msrb.mxu3 %v16459_v56  ;;  %19393 = vst [vmem:[#allocation10_spill] sm:$0xff] %v16465_v57  ;;  %v16477_v54 = vld [vmem:[%s19015_s1 + $0x1c0] sm:$0xff]  ;;  %v16483_v56 = vld [vmem:[%s19015_s1 + $0x230] sm:$0xff] }
 0x7a6   :  { %19394 = vst [vmem:[#allocation7_spill] sm:$0xff] %v16471_v62  ;;  %4637 = vmatpush.bf16.msra.mxu0 %v16471_v62  ;;  %4650 = vmatpush.bf16.msra.mxu1 %v16477_v54  ;;  %v16489_v62 = vld [vmem:[%s19015_s1 + $0x228] sm:$0xff] }
 0x7a7   :  { %19395 = vst [vmem:[#allocation9_spill] sm:$0xff] %v16477_v54 }
 0x7a8   :  { %4612 = vmatmul.bf16.vlgmr.msrb.gmra.mxu2 %v4536_v27  ;;  %4625 = vmatmul.bf16.vlgmr.msrb.gmra.mxu3 %v4537_v39  ;;  %19396 = vst [vmem:[#allocation8_spill] sm:$0xff] %v16483_v56  ;;  %v4542_v27 = vld [vmem:[#allocation1] sm:$0xff] }
 0x7a9   :  { %4656 = vmatpush.bf16.msra.mxu2 %v16465_v57  ;;  %4638 = vmatmul.bf16.vlgmr.msra.gmra.mxu0 %v4538_v49  ;;  %19397 = vst [vmem:[#allocation12_spill] sm:$0xff] %v16489_v62  ;;  %v9258_v39 = vld [vmem:[%s19017_s3 + $0xae0] sm:$0xf]  ;;  %v10632_v49 = vld [vmem:[%s19017_s3 + $0xaec] sm:$0xf0] }
 0x7aa   :  { %4651 = vmatmul.bf16.vlgmr.msra.gmra.mxu1 %v4539_v26  ;;  %v10624_v26 = vld [vmem:[%s19017_s3 + $0xaac] sm:$0xf0]  ;;  %v9250_v57 = vld [vmem:[%s19017_s3 + $0xac8] sm:$0xf] }
 0x7ad   :  { %4657 = vmatpush.bf16.msra.mxu2 %v16483_v56 }
 0x7b1   :  { %4658 = vmatpush.bf16.msra.mxu2 %v16489_v62 }
 0x7b5   :  { %4659 = vmatpush.bf16.msra.mxu2 %v15859_v45  ;;  %v9242_v45 = vld [vmem:[%s19017_s3 + $0xac0] sm:$0xf] }
 0x7b9   :  { %4660 = vmatpush.bf16.msra.mxu2 %v15865_v18  ;;  %v9259_v18 = vor.u32 %v10632_v49, %v9258_v39  ;;  %v10631_v39 = vld [vmem:[%s19017_s3 + $0xaec] sm:$0xf]  ;;  %v9268_v49 = vld [vmem:[%s19017_s3 + $0xaf8] sm:$0xf0] }
 0x7bb   :  { %4864 = vmatpush.bf16.msra.mxu3 %v9259_v18  ;;  %v9271_v18 = vor.u32 %v10631_v39, %v9268_v49  ;;  %v9266_v39 = vld [vmem:[%s19017_s3 + $0xae8] sm:$0xf]  ;;  %v10633_v49 = vld [vmem:[%s19017_s3 + $0xaf4] sm:$0xf0] }
 0x7bd   :  { %4661 = vmatpush.bf16.msra.mxu2 %v15871_v46  ;;  %v10628_v46 = vld [vmem:[%s19017_s3 + $0xacc] sm:$0xf0] }
 0x7c1   :  { %4662 = vmatpush.bf16.msra.mxu2 %v15877_v55  ;;  %v9243_v55 = vor.u32 %v10628_v46, %v9242_v45  ;;  %v9210_v45 = vld [vmem:[%s19017_s3 + $0xa80] sm:$0xf]  ;;  %v10620_v46 = vld [vmem:[%s19017_s3 + $0xa8c] sm:$0xf0] }
 0x7c3   :  { %4865 = vmatpush.bf16.msra.mxu3 %v9243_v55  ;;  %v9211_v55 = vor.u32 %v10620_v46, %v9210_v45  ;;  %v9267_v45 = vor.u32 %v10633_v49, %v9266_v39  ;;  %v9252_v46 = vld [vmem:[%s19017_s3 + $0xad8] sm:$0xf0]  ;;  %v9244_v39 = vld [vmem:[%s19017_s3 + $0xad0] sm:$0xf0] }
 0x7c5   :  { %4663 = vmatpush.bf16.msra.mxu2 %v15883_v1  ;;  %v9226_v1 = vld [vmem:[%s19017_s3 + $0xaa0] sm:$0xf]  ;;  %4890 = vmatpush.bf16.msrb.mxu1 %v9267_v45 }
 0x7c6   :  { %v9178_v45 = vld [vmem:[%s19017_s3 + $0xa40] sm:$0xf] }
 0x7c8   :  { %4664 = vmatmul.bf16.vlgmr.msra.gmra.mxu2 %v4542_v27  ;;  %v9227_v27 = vor.u32 %v10624_v26, %v9226_v1  ;;  %v10630_v1 = vld [vmem:[%s19017_s3 + $0xae4] sm:$0xf]  ;;  %v9260_v26 = vld [vmem:[%s19017_s3 + $0xaf0] sm:$0xf0] }
 0x7c9   :  { %4903 = vmatpush.bf16.msrb.mxu2 %v9271_v18  ;;  %v9263_v62 = vor.u32 %v10630_v1, %v9260_v26  ;;  %v9194_v18 = vld [vmem:[%s19017_s3 + $0xa60] sm:$0xf]  ;;  %v10616_v1 = vld [vmem:[%s19017_s3 + $0xa6c] sm:$0xf0] }
 0x7ca   :  { %4866 = vmatpush.bf16.msra.mxu3 %v9227_v27  ;;  %v10627_v27 = vld [vmem:[%s19017_s3 + $0xacc] sm:$0xf]  ;;  %v9195_v56 = vor.u32 %v10616_v1, %v9194_v18  ;;  %v9236_v18 = vld [vmem:[%s19017_s3 + $0xab8] sm:$0xf0]  ;;  %v10612_v1 = vld [vmem:[%s19017_s3 + $0xa4c] sm:$0xf0] }
 0x7cb   :  { %4877 = vmatpush.bf16.msrb.mxu0 %v9263_v62  ;;  %v9255_v26 = vor.u32 %v10627_v27, %v9252_v46  ;;  %v10626_v62 = vld [vmem:[%s19017_s3 + $0xac4] sm:$0xf]  ;;  %v10623_v27 = vld [vmem:[%s19017_s3 + $0xaac] sm:$0xf]  ;;  %v9179_v37 = vor.u32 %v10612_v1, %v9178_v45  ;;  %v9162_v45 = vld [vmem:[%s19017_s3 + $0xa20] sm:$0xf] }
 0x7cc   :  { %v9247_v49 = vor.u32 %v10626_v62, %v9244_v39  ;;  %v9239_v62 = vor.u32 %v10623_v27, %v9236_v18  ;;  %v10622_v39 = vld [vmem:[%s19017_s3 + $0xaa4] sm:$0xf]  ;;  %v10619_v27 = vld [vmem:[%s19017_s3 + $0xa8c] sm:$0xf]  ;;  %v9220_v18 = vld [vmem:[%s19017_s3 + $0xa98] sm:$0xf0] }
 0x7cd   :  { %4904 = vmatpush.bf16.msrb.mxu2 %v9255_v26  ;;  %v9234_v26 = vld [vmem:[%s19017_s3 + $0xaa8] sm:$0xf]  ;;  %v10608_v1 = vld [vmem:[%s19017_s3 + $0xa2c] sm:$0xf0] }
 0x7ce   :  { %4867 = vmatpush.bf16.msra.mxu3 %v9211_v55  ;;  %v10629_v55 = vld [vmem:[%s19017_s3 + $0xad4] sm:$0xf0] }
 0x7cf   :  { %v9251_v46 = vor.u32 %v10629_v55, %v9250_v57  ;;  %4878 = vmatpush.bf16.msrb.mxu0 %v9247_v49  ;;  %v9228_v57 = vld [vmem:[%s19017_s3 + $0xab0] sm:$0xf0]  ;;  %v10625_v49 = vld [vmem:[%s19017_s3 + $0xab4] sm:$0xf0] }
 0x7d0   :  { %v9231_v13 = vor.u32 %v10622_v39, %v9228_v57  ;;  %v10618_v39 = vld [vmem:[%s19017_s3 + $0xa84] sm:$0xf] }
 0x7d1   :  { %4891 = vmatpush.bf16.msrb.mxu1 %v9251_v46  ;;  %4905 = vmatpush.bf16.msrb.mxu2 %v9239_v62  ;;  %v9163_v46 = vor.u32 %v10608_v1, %v9162_v45  ;;  %v9218_v62 = vld [vmem:[%s19017_s3 + $0xa88] sm:$0xf]  ;;  %v10604_v45 = vld [vmem:[%s19017_s3 + $0xa0c] sm:$0xf0] }
 0x7d2   :  { %4868 = vmatpush.bf16.msra.mxu3 %v9195_v56  ;;  %v9235_v56 = vor.u32 %v10625_v49, %v9234_v26 }
 0x7d3   :  { %4879 = vmatpush.bf16.msrb.mxu0 %v9231_v13  ;;  %v10621_v13 = vld [vmem:[%s19017_s3 + $0xa94] sm:$0xf0] }
 0x7d5   :  { %4892 = vmatpush.bf16.msrb.mxu1 %v9235_v56  ;;  %v9146_v56 = vld [vmem:[%s19017_s3 + $0xa00] sm:$0xf] }
 0x7d6   :  { %4869 = vmatpush.bf16.msra.mxu3 %v9179_v37  ;;  %v10615_v37 = vld [vmem:[%s19017_s3 + $0xa6c] sm:$0xf] }
 0x7da   :  { %4870 = vmatpush.bf16.msra.mxu3 %v9163_v46  ;;  %v9202_v46 = vld [vmem:[%s19017_s3 + $0xa68] sm:$0xf] }
 0x805   :  { %v4506_v55 = vpop.f32.mrf.mxu0  ;;  %v4519_v54 = vpop.f32.mrf.mxu1 }
 0x806   :  { %v16594_v43 = vadd.f32 %v4506_v55, %v16037_v41  ;;  %v16597_v14 = vadd.f32 %v4519_v54, %v15998_v59  ;;  %v9223_v41 = vor.u32 %v10619_v27, %v9220_v18  ;;  %v9212_v59 = vld [vmem:[%s19017_s3 + $0xa90] sm:$0xf0]  ;;  %v9219_v18 = vor.u32 %v10621_v13, %v9218_v62  ;;  %v9188_v13 = vld [vmem:[%s19017_s3 + $0xa58] sm:$0xf0] }
 0x807   :  { %v9215_v54 = vor.u32 %v10618_v39, %v9212_v59  ;;  %v9147_v39 = vor.u32 %v10604_v45, %v9146_v56  ;;  %v9196_v59 = vld [vmem:[%s19017_s3 + $0xa70] sm:$0xf0] }
 0x808   :  { %19398 = vst [vmem:[#allocation13_spill] sm:$0xff] %v16597_v14  ;;  %4906 = vmatpush.bf16.msrb.mxu2 %v9223_v41  ;;  %v10614_v41 = vld [vmem:[%s19017_s3 + $0xa64] sm:$0xf]  ;;  %4893 = vmatpush.bf16.msrb.mxu1 %v9219_v18  ;;  %v9180_v56 = vld [vmem:[%s19017_s3 + $0xa50] sm:$0xf0] }
 0x809   :  { %4880 = vmatpush.bf16.msrb.mxu0 %v9215_v54  ;;  %v9199_v54 = vor.u32 %v10614_v41, %v9196_v59  ;;  %4871 = vmatpush.bf16.msra.mxu3 %v9147_v39  ;;  %v10613_v39 = vld [vmem:[%s19017_s3 + $0xa54] sm:$0xf0]  ;;  %v10607_v41 = vld [vmem:[%s19017_s3 + $0xa2c] sm:$0xf] }
 0x80a   :  { %v4480_v57 = vpop.f32.mrf.mxu2  ;;  %v4493_v26 = vpop.f32.mrf.mxu3 }
 0x80b   :  { %v16612_v55 = vadd.f32 %v4480_v57, %v15989_v52  ;;  %v16615_v49 = vadd.f32 %v4493_v26, %v16025_v40  ;;  %v9204_v40 = vld [vmem:[%s19017_s3 + $0xa78] sm:$0xf0]  ;;  %v10617_v57 = vld [vmem:[%s19017_s3 + $0xa74] sm:$0xf0]  ;;  %v10611_v26 = vld [vmem:[%s19017_s3 + $0xa4c] sm:$0xf] }
 0x80c   :  { %v9207_v1 = vor.u32 %v10615_v37, %v9204_v40  ;;  %v9203_v62 = vor.u32 %v10617_v57, %v9202_v46  ;;  %v9191_v18 = vor.u32 %v10611_v26, %v9188_v13  ;;  %v10610_v40 = vld [vmem:[%s19017_s3 + $0xa44] sm:$0xf]  ;;  %v9164_v57 = vld [vmem:[%s19017_s3 + $0xa30] sm:$0xf0] }
 0x80d   :  { %19399 = vst [vmem:[#allocation11_spill] sm:$0xff] %v16612_v55  ;;  %v4508_v27 = vpop.f32.mrf.mxu0  ;;  %v4521_v52 = vpop.f32.mrf.mxu1  ;;  %4881 = vmatpush.bf16.msrb.mxu0 %v9199_v54  ;;  %v9183_v45 = vor.u32 %v10610_v40, %v9180_v56  ;;  %v9172_v54 = vld [vmem:[%s19017_s3 + $0xa38] sm:$0xf0]  ;;  %v10606_v46 = vld [vmem:[%s19017_s3 + $0xa24] sm:$0xf]  ;;  %v16699_v56 = vld [vmem:[%s19015_s1 + $0x30] sm:$0xff] }
 0x80e   :  { %4907 = vmatpush.bf16.msrb.mxu2 %v9207_v1  ;;  %v16656_v52 = vld [vmem:[%s19015_s1 + $0x38] sm:$0xff]  ;;  %4894 = vmatpush.bf16.msrb.mxu1 %v9203_v62  ;;  %v9186_v1 = vld [vmem:[%s19017_s3 + $0xa48] sm:$0xf]  ;;  %v9175_v13 = vor.u32 %v10607_v41, %v9172_v54  ;;  %v10603_v40 = vld [vmem:[%s19017_s3 + $0xa0c] sm:$0xf]  ;;  %19401 = vst [vmem:[#allocation16_spill] sm:$0xff] %v16699_v56 }
 0x80f   :  { %19400 = vst [vmem:[#allocation14_spill] sm:$0xff] %v16656_v52  ;;  %4945 = vmatpush.bf16.msrb.mxu3 %v16656_v52  ;;  %v9187_v59 = vor.u32 %v10613_v39, %v9186_v1  ;;  %v10602_v1 = vld [vmem:[%s19017_s3 + $0xa04] sm:$0xf]  ;;  %v9148_v39 = vld [vmem:[%s19017_s3 + $0xa10] sm:$0xf0] }
 0x811   :  { %4882 = vmatpush.bf16.msrb.mxu0 %v9183_v45  ;;  %v9156_v45 = vld [vmem:[%s19017_s3 + $0xa18] sm:$0xf0] }
 0x812   :  { %v4482_v37 = vpop.f32.mrf.mxu2  ;;  %v4495_v27 = vpop.f32.mrf.mxu3  ;;  %4908 = vmatpush.bf16.msrb.mxu2 %v9191_v18  ;;  %v10609_v18 = vld [vmem:[%s19017_s3 + $0xa34] sm:$0xf0]  ;;  %4895 = vmatpush.bf16.msrb.mxu1 %v9187_v59  ;;  %v9159_v54 = vor.u32 %v10603_v40, %v9156_v45 }
 0x813   :  { %v9167_v37 = vor.u32 %v10606_v46, %v9164_v57  ;;  %v9170_v27 = vld [vmem:[%s19017_s3 + $0xa28] sm:$0xf]  ;;  %4946 = vmatpush.bf16.msrb.mxu3 %v16699_v56  ;;  %v10605_v57 = vld [vmem:[%s19017_s3 + $0xa14] sm:$0xf0]  ;;  %v9151_v56 = vor.u32 %v10602_v1, %v9148_v39 }
 0x814   :  { %v9171_v41 = vor.u32 %v10609_v18, %v9170_v27  ;;  %v9154_v46 = vld [vmem:[%s19017_s3 + $0xa08] sm:$0xf]  ;;  %v19419_v40 = vld [vmem:[#allocation10_spill] sm:$0xff]  ;;  %v19421_v45 = vld [vmem:[#allocation7_spill] sm:$0xff] }
 0x815   :  { %v16683_v26 = vpop.f32.mrf.mxu0  ;;  %v16685_v62 = vpop.f32.mrf.mxu1  ;;  %4883 = vmatpush.bf16.msrb.mxu0 %v9167_v37  ;;  %v9155_v55 = vor.u32 %v10605_v57, %v9154_v46  ;;  %v19418_v18 = vld [vmem:[#allocation9_spill] sm:$0xff]  ;;  %v19422_v1 = vld [vmem:[#allocation8_spill] sm:$0xff] }
 0x816   :  { %4909 = vmatpush.bf16.msrb.mxu2 %v9175_v13  ;;  %4896 = vmatpush.bf16.msrb.mxu1 %v9171_v41  ;;  %v19423_v39 = vld [vmem:[#allocation12_spill] sm:$0xff]  ;;  %v16811_v46 = vld [vmem:[%s19015_s1 + $0x210] sm:$0xff] }
 0x817   :  { %4947 = vmatpush.bf16.msrb.mxu3 %v16089_v23  ;;  %v16799_v41 = vld [vmem:[%s19015_s1 + $0x220] sm:$0xff]  ;;  %v16817_v57 = vld [vmem:[%s19015_s1 + $0x208] sm:$0xff] }
 0x819   :  { %4884 = vmatpush.bf16.msrb.mxu0 %v9151_v56  ;;  %v19420_v56 = vld [vmem:[#allocation6_spill] sm:$0xff] }
 0x81a   :  { %v4561_v52 = vpop.f32.mrf.mxu2  ;;  %v4574_v14 = vpop.f32.mrf.mxu3  ;;  %4910 = vmatpush.bf16.msrb.mxu2 %v9159_v54  ;;  %4897 = vmatpush.bf16.msrb.mxu1 %v9155_v55  ;;  %v19414_v55 = vld [vmem:[#allocation5_spill] sm:$0xff]  ;;  %v16805_v54 = vld [vmem:[%s19015_s1 + $0x218] sm:$0xff] }
 0x81b   :  { %4948 = vmatpush.bf16.msrb.mxu3 %v16115_v19 }
 0x81d   :  { %v4589_v59 = vpop.f32.mrf.mxu0  ;;  %v4602_v13 = vpop.f32.mrf.mxu1  ;;  %4958 = vmatpush.bf16.msra.mxu0 %v16083_v29 }
 0x81e   :  { %4984 = vmatpush.bf16.msra.mxu2 %v16139_v61  ;;  %4971 = vmatpush.bf16.msra.mxu1 %v16127_v17  ;;  %v16823_v59 = vld [vmem:[%s19015_s1 + $0x200] sm:$0xff] }
 0x81f   :  { %4949 = vmatpush.bf16.msrb.mxu3 %v16133_v48 }
 0x821   :  { %4959 = vmatpush.bf16.msra.mxu0 %v16109_v31  ;;  %v16736_v31 = vld [vmem:[%s19016_s2] ss:$0 sm:$0xff] }
 0x822   :  { %4985 = vmatpush.bf16.msra.mxu2 %v16163_v58  ;;  %v4563_v37 = vpop.f32.mrf.mxu2  ;;  %v4576_v27 = vpop.f32.mrf.mxu3  ;;  %4972 = vmatpush.bf16.msra.mxu1 %v16151_v50  ;;  %v4562_v19 = vadd.f32 %v16736_v31, %v4561_v52  ;;  %v19415_v52 = vld [vmem:[#allocation29_spill] sm:$0xff] }
 0x823   :  { %4950 = vmatpush.bf16.msrb.mxu3 %v16157_v9  ;;  %v9420_v37 = vld [vmem:[%s19017_s3 + $0xbe0] sm:$0xf]  ;;  %v10664_v27 = vld [vmem:[%s19017_s3 + $0xbec] sm:$0xf0] }
 0x824   :  { %v4575_v61 = vadd.f32 %v4574_v14, %v4562_v19  ;;  %v19413_v14 = vld [vmem:[#allocation25_spill] sm:$0xff]  ;;  %v10665_v19 = vld [vmem:[%s19017_s3 + $0xbf4] sm:$0xf0] }
 0x825   :  { %4960 = vmatpush.bf16.msra.mxu0 %v16121_v16 }
 0x826   :  { %4986 = vmatpush.bf16.msra.mxu2 %v16188_v15  ;;  %v4639_v23 = vpop.f32.mrf.mxu0  ;;  %4973 = vmatpush.bf16.msra.mxu1 %v16175_v42  ;;  %v4588_v50 = vadd.f32 %v16683_v26, %v4575_v61  ;;  %v19416_v26 = vld [vmem:[#allocation30_spill] sm:$0xff]  ;;  %v10663_v61 = vld [vmem:[%s19017_s3 + $0xbec] sm:$0xf] }
 0x827   :  { %v4652_v29 = vpop.f32.mrf.mxu1  ;;  %4951 = vmatpush.bf16.msrb.mxu3 %v16182_v25  ;;  %v9272_v25 = vld [vmem:[%s19014_s0 + $0x63] sm:$0xff] }
 0x828   :  { %4924 = vst [vmem:[#allocation1] ss:$9 sm:$0xff] %v9272_v25 }
 0x829   :  { %4961 = vmatpush.bf16.msra.mxu0 %v16145_v47 }
 0x82a   :  { %4987 = vmatpush.bf16.msra.mxu2 %v16212_v3  ;;  %4974 = vmatpush.bf16.msra.mxu1 %v16200_v28 }
 0x82b   :  { %v4613_v17 = vpop.f32.mrf.mxu2  ;;  %v4626_v48 = vpop.f32.mrf.mxu3  ;;  %4952 = vmatpush.bf16.msrb.mxu3 %v16206_v2 }
 0x82d   :  { %4962 = vmatpush.bf16.msra.mxu0 %v16169_v4  ;;  %v4601_v4 = vadd.f32 %v16685_v62, %v4588_v50  ;;  %v19417_v62 = vld [vmem:[#allocation31_spill] sm:$0xff] }
 0x82e   :  { %4988 = vmatpush.bf16.msra.mxu2 %v16230_v35  ;;  %v4641_v16 = vpop.f32.mrf.mxu0  ;;  %4975 = vmatpush.bf16.msra.mxu1 %v16224_v33 }
 0x82f   :  { %v4654_v47 = vpop.f32.mrf.mxu1  ;;  %v4614_v42 = vadd.f32 %v4613_v17, %v4601_v4  ;;  %v9404_v17 = vld [vmem:[%s19017_s3 + $0xbc0] sm:$0xf]  ;;  %v10660_v16 = vld [vmem:[%s19017_s3 + $0xbcc] sm:$0xf0]  ;;  %v9422_v4 = vld [vmem:[%s19017_s3 + $0xbf0] sm:$0xf0] }
 0x830   :  { %v9430_v47 = vld [vmem:[%s19017_s3 + $0xbf8] sm:$0xf0]  ;;  %v9405_v50 = vor.u32 %v10660_v16, %v9404_v17 }
 0x831   :  { %4963 = vmatpush.bf16.msra.mxu0 %v16194_v21  ;;  %v4627_v15 = vadd.f32 %v4626_v48, %v4614_v42  ;;  %v9412_v42 = vld [vmem:[%s19017_s3 + $0xbc8] sm:$0xf] }
 0x832   :  { %4989 = vmatpush.bf16.msra.mxu2 %v16249_v60  ;;  %4976 = vmatpush.bf16.msra.mxu1 %v16242_v63  ;;  %v4926_v63 = vld [vmem:[#allocation1 + $0x9] sm:$0xff] }
 0x833   :  { %v4615_v9 = vpop.f32.mrf.mxu2  ;;  %v4628_v58 = vpop.f32.mrf.mxu3  ;;  %v4640_v21 = vadd.f32 %v4639_v23, %v4627_v15  ;;  %v19402_v60 = vld [vmem:[#allocation21_spill] sm:$0xff]  ;;  %v9421_v23 = vor.u32 %v10664_v27, %v9420_v37  ;;  %v10661_v15 = vld [vmem:[%s19017_s3 + $0xbd4] sm:$0xf0] }
 0x834   :  { %v9433_v9 = vor.u32 %v10663_v61, %v9430_v47  ;;  %v10662_v58 = vld [vmem:[%s19017_s3 + $0xbe4] sm:$0xf]  ;;  %v10647_v27 = vld [vmem:[%s19017_s3 + $0xb6c] sm:$0xf]  ;;  %v9358_v61 = vld [vmem:[%s19017_s3 + $0xb70] sm:$0xf0] }
 0x835   :  { %4964 = vmatpush.bf16.msra.mxu0 %v16218_v51  ;;  %v4653_v28 = vadd.f32 %v4652_v29, %v4640_v21  ;;  %v9428_v29 = vld [vmem:[%s19017_s3 + $0xbe8] sm:$0xf]  ;;  %v9425_v25 = vor.u32 %v10662_v58, %v9422_v4  ;;  %v9388_v21 = vld [vmem:[%s19017_s3 + $0xba0] sm:$0xf]  ;;  %v10640_v4 = vld [vmem:[%s19017_s3 + $0xb2c] sm:$0xf0] }
 0x836   :  { %4990 = vmatpush.bf16.msra.mxu2 %v16261_v8  ;;  %4977 = vmatpush.bf16.msra.mxu1 %v16255_v30  ;;  %v4928_v30 = vld [vmem:[#allocation1 + $0x1b] sm:$0xff]  ;;  %v4927_v8 = vld [vmem:[#allocation1 + $0x12] sm:$0xff]  ;;  %v9429_v48 = vor.u32 %v10665_v19, %v9428_v29  ;;  %v10646_v29 = vld [vmem:[%s19017_s3 + $0xb64] sm:$0xf] }
 0x837   :  { %v9348_v47 = vld [vmem:[%s19017_s3 + $0xb48] sm:$0xf]  ;;  %v9324_v58 = vld [vmem:[%s19017_s3 + $0xb20] sm:$0xf] }
 0x839   :  { %4965 = vmatpush.bf16.msra.mxu0 %v16236_v5  ;;  %v4925_v5 = vld [vmem:[#allocation1] sm:$0xff] }
 0x83a   :  { %4991 = vmatpush.bf16.msra.mxu2 %v16276_v44  ;;  %4978 = vmatpush.bf16.msra.mxu1 %v16270_v38  ;;  %v19403_v38 = vld [vmem:[#allocation17_spill] sm:$0xff]  ;;  %v19404_v44 = vld [vmem:[#allocation15_spill] sm:$0xff] }
 0x84b   :  { %v4665_v2 = vpop.f32.mrf.mxu2 }
 0x84c   :  { %v4666_v3 = vadd.f32 %v4665_v2, %v4653_v28  ;;  %v10656_v28 = vld [vmem:[%s19017_s3 + $0xbac] sm:$0xf0]  ;;  %v9413_v2 = vor.u32 %v10661_v15, %v9412_v42  ;;  %v10643_v42 = vld [vmem:[%s19017_s3 + $0xb4c] sm:$0xf] }
 0x84e   :  { %v4669_v51 = vmax.f32 %v4666_v3, 0.0  ;;  %v10659_v3 = vld [vmem:[%s19017_s3 + $0xbcc] sm:$0xf] }
 0x850   :  { %v4670_v33 = vpack.c.bf16 %v4669_v51, %v4669_v51  ;;  %v9414_v51 = vld [vmem:[%s19017_s3 + $0xbd8] sm:$0xf0] }
 0x852   :  { %4872 = vmatmul.bf16.vlgmr.msra.gmra.mxu3 %v4670_v33  ;;  %4885 = vmatmul.bf16.vlgmr.msrb.gmra.mxu0 %v4670_v33 }
 0x853   :  { %4898 = vmatmul.bf16.vlgmr.msrb.gmra.mxu1 %v4670_v33  ;;  %4911 = vmatmul.bf16.vlgmr.msrb.gmra.mxu2 %v4670_v33  ;;  %v4667_v35 = vpop.f32.mrf.mxu2  ;;  %v9417_v33 = vor.u32 %v10659_v3, %v9414_v51 }
 0x854   :  { %4997 = vmatpush.bf16.msra.mxu3 %v16282_v34  ;;  %5036 = vmatpush.bf16.msrb.mxu2 %v16300_v12  ;;  %v19405_v34 = vld [vmem:[#allocation26_spill] sm:$0xff]  ;;  %v19408_v12 = vld [vmem:[#allocation20_spill] sm:$0xff]  ;;  %v9389_v35 = vor.u32 %v10656_v28, %v9388_v21  ;;  %v9325_v21 = vor.u32 %v10640_v4, %v9324_v58 }
 0x855   :  { %5010 = vmatpush.bf16.msrb.mxu0 %v16288_v7  ;;  %5023 = vmatpush.bf16.msrb.mxu1 %v16294_v11  ;;  %v19406_v7 = vld [vmem:[#allocation22_spill] sm:$0xff]  ;;  %v19407_v11 = vld [vmem:[#allocation19_spill] sm:$0xff]  ;;  %v17083_v58 = vld [vmem:[%s19015_s1 + $0xa8] sm:$0xff] }
 0x856   :  { %v17089_v4 = vld [vmem:[%s19015_s1 + $0x20] sm:$0xff] }
 0x858   :  { %4998 = vmatpush.bf16.msra.mxu3 %v16306_v22  ;;  %5037 = vmatpush.bf16.msrb.mxu2 %v16324_v0  ;;  %v4929_v22 = vld [vmem:[#allocation1 + $0x24] sm:$0xff]  ;;  %v4931_v0 = vld [vmem:[#allocation1 + $0x36] sm:$0xff] }
 0x859   :  { %5011 = vmatpush.bf16.msrb.mxu0 %v16312_v10  ;;  %5024 = vmatpush.bf16.msrb.mxu1 %v16318_v6  ;;  %v4932_v10 = vld [vmem:[#allocation1 + $0x3f] sm:$0xff]  ;;  %v4930_v6 = vld [vmem:[#allocation1 + $0x2d] sm:$0xff] }
 0x85c   :  { %4999 = vmatpush.bf16.msra.mxu3 %v16330_v36  ;;  %5038 = vmatpush.bf16.msrb.mxu2 %v16348_v20  ;;  %v9273_v36 = vld [vmem:[%s19014_s0 + $0x6b] sm:$0x1]  ;;  %v19411_v20 = vld [vmem:[#allocation23_spill] sm:$0xff] }
 0x85d   :  { %5012 = vmatpush.bf16.msrb.mxu0 %v16336_v24  ;;  %5025 = vmatpush.bf16.msrb.mxu1 %v16342_v32  ;;  %v19409_v24 = vld [vmem:[#allocation24_spill] sm:$0xff]  ;;  %4934 = vst [vmem:[#allocation1] ss:$9 sm:$0xff] %v9273_v36 }
 0x85e   :  { %v19410_v32 = vld [vmem:[#allocation28_spill] sm:$0xff] }
 0x860   :  { %5000 = vmatpush.bf16.msra.mxu3 %v16354_v53  ;;  %5039 = vmatpush.bf16.msrb.mxu2 %v19402_v60  ;;  %v19412_v53 = vld [vmem:[#allocation27_spill] sm:$0xff]  ;;  %v9396_v60 = vld [vmem:[%s19017_s3 + $0xba8] sm:$0xf] }
 0x861   :  { %5013 = vmatpush.bf16.msrb.mxu0 %v19403_v38  ;;  %5026 = vmatpush.bf16.msrb.mxu1 %v19404_v44  ;;  %v9372_v38 = vld [vmem:[%s19017_s3 + $0xb80] sm:$0xf]  ;;  %v10652_v44 = vld [vmem:[%s19017_s3 + $0xb8c] sm:$0xf0] }
 0x862   :  { %4953 = vmatmul.bf16.vlgmr.msrb.gmra.mxu3 %v4925_v5  ;;  %4966 = vmatmul.bf16.vlgmr.msra.gmra.mxu0 %v4926_v63  ;;  %v10658_v5 = vld [vmem:[%s19017_s3 + $0xbc4] sm:$0xf]  ;;  %v9406_v63 = vld [vmem:[%s19017_s3 + $0xbd0] sm:$0xf0] }
 0x863   :  { %4992 = vmatmul.bf16.vlgmr.msra.gmra.mxu2 %v4928_v30  ;;  %4979 = vmatmul.bf16.vlgmr.msra.gmra.mxu1 %v4927_v8  ;;  %v9409_v30 = vor.u32 %v10658_v5, %v9406_v63  ;;  %v10657_v8 = vld [vmem:[%s19017_s3 + $0xbb4] sm:$0xf0]  ;;  %v10642_v63 = vld [vmem:[%s19017_s3 + $0xb44] sm:$0xf] }
 0x864   :  { %5001 = vmatpush.bf16.msra.mxu3 %v19405_v34  ;;  %5040 = vmatpush.bf16.msrb.mxu2 %v19406_v7  ;;  %v4935_v13 = vld [vmem:[#allocation1] sm:$0xff]  ;;  %v9397_v34 = vor.u32 %v10657_v8, %v9396_v60  ;;  %v9373_v7 = vor.u32 %v10652_v44, %v9372_v38  ;;  %v9342_v60 = vld [vmem:[%s19017_s3 + $0xb50] sm:$0xf0]  ;;  %v10641_v44 = vld [vmem:[%s19017_s3 + $0xb34] sm:$0xf0] }
 0x865   :  { %5014 = vmatpush.bf16.msrb.mxu0 %v19407_v11  ;;  %5027 = vmatpush.bf16.msrb.mxu1 %v19408_v12  ;;  %v10655_v11 = vld [vmem:[%s19017_s3 + $0xbac] sm:$0xf]  ;;  %v9398_v12 = vld [vmem:[%s19017_s3 + $0xbb8] sm:$0xf0]  ;;  %v9345_v38 = vor.u32 %v10642_v63, %v9342_v60  ;;  %v17137_v63 = vld [vmem:[%s19015_s1 + $0x10] sm:$0xff] }
 0x866   :  { %v17143_v60 = vld [vmem:[%s19015_s1 + $0xd8] sm:$0xff] }
 0x868   :  { %5002 = vmatpush.bf16.msra.mxu3 %v19409_v24  ;;  %5041 = vmatpush.bf16.msrb.mxu2 %v19410_v32  ;;  %v10653_v24 = vld [vmem:[%s19017_s3 + $0xb94] sm:$0xf0]  ;;  %v9356_v32 = vld [vmem:[%s19017_s3 + $0xb60] sm:$0xf] }
 0x869   :  { %5015 = vmatpush.bf16.msrb.mxu0 %v19411_v20  ;;  %5028 = vmatpush.bf16.msrb.mxu1 %v19412_v53  ;;  %v10648_v20 = vld [vmem:[%s19017_s3 + $0xb6c] sm:$0xf0] }
 0x86c   :  { %5003 = vmatpush.bf16.msra.mxu3 %v19413_v14  ;;  %5042 = vmatpush.bf16.msrb.mxu2 %v19414_v55  ;;  %v9357_v14 = vor.u32 %v10648_v20, %v9356_v32  ;;  %v10651_v55 = vld [vmem:[%s19017_s3 + $0xb8c] sm:$0xf]  ;;  %v10637_v20 = vld [vmem:[%s19017_s3 + $0xb14] sm:$0xf0] }
 0x86d   :  { %5016 = vmatpush.bf16.msrb.mxu0 %v19415_v52  ;;  %5029 = vmatpush.bf16.msrb.mxu1 %v19416_v26  ;;  %v9382_v52 = vld [vmem:[%s19017_s3 + $0xb98] sm:$0xf0] }
 0x86e   :  { %v9385_v26 = vor.u32 %v10651_v55, %v9382_v52  ;;  %v10635_v52 = vld [vmem:[%s19017_s3 + $0xb0c] sm:$0xf] }
 0x870   :  { %5004 = vmatpush.bf16.msra.mxu3 %v19417_v62  ;;  %5043 = vmatpush.bf16.msrb.mxu2 %v19418_v18  ;;  %v10650_v62 = vld [vmem:[%s19017_s3 + $0xb84] sm:$0xf]  ;;  %v9374_v18 = vld [vmem:[%s19017_s3 + $0xb90] sm:$0xf0] }
 0x871   :  { %5017 = vmatpush.bf16.msrb.mxu0 %v19420_v56  ;;  %5030 = vmatpush.bf16.msrb.mxu1 %v19421_v45  ;;  %v9377_v56 = vor.u32 %v10650_v62, %v9374_v18  ;;  %v10649_v45 = vld [vmem:[%s19017_s3 + $0xb74] sm:$0xf0] }
 0x873   :  { %5005 = vmatmul.bf16.vlgmr.msra.gmra.mxu3 %v4929_v22  ;;  %5044 = vmatmul.bf16.vlgmr.msrb.gmra.mxu2 %v4932_v10  ;;  %v9401_v22 = vor.u32 %v10655_v11, %v9398_v12  ;;  %v10654_v10 = vld [vmem:[%s19017_s3 + $0xba4] sm:$0xf] }
 0x874   :  { %5049 = vmatpush.bf16.msrb.mxu3 %v19419_v40  ;;  %5018 = vmatmul.bf16.vlgmr.msrb.gmra.mxu0 %v4930_v6  ;;  %v9390_v6 = vld [vmem:[%s19017_s3 + $0xbb0] sm:$0xf0]  ;;  %v9364_v40 = vld [vmem:[%s19017_s3 + $0xb68] sm:$0xf] }
 0x875   :  { %5031 = vmatmul.bf16.vlgmr.msrb.gmra.mxu1 %v4931_v0  ;;  %5257 = vmatpush.bf16.msra.mxu0 %v9421_v23  ;;  %v9380_v0 = vld [vmem:[%s19017_s3 + $0xb88] sm:$0xf]  ;;  %v9393_v36 = vor.u32 %v10654_v10, %v9390_v6  ;;  %v9365_v37 = vor.u32 %v10649_v45, %v9364_v40  ;;  %v9366_v23 = vld [vmem:[%s19017_s3 + $0xb78] sm:$0xf0]  ;;  %v10634_v40 = vld [vmem:[%s19017_s3 + $0xb04] sm:$0xf] }
 0x876   :  { %5283 = vmatpush.bf16.msra.mxu2 %v9429_v48  ;;  %5270 = vmatpush.bf16.msra.mxu1 %v9425_v25  ;;  %v9381_v53 = vor.u32 %v10653_v24, %v9380_v0  ;;  %v9369_v16 = vor.u32 %v10647_v27, %v9366_v23  ;;  %v9334_v10 = vld [vmem:[%s19017_s3 + $0xb38] sm:$0xf0]  ;;  %v10638_v0 = vld [vmem:[%s19017_s3 + $0xb24] sm:$0xf]  ;;  %v9316_v24 = vld [vmem:[%s19017_s3 + $0xb08] sm:$0xf] }
 0x877   :  { %v9317_v55 = vor.u32 %v10637_v20, %v9316_v24  ;;  %v17045_v27 = vld [vmem:[%s19015_s1 + $0xf8] sm:$0xff]  ;;  %v17205_v20 = vld [vmem:[%s19015_s1 + $0x80] sm:$0xff] }
 0x878   :  { %5050 = vmatpush.bf16.msrb.mxu3 %v19422_v1  ;;  %v9340_v1 = vld [vmem:[%s19017_s3 + $0xb40] sm:$0xf]  ;;  %v17051_v23 = vld [vmem:[%s19015_s1 + $0x78] sm:$0xff] }
 0x879   :  { %5258 = vmatpush.bf16.msra.mxu0 %v9405_v50  ;;  %v10645_v50 = vld [vmem:[%s19017_s3 + $0xb54] sm:$0xf0] }
 0x87a   :  { %5284 = vmatpush.bf16.msra.mxu2 %v9413_v2  ;;  %5271 = vmatpush.bf16.msra.mxu1 %v9409_v30  ;;  %v9349_v25 = vor.u32 %v10645_v50, %v9348_v47  ;;  %v19424_v2 = vld [vmem:[#allocation11_spill] sm:$0xff]  ;;  %v9332_v30 = vld [vmem:[%s19017_s3 + $0xb28] sm:$0xf]  ;;  %v17077_v50 = vld [vmem:[%s19015_s1 + $0x70] sm:$0xff] }
 0x87b   :  { %v9333_v11 = vor.u32 %v10641_v44, %v9332_v30  ;;  %v17161_v44 = vld [vmem:[%s19015_s1 + $0x8] sm:$0xff] }
 0x87c   :  { %5051 = vmatpush.bf16.msrb.mxu3 %v19423_v39  ;;  %v10644_v39 = vld [vmem:[%s19017_s3 + $0xb4c] sm:$0xf0] }
 0x87d   :  { %5259 = vmatpush.bf16.msra.mxu0 %v9389_v35  ;;  %v9341_v48 = vor.u32 %v10644_v39, %v9340_v1 }
 0x87e   :  { %5285 = vmatpush.bf16.msra.mxu2 %v9397_v34  ;;  %5272 = vmatpush.bf16.msra.mxu1 %v9393_v36  ;;  %v9308_v34 = vld [vmem:[%s19017_s3 + $0xb00] sm:$0xf]  ;;  %v9326_v36 = vld [vmem:[%s19017_s3 + $0xb30] sm:$0xf0] }
 0x87f   :  { %v9329_v32 = vor.u32 %v10638_v0, %v9326_v36  ;;  %v17192_v0 = vld [vmem:[%s19015_s1 + $0xc8] sm:$0xff] }
 0x880   :  { %5052 = vmatpush.bf16.msrb.mxu3 %v16799_v41 }
 0x881   :  { %5260 = vmatpush.bf16.msra.mxu0 %v9373_v7  ;;  %v10636_v7 = vld [vmem:[%s19017_s3 + $0xb0c] sm:$0xf0] }
 0x882   :  { %5286 = vmatpush.bf16.msra.mxu2 %v9381_v53  ;;  %5273 = vmatpush.bf16.msra.mxu1 %v9377_v56  ;;  %v9309_v12 = vor.u32 %v10636_v7, %v9308_v34  ;;  %v9310_v56 = vld [vmem:[%s19017_s3 + $0xb10] sm:$0xf0] }
 0x883   :  { %v9313_v1 = vor.u32 %v10634_v40, %v9310_v56  ;;  %v17167_v34 = vld [vmem:[%s19015_s1 + $0xd0] sm:$0xff] }
 0x884   :  { %5053 = vmatpush.bf16.msrb.mxu3 %v16805_v54 }
 0x885   :  { %5261 = vmatpush.bf16.msra.mxu0 %v9357_v14  ;;  %v19426_v14 = vld [vmem:[#allocation14_spill] sm:$0xff] }
 0x886   :  { %5287 = vmatpush.bf16.msra.mxu2 %v9365_v37  ;;  %v19427_v37 = vld [vmem:[#allocation16_spill] sm:$0xff] }
 0x888   :  { %5054 = vmatpush.bf16.msrb.mxu3 %v16811_v46 }
 0x889   :  { %5262 = vmatpush.bf16.msra.mxu0 %v9341_v48  ;;  %v17063_v48 = vld [vmem:[%s19015_s1 + $0x28] sm:$0xff] }
 0x88a   :  { %5288 = vmatpush.bf16.msra.mxu2 %v9349_v25  ;;  %v17101_v25 = vld [vmem:[%s19015_s1 + $0x68] sm:$0xff] }
 0x88c   :  { %5055 = vmatpush.bf16.msrb.mxu3 %v16817_v57 }
 0x88d   :  { %5263 = vmatpush.bf16.msra.mxu0 %v9325_v21  ;;  %v17113_v21 = vld [vmem:[%s19015_s1 + $0x18] sm:$0xff] }
 0x88e   :  { %5289 = vmatpush.bf16.msra.mxu2 %v9333_v11 }
 0x890   :  { %5056 = vmatpush.bf16.msrb.mxu3 %v16823_v59 }
 0x891   :  { %5264 = vmatpush.bf16.msra.mxu0 %v9309_v12 }
 0x892   :  { %5290 = vmatpush.bf16.msra.mxu2 %v9317_v55 }
 0x893   :  { %5057 = vmatmul.bf16.vlgmr.msrb.gmra.mxu3 %v4935_v13 }
 0x894   :  { %5296 = vmatpush.bf16.msra.mxu3 %v9433_v9 }
 0x895   :  { %5338 = vmatpush.bf16.msrb.mxu0 %v19426_v14 }
 0x898   :  { %5297 = vmatpush.bf16.msra.mxu3 %v9417_v33  ;;  %v19425_v33 = vld [vmem:[#allocation13_spill] sm:$0xff] }
 0x899   :  { %5339 = vmatpush.bf16.msrb.mxu0 %v19427_v37 }
 0x89c   :  { %5298 = vmatpush.bf16.msra.mxu3 %v9401_v22  ;;  %v10639_v22 = vld [vmem:[%s19017_s3 + $0xb2c] sm:$0xf] }
 0x89d   :  { %v9337_v6 = vor.u32 %v10639_v22, %v9334_v10  ;;  %5340 = vmatpush.bf16.msrb.mxu0 %v17063_v48  ;;  %v17174_v22 = vld [vmem:[%s19015_s1 + $0x50] sm:$0xff]  ;;  %v17180_v10 = vld [vmem:[%s19015_s1 + $0x88] sm:$0xff] }
 0x8a0   :  { %5299 = vmatpush.bf16.msra.mxu3 %v9385_v26  ;;  %v9318_v26 = vld [vmem:[%s19017_s3 + $0xb18] sm:$0xf0] }
 0x8a1   :  { %v9321_v18 = vor.u32 %v10635_v52, %v9318_v26  ;;  %5341 = vmatpush.bf16.msrb.mxu0 %v17089_v4  ;;  %v17218_v26 = vld [vmem:[%s19015_s1 + $0x40] sm:$0xff] }
 0x8a4   :  { %5300 = vmatpush.bf16.msra.mxu3 %v9369_v16  ;;  %v17069_v16 = vld [vmem:[%s19015_s1 + $0xf0] sm:$0xff] }
 0x8a5   :  { %5342 = vmatpush.bf16.msrb.mxu0 %v17113_v21 }
 0x8a9   :  { %5343 = vmatpush.bf16.msrb.mxu0 %v17137_v63 }
 0x8ad   :  { %5344 = vmatpush.bf16.msrb.mxu0 %v17161_v44 }
 0x8cf   :  { %v4886_v13 = vpop.f32.mrf.mxu0 }
 0x8d0   :  { %v16950_v19 = vadd.f32 %v4886_v13, %v16615_v49  ;;  %v4899_v17 = vpop.f32.mrf.mxu1  ;;  %v9361_v49 = vor.u32 %v10646_v29, %v9358_v61  ;;  %v17038_v13 = vld [vmem:[%s19015_s1 + $0xb8] sm:$0xff]  ;;  %v17057_v29 = vld [vmem:[%s19015_s1 + $0xb0] sm:$0xff] }
 0x8d1   :  { %v16962_v9 = vadd.f32 %v4899_v17, %v16594_v43  ;;  %v9350_v43 = vld [vmem:[%s19017_s3 + $0xb58] sm:$0xf0]  ;;  %5364 = vmatpush.bf16.msrb.mxu2 %v17038_v13 }
 0x8d2   :  { %v9353_v15 = vor.u32 %v10643_v42, %v9350_v43  ;;  %5274 = vmatpush.bf16.msra.mxu1 %v9361_v49  ;;  %v17095_v42 = vld [vmem:[%s19015_s1 + $0xe8] sm:$0xff]  ;;  %v17107_v43 = vld [vmem:[%s19015_s1 + $0xa0] sm:$0xff] }
 0x8d4   :  { %5301 = vmatpush.bf16.msra.mxu3 %v9353_v15 }
 0x8d5   :  { %v4873_v28 = vpop.f32.mrf.mxu3  ;;  %5365 = vmatpush.bf16.msrb.mxu2 %v17057_v29 }
 0x8d6   :  { %v16977_v3 = vadd.f32 %v4873_v28, %v19424_v2  ;;  %v4912_v51 = vpop.f32.mrf.mxu2  ;;  %5275 = vmatpush.bf16.msra.mxu1 %v9345_v38  ;;  %v17119_v28 = vld [vmem:[%s19015_s1 + $0xe0] sm:$0xff]  ;;  %v17155_v38 = vld [vmem:[%s19015_s1 + $0x90] sm:$0xff] }
 0x8d7   :  { %v16980_v35 = vadd.f32 %v4912_v51, %v19425_v33  ;;  %v4888_v5 = vpop.f32.mrf.mxu0  ;;  %v17125_v51 = vld [vmem:[%s19015_s1 + $0x60] sm:$0xff]  ;;  %v17131_v33 = vld [vmem:[%s19015_s1 + $0x98] sm:$0xff] }
 0x8d8   :  { %v4901_v8 = vpop.f32.mrf.mxu1  ;;  %5302 = vmatpush.bf16.msra.mxu3 %v9337_v6 }
 0x8d9   :  { %5366 = vmatpush.bf16.msrb.mxu2 %v17083_v58  ;;  %v17149_v8 = vld [vmem:[%s19015_s1 + $0x58] sm:$0xff] }
 0x8da   :  { %5276 = vmatpush.bf16.msra.mxu1 %v9329_v32  ;;  %v17199_v32 = vld [vmem:[%s19015_s1 + $0x48] sm:$0xff] }
 0x8dc   :  { %5303 = vmatpush.bf16.msra.mxu3 %v9321_v18  ;;  %v9434_v18 = vld [vmem:[%s19014_s0 + $0x6c] sm:$0xff] }
 0x8dd   :  { %v4875_v53 = vpop.f32.mrf.mxu3  ;;  %5367 = vmatpush.bf16.msrb.mxu2 %v17107_v43  ;;  %5317 = vst [vmem:[#allocation1] ss:$9 sm:$0xff] %v9434_v18  ;;  %v17306_v18 = vld [vmem:[%s19015_s1 + $0x1a0] sm:$0xff] }
 0x8de   :  { %v4914_v62 = vpop.f32.mrf.mxu2  ;;  %5277 = vmatpush.bf16.msra.mxu1 %v9313_v1  ;;  %v17211_v53 = vld [vmem:[%s19015_s1 + $0xc0] sm:$0xff] }
 0x8df   :  { %v17031_v45 = vpop.f32.mrf.mxu0 }
 0x8e0   :  { %v17033_v39 = vpop.f32.mrf.mxu1  ;;  %5377 = vmatpush.bf16.msrb.mxu3 %v17045_v27 }
 0x8e1   :  { %5368 = vmatpush.bf16.msrb.mxu2 %v17131_v33 }
 0x8e2   :  { %5351 = vmatpush.bf16.msrb.mxu1 %v17051_v23 }
 0x8e4   :  { %5378 = vmatpush.bf16.msrb.mxu3 %v17069_v16 }
 0x8e5   :  { %v4954_v17 = vpop.f32.mrf.mxu3  ;;  %5369 = vmatpush.bf16.msrb.mxu2 %v17155_v38 }
 0x8e6   :  { %v17072_v61 = vpop.f32.mrf.mxu2  ;;  %5352 = vmatpush.bf16.msrb.mxu1 %v17077_v50  ;;  %v4955_v7 = vadd.f32 %v16736_v31, %v4954_v17  ;;  %v17186_v31 = vld [vmem:[%s19015_s1] sm:$0xff] }
 0x8e7   :  { %v4969_v47 = vpop.f32.mrf.mxu0  ;;  %5345 = vmatpush.bf16.msrb.mxu0 %v17186_v31 }
 0x8e8   :  { %v4982_v49 = vpop.f32.mrf.mxu1  ;;  %5379 = vmatpush.bf16.msrb.mxu3 %v17095_v42  ;;  %v4968_v36 = vadd.f32 %v17031_v45, %v4955_v7  ;;  %v17258_v7 = vld [vmem:[%s19015_s1 + $0x1b0] sm:$0xff] }
 0x8e9   :  { %5370 = vmatpush.bf16.msrb.mxu2 %v17180_v10 }
 0x8ea   :  { %5353 = vmatpush.bf16.msrb.mxu1 %v17101_v25  ;;  %v4981_v14 = vadd.f32 %v17033_v39, %v4968_v36  ;;  %v17282_v36 = vld [vmem:[%s19015_s1 + $0x1a8] sm:$0xff] }
 0x8ec   :  { %5380 = vmatpush.bf16.msrb.mxu3 %v17119_v28  ;;  %v4994_v62 = vadd.f32 %v17072_v61, %v4981_v14  ;;  %v17228_v61 = vld [vmem:[%s19015_s1 + $0x138] sm:$0xff]  ;;  %v17294_v14 = vld [vmem:[%s19015_s1 + $0x168] sm:$0xff] }
 0x8ed   :  { %v4956_v15 = vpop.f32.mrf.mxu3  ;;  %5371 = vmatpush.bf16.msrb.mxu2 %v17205_v20 }
 0x8ee   :  { %v4995_v2 = vpop.f32.mrf.mxu2  ;;  %5354 = vmatpush.bf16.msrb.mxu1 %v17125_v51  ;;  %v17234_v15 = vld [vmem:[%s19015_s1 + $0x1b8] sm:$0xff] }
 0x8ef   :  { %v17240_v2 = vld [vmem:[%s19015_s1 + $0x1f8] sm:$0xff] }
 0x8f0   :  { %5381 = vmatpush.bf16.msrb.mxu3 %v17143_v60 }
 0x8f1   :  { %v5019_v5 = vpop.f32.mrf.mxu0 }
 0x8f2   :  { %v5032_v30 = vpop.f32.mrf.mxu1  ;;  %5355 = vmatpush.bf16.msrb.mxu1 %v17149_v8 }
 0x8f4   :  { %5382 = vmatpush.bf16.msrb.mxu3 %v17167_v34 }
 0x8f6   :  { %v5006_v11 = vpop.f32.mrf.mxu3  ;;  %v5045_v12 = vpop.f32.mrf.mxu2  ;;  %5356 = vmatpush.bf16.msrb.mxu1 %v17174_v22 }
 0x8f7   :  { %v5007_v40 = vadd.f32 %v5006_v11, %v4994_v62  ;;  %v17264_v11 = vld [vmem:[%s19015_s1 + $0x1f0] sm:$0xff]  ;;  %v17300_v62 = vld [vmem:[%s19015_s1 + $0x120] sm:$0xff] }
 0x8f8   :  { %5383 = vmatpush.bf16.msrb.mxu3 %v17192_v0 }
 0x8f9   :  { %v5021_v6 = vpop.f32.mrf.mxu0  ;;  %v5020_v56 = vadd.f32 %v5019_v5, %v5007_v40  ;;  %v17246_v5 = vld [vmem:[%s19015_s1 + $0x178] sm:$0xff] }
 0x8fa   :  { %v5034_v24 = vpop.f32.mrf.mxu1  ;;  %5357 = vmatpush.bf16.msrb.mxu1 %v17199_v32  ;;  %v17276_v6 = vld [vmem:[%s19015_s1 + $0x128] sm:$0xff]  ;;  %v5320_v40 = vld [vmem:[#allocation1 + $0x12] sm:$0xff] }
 0x8fb   :  { %v5033_v45 = vadd.f32 %v5032_v30, %v5020_v56  ;;  %v17252_v30 = vld [vmem:[%s19015_s1 + $0x130] sm:$0xff]  ;;  %v17288_v24 = vld [vmem:[%s19015_s1 + $0x1e8] sm:$0xff]  ;;  %v5321_v56 = vld [vmem:[#allocation1 + $0x1b] sm:$0xff] }
 0x8fc   :  { %5384 = vmatpush.bf16.msrb.mxu3 %v17211_v53 }
 0x8fd   :  { %v5046_v1 = vadd.f32 %v5045_v12, %v5033_v45  ;;  %v17270_v12 = vld [vmem:[%s19015_s1 + $0x170] sm:$0xff]  ;;  %v17312_v45 = vld [vmem:[%s19015_s1 + $0x1e0] sm:$0xff] }
 0x8fe   :  { %v5008_v55 = vpop.f32.mrf.mxu3  ;;  %v5047_v52 = vpop.f32.mrf.mxu2  ;;  %5358 = vmatpush.bf16.msrb.mxu1 %v17218_v26 }
 0x8ff   :  { %v5318_v55 = vld [vmem:[#allocation1] sm:$0xff]  ;;  %v5319_v52 = vld [vmem:[#allocation1 + $0x9] sm:$0xff] }
 0x916   :  { %v5058_v39 = vpop.f32.mrf.mxu3 }
 0x917   :  { %v5059_v37 = vadd.f32 %v5058_v39, %v5046_v1  ;;  %v17318_v1 = vld [vmem:[%s19015_s1 + $0x160] sm:$0xff]  ;;  %v17324_v39 = vld [vmem:[%s19015_s1 + $0x118] sm:$0xff] }
 0x918   :  { %19428 = vst [vmem:[#allocation18_spill] sm:$0xff] %v17324_v39 }
 0x919   :  { %v5062_v17 = vmax.f32 %v5059_v37, 0.0  ;;  %v17330_v37 = vld [vmem:[%s19015_s1 + $0x198] sm:$0xff] }
 0x91a   :  { %19429 = vst [vmem:[#allocation21_spill] sm:$0xff] %v17330_v37 }
 0x91b   :  { %v5063_v47 = vpack.c.bf16 %v5062_v17, %v5062_v17  ;;  %v17336_v17 = vld [vmem:[%s19015_s1 + $0x1d8] sm:$0xff] }
 0x91c   :  { %19430 = vst [vmem:[#allocation17_spill] sm:$0xff] %v17336_v17 }
 0x91d   :  { %5265 = vmatmul.bf16.vlgmr.msra.gmra.mxu0 %v5063_v47  ;;  %5278 = vmatmul.bf16.vlgmr.msra.gmra.mxu1 %v5063_v47 }
 0x91e   :  { %5291 = vmatmul.bf16.vlgmr.msra.gmra.mxu2 %v5063_v47  ;;  %5304 = vmatmul.bf16.vlgmr.msra.gmra.mxu3 %v5063_v47  ;;  %v5060_v49 = vpop.f32.mrf.mxu3  ;;  %v17342_v47 = vld [vmem:[%s19015_s1 + $0x158] sm:$0xff] }
 0x91f   :  { %5390 = vmatpush.bf16.msra.mxu0 %v17228_v61  ;;  %5416 = vmatpush.bf16.msra.mxu2 %v17234_v15  ;;  %19431 = vst [vmem:[#allocation15_spill] sm:$0xff] %v17342_v47  ;;  %v5324_v49 = vld [vmem:[#allocation1 + $0x36] sm:$0xff] }
 0x920   :  { %5429 = vmatpush.bf16.msra.mxu3 %v17240_v2  ;;  %5403 = vmatpush.bf16.msra.mxu1 %v17246_v5 }
 0x923   :  { %5391 = vmatpush.bf16.msra.mxu0 %v17252_v30  ;;  %5417 = vmatpush.bf16.msra.mxu2 %v17258_v7 }
 0x924   :  { %5430 = vmatpush.bf16.msra.mxu3 %v17264_v11  ;;  %5404 = vmatpush.bf16.msra.mxu1 %v17270_v12 }
 0x927   :  { %5392 = vmatpush.bf16.msra.mxu0 %v17276_v6  ;;  %5418 = vmatpush.bf16.msra.mxu2 %v17282_v36 }
 0x928   :  { %5431 = vmatpush.bf16.msra.mxu3 %v17288_v24  ;;  %5405 = vmatpush.bf16.msra.mxu1 %v17294_v14 }
 0x92b   :  { %5393 = vmatpush.bf16.msra.mxu0 %v17300_v62  ;;  %5419 = vmatpush.bf16.msra.mxu2 %v17306_v18 }
 0x92c   :  { %5432 = vmatpush.bf16.msra.mxu3 %v17312_v45  ;;  %5406 = vmatpush.bf16.msra.mxu1 %v17318_v1 }
 0x92d   :  { %5346 = vmatmul.bf16.vlgmr.msrb.gmra.mxu0 %v5318_v55  ;;  %5359 = vmatmul.bf16.vlgmr.msrb.gmra.mxu1 %v5319_v52  ;;  %v5322_v55 = vld [vmem:[#allocation1 + $0x24] sm:$0xff] }
 0x92e   :  { %5372 = vmatmul.bf16.vlgmr.msrb.gmra.mxu2 %v5320_v40  ;;  %5385 = vmatmul.bf16.vlgmr.msrb.gmra.mxu3 %v5321_v56  ;;  %v5325_v52 = vld [vmem:[#allocation1 + $0x3f] sm:$0xff]  ;;  %v5323_v40 = vld [vmem:[#allocation1 + $0x2d] sm:$0xff] }
 0x92f   :  { %5394 = vmatpush.bf16.msra.mxu0 %v17324_v39  ;;  %5420 = vmatpush.bf16.msra.mxu2 %v17330_v37  ;;  %v9435_v56 = vld [vmem:[%s19014_s0 + $0x74] sm:$0x1] }
 0x930   :  { %5433 = vmatpush.bf16.msra.mxu3 %v17336_v17  ;;  %5407 = vmatpush.bf16.msra.mxu1 %v17342_v47  ;;  %v17351_v37 = vld [vmem:[%s19015_s1 + $0x110] sm:$0xff]  ;;  %5327 = vst [vmem:[#allocation1] ss:$9 sm:$0xff] %v9435_v56  ;;  %v17381_v56 = vld [vmem:[%s19015_s1 + $0x188] sm:$0xff] }
 0x931   :  { %19432 = vst [vmem:[#allocation26_spill] sm:$0xff] %v17351_v37  ;;  %v17357_v17 = vld [vmem:[%s19015_s1 + $0x190] sm:$0xff] }
 0x932   :  { %19433 = vst [vmem:[#allocation22_spill] sm:$0xff] %v17357_v17  ;;  %v17363_v47 = vld [vmem:[%s19015_s1 + $0x1d0] sm:$0xff] }
 0x933   :  { %5395 = vmatpush.bf16.msra.mxu0 %v17351_v37  ;;  %5421 = vmatpush.bf16.msra.mxu2 %v17357_v17  ;;  %19434 = vst [vmem:[#allocation19_spill] sm:$0xff] %v17363_v47  ;;  %v17369_v39 = vld [vmem:[%s19015_s1 + $0x150] sm:$0xff]  ;;  %v17375_v37 = vld [vmem:[%s19015_s1 + $0x108] sm:$0xff] }
 0x934   :  { %5434 = vmatpush.bf16.msra.mxu3 %v17363_v47  ;;  %19435 = vst [vmem:[#allocation20_spill] sm:$0xff] %v17369_v39  ;;  %5408 = vmatpush.bf16.msra.mxu1 %v17369_v39  ;;  %v17387_v47 = vld [vmem:[%s19015_s1 + $0x1c8] sm:$0xff] }
 0x935   :  { %19436 = vst [vmem:[#allocation24_spill] sm:$0xff] %v17375_v37  ;;  %v17393_v17 = vld [vmem:[%s19015_s1 + $0x148] sm:$0xff] }
 0x936   :  { %19437 = vst [vmem:[#allocation28_spill] sm:$0xff] %v17381_v56 }
 0x937   :  { %5396 = vmatpush.bf16.msra.mxu0 %v17375_v37  ;;  %5422 = vmatpush.bf16.msra.mxu2 %v17381_v56  ;;  %19438 = vst [vmem:[#allocation23_spill] sm:$0xff] %v17387_v47  ;;  %v17399_v37 = vld [vmem:[%s19015_s1 + $0x100] sm:$0xff] }
 0x938   :  { %5435 = vmatpush.bf16.msra.mxu3 %v17387_v47  ;;  %19439 = vst [vmem:[#allocation27_spill] sm:$0xff] %v17393_v17  ;;  %5409 = vmatpush.bf16.msra.mxu1 %v17393_v17  ;;  %v17405_v56 = vld [vmem:[%s19015_s1 + $0x180] sm:$0xff]  ;;  %v17411_v47 = vld [vmem:[%s19015_s1 + $0x238] sm:$0xff] }
 0x939   :  { %19440 = vst [vmem:[#allocation25_spill] sm:$0xff] %v17399_v37  ;;  %v17417_v17 = vld [vmem:[%s19015_s1 + $0x1c0] sm:$0xff] }
 0x93a   :  { %19441 = vst [vmem:[#allocation5_spill] sm:$0xff] %v17405_v56 }
 0x93b   :  { %5397 = vmatpush.bf16.msra.mxu0 %v17399_v37  ;;  %5423 = vmatpush.bf16.msra.mxu2 %v17405_v56  ;;  %19442 = vst [vmem:[#allocation29_spill] sm:$0xff] %v17411_v47  ;;  %v17423_v37 = vld [vmem:[%s19015_s1 + $0x140] sm:$0xff]  ;;  %v17429_v56 = vld [vmem:[%s19015_s1 + $0x230] sm:$0xff] }
 0x93c   :  { %19443 = vst [vmem:[#allocation30_spill] sm:$0xff] %v17417_v17  ;;  %5436 = vmatpush.bf16.msra.mxu3 %v17417_v17  ;;  %5410 = vmatpush.bf16.msra.mxu1 %v17423_v37  ;;  %v17435_v17 = vld [vmem:[%s19015_s1 + $0x228] sm:$0xff] }
 0x93d   :  { %19444 = vst [vmem:[#allocation31_spill] sm:$0xff] %v17423_v37  ;;  %v9542_v37 = vld [vmem:[%s19017_s3 + $0xc88] sm:$0xf] }
 0x93e   :  { %5424 = vmatmul.bf16.vlgmr.msra.gmra.mxu2 %v5324_v49  ;;  %5398 = vmatmul.bf16.vlgmr.msra.gmra.mxu0 %v5322_v55  ;;  %19445 = vst [vmem:[#allocation9_spill] sm:$0xff] %v17429_v56  ;;  %v5328_v49 = vld [vmem:[#allocation1] sm:$0xff] }
 0x93f   :  { %5442 = vmatpush.bf16.msrb.mxu0 %v17411_v47  ;;  %5437 = vmatmul.bf16.vlgmr.msra.gmra.mxu3 %v5325_v52  ;;  %19446 = vst [vmem:[#allocation10_spill] sm:$0xff] %v17435_v17  ;;  %v9582_v55 = vld [vmem:[%s19017_s3 + $0xce0] sm:$0xf]  ;;  %v10696_v52 = vld [vmem:[%s19017_s3 + $0xcec] sm:$0xf0] }
 0x940   :  { %5411 = vmatmul.bf16.vlgmr.msra.gmra.mxu1 %v5323_v40  ;;  %v9592_v47 = vld [vmem:[%s19017_s3 + $0xcf8] sm:$0xf0] }
 0x943   :  { %5443 = vmatpush.bf16.msrb.mxu0 %v17429_v56  ;;  %v10690_v56 = vld [vmem:[%s19017_s3 + $0xcc4] sm:$0xf] }
 0x947   :  { %5444 = vmatpush.bf16.msrb.mxu0 %v17435_v17  ;;  %v9566_v17 = vld [vmem:[%s19017_s3 + $0xcc0] sm:$0xf] }
 0x94b   :  { %5445 = vmatpush.bf16.msrb.mxu0 %v16799_v41  ;;  %v10694_v41 = vld [vmem:[%s19017_s3 + $0xce4] sm:$0xf] }
 0x94f   :  { %5446 = vmatpush.bf16.msrb.mxu0 %v16805_v54  ;;  %v9583_v54 = vor.u32 %v10696_v52, %v9582_v55  ;;  %v10692_v55 = vld [vmem:[%s19017_s3 + $0xccc] sm:$0xf0] }
 0x950   :  { %v9567_v52 = vor.u32 %v10692_v55, %v9566_v17  ;;  %v10693_v17 = vld [vmem:[%s19017_s3 + $0xcd4] sm:$0xf0] }
 0x951   :  { %5650 = vmatpush.bf16.msrb.mxu1 %v9583_v54  ;;  %v9550_v54 = vld [vmem:[%s19017_s3 + $0xca0] sm:$0xf] }
 0x953   :  { %5447 = vmatpush.bf16.msrb.mxu0 %v16811_v46  ;;  %v9584_v46 = vld [vmem:[%s19017_s3 + $0xcf0] sm:$0xf0] }
 0x954   :  { %v9587_v40 = vor.u32 %v10694_v41, %v9584_v46  ;;  %v9568_v41 = vld [vmem:[%s19017_s3 + $0xcd0] sm:$0xf0] }
 0x955   :  { %v9571_v46 = vor.u32 %v10690_v56, %v9568_v41  ;;  %5651 = vmatpush.bf16.msrb.mxu1 %v9567_v52  ;;  %v10686_v56 = vld [vmem:[%s19017_s3 + $0xca4] sm:$0xf]  ;;  %v9558_v41 = vld [vmem:[%s19017_s3 + $0xca8] sm:$0xf] }
 0x956   :  { %5663 = vmatpush.bf16.msrb.mxu2 %v9587_v40  ;;  %v10688_v40 = vld [vmem:[%s19017_s3 + $0xcac] sm:$0xf0] }
 0x957   :  { %5448 = vmatpush.bf16.msrb.mxu0 %v16817_v57  ;;  %v9590_v57 = vld [vmem:[%s19017_s3 + $0xce8] sm:$0xf]  ;;  %v9551_v55 = vor.u32 %v10688_v40, %v9550_v54  ;;  %v9534_v54 = vld [vmem:[%s19017_s3 + $0xc80] sm:$0xf]  ;;  %v10684_v40 = vld [vmem:[%s19017_s3 + $0xc8c] sm:$0xf0] }
 0x959   :  { %5652 = vmatpush.bf16.msrb.mxu1 %v9551_v55  ;;  %v10691_v55 = vld [vmem:[%s19017_s3 + $0xccc] sm:$0xf] }
 0x95a   :  { %5664 = vmatpush.bf16.msrb.mxu2 %v9571_v46  ;;  %v10689_v46 = vld [vmem:[%s19017_s3 + $0xcb4] sm:$0xf0] }
 0x95b   :  { %5449 = vmatpush.bf16.msrb.mxu0 %v16823_v59  ;;  %v10697_v59 = vld [vmem:[%s19017_s3 + $0xcf4] sm:$0xf0] }
 0x95e   :  { %5450 = vmatmul.bf16.vlgmr.msrb.gmra.mxu0 %v5328_v49  ;;  %v9591_v49 = vor.u32 %v10697_v59, %v9590_v57  ;;  %v9574_v57 = vld [vmem:[%s19017_s3 + $0xcc8] sm:$0xf] }
 0x95f   :  { %v9575_v59 = vor.u32 %v10693_v17, %v9574_v57  ;;  %v10695_v57 = vld [vmem:[%s19017_s3 + $0xcec] sm:$0xf]  ;;  %v9559_v17 = vor.u32 %v10689_v46, %v9558_v41  ;;  %v9536_v41 = vld [vmem:[%s19017_s3 + $0xc90] sm:$0xf0] }
 0x960   :  { %5676 = vmatpush.bf16.msrb.mxu3 %v9591_v49  ;;  %v9552_v49 = vld [vmem:[%s19017_s3 + $0xcb0] sm:$0xf0] }
 0x961   :  { %v9555_v52 = vor.u32 %v10686_v56, %v9552_v49  ;;  %v9595_v56 = vor.u32 %v10695_v57, %v9592_v47  ;;  %v9535_v49 = vor.u32 %v10684_v40, %v9534_v54  ;;  %v10685_v47 = vld [vmem:[%s19017_s3 + $0xc94] sm:$0xf0]  ;;  %v10680_v54 = vld [vmem:[%s19017_s3 + $0xc6c] sm:$0xf0] }
 0x962   :  { %v9543_v57 = vor.u32 %v10685_v47, %v9542_v37  ;;  %v9520_v37 = vld [vmem:[%s19017_s3 + $0xc70] sm:$0xf0]  ;;  %v10687_v47 = vld [vmem:[%s19017_s3 + $0xcac] sm:$0xf] }
 0x963   :  { %5665 = vmatpush.bf16.msrb.mxu2 %v9555_v52  ;;  %5689 = vmatpush.bf16.msra.mxu0 %v9595_v56  ;;  %v9576_v52 = vld [vmem:[%s19017_s3 + $0xcd8] sm:$0xf0] }
 0x964   :  { %5677 = vmatpush.bf16.msrb.mxu3 %v9575_v59  ;;  %v10682_v59 = vld [vmem:[%s19017_s3 + $0xc84] sm:$0xf]  ;;  %5653 = vmatpush.bf16.msrb.mxu1 %v9535_v49  ;;  %v9579_v40 = vor.u32 %v10691_v55, %v9576_v52  ;;  %v9502_v52 = vld [vmem:[%s19017_s3 + $0xc40] sm:$0xf] }
 0x965   :  { %v9539_v46 = vor.u32 %v10682_v59, %v9536_v41  ;;  %v10678_v49 = vld [vmem:[%s19017_s3 + $0xc64] sm:$0xf]  ;;  %v9526_v41 = vld [vmem:[%s19017_s3 + $0xc68] sm:$0xf] }
 0x966   :  { %v9523_v59 = vor.u32 %v10678_v49, %v9520_v37 }
 0x967   :  { %5666 = vmatpush.bf16.msrb.mxu2 %v9539_v46  ;;  %v10681_v46 = vld [vmem:[%s19017_s3 + $0xc74] sm:$0xf0]  ;;  %5690 = vmatpush.bf16.msra.mxu0 %v9579_v40  ;;  %v10674_v40 = vld [vmem:[%s19017_s3 + $0xc44] sm:$0xf] }
 0x968   :  { %5678 = vmatpush.bf16.msrb.mxu3 %v9559_v17  ;;  %v9518_v17 = vld [vmem:[%s19017_s3 + $0xc60] sm:$0xf]  ;;  %v9527_v55 = vor.u32 %v10681_v46, %v9526_v41  ;;  %v9510_v41 = vld [vmem:[%s19017_s3 + $0xc48] sm:$0xf]  ;;  %v10683_v46 = vld [vmem:[%s19017_s3 + $0xc8c] sm:$0xf] }
 0x969   :  { %v9519_v56 = vor.u32 %v10680_v54, %v9518_v17  ;;  %v10676_v17 = vld [vmem:[%s19017_s3 + $0xc4c] sm:$0xf0] }
 0x96a   :  { %v9503_v49 = vor.u32 %v10676_v17, %v9502_v52  ;;  %v9486_v17 = vld [vmem:[%s19017_s3 + $0xc20] sm:$0xf] }
 0x96b   :  { %5654 = vmatpush.bf16.msrb.mxu1 %v9519_v56  ;;  %5667 = vmatpush.bf16.msrb.mxu2 %v9523_v59  ;;  %v9504_v56 = vld [vmem:[%s19017_s3 + $0xc50] sm:$0xf0]  ;;  %v10677_v59 = vld [vmem:[%s19017_s3 + $0xc54] sm:$0xf0] }
 0x96c   :  { %5679 = vmatpush.bf16.msrb.mxu3 %v9543_v57  ;;  %v9560_v57 = vld [vmem:[%s19017_s3 + $0xcb8] sm:$0xf0]  ;;  %v9507_v37 = vor.u32 %v10674_v40, %v9504_v56  ;;  %v9511_v52 = vor.u32 %v10677_v59, %v9510_v41  ;;  %v10670_v41 = vld [vmem:[%s19017_s3 + $0xc24] sm:$0xf]  ;;  %v9488_v59 = vld [vmem:[%s19017_s3 + $0xc30] sm:$0xf0] }
 0x96d   :  { %v9563_v54 = vor.u32 %v10687_v47, %v9560_v57  ;;  %v9491_v39 = vor.u32 %v10670_v41, %v9488_v59 }
 0x96f   :  { %5691 = vmatpush.bf16.msra.mxu0 %v9563_v54  ;;  %5655 = vmatpush.bf16.msrb.mxu1 %v9503_v49  ;;  %v10672_v54 = vld [vmem:[%s19017_s3 + $0xc2c] sm:$0xf0] }
 0x970   :  { %5680 = vmatpush.bf16.msrb.mxu3 %v9527_v55  ;;  %5668 = vmatpush.bf16.msrb.mxu2 %v9507_v37  ;;  %v9544_v55 = vld [vmem:[%s19017_s3 + $0xc98] sm:$0xf0]  ;;  %v9487_v37 = vor.u32 %v10672_v54, %v9486_v17 }
 0x971   :  { %v9547_v56 = vor.u32 %v10683_v46, %v9544_v55  ;;  %v10679_v46 = vld [vmem:[%s19017_s3 + $0xc6c] sm:$0xf]  ;;  %v10668_v55 = vld [vmem:[%s19017_s3 + $0xc0c] sm:$0xf0] }
 0x973   :  { %5692 = vmatpush.bf16.msra.mxu0 %v9547_v56  ;;  %5656 = vmatpush.bf16.msrb.mxu1 %v9487_v37  ;;  %v10666_v56 = vld [vmem:[%s19017_s3 + $0xc04] sm:$0xf]  ;;  %v9472_v37 = vld [vmem:[%s19017_s3 + $0xc10] sm:$0xf0] }
 0x974   :  { %5681 = vmatpush.bf16.msrb.mxu3 %v9511_v52  ;;  %v9470_v52 = vld [vmem:[%s19017_s3 + $0xc00] sm:$0xf]  ;;  %5669 = vmatpush.bf16.msrb.mxu2 %v9491_v39  ;;  %v9475_v41 = vor.u32 %v10666_v56, %v9472_v37  ;;  %v9478_v39 = vld [vmem:[%s19017_s3 + $0xc08] sm:$0xf]  ;;  %v9512_v56 = vld [vmem:[%s19017_s3 + $0xc58] sm:$0xf0] }
 0x975   :  { %v9471_v54 = vor.u32 %v10668_v55, %v9470_v52  ;;  %v9496_v37 = vld [vmem:[%s19017_s3 + $0xc38] sm:$0xf0] }
 0x977   :  { %5657 = vmatpush.bf16.msrb.mxu1 %v9471_v54 }
 0x978   :  { %5670 = vmatpush.bf16.msrb.mxu2 %v9475_v41 }
 0x97c   :  { %5744 = vmatpush.bf16.msra.mxu2 %v17051_v23  ;;  %v10667_v23 = vld [vmem:[%s19017_s3 + $0xc0c] sm:$0xf] }
 0x980   :  { %5745 = vmatpush.bf16.msra.mxu2 %v17077_v50 }
 0x984   :  { %5746 = vmatpush.bf16.msra.mxu2 %v17101_v25 }
 0x988   :  { %5747 = vmatpush.bf16.msra.mxu2 %v17125_v51 }
 0x98c   :  { %5748 = vmatpush.bf16.msra.mxu2 %v17149_v8 }
 0x990   :  { %5749 = vmatpush.bf16.msra.mxu2 %v17174_v22 }
 0x994   :  { %5750 = vmatpush.bf16.msra.mxu2 %v17199_v32 }
 0x998   :  { %5751 = vmatpush.bf16.msra.mxu2 %v17218_v26 }
 0x99a   :  { %v5266_v47 = vpop.f32.mrf.mxu0  ;;  %v5279_v57 = vpop.f32.mrf.mxu1 }
 0x99b   :  { %v17582_v49 = vadd.f32 %v5266_v47, %v16977_v3  ;;  %v17585_v40 = vadd.f32 %v5279_v57, %v16950_v19  ;;  %v9494_v3 = vld [vmem:[%s19017_s3 + $0xc28] sm:$0xf]  ;;  %v10673_v19 = vld [vmem:[%s19017_s3 + $0xc34] sm:$0xf0]  ;;  %v9528_v57 = vld [vmem:[%s19017_s3 + $0xc78] sm:$0xf0] }
 0x99c   :  { %v9495_v47 = vor.u32 %v10673_v19, %v9494_v3  ;;  %v9531_v17 = vor.u32 %v10679_v46, %v9528_v57  ;;  %v10669_v19 = vld [vmem:[%s19017_s3 + $0xc14] sm:$0xf0]  ;;  %v10675_v46 = vld [vmem:[%s19017_s3 + $0xc4c] sm:$0xf] }
 0x99d   :  { %v9479_v54 = vor.u32 %v10669_v19, %v9478_v39 }
 0x99e   :  { %5682 = vmatpush.bf16.msrb.mxu3 %v9495_v47  ;;  %5693 = vmatpush.bf16.msra.mxu0 %v9531_v17  ;;  %v17635_v17 = vld [vmem:[%s19015_s1 + $0x38] sm:$0xff] }
 0x99f   :  { %5731 = vmatpush.bf16.msra.mxu1 %v17635_v17 }
 0x9a1   :  { %v5292_v59 = vpop.f32.mrf.mxu2  ;;  %v5305_v3 = vpop.f32.mrf.mxu3 }
 0x9a2   :  { %v17627_v57 = vadd.f32 %v5292_v59, %v16962_v9  ;;  %v17630_v47 = vadd.f32 %v5305_v3, %v16980_v35  ;;  %v5268_v52 = vpop.f32.mrf.mxu0  ;;  %v5281_v55 = vpop.f32.mrf.mxu1  ;;  %v9515_v9 = vor.u32 %v10675_v46, %v9512_v56  ;;  %5683 = vmatpush.bf16.msrb.mxu3 %v9479_v54  ;;  %v10671_v35 = vld [vmem:[%s19017_s3 + $0xc2c] sm:$0xf]  ;;  %v17652_v59 = vld [vmem:[%s19015_s1 + $0x30] sm:$0xff]  ;;  %v9480_v3 = vld [vmem:[%s19017_s3 + $0xc18] sm:$0xf0] }
 0x9a3   :  { %v9499_v41 = vor.u32 %v10671_v35, %v9496_v37  ;;  %5732 = vmatpush.bf16.msra.mxu1 %v17652_v59  ;;  %v9483_v19 = vor.u32 %v10667_v23, %v9480_v3  ;;  %v19455_v56 = vld [vmem:[#allocation24_spill] sm:$0xff]  ;;  %v19458_v37 = vld [vmem:[#allocation23_spill] sm:$0xff]  ;;  %v19461_v3 = vld [vmem:[#allocation29_spill] sm:$0xff] }
 0x9a4   :  { %5694 = vmatpush.bf16.msra.mxu0 %v9515_v9  ;;  %v19456_v9 = vld [vmem:[#allocation27_spill] sm:$0xff]  ;;  %v19457_v35 = vld [vmem:[#allocation28_spill] sm:$0xff] }
 0x9a5   :  { %v19460_v23 = vld [vmem:[#allocation31_spill] sm:$0xff] }
 0x9a6   :  { %5757 = vmatpush.bf16.msra.mxu3 %v17038_v13 }
 0x9a7   :  { %5733 = vmatpush.bf16.msra.mxu1 %v17063_v48 }
 0x9a8   :  { %5695 = vmatpush.bf16.msra.mxu0 %v9499_v41  ;;  %v19459_v41 = vld [vmem:[#allocation25_spill] sm:$0xff] }
 0x9a9   :  { %v5294_v39 = vpop.f32.mrf.mxu2  ;;  %v5307_v13 = vpop.f32.mrf.mxu3 }
 0x9aa   :  { %5758 = vmatpush.bf16.msra.mxu3 %v17057_v29  ;;  %v5347_v46 = vpop.f32.mrf.mxu0  ;;  %v5360_v52 = vpop.f32.mrf.mxu1  ;;  %v19462_v39 = vld [vmem:[#allocation5_spill] sm:$0xff]  ;;  %v19463_v13 = vld [vmem:[#allocation30_spill] sm:$0xff] }
 0x9ab   :  { %5734 = vmatpush.bf16.msra.mxu1 %v17089_v4 }
 0x9ac   :  { %5696 = vmatpush.bf16.msra.mxu0 %v9483_v19  ;;  %v19464_v19 = vld [vmem:[#allocation9_spill] sm:$0xff] }
 0x9ae   :  { %5759 = vmatpush.bf16.msra.mxu3 %v17083_v58 }
 0x9af   :  { %5735 = vmatpush.bf16.msra.mxu1 %v17113_v21 }
 0x9b0   :  { %5770 = vmatpush.bf16.msrb.mxu0 %v17045_v27 }
 0x9b1   :  { %v5373_v50 = vpop.f32.mrf.mxu2  ;;  %v5386_v55 = vpop.f32.mrf.mxu3 }
 0x9b2   :  { %5760 = vmatpush.bf16.msra.mxu3 %v17107_v43  ;;  %v5349_v29 = vpop.f32.mrf.mxu0  ;;  %v5362_v54 = vpop.f32.mrf.mxu1 }
 0x9b3   :  { %5736 = vmatpush.bf16.msra.mxu1 %v17137_v63  ;;  %v17757_v29 = vld [vmem:[%s19015_s1 + $0x208] sm:$0xff]  ;;  %v17763_v54 = vld [vmem:[%s19015_s1 + $0x200] sm:$0xff] }
 0x9b4   :  { %5771 = vmatpush.bf16.msrb.mxu0 %v17069_v16  ;;  %v17683_v16 = vld [vmem:[%s19016_s2] ss:$0 sm:$0xff] }
 0x9b5   :  { %v5348_v58 = vadd.f32 %v17683_v16, %v5347_v46  ;;  %v19465_v46 = vld [vmem:[#allocation10_spill] sm:$0xff] }
 0x9b6   :  { %5761 = vmatpush.bf16.msra.mxu3 %v17131_v33 }
 0x9b7   :  { %5737 = vmatpush.bf16.msra.mxu1 %v17161_v44  ;;  %v5361_v25 = vadd.f32 %v5360_v52, %v5348_v58  ;;  %v17739_v52 = vld [vmem:[%s19015_s1 + $0x220] sm:$0xff]  ;;  %v10728_v58 = vld [vmem:[%s19017_s3 + $0xdec] sm:$0xf0] }
 0x9b8   :  { %5772 = vmatpush.bf16.msrb.mxu0 %v17095_v42 }
 0x9b9   :  { %v5375_v27 = vpop.f32.mrf.mxu2  ;;  %v5388_v48 = vpop.f32.mrf.mxu3 }
 0x9ba   :  { %5762 = vmatpush.bf16.msra.mxu3 %v17155_v38  ;;  %v9744_v48 = vld [vmem:[%s19017_s3 + $0xde0] sm:$0xf] }
 0x9bb   :  { %v5399_v4 = vpop.f32.mrf.mxu0  ;;  %5738 = vmatpush.bf16.msra.mxu1 %v17186_v31 }
 0x9bc   :  { %5773 = vmatpush.bf16.msrb.mxu0 %v17119_v28  ;;  %v5374_v28 = vadd.f32 %v5373_v50, %v5361_v25  ;;  %v17745_v50 = vld [vmem:[%s19015_s1 + $0x218] sm:$0xff]  ;;  %v10724_v25 = vld [vmem:[%s19017_s3 + $0xdcc] sm:$0xf0] }
 0x9bd   :  { %v5412_v42 = vpop.f32.mrf.mxu1 }
 0x9be   :  { %5763 = vmatpush.bf16.msra.mxu3 %v17180_v10  ;;  %v5387_v63 = vadd.f32 %v5386_v55, %v5374_v28  ;;  %v17751_v55 = vld [vmem:[%s19015_s1 + $0x210] sm:$0xff] }
 0x9bf   :  { %v9746_v28 = vld [vmem:[%s19017_s3 + $0xdf0] sm:$0xf0] }
 0x9c0   :  { %5774 = vmatpush.bf16.msrb.mxu0 %v17143_v60  ;;  %v9596_v60 = vld [vmem:[%s19014_s0 + $0x75] sm:$0xff]  ;;  %v5400_v44 = vadd.f32 %v5399_v4, %v5387_v63  ;;  %v9745_v4 = vor.u32 %v10728_v58, %v9744_v48  ;;  %v10720_v63 = vld [vmem:[%s19017_s3 + $0xdac] sm:$0xf0] }
 0x9c1   :  { %v5425_v43 = vpop.f32.mrf.mxu2  ;;  %5710 = vst [vmem:[#allocation1] ss:$9 sm:$0xff] %v9596_v60 }
 0x9c2   :  { %5764 = vmatpush.bf16.msra.mxu3 %v17205_v20  ;;  %v5438_v21 = vpop.f32.mrf.mxu3  ;;  %v5413_v22 = vadd.f32 %v5412_v42, %v5400_v44  ;;  %v9728_v42 = vld [vmem:[%s19017_s3 + $0xdc0] sm:$0xf] }
 0x9c3   :  { %v5401_v51 = vpop.f32.mrf.mxu0  ;;  %v9696_v44 = vld [vmem:[%s19017_s3 + $0xd80] sm:$0xf] }
 0x9c4   :  { %5775 = vmatpush.bf16.msrb.mxu0 %v17167_v34  ;;  %v5426_v10 = vadd.f32 %v5425_v43, %v5413_v22  ;;  %v9729_v43 = vor.u32 %v10724_v25, %v9728_v42  ;;  %v9712_v51 = vld [vmem:[%s19017_s3 + $0xda0] sm:$0xf]  ;;  %v9722_v42 = vld [vmem:[%s19017_s3 + $0xdb8] sm:$0xf0] }
 0x9c5   :  { %v5414_v33 = vpop.f32.mrf.mxu1  ;;  %v9713_v60 = vor.u32 %v10720_v63, %v9712_v51  ;;  %v10700_v63 = vld [vmem:[%s19017_s3 + $0xd0c] sm:$0xf0] }
 0x9c6   :  { %v5439_v31 = vadd.f32 %v5438_v21, %v5426_v10  ;;  %v10726_v21 = vld [vmem:[%s19017_s3 + $0xde4] sm:$0xf]  ;;  %v10716_v10 = vld [vmem:[%s19017_s3 + $0xd8c] sm:$0xf0] }
 0x9c7   :  { %v9749_v33 = vor.u32 %v10726_v21, %v9746_v28  ;;  %v9666_v21 = vld [vmem:[%s19017_s3 + $0xd50] sm:$0xf0]  ;;  %v9704_v28 = vld [vmem:[%s19017_s3 + $0xd88] sm:$0xf] }
 0x9c8   :  { %5776 = vmatpush.bf16.msrb.mxu0 %v17192_v0 }
 0x9c9   :  { %v5427_v8 = vpop.f32.mrf.mxu2 }
 0x9ca   :  { %v5440_v38 = vpop.f32.mrf.mxu3  ;;  %v10722_v8 = vld [vmem:[%s19017_s3 + $0xdc4] sm:$0xf] }
 0x9cb   :  { %v9730_v38 = vld [vmem:[%s19017_s3 + $0xdd0] sm:$0xf0] }
 0x9cc   :  { %5777 = vmatpush.bf16.msrb.mxu0 %v17211_v53  ;;  %v5712_v53 = vld [vmem:[#allocation1 + $0x9] sm:$0xff]  ;;  %v9733_v22 = vor.u32 %v10722_v8, %v9730_v38 }
 0x9cd   :  { %v10715_v38 = vld [vmem:[%s19017_s3 + $0xd8c] sm:$0xf] }
 0x9db   :  { %v5451_v34 = vpop.f32.mrf.mxu0 }
 0x9dc   :  { %v5452_v32 = vadd.f32 %v5451_v34, %v5439_v31  ;;  %v9697_v31 = vor.u32 %v10716_v10, %v9696_v44  ;;  %v10718_v34 = vld [vmem:[%s19017_s3 + $0xda4] sm:$0xf]  ;;  %v9706_v44 = vld [vmem:[%s19017_s3 + $0xd98] sm:$0xf0] }
 0x9dd   :  { %v9709_v10 = vor.u32 %v10715_v38, %v9706_v44  ;;  %v18031_v38 = vld [vmem:[%s19015_s1 + $0xb0] sm:$0xff] }
 0x9de   :  { %v5455_v20 = vmax.f32 %v5452_v32, 0.0  ;;  %v9714_v32 = vld [vmem:[%s19017_s3 + $0xdb0] sm:$0xf0] }
 0x9df   :  { %v18037_v44 = vld [vmem:[%s19015_s1 + $0x10] sm:$0xff] }
 0x9e0   :  { %v5456_v26 = vpack.c.bf16 %v5455_v20, %v5455_v20  ;;  %v9752_v20 = vld [vmem:[%s19017_s3 + $0xde8] sm:$0xf] }
 0x9e2   :  { %5658 = vmatmul.bf16.vlgmr.msrb.gmra.mxu1 %v5456_v26  ;;  %5671 = vmatmul.bf16.vlgmr.msrb.gmra.mxu2 %v5456_v26 }
 0x9e3   :  { %5684 = vmatmul.bf16.vlgmr.msrb.gmra.mxu3 %v5456_v26  ;;  %5697 = vmatmul.bf16.vlgmr.msra.gmra.mxu0 %v5456_v26  ;;  %v5453_v0 = vpop.f32.mrf.mxu0  ;;  %v9717_v26 = vor.u32 %v10718_v34, %v9714_v32  ;;  %v10702_v32 = vld [vmem:[%s19017_s3 + $0xd24] sm:$0xf] }
 0x9e4   :  { %5783 = vmatpush.bf16.msrb.mxu1 %v17228_v61  ;;  %5796 = vmatpush.bf16.msrb.mxu2 %v17246_v5  ;;  %v5711_v61 = vld [vmem:[#allocation1] sm:$0xff]  ;;  %v19447_v5 = vld [vmem:[#allocation18_spill] sm:$0xff] }
 0x9e5   :  { %5809 = vmatpush.bf16.msrb.mxu3 %v17234_v15  ;;  %5822 = vmatpush.bf16.msra.mxu0 %v17240_v2  ;;  %v5713_v15 = vld [vmem:[#allocation1 + $0x12] sm:$0xff]  ;;  %v5714_v2 = vld [vmem:[#allocation1 + $0x1b] sm:$0xff] }
 0x9e6   :  { %v10729_v0 = vld [vmem:[%s19017_s3 + $0xdf4] sm:$0xf0] }
 0x9e8   :  { %5784 = vmatpush.bf16.msrb.mxu1 %v17252_v30  ;;  %5797 = vmatpush.bf16.msrb.mxu2 %v17270_v12  ;;  %v19448_v30 = vld [vmem:[#allocation15_spill] sm:$0xff]  ;;  %v5716_v12 = vld [vmem:[#allocation1 + $0x2d] sm:$0xff] }
 0x9e9   :  { %5810 = vmatpush.bf16.msrb.mxu3 %v17258_v7  ;;  %5823 = vmatpush.bf16.msra.mxu0 %v17264_v11  ;;  %v19449_v7 = vld [vmem:[#allocation21_spill] sm:$0xff] }
 0x9ea   :  { %v19450_v11 = vld [vmem:[#allocation17_spill] sm:$0xff] }
 0x9ec   :  { %5785 = vmatpush.bf16.msrb.mxu1 %v17276_v6  ;;  %5798 = vmatpush.bf16.msrb.mxu2 %v17294_v14  ;;  %v5717_v6 = vld [vmem:[#allocation1 + $0x36] sm:$0xff] }
 0x9ed   :  { %5811 = vmatpush.bf16.msrb.mxu3 %v17282_v36  ;;  %5824 = vmatpush.bf16.msra.mxu0 %v17288_v24  ;;  %v5715_v36 = vld [vmem:[#allocation1 + $0x24] sm:$0xff]  ;;  %v9597_v14 = vld [vmem:[%s19014_s0 + $0x7d] sm:$0x1] }
 0x9ee   :  { %v5718_v24 = vld [vmem:[#allocation1 + $0x3f] sm:$0xff] }
 0x9ef   :  { %5720 = vst [vmem:[#allocation1] ss:$9 sm:$0xff] %v9597_v14  ;;  %v9664_v14 = vld [vmem:[%s19017_s3 + $0xd40] sm:$0xf] }
 0x9f0   :  { %5786 = vmatpush.bf16.msrb.mxu1 %v17300_v62  ;;  %5799 = vmatpush.bf16.msrb.mxu2 %v17318_v1  ;;  %v19451_v62 = vld [vmem:[#allocation26_spill] sm:$0xff]  ;;  %v19454_v1 = vld [vmem:[#allocation19_spill] sm:$0xff] }
 0x9f1   :  { %5812 = vmatpush.bf16.msrb.mxu3 %v17306_v18  ;;  %5825 = vmatpush.bf16.msra.mxu0 %v17312_v45  ;;  %v19452_v18 = vld [vmem:[#allocation20_spill] sm:$0xff]  ;;  %v19453_v45 = vld [vmem:[#allocation22_spill] sm:$0xff] }
 0x9f2   :  { %5752 = vmatmul.bf16.vlgmr.msra.gmra.mxu2 %v5712_v53  ;;  %5739 = vmatmul.bf16.vlgmr.msra.gmra.mxu1 %v5711_v61  ;;  %v9680_v53 = vld [vmem:[%s19017_s3 + $0xd60] sm:$0xf]  ;;  %v10712_v61 = vld [vmem:[%s19017_s3 + $0xd6c] sm:$0xf0] }
 0x9f3   :  { %5765 = vmatmul.bf16.vlgmr.msra.gmra.mxu3 %v5713_v15  ;;  %5778 = vmatmul.bf16.vlgmr.msrb.gmra.mxu0 %v5714_v2  ;;  %v9753_v15 = vor.u32 %v10729_v0, %v9752_v20  ;;  %v9681_v2 = vor.u32 %v10712_v61, %v9680_v53  ;;  %v9650_v20 = vld [vmem:[%s19017_s3 + $0xd30] sm:$0xf0]  ;;  %v10713_v61 = vld [vmem:[%s19017_s3 + $0xd74] sm:$0xf0] }
 0x9f4   :  { %5787 = vmatpush.bf16.msrb.mxu1 %v19447_v5  ;;  %5800 = vmatpush.bf16.msrb.mxu2 %v19448_v30  ;;  %v10727_v5 = vld [vmem:[%s19017_s3 + $0xdec] sm:$0xf]  ;;  %v9754_v30 = vld [vmem:[%s19017_s3 + $0xdf8] sm:$0xf0]  ;;  %v9653_v53 = vor.u32 %v10702_v32, %v9650_v20 }
 0x9f5   :  { %5813 = vmatpush.bf16.msrb.mxu3 %v19449_v7  ;;  %5826 = vmatpush.bf16.msra.mxu0 %v19450_v11  ;;  %v9757_v7 = vor.u32 %v10727_v5, %v9754_v30  ;;  %v10714_v11 = vld [vmem:[%s19017_s3 + $0xd84] sm:$0xf]  ;;  %v10711_v5 = vld [vmem:[%s19017_s3 + $0xd6c] sm:$0xf]  ;;  %v18049_v32 = vld [vmem:[%s19015_s1 + $0x58] sm:$0xff] }
 0x9f6   :  { %v5721_v27 = vld [vmem:[#allocation1] sm:$0xff]  ;;  %v18055_v20 = vld [vmem:[%s19015_s1 + $0xa8] sm:$0xff] }
 0x9f8   :  { %5788 = vmatpush.bf16.msrb.mxu1 %v19451_v62  ;;  %5801 = vmatpush.bf16.msrb.mxu2 %v19452_v18  ;;  %v10708_v62 = vld [vmem:[%s19017_s3 + $0xd4c] sm:$0xf0] }
 0x9f9   :  { %5814 = vmatpush.bf16.msrb.mxu3 %v19453_v45  ;;  %5827 = vmatpush.bf16.msra.mxu0 %v19454_v1  ;;  %v9665_v45 = vor.u32 %v10708_v62, %v9664_v14  ;;  %v10723_v1 = vld [vmem:[%s19017_s3 + $0xdcc] sm:$0xf] }
 0x9fc   :  { %5789 = vmatpush.bf16.msrb.mxu1 %v19455_v56  ;;  %5802 = vmatpush.bf16.msrb.mxu2 %v19456_v9  ;;  %v9738_v56 = vld [vmem:[%s19017_s3 + $0xdd8] sm:$0xf0] }
 0x9fd   :  { %5815 = vmatpush.bf16.msrb.mxu3 %v19457_v35  ;;  %5828 = vmatpush.bf16.msra.mxu0 %v19458_v37  ;;  %v9741_v9 = vor.u32 %v10723_v1, %v9738_v56  ;;  %v10710_v35 = vld [vmem:[%s19017_s3 + $0xd64] sm:$0xf]  ;;  %v9682_v37 = vld [vmem:[%s19017_s3 + $0xd70] sm:$0xf0]  ;;  %v9658_v56 = vld [vmem:[%s19017_s3 + $0xd38] sm:$0xf0] }
 0xa00   :  { %5790 = vmatpush.bf16.msrb.mxu1 %v19459_v41  ;;  %5803 = vmatpush.bf16.msrb.mxu2 %v19460_v23  ;;  %v9720_v41 = vld [vmem:[%s19017_s3 + $0xda8] sm:$0xf] }
 0xa01   :  { %5816 = vmatpush.bf16.msrb.mxu3 %v19462_v39  ;;  %5829 = vmatpush.bf16.msra.mxu0 %v19463_v13  ;;  %v10721_v39 = vld [vmem:[%s19017_s3 + $0xdb4] sm:$0xf0]  ;;  %v9648_v13 = vld [vmem:[%s19017_s3 + $0xd20] sm:$0xf] }
 0xa02   :  { %v9721_v48 = vor.u32 %v10721_v39, %v9720_v41  ;;  %v9640_v39 = vld [vmem:[%s19017_s3 + $0xd08] sm:$0xf] }
 0xa03   :  { %5804 = vmatmul.bf16.vlgmr.msrb.gmra.mxu2 %v5716_v12  ;;  %5791 = vmatmul.bf16.vlgmr.msrb.gmra.mxu1 %v5715_v36  ;;  %v9698_v12 = vld [vmem:[%s19017_s3 + $0xd90] sm:$0xf0] }
 0xa04   :  { %5835 = vmatpush.bf16.msra.mxu1 %v19461_v3  ;;  %5817 = vmatmul.bf16.vlgmr.msrb.gmra.mxu3 %v5717_v6  ;;  %v9736_v6 = vld [vmem:[%s19017_s3 + $0xdc8] sm:$0xf]  ;;  %v9701_v36 = vor.u32 %v10714_v11, %v9698_v12  ;;  %v9685_v3 = vor.u32 %v10710_v35, %v9682_v37  ;;  %v17963_v35 = vld [vmem:[%s19015_s1 + $0x78] sm:$0xff] }
 0xa05   :  { %5830 = vmatmul.bf16.vlgmr.msra.gmra.mxu0 %v5718_v24  ;;  %6043 = vmatpush.bf16.msra.mxu2 %v9745_v4  ;;  %v10725_v24 = vld [vmem:[%s19017_s3 + $0xdd4] sm:$0xf0]  ;;  %v10719_v4 = vld [vmem:[%s19017_s3 + $0xdac] sm:$0xf]  ;;  %v9672_v11 = vld [vmem:[%s19017_s3 + $0xd48] sm:$0xf] }
 0xa06   :  { %6056 = vmatpush.bf16.msra.mxu3 %v9749_v33  ;;  %6069 = vmatpush.bf16.msrb.mxu0 %v9753_v15  ;;  %v9737_v18 = vor.u32 %v10725_v24, %v9736_v6  ;;  %v9632_v33 = vld [vmem:[%s19017_s3 + $0xd00] sm:$0xf]  ;;  %v10709_v6 = vld [vmem:[%s19017_s3 + $0xd54] sm:$0xf0]  ;;  %v9674_v24 = vld [vmem:[%s19017_s3 + $0xd58] sm:$0xf0] }
 0xa07   :  { %v9633_v8 = vor.u32 %v10700_v63, %v9632_v33  ;;  %v9673_v14 = vor.u32 %v10709_v6, %v9672_v11  ;;  %v18013_v63 = vld [vmem:[%s19015_s1 + $0x18] sm:$0xff] }
 0xa08   :  { %5836 = vmatpush.bf16.msra.mxu1 %v19464_v19  ;;  %v10704_v19 = vld [vmem:[%s19017_s3 + $0xd2c] sm:$0xf0] }
 0xa09   :  { %6044 = vmatpush.bf16.msra.mxu2 %v9729_v43  ;;  %v9649_v58 = vor.u32 %v10704_v19, %v9648_v13  ;;  %v9725_v43 = vor.u32 %v10719_v4, %v9722_v42  ;;  %v10701_v13 = vld [vmem:[%s19017_s3 + $0xd14] sm:$0xf0]  ;;  %v17995_v42 = vld [vmem:[%s19015_s1 + $0x20] sm:$0xff] }
 0xa0a   :  { %6057 = vmatpush.bf16.msra.mxu3 %v9733_v22  ;;  %6070 = vmatpush.bf16.msrb.mxu0 %v9737_v18  ;;  %v9656_v18 = vld [vmem:[%s19017_s3 + $0xd28] sm:$0xf]  ;;  %v9641_v4 = vor.u32 %v10701_v13, %v9640_v39  ;;  %v18150_v39 = vld [vmem:[%s19015_s1 + $0x80] sm:$0xff] }
 0xa0c   :  { %5837 = vmatpush.bf16.msra.mxu1 %v19465_v46 }
 0xa0d   :  { %6045 = vmatpush.bf16.msra.mxu2 %v9713_v60 }
 0xa0e   :  { %6058 = vmatpush.bf16.msra.mxu3 %v9717_v26  ;;  %6071 = vmatpush.bf16.msrb.mxu0 %v9721_v48  ;;  %v9688_v26 = vld [vmem:[%s19017_s3 + $0xd68] sm:$0xf]  ;;  %v9642_v48 = vld [vmem:[%s19017_s3 + $0xd18] sm:$0xf0] }
 0xa10   :  { %5838 = vmatpush.bf16.msra.mxu1 %v17739_v52 }
 0xa11   :  { %6046 = vmatpush.bf16.msra.mxu2 %v9697_v31 }
 0xa12   :  { %6059 = vmatpush.bf16.msra.mxu3 %v9701_v36  ;;  %v10707_v36 = vld [vmem:[%s19017_s3 + $0xd4c] sm:$0xf] }
 0xa13   :  { %v9677_v62 = vor.u32 %v10707_v36, %v9674_v24  ;;  %v18110_v24 = vld [vmem:[%s19015_s1 + $0xd8] sm:$0xff] }
 0xa14   :  { %5839 = vmatpush.bf16.msra.mxu1 %v17745_v50 }
 0xa15   :  { %6047 = vmatpush.bf16.msra.mxu2 %v9681_v2  ;;  %v9689_v2 = vor.u32 %v10713_v61, %v9688_v26  ;;  %v18068_v61 = vld [vmem:[%s19015_s1 + $0xe8] sm:$0xff] }
 0xa16   :  { %6060 = vmatpush.bf16.msra.mxu3 %v9685_v3 }
 0xa18   :  { %5840 = vmatpush.bf16.msra.mxu1 %v17751_v55 }
 0xa19   :  { %6048 = vmatpush.bf16.msra.mxu2 %v9665_v45  ;;  %v10703_v45 = vld [vmem:[%s19017_s3 + $0xd2c] sm:$0xf] }
 0xa1a   :  { %v9661_v3 = vor.u32 %v10703_v45, %v9658_v56  ;;  %v18129_v45 = vld [vmem:[%s19015_s1 + $0xd0] sm:$0xff] }
 0xa1c   :  { %5841 = vmatpush.bf16.msra.mxu1 %v17757_v29 }
 0xa1d   :  { %6049 = vmatpush.bf16.msra.mxu2 %v9649_v58  ;;  %v17989_v58 = vld [vmem:[%s19015_s1 + $0x70] sm:$0xff] }
 0xa20   :  { %5842 = vmatpush.bf16.msra.mxu1 %v17763_v54 }
 0xa21   :  { %6050 = vmatpush.bf16.msra.mxu2 %v9633_v8  ;;  %v18025_v8 = vld [vmem:[%s19015_s1 + $0x60] sm:$0xff] }
 0xa23   :  { %5843 = vmatmul.bf16.vlgmr.msra.gmra.mxu1 %v5721_v27 }
 0xa24   :  { %6082 = vmatpush.bf16.msrb.mxu1 %v9757_v7  ;;  %v9634_v7 = vld [vmem:[%s19017_s3 + $0xd10] sm:$0xf0] }
 0xa25   :  { %6124 = vmatpush.bf16.msrb.mxu2 %v17635_v17  ;;  %v10698_v17 = vld [vmem:[%s19017_s3 + $0xd04] sm:$0xf] }
 0xa26   :  { %v9637_v12 = vor.u32 %v10698_v17, %v9634_v7  ;;  %v18098_v7 = vld [vmem:[%s19015_s1 + $0x48] sm:$0xff] }
 0xa28   :  { %6083 = vmatpush.bf16.msrb.mxu1 %v9741_v9 }
 0xa29   :  { %6125 = vmatpush.bf16.msrb.mxu2 %v17652_v59  ;;  %v10705_v59 = vld [vmem:[%s19017_s3 + $0xd34] sm:$0xf0] }
 0xa2a   :  { %v9657_v37 = vor.u32 %v10705_v59, %v9656_v18  ;;  %v18122_v18 = vld [vmem:[%s19015_s1 + $0x90] sm:$0xff] }
 0xa2c   :  { %6084 = vmatpush.bf16.msrb.mxu1 %v9725_v43 }
 0xa30   :  { %6085 = vmatpush.bf16.msrb.mxu1 %v9709_v10 }
 0xa5f   :  { %v5659_v23 = vpop.f32.mrf.mxu1 }
 0xa60   :  { %v17869_v46 = vadd.f32 %v5659_v23, %v17582_v49  ;;  %v5698_v27 = vpop.f32.mrf.mxu0  ;;  %v10706_v49 = vld [vmem:[%s19017_s3 + $0xd44] sm:$0xf]  ;;  %v17969_v23 = vld [vmem:[%s19015_s1 + $0x28] sm:$0xff] }
 0xa61   :  { %v17878_v25 = vadd.f32 %v5698_v27, %v17630_v47  ;;  %v9669_v51 = vor.u32 %v10706_v49, %v9666_v21  ;;  %v10717_v47 = vld [vmem:[%s19017_s3 + $0xd94] sm:$0xf0]  ;;  %6126 = vmatpush.bf16.msrb.mxu2 %v17969_v23  ;;  %v10699_v27 = vld [vmem:[%s19017_s3 + $0xd0c] sm:$0xf] }
 0xa62   :  { %v9705_v60 = vor.u32 %v10717_v47, %v9704_v28  ;;  %v9645_v43 = vor.u32 %v10699_v27, %v9642_v48  ;;  %v18001_v28 = vld [vmem:[%s19015_s1 + $0x68] sm:$0xff]  ;;  %v18007_v47 = vld [vmem:[%s19015_s1 + $0xb8] sm:$0xff] }
 0xa63   :  { %6061 = vmatpush.bf16.msra.mxu3 %v9669_v51 }
 0xa64   :  { %6072 = vmatpush.bf16.msrb.mxu0 %v9705_v60  ;;  %v18019_v60 = vld [vmem:[%s19015_s1 + $0xf8] sm:$0xff] }
 0xa65   :  { %v5672_v22 = vpop.f32.mrf.mxu2  ;;  %6127 = vmatpush.bf16.msrb.mxu2 %v17995_v42 }
 0xa66   :  { %v17905_v31 = vadd.f32 %v5672_v22, %v17585_v40  ;;  %v5685_v34 = vpop.f32.mrf.mxu3  ;;  %v18043_v22 = vld [vmem:[%s19015_s1 + $0xf0] sm:$0xff] }
 0xa67   :  { %v17917_v0 = vadd.f32 %v5685_v34, %v17627_v57  ;;  %v5661_v40 = vpop.f32.mrf.mxu1  ;;  %v9690_v57 = vld [vmem:[%s19017_s3 + $0xd78] sm:$0xf0]  ;;  %6062 = vmatpush.bf16.msra.mxu3 %v9653_v53  ;;  %v18062_v53 = vld [vmem:[%s19015_s1 + $0x8] sm:$0xff] }
 0xa68   :  { %v5700_v15 = vpop.f32.mrf.mxu0  ;;  %v9693_v30 = vor.u32 %v10711_v5, %v9690_v57  ;;  %6073 = vmatpush.bf16.msrb.mxu0 %v9689_v2  ;;  %v18080_v2 = vld [vmem:[%s19015_s1 + $0xa0] sm:$0xff] }
 0xa69   :  { %6128 = vmatpush.bf16.msrb.mxu2 %v18013_v63  ;;  %v18086_v57 = vld [vmem:[%s19015_s1] sm:$0xff] }
 0xa6a   :  { %6086 = vmatpush.bf16.msrb.mxu1 %v9693_v30  ;;  %v18092_v30 = vld [vmem:[%s19015_s1 + $0xe0] sm:$0xff] }
 0xa6b   :  { %6063 = vmatpush.bf16.msra.mxu3 %v9637_v12  ;;  %v18104_v12 = vld [vmem:[%s19015_s1 + $0x98] sm:$0xff] }
 0xa6c   :  { %6074 = vmatpush.bf16.msrb.mxu0 %v9673_v14 }
 0xa6d   :  { %v5674_v1 = vpop.f32.mrf.mxu2  ;;  %6129 = vmatpush.bf16.msrb.mxu2 %v18037_v44 }
 0xa6e   :  { %v5687_v9 = vpop.f32.mrf.mxu3  ;;  %6087 = vmatpush.bf16.msrb.mxu1 %v9677_v62  ;;  %v18116_v62 = vld [vmem:[%s19015_s1 + $0x40] sm:$0xff] }
 0xa6f   :  { %6137 = vmatpush.bf16.msrb.mxu3 %v17963_v35  ;;  %v5740_v41 = vpop.f32.mrf.mxu1  ;;  %v18135_v9 = vld [vmem:[%s19015_s1 + $0x88] sm:$0xff] }
 0xa70   :  { %v17978_v19 = vpop.f32.mrf.mxu0  ;;  %6075 = vmatpush.bf16.msrb.mxu0 %v9657_v37  ;;  %v5741_v26 = vadd.f32 %v17683_v16, %v5740_v41  ;;  %v18074_v16 = vld [vmem:[%s19015_s1 + $0x50] sm:$0xff]  ;;  %v18141_v41 = vld [vmem:[%s19015_s1 + $0xc8] sm:$0xff] }
 0xa71   :  { %6130 = vmatpush.bf16.msrb.mxu2 %v18062_v53 }
 0xa72   :  { %6088 = vmatpush.bf16.msrb.mxu1 %v9661_v3  ;;  %v9758_v3 = vld [vmem:[%s19014_s0 + $0x7e] sm:$0xff] }
 0xa73   :  { %6138 = vmatpush.bf16.msrb.mxu3 %v17989_v58  ;;  %6103 = vst [vmem:[#allocation1] ss:$9 sm:$0xff] %v9758_v3 }
 0xa74   :  { %6076 = vmatpush.bf16.msrb.mxu0 %v9641_v4 }
 0xa75   :  { %v5753_v49 = vpop.f32.mrf.mxu2  ;;  %6131 = vmatpush.bf16.msrb.mxu2 %v18086_v57 }
 0xa76   :  { %v5766_v21 = vpop.f32.mrf.mxu3  ;;  %6089 = vmatpush.bf16.msrb.mxu1 %v9645_v43  ;;  %v5754_v5 = vadd.f32 %v5753_v49, %v5741_v26  ;;  %v18180_v26 = vld [vmem:[%s19015_s1 + $0x1f8] sm:$0xff] }
 0xa77   :  { %6139 = vmatpush.bf16.msrb.mxu3 %v18001_v28  ;;  %v5742_v51 = vpop.f32.mrf.mxu1 }
 0xa78   :  { %6150 = vmatpush.bf16.msra.mxu0 %v18007_v47  ;;  %v5781_v33 = vpop.f32.mrf.mxu0  ;;  %v5767_v6 = vadd.f32 %v5766_v21, %v5754_v5  ;;  %v18198_v5 = vld [vmem:[%s19015_s1 + $0x1b0] sm:$0xff] }
 0xa79   :  { %v18162_v33 = vld [vmem:[%s19015_s1 + $0x138] sm:$0xff] }
 0xa7a   :  { %6163 = vmatpush.bf16.msra.mxu1 %v18019_v60  ;;  %v5780_v59 = vadd.f32 %v17978_v19, %v5767_v6  ;;  %v18156_v19 = vld [vmem:[%s19015_s1 + $0xc0] sm:$0xff]  ;;  %v18216_v6 = vld [vmem:[%s19015_s1 + $0x168] sm:$0xff]  ;;  %v6106_v3 = vld [vmem:[#allocation1 + $0x12] sm:$0xff] }
 0xa7b   :  { %6140 = vmatpush.bf16.msrb.mxu3 %v18025_v8 }
 0xa7c   :  { %6151 = vmatpush.bf16.msra.mxu0 %v18031_v38 }
 0xa7d   :  { %v5755_v10 = vpop.f32.mrf.mxu2 }
 0xa7e   :  { %6164 = vmatpush.bf16.msra.mxu1 %v18043_v22  ;;  %v5768_v34 = vpop.f32.mrf.mxu3  ;;  %v18168_v10 = vld [vmem:[%s19015_s1 + $0x178] sm:$0xff] }
 0xa7f   :  { %6141 = vmatpush.bf16.msrb.mxu3 %v18049_v32  ;;  %v18174_v34 = vld [vmem:[%s19015_s1 + $0x1b8] sm:$0xff] }
 0xa80   :  { %6152 = vmatpush.bf16.msra.mxu0 %v18055_v20  ;;  %v5792_v40 = vpop.f32.mrf.mxu1 }
 0xa81   :  { %v5793_v37 = vadd.f32 %v5792_v40, %v5780_v59  ;;  %v18186_v40 = vld [vmem:[%s19015_s1 + $0x130] sm:$0xff]  ;;  %v6104_v59 = vld [vmem:[#allocation1] sm:$0xff] }
 0xa82   :  { %6165 = vmatpush.bf16.msra.mxu1 %v18068_v61  ;;  %v5831_v15 = vpop.f32.mrf.mxu0 }
 0xa83   :  { %6142 = vmatpush.bf16.msrb.mxu3 %v18074_v16 }
 0xa84   :  { %6153 = vmatpush.bf16.msra.mxu0 %v18080_v2 }
 0xa86   :  { %6166 = vmatpush.bf16.msra.mxu1 %v18092_v30  ;;  %v5805_v17 = vpop.f32.mrf.mxu2 }
 0xa87   :  { %6143 = vmatpush.bf16.msrb.mxu3 %v18098_v7  ;;  %v5818_v11 = vpop.f32.mrf.mxu3  ;;  %v5806_v13 = vadd.f32 %v5805_v17, %v5793_v37  ;;  %v18204_v17 = vld [vmem:[%s19015_s1 + $0x1f0] sm:$0xff]  ;;  %v18240_v37 = vld [vmem:[%s19015_s1 + $0x160] sm:$0xff] }
 0xa88   :  { %6154 = vmatpush.bf16.msra.mxu0 %v18104_v12  ;;  %v5794_v36 = vpop.f32.mrf.mxu1  ;;  %19466 = vst [vmem:[#allocation6_spill] sm:$0xff] %v18240_v37 }
 0xa89   :  { %v5819_v27 = vadd.f32 %v5818_v11, %v5806_v13  ;;  %v18210_v11 = vld [vmem:[%s19015_s1 + $0x128] sm:$0xff]  ;;  %v6107_v13 = vld [vmem:[#allocation1 + $0x1b] sm:$0xff] }
 0xa8a   :  { %6167 = vmatpush.bf16.msra.mxu1 %v18110_v24  ;;  %v5833_v14 = vpop.f32.mrf.mxu0  ;;  %v18222_v36 = vld [vmem:[%s19015_s1 + $0x1a8] sm:$0xff] }
 0xa8b   :  { %6144 = vmatpush.bf16.msrb.mxu3 %v18116_v62  ;;  %v5832_v48 = vadd.f32 %v5831_v15, %v5819_v27  ;;  %v18192_v15 = vld [vmem:[%s19015_s1 + $0x170] sm:$0xff]  ;;  %v18228_v14 = vld [vmem:[%s19015_s1 + $0x1e8] sm:$0xff]  ;;  %v18246_v27 = vld [vmem:[%s19015_s1 + $0x1a0] sm:$0xff] }
 0xa8c   :  { %6155 = vmatpush.bf16.msra.mxu0 %v18122_v18  ;;  %19467 = vst [vmem:[#allocation7_spill] sm:$0xff] %v18246_v27 }
 0xa8e   :  { %6168 = vmatpush.bf16.msra.mxu1 %v18129_v45  ;;  %v5807_v1 = vpop.f32.mrf.mxu2 }
 0xa8f   :  { %v5820_v56 = vpop.f32.mrf.mxu3  ;;  %v6105_v1 = vld [vmem:[#allocation1 + $0x9] sm:$0xff] }
 0xa90   :  { %6156 = vmatpush.bf16.msra.mxu0 %v18135_v9  ;;  %v18234_v56 = vld [vmem:[%s19015_s1 + $0x120] sm:$0xff] }
 0xa92   :  { %6169 = vmatpush.bf16.msra.mxu1 %v18141_v41 }
 0xa94   :  { %6157 = vmatpush.bf16.msra.mxu0 %v18150_v39 }
 0xa96   :  { %6170 = vmatpush.bf16.msra.mxu1 %v18156_v19 }
 0xaa0   :  { %v5844_v4 = vpop.f32.mrf.mxu1 }
 0xaa1   :  { %v5845_v43 = vadd.f32 %v5844_v4, %v5832_v48  ;;  %v18252_v48 = vld [vmem:[%s19015_s1 + $0x1e0] sm:$0xff]  ;;  %v18258_v4 = vld [vmem:[%s19015_s1 + $0x118] sm:$0xff] }
 0xaa2   :  { %19468 = vst [vmem:[#allocation8_spill] sm:$0xff] %v18252_v48 }
 0xaa3   :  { %v5848_v49 = vmax.f32 %v5845_v43, 0.0  ;;  %19469 = vst [vmem:[#allocation12_spill] sm:$0xff] %v18258_v4  ;;  %v18264_v43 = vld [vmem:[%s19015_s1 + $0x158] sm:$0xff] }
 0xaa4   :  { %19470 = vst [vmem:[#allocation11_spill] sm:$0xff] %v18264_v43 }
 0xaa5   :  { %v5849_v21 = vpack.c.bf16 %v5848_v49, %v5848_v49  ;;  %v18270_v49 = vld [vmem:[%s19015_s1 + $0x198] sm:$0xff] }
 0xaa6   :  { %19471 = vst [vmem:[#allocation13_spill] sm:$0xff] %v18270_v49 }
 0xaa7   :  { %6051 = vmatmul.bf16.vlgmr.msra.gmra.mxu2 %v5849_v21  ;;  %6064 = vmatmul.bf16.vlgmr.msra.gmra.mxu3 %v5849_v21 }
 0xaa8   :  { %6077 = vmatmul.bf16.vlgmr.msrb.gmra.mxu0 %v5849_v21  ;;  %6090 = vmatmul.bf16.vlgmr.msrb.gmra.mxu1 %v5849_v21  ;;  %v5846_v51 = vpop.f32.mrf.mxu1  ;;  %v18276_v21 = vld [vmem:[%s19015_s1 + $0x1d8] sm:$0xff] }
 0xaa9   :  { %6176 = vmatpush.bf16.msra.mxu2 %v18162_v33  ;;  %6189 = vmatpush.bf16.msra.mxu3 %v18168_v10  ;;  %19472 = vst [vmem:[#allocation14_spill] sm:$0xff] %v18276_v21  ;;  %v6108_v51 = vld [vmem:[#allocation1 + $0x24] sm:$0xff] }
 0xaaa   :  { %6202 = vmatpush.bf16.msrb.mxu0 %v18174_v34  ;;  %6215 = vmatpush.bf16.msrb.mxu1 %v18180_v26 }
 0xaad   :  { %6177 = vmatpush.bf16.msra.mxu2 %v18186_v40  ;;  %6190 = vmatpush.bf16.msra.mxu3 %v18192_v15 }
 0xaae   :  { %6203 = vmatpush.bf16.msrb.mxu0 %v18198_v5  ;;  %6216 = vmatpush.bf16.msrb.mxu1 %v18204_v17 }
 0xab1   :  { %6178 = vmatpush.bf16.msra.mxu2 %v18210_v11  ;;  %6191 = vmatpush.bf16.msra.mxu3 %v18216_v6 }
 0xab2   :  { %6204 = vmatpush.bf16.msrb.mxu0 %v18222_v36  ;;  %6217 = vmatpush.bf16.msrb.mxu1 %v18228_v14 }
 0xab5   :  { %6179 = vmatpush.bf16.msra.mxu2 %v18234_v56  ;;  %6192 = vmatpush.bf16.msra.mxu3 %v18240_v37 }
 0xab6   :  { %6205 = vmatpush.bf16.msrb.mxu0 %v18246_v27  ;;  %6218 = vmatpush.bf16.msrb.mxu1 %v18252_v48 }
 0xab7   :  { %6132 = vmatmul.bf16.vlgmr.msrb.gmra.mxu2 %v6104_v59  ;;  %6145 = vmatmul.bf16.vlgmr.msrb.gmra.mxu3 %v6105_v1  ;;  %v6109_v59 = vld [vmem:[#allocation1 + $0x2d] sm:$0xff]  ;;  %v6110_v1 = vld [vmem:[#allocation1 + $0x36] sm:$0xff] }
 0xab8   :  { %6158 = vmatmul.bf16.vlgmr.msra.gmra.mxu0 %v6106_v3  ;;  %6171 = vmatmul.bf16.vlgmr.msra.gmra.mxu1 %v6107_v13  ;;  %v6111_v3 = vld [vmem:[#allocation1 + $0x3f] sm:$0xff] }
 0xab9   :  { %6180 = vmatpush.bf16.msra.mxu2 %v18258_v4  ;;  %6193 = vmatpush.bf16.msra.mxu3 %v18264_v43  ;;  %v9759_v13 = vld [vmem:[%s19014_s0 + $0x86] sm:$0x1]  ;;  %v18285_v43 = vld [vmem:[%s19015_s1 + $0x110] sm:$0xff] }
 0xaba   :  { %6206 = vmatpush.bf16.msrb.mxu0 %v18270_v49  ;;  %6219 = vmatpush.bf16.msrb.mxu1 %v18276_v21  ;;  %19473 = vst [vmem:[#allocation16_spill] sm:$0xff] %v18285_v43  ;;  %v18291_v49 = vld [vmem:[%s19015_s1 + $0x150] sm:$0xff] }
 0xabb   :  { %19474 = vst [vmem:[#allocation18_spill] sm:$0xff] %v18291_v49  ;;  %v18297_v21 = vld [vmem:[%s19015_s1 + $0x190] sm:$0xff] }
 0xabc   :  { %6113 = vst [vmem:[#allocation1] ss:$9 sm:$0xff] %v9759_v13  ;;  %v18303_v4 = vld [vmem:[%s19015_s1 + $0x1d0] sm:$0xff]  ;;  %v18315_v13 = vld [vmem:[%s19015_s1 + $0x148] sm:$0xff] }
 0xabd   :  { %6181 = vmatpush.bf16.msra.mxu2 %v18285_v43  ;;  %6194 = vmatpush.bf16.msra.mxu3 %v18291_v49  ;;  %19475 = vst [vmem:[#allocation15_spill] sm:$0xff] %v18297_v21  ;;  %v18309_v43 = vld [vmem:[%s19015_s1 + $0x108] sm:$0xff] }
 0xabe   :  { %6207 = vmatpush.bf16.msrb.mxu0 %v18297_v21  ;;  %19476 = vst [vmem:[#allocation21_spill] sm:$0xff] %v18303_v4  ;;  %6220 = vmatpush.bf16.msrb.mxu1 %v18303_v4  ;;  %v18321_v21 = vld [vmem:[%s19015_s1 + $0x188] sm:$0xff] }
 0xabf   :  { %19477 = vst [vmem:[#allocation17_spill] sm:$0xff] %v18309_v43  ;;  %v18327_v49 = vld [vmem:[%s19015_s1 + $0x1c8] sm:$0xff] }
 0xac0   :  { %19478 = vst [vmem:[#allocation26_spill] sm:$0xff] %v18315_v13 }
 0xac1   :  { %6182 = vmatpush.bf16.msra.mxu2 %v18309_v43  ;;  %6195 = vmatpush.bf16.msra.mxu3 %v18315_v13  ;;  %19479 = vst [vmem:[#allocation20_spill] sm:$0xff] %v18321_v21  ;;  %v18333_v43 = vld [vmem:[%s19015_s1 + $0x100] sm:$0xff] }
 0xac2   :  { %6208 = vmatpush.bf16.msrb.mxu0 %v18321_v21  ;;  %19480 = vst [vmem:[#allocation22_spill] sm:$0xff] %v18327_v49  ;;  %6221 = vmatpush.bf16.msrb.mxu1 %v18327_v49  ;;  %v18339_v13 = vld [vmem:[%s19015_s1 + $0x140] sm:$0xff]  ;;  %v18345_v21 = vld [vmem:[%s19015_s1 + $0x238] sm:$0xff] }
 0xac3   :  { %19481 = vst [vmem:[#allocation19_spill] sm:$0xff] %v18333_v43  ;;  %v18351_v49 = vld [vmem:[%s19015_s1 + $0x180] sm:$0xff] }
 0xac4   :  { %19482 = vst [vmem:[#allocation24_spill] sm:$0xff] %v18339_v13 }
 0xac5   :  { %6183 = vmatpush.bf16.msra.mxu2 %v18333_v43  ;;  %6196 = vmatpush.bf16.msra.mxu3 %v18339_v13  ;;  %19483 = vst [vmem:[#allocation27_spill] sm:$0xff] %v18345_v21  ;;  %v18357_v43 = vld [vmem:[%s19015_s1 + $0x1c0] sm:$0xff]  ;;  %v18363_v13 = vld [vmem:[%s19015_s1 + $0x230] sm:$0xff] }
 0xac6   :  { %19484 = vst [vmem:[#allocation28_spill] sm:$0xff] %v18351_v49  ;;  %6209 = vmatpush.bf16.msrb.mxu0 %v18351_v49  ;;  %6222 = vmatpush.bf16.msrb.mxu1 %v18357_v43  ;;  %v18369_v49 = vld [vmem:[%s19015_s1 + $0x228] sm:$0xff] }
 0xac7   :  { %19485 = vst [vmem:[#allocation23_spill] sm:$0xff] %v18357_v43 }
 0xac8   :  { %6184 = vmatmul.bf16.vlgmr.msra.gmra.mxu2 %v6108_v51  ;;  %6197 = vmatmul.bf16.vlgmr.msra.gmra.mxu3 %v6109_v59  ;;  %19486 = vst [vmem:[#allocation25_spill] sm:$0xff] %v18363_v13  ;;  %v6114_v51 = vld [vmem:[#allocation1] sm:$0xff] }
 0xac9   :  { %6228 = vmatpush.bf16.msrb.mxu2 %v18345_v21  ;;  %6210 = vmatmul.bf16.vlgmr.msrb.gmra.mxu0 %v6110_v1  ;;  %19487 = vst [vmem:[#allocation31_spill] sm:$0xff] %v18369_v49  ;;  %v9906_v59 = vld [vmem:[%s19017_s3 + $0xee0] sm:$0xf]  ;;  %v10760_v1 = vld [vmem:[%s19017_s3 + $0xeec] sm:$0xf0] }
 0xaca   :  { %6223 = vmatmul.bf16.vlgmr.msrb.gmra.mxu1 %v6111_v3  ;;  %v10752_v3 = vld [vmem:[%s19017_s3 + $0xeac] sm:$0xf0]  ;;  %v9898_v21 = vld [vmem:[%s19017_s3 + $0xec8] sm:$0xf] }
 0xacd   :  { %6229 = vmatpush.bf16.msrb.mxu2 %v18363_v13 }
 0xad1   :  { %6230 = vmatpush.bf16.msrb.mxu2 %v18369_v49 }
 0xad5   :  { %6231 = vmatpush.bf16.msrb.mxu2 %v17739_v52  ;;  %v9890_v52 = vld [vmem:[%s19017_s3 + $0xec0] sm:$0xf] }
 0xad9   :  { %6232 = vmatpush.bf16.msrb.mxu2 %v17745_v50  ;;  %v9907_v50 = vor.u32 %v10760_v1, %v9906_v59  ;;  %v10759_v59 = vld [vmem:[%s19017_s3 + $0xeec] sm:$0xf]  ;;  %v9916_v1 = vld [vmem:[%s19017_s3 + $0xef8] sm:$0xf0] }
 0xadb   :  { %6436 = vmatpush.bf16.msrb.mxu3 %v9907_v50  ;;  %v9919_v50 = vor.u32 %v10759_v59, %v9916_v1  ;;  %v9914_v59 = vld [vmem:[%s19017_s3 + $0xee8] sm:$0xf]  ;;  %v10761_v1 = vld [vmem:[%s19017_s3 + $0xef4] sm:$0xf0] }
 0xadd   :  { %6233 = vmatpush.bf16.msrb.mxu2 %v17751_v55  ;;  %v10756_v55 = vld [vmem:[%s19017_s3 + $0xecc] sm:$0xf0] }
 0xae1   :  { %6234 = vmatpush.bf16.msrb.mxu2 %v17757_v29  ;;  %v9891_v29 = vor.u32 %v10756_v55, %v9890_v52  ;;  %v9858_v52 = vld [vmem:[%s19017_s3 + $0xe80] sm:$0xf]  ;;  %v10748_v55 = vld [vmem:[%s19017_s3 + $0xe8c] sm:$0xf0] }
 0xae3   :  { %6437 = vmatpush.bf16.msrb.mxu3 %v9891_v29  ;;  %v9859_v29 = vor.u32 %v10748_v55, %v9858_v52  ;;  %v9915_v52 = vor.u32 %v10761_v1, %v9914_v59  ;;  %v9900_v55 = vld [vmem:[%s19017_s3 + $0xed8] sm:$0xf0]  ;;  %v9892_v59 = vld [vmem:[%s19017_s3 + $0xed0] sm:$0xf0] }
 0xae5   :  { %6235 = vmatpush.bf16.msrb.mxu2 %v17763_v54  ;;  %v9874_v54 = vld [vmem:[%s19017_s3 + $0xea0] sm:$0xf]  ;;  %6462 = vmatpush.bf16.msra.mxu1 %v9915_v52 }
 0xae6   :  { %v9826_v52 = vld [vmem:[%s19017_s3 + $0xe40] sm:$0xf] }
 0xae8   :  { %6236 = vmatmul.bf16.vlgmr.msrb.gmra.mxu2 %v6114_v51  ;;  %v9875_v51 = vor.u32 %v10752_v3, %v9874_v54  ;;  %v10758_v54 = vld [vmem:[%s19017_s3 + $0xee4] sm:$0xf]  ;;  %v9908_v3 = vld [vmem:[%s19017_s3 + $0xef0] sm:$0xf0] }
 0xae9   :  { %6475 = vmatpush.bf16.msra.mxu2 %v9919_v50  ;;  %v9911_v49 = vor.u32 %v10758_v54, %v9908_v3  ;;  %v9842_v50 = vld [vmem:[%s19017_s3 + $0xe60] sm:$0xf]  ;;  %v10744_v54 = vld [vmem:[%s19017_s3 + $0xe6c] sm:$0xf0] }
 0xaea   :  { %6438 = vmatpush.bf16.msrb.mxu3 %v9875_v51  ;;  %v10755_v51 = vld [vmem:[%s19017_s3 + $0xecc] sm:$0xf]  ;;  %v9843_v13 = vor.u32 %v10744_v54, %v9842_v50  ;;  %v9884_v50 = vld [vmem:[%s19017_s3 + $0xeb8] sm:$0xf0]  ;;  %v10740_v54 = vld [vmem:[%s19017_s3 + $0xe4c] sm:$0xf0] }
 0xaeb   :  { %6449 = vmatpush.bf16.msra.mxu0 %v9911_v49  ;;  %v9903_v3 = vor.u32 %v10755_v51, %v9900_v55  ;;  %v10754_v49 = vld [vmem:[%s19017_s3 + $0xec4] sm:$0xf]  ;;  %v10751_v51 = vld [vmem:[%s19017_s3 + $0xeac] sm:$0xf]  ;;  %v9827_v4 = vor.u32 %v10740_v54, %v9826_v52  ;;  %v9810_v52 = vld [vmem:[%s19017_s3 + $0xe20] sm:$0xf] }
 0xaec   :  { %v9895_v1 = vor.u32 %v10754_v49, %v9892_v59  ;;  %v9887_v49 = vor.u32 %v10751_v51, %v9884_v50  ;;  %v10750_v59 = vld [vmem:[%s19017_s3 + $0xea4] sm:$0xf]  ;;  %v10747_v51 = vld [vmem:[%s19017_s3 + $0xe8c] sm:$0xf]  ;;  %v9868_v50 = vld [vmem:[%s19017_s3 + $0xe98] sm:$0xf0] }
 0xaed   :  { %6476 = vmatpush.bf16.msra.mxu2 %v9903_v3  ;;  %v9882_v3 = vld [vmem:[%s19017_s3 + $0xea8] sm:$0xf]  ;;  %v10736_v54 = vld [vmem:[%s19017_s3 + $0xe2c] sm:$0xf0] }
 0xaee   :  { %6439 = vmatpush.bf16.msrb.mxu3 %v9859_v29  ;;  %v10757_v29 = vld [vmem:[%s19017_s3 + $0xed4] sm:$0xf0] }
 0xaef   :  { %v9899_v55 = vor.u32 %v10757_v29, %v9898_v21  ;;  %6450 = vmatpush.bf16.msra.mxu0 %v9895_v1  ;;  %v9876_v21 = vld [vmem:[%s19017_s3 + $0xeb0] sm:$0xf0]  ;;  %v10753_v1 = vld [vmem:[%s19017_s3 + $0xeb4] sm:$0xf0] }
 0xaf0   :  { %v9879_v27 = vor.u32 %v10750_v59, %v9876_v21  ;;  %v10746_v59 = vld [vmem:[%s19017_s3 + $0xe84] sm:$0xf] }
 0xaf1   :  { %6463 = vmatpush.bf16.msra.mxu1 %v9899_v55  ;;  %6477 = vmatpush.bf16.msra.mxu2 %v9887_v49  ;;  %v9811_v55 = vor.u32 %v10736_v54, %v9810_v52  ;;  %v9866_v49 = vld [vmem:[%s19017_s3 + $0xe88] sm:$0xf]  ;;  %v10732_v52 = vld [vmem:[%s19017_s3 + $0xe0c] sm:$0xf0] }
 0xaf2   :  { %6440 = vmatpush.bf16.msrb.mxu3 %v9843_v13  ;;  %v9883_v13 = vor.u32 %v10753_v1, %v9882_v3 }
 0xaf3   :  { %6451 = vmatpush.bf16.msra.mxu0 %v9879_v27  ;;  %v10749_v27 = vld [vmem:[%s19017_s3 + $0xe94] sm:$0xf0] }
 0xaf5   :  { %6464 = vmatpush.bf16.msra.mxu1 %v9883_v13  ;;  %v9794_v13 = vld [vmem:[%s19017_s3 + $0xe00] sm:$0xf] }
 0xaf6   :  { %6441 = vmatpush.bf16.msrb.mxu3 %v9827_v4  ;;  %v10743_v4 = vld [vmem:[%s19017_s3 + $0xe6c] sm:$0xf] }
 0xafa   :  { %6442 = vmatpush.bf16.msrb.mxu3 %v9811_v55  ;;  %v9850_v55 = vld [vmem:[%s19017_s3 + $0xe68] sm:$0xf] }
 0xb25   :  { %v6078_v29 = vpop.f32.mrf.mxu0  ;;  %v6091_v43 = vpop.f32.mrf.mxu1 }
 0xb26   :  { %v18474_v37 = vadd.f32 %v6078_v29, %v17917_v0  ;;  %v18477_v48 = vadd.f32 %v6091_v43, %v17878_v25  ;;  %v9871_v0 = vor.u32 %v10747_v51, %v9868_v50  ;;  %v9860_v25 = vld [vmem:[%s19017_s3 + $0xe90] sm:$0xf0]  ;;  %v9867_v50 = vor.u32 %v10749_v27, %v9866_v49  ;;  %v9836_v27 = vld [vmem:[%s19017_s3 + $0xe58] sm:$0xf0] }
 0xb27   :  { %v9863_v43 = vor.u32 %v10746_v59, %v9860_v25  ;;  %v9795_v59 = vor.u32 %v10732_v52, %v9794_v13  ;;  %v9844_v25 = vld [vmem:[%s19017_s3 + $0xe70] sm:$0xf0] }
 0xb28   :  { %19488 = vst [vmem:[#allocation29_spill] sm:$0xff] %v18477_v48  ;;  %6478 = vmatpush.bf16.msra.mxu2 %v9871_v0  ;;  %v10742_v0 = vld [vmem:[%s19017_s3 + $0xe64] sm:$0xf]  ;;  %6465 = vmatpush.bf16.msra.mxu1 %v9867_v50  ;;  %v9828_v13 = vld [vmem:[%s19017_s3 + $0xe50] sm:$0xf0] }
 0xb29   :  { %6452 = vmatpush.bf16.msra.mxu0 %v9863_v43  ;;  %v9847_v43 = vor.u32 %v10742_v0, %v9844_v25  ;;  %6443 = vmatpush.bf16.msrb.mxu3 %v9795_v59  ;;  %v10741_v59 = vld [vmem:[%s19017_s3 + $0xe54] sm:$0xf0]  ;;  %v10735_v0 = vld [vmem:[%s19017_s3 + $0xe2c] sm:$0xf] }
 0xb2a   :  { %v6052_v21 = vpop.f32.mrf.mxu2  ;;  %v6065_v3 = vpop.f32.mrf.mxu3 }
 0xb2b   :  { %v18492_v29 = vadd.f32 %v6052_v21, %v17869_v46  ;;  %v18495_v1 = vadd.f32 %v6065_v3, %v17905_v31  ;;  %v9852_v31 = vld [vmem:[%s19017_s3 + $0xe78] sm:$0xf0]  ;;  %v10745_v21 = vld [vmem:[%s19017_s3 + $0xe74] sm:$0xf0]  ;;  %v10739_v3 = vld [vmem:[%s19017_s3 + $0xe4c] sm:$0xf] }
 0xb2c   :  { %v9855_v54 = vor.u32 %v10743_v4, %v9852_v31  ;;  %v9851_v49 = vor.u32 %v10745_v21, %v9850_v55  ;;  %v9839_v50 = vor.u32 %v10739_v3, %v9836_v27  ;;  %v10738_v31 = vld [vmem:[%s19017_s3 + $0xe44] sm:$0xf]  ;;  %v9812_v21 = vld [vmem:[%s19017_s3 + $0xe30] sm:$0xf0] }
 0xb2d   :  { %19489 = vst [vmem:[#allocation5_spill] sm:$0xff] %v18492_v29  ;;  %v6080_v51 = vpop.f32.mrf.mxu0  ;;  %v6093_v46 = vpop.f32.mrf.mxu1  ;;  %6453 = vmatpush.bf16.msra.mxu0 %v9847_v43  ;;  %v9831_v52 = vor.u32 %v10738_v31, %v9828_v13  ;;  %v9820_v43 = vld [vmem:[%s19017_s3 + $0xe38] sm:$0xf0]  ;;  %v10734_v55 = vld [vmem:[%s19017_s3 + $0xe24] sm:$0xf]  ;;  %v11333_v31 = vld [vmem:[%s19015_s1 + $0x30] sm:$0xff] }
 0xb2e   :  { %6479 = vmatpush.bf16.msra.mxu2 %v9855_v54  ;;  %v11332_v46 = vld [vmem:[%s19015_s1 + $0x38] sm:$0xff]  ;;  %6466 = vmatpush.bf16.msra.mxu1 %v9851_v49  ;;  %v9834_v54 = vld [vmem:[%s19017_s3 + $0xe48] sm:$0xf]  ;;  %v9823_v27 = vor.u32 %v10735_v0, %v9820_v43 }
 0xb2f   :  { %6517 = vmatpush.bf16.msra.mxu3 %v11332_v46  ;;  %v9835_v25 = vor.u32 %v10741_v59, %v9834_v54  ;;  %v10737_v46 = vld [vmem:[%s19017_s3 + $0xe34] sm:$0xf0]  ;;  %v9804_v13 = vld [vmem:[%s19017_s3 + $0xe18] sm:$0xf0]  ;;  %v9796_v54 = vld [vmem:[%s19017_s3 + $0xe10] sm:$0xf0] }
 0xb30   :  { %v9802_v43 = vld [vmem:[%s19017_s3 + $0xe08] sm:$0xf] }
 0xb31   :  { %6454 = vmatpush.bf16.msra.mxu0 %v9831_v52  ;;  %v10730_v52 = vld [vmem:[%s19017_s3 + $0xe04] sm:$0xf] }
 0xb32   :  { %v6054_v4 = vpop.f32.mrf.mxu2  ;;  %v6067_v51 = vpop.f32.mrf.mxu3  ;;  %6480 = vmatpush.bf16.msra.mxu2 %v9839_v50  ;;  %v10731_v50 = vld [vmem:[%s19017_s3 + $0xe0c] sm:$0xf]  ;;  %6467 = vmatpush.bf16.msra.mxu1 %v9835_v25 }
 0xb33   :  { %v9815_v4 = vor.u32 %v10734_v55, %v9812_v21  ;;  %v9818_v51 = vld [vmem:[%s19017_s3 + $0xe28] sm:$0xf]  ;;  %6518 = vmatpush.bf16.msra.mxu3 %v11333_v31  ;;  %v9807_v0 = vor.u32 %v10731_v50, %v9804_v13  ;;  %v10733_v55 = vld [vmem:[%s19017_s3 + $0xe14] sm:$0xf0]  ;;  %v9799_v21 = vor.u32 %v10730_v52, %v9796_v54 }
 0xb34   :  { %v9819_v59 = vor.u32 %v10737_v46, %v9818_v51  ;;  %v9803_v29 = vor.u32 %v10733_v55, %v9802_v43  ;;  %v19505_v46 = vld [vmem:[#allocation19_spill] sm:$0xff]  ;;  %v19508_v52 = vld [vmem:[#allocation24_spill] sm:$0xff] }
 0xb35   :  { %v18560_v3 = vpop.f32.mrf.mxu0  ;;  %v18562_v49 = vpop.f32.mrf.mxu1  ;;  %6455 = vmatpush.bf16.msra.mxu0 %v9815_v4  ;;  %v19506_v50 = vld [vmem:[#allocation23_spill] sm:$0xff]  ;;  %v19509_v54 = vld [vmem:[#allocation28_spill] sm:$0xff] }
 0xb36   :  { %6481 = vmatpush.bf16.msra.mxu2 %v9823_v27  ;;  %6468 = vmatpush.bf16.msra.mxu1 %v9819_v59  ;;  %v19507_v13 = vld [vmem:[#allocation27_spill] sm:$0xff]  ;;  %v19510_v59 = vld [vmem:[#allocation25_spill] sm:$0xff] }
 0xb37   :  { %6519 = vmatpush.bf16.msra.mxu3 %v17969_v23  ;;  %v11335_v43 = vld [vmem:[%s19015_s1 + $0x220] sm:$0xff]  ;;  %v11336_v55 = vld [vmem:[%s19015_s1 + $0x218] sm:$0xff] }
 0xb39   :  { %6456 = vmatpush.bf16.msra.mxu0 %v9799_v21  ;;  %v11337_v21 = vld [vmem:[%s19015_s1 + $0x210] sm:$0xff] }
 0xb3a   :  { %v6133_v31 = vpop.f32.mrf.mxu2  ;;  %v6146_v48 = vpop.f32.mrf.mxu3  ;;  %6482 = vmatpush.bf16.msra.mxu2 %v9807_v0  ;;  %6469 = vmatpush.bf16.msra.mxu1 %v9803_v29  ;;  %v19502_v29 = vld [vmem:[#allocation22_spill] sm:$0xff]  ;;  %v19511_v0 = vld [vmem:[#allocation31_spill] sm:$0xff] }
 0xb3b   :  { %6520 = vmatpush.bf16.msra.mxu3 %v17995_v42 }
 0xb3d   :  { %v6161_v25 = vpop.f32.mrf.mxu0  ;;  %v6174_v27 = vpop.f32.mrf.mxu1  ;;  %6530 = vmatpush.bf16.msrb.mxu0 %v17963_v35 }
 0xb3e   :  { %6556 = vmatpush.bf16.msrb.mxu2 %v18019_v60  ;;  %6543 = vmatpush.bf16.msrb.mxu1 %v18007_v47  ;;  %v11339_v25 = vld [vmem:[%s19015_s1 + $0x200] sm:$0xff] }
 0xb3f   :  { %6521 = vmatpush.bf16.msra.mxu3 %v18013_v63 }
 0xb41   :  { %6531 = vmatpush.bf16.msrb.mxu0 %v17989_v58  ;;  %v18610_v58 = vld [vmem:[%s19016_s2] ss:$0 sm:$0xff] }
 0xb42   :  { %6557 = vmatpush.bf16.msrb.mxu2 %v18043_v22  ;;  %v6135_v4 = vpop.f32.mrf.mxu2  ;;  %v6148_v51 = vpop.f32.mrf.mxu3  ;;  %6544 = vmatpush.bf16.msrb.mxu1 %v18031_v38  ;;  %v6134_v42 = vadd.f32 %v18610_v58, %v6133_v31  ;;  %v11338_v31 = vld [vmem:[%s19015_s1 + $0x208] sm:$0xff] }
 0xb43   :  { %6522 = vmatpush.bf16.msra.mxu3 %v18037_v44 }
 0xb44   :  { %v6147_v60 = vadd.f32 %v6146_v48, %v6134_v42  ;;  %v19501_v48 = vld [vmem:[#allocation17_spill] sm:$0xff] }
 0xb45   :  { %6532 = vmatpush.bf16.msrb.mxu0 %v18001_v28 }
 0xb46   :  { %6558 = vmatpush.bf16.msrb.mxu2 %v18068_v61  ;;  %v6211_v23 = vpop.f32.mrf.mxu0  ;;  %6545 = vmatpush.bf16.msrb.mxu1 %v18055_v20  ;;  %v6160_v38 = vadd.f32 %v18560_v3, %v6147_v60  ;;  %v19503_v3 = vld [vmem:[#allocation26_spill] sm:$0xff]  ;;  %v19513_v60 = vld [vmem:[#allocation29_spill] sm:$0xff] }
 0xb47   :  { %v6224_v35 = vpop.f32.mrf.mxu1  ;;  %6523 = vmatpush.bf16.msra.mxu3 %v18062_v53  ;;  %v9920_v53 = vld [vmem:[%s19014_s0 + $0x87] sm:$0xff] }
 0xb48   :  { %6496 = vst [vmem:[#allocation1] ss:$9 sm:$0xff] %v9920_v53  ;;  %v10076_v53 = vld [vmem:[%s19017_s3 + $0xfe8] sm:$0xf] }
 0xb49   :  { %6533 = vmatpush.bf16.msrb.mxu0 %v18025_v8 }
 0xb4a   :  { %6559 = vmatpush.bf16.msrb.mxu2 %v18092_v30  ;;  %6546 = vmatpush.bf16.msrb.mxu1 %v18080_v2 }
 0xb4b   :  { %v6185_v47 = vpop.f32.mrf.mxu2  ;;  %v6198_v63 = vpop.f32.mrf.mxu3  ;;  %6524 = vmatpush.bf16.msra.mxu3 %v18086_v57 }
 0xb4d   :  { %6534 = vmatpush.bf16.msrb.mxu0 %v18049_v32  ;;  %v6173_v32 = vadd.f32 %v18562_v49, %v6160_v38  ;;  %v19504_v49 = vld [vmem:[#allocation20_spill] sm:$0xff] }
 0xb4e   :  { %6560 = vmatpush.bf16.msrb.mxu2 %v18110_v24  ;;  %v6213_v28 = vpop.f32.mrf.mxu0  ;;  %6547 = vmatpush.bf16.msrb.mxu1 %v18104_v12 }
 0xb4f   :  { %v6226_v8 = vpop.f32.mrf.mxu1  ;;  %v6186_v20 = vadd.f32 %v6185_v47, %v6173_v32  ;;  %v19512_v47 = vld [vmem:[#allocation5_spill] sm:$0xff] }
 0xb51   :  { %6535 = vmatpush.bf16.msrb.mxu0 %v18074_v16  ;;  %v6199_v61 = vadd.f32 %v6198_v63, %v6186_v20  ;;  %v10070_v20 = vld [vmem:[%s19017_s3 + $0xff0] sm:$0xf0] }
 0xb52   :  { %6561 = vmatpush.bf16.msrb.mxu2 %v18129_v45  ;;  %6548 = vmatpush.bf16.msrb.mxu1 %v18122_v18  ;;  %v6498_v18 = vld [vmem:[#allocation1 + $0x9] sm:$0xff] }
 0xb53   :  { %v6187_v44 = vpop.f32.mrf.mxu2  ;;  %v6200_v22 = vpop.f32.mrf.mxu3  ;;  %v6212_v16 = vadd.f32 %v6211_v23, %v6199_v61  ;;  %v19490_v45 = vld [vmem:[#allocation8_spill] sm:$0xff]  ;;  %v10793_v61 = vld [vmem:[%s19017_s3 + $0xff4] sm:$0xf0] }
 0xb54   :  { %v10068_v44 = vld [vmem:[%s19017_s3 + $0xfe0] sm:$0xf] }
 0xb55   :  { %6536 = vmatpush.bf16.msrb.mxu0 %v18098_v7  ;;  %v6225_v2 = vadd.f32 %v6224_v35, %v6212_v16 }
 0xb56   :  { %6562 = vmatpush.bf16.msrb.mxu2 %v18141_v41  ;;  %6549 = vmatpush.bf16.msrb.mxu1 %v18135_v9  ;;  %v6500_v9 = vld [vmem:[#allocation1 + $0x1b] sm:$0xff]  ;;  %v6499_v41 = vld [vmem:[#allocation1 + $0x12] sm:$0xff] }
 0xb59   :  { %6537 = vmatpush.bf16.msrb.mxu0 %v18116_v62  ;;  %v6497_v62 = vld [vmem:[#allocation1] sm:$0xff] }
 0xb5a   :  { %6563 = vmatpush.bf16.msrb.mxu2 %v18156_v19  ;;  %6550 = vmatpush.bf16.msrb.mxu1 %v18150_v39  ;;  %v19491_v39 = vld [vmem:[#allocation6_spill] sm:$0xff]  ;;  %v19492_v19 = vld [vmem:[#allocation7_spill] sm:$0xff] }
 0xb6b   :  { %v6237_v57 = vpop.f32.mrf.mxu2 }
 0xb6c   :  { %v6238_v30 = vadd.f32 %v6237_v57, %v6225_v2  ;;  %v10077_v2 = vor.u32 %v10793_v61, %v10076_v53  ;;  %v10791_v57 = vld [vmem:[%s19017_s3 + $0xfec] sm:$0xf] }
 0xb6e   :  { %v6241_v7 = vmax.f32 %v6238_v30, 0.0  ;;  %v10078_v30 = vld [vmem:[%s19017_s3 + $0xff8] sm:$0xf0] }
 0xb70   :  { %v6242_v12 = vpack.c.bf16 %v6241_v7, %v6241_v7  ;;  %v10081_v7 = vor.u32 %v10791_v57, %v10078_v30  ;;  %v10770_v57 = vld [vmem:[%s19017_s3 + $0xf44] sm:$0xf] }
 0xb72   :  { %6444 = vmatmul.bf16.vlgmr.msrb.gmra.mxu3 %v6242_v12  ;;  %6457 = vmatmul.bf16.vlgmr.msra.gmra.mxu0 %v6242_v12 }
 0xb73   :  { %6470 = vmatmul.bf16.vlgmr.msra.gmra.mxu1 %v6242_v12  ;;  %6483 = vmatmul.bf16.vlgmr.msra.gmra.mxu2 %v6242_v12  ;;  %v6239_v24 = vpop.f32.mrf.mxu2  ;;  %v10052_v12 = vld [vmem:[%s19017_s3 + $0xfc0] sm:$0xf] }
 0xb74   :  { %6569 = vmatpush.bf16.msrb.mxu3 %v18162_v33  ;;  %6608 = vmatpush.bf16.msra.mxu2 %v18180_v26  ;;  %v19493_v33 = vld [vmem:[#allocation12_spill] sm:$0xff]  ;;  %v19496_v26 = vld [vmem:[#allocation13_spill] sm:$0xff] }
 0xb75   :  { %6582 = vmatpush.bf16.msra.mxu0 %v18168_v10  ;;  %6595 = vmatpush.bf16.msra.mxu1 %v18174_v34  ;;  %v19494_v10 = vld [vmem:[#allocation14_spill] sm:$0xff]  ;;  %v19495_v34 = vld [vmem:[#allocation11_spill] sm:$0xff] }
 0xb76   :  { %v10788_v24 = vld [vmem:[%s19017_s3 + $0xfcc] sm:$0xf0] }
 0xb78   :  { %6570 = vmatpush.bf16.msrb.mxu3 %v18186_v40  ;;  %6609 = vmatpush.bf16.msra.mxu2 %v18204_v17  ;;  %v6501_v40 = vld [vmem:[#allocation1 + $0x24] sm:$0xff]  ;;  %v6503_v17 = vld [vmem:[#allocation1 + $0x36] sm:$0xff] }
 0xb79   :  { %6583 = vmatpush.bf16.msra.mxu0 %v18192_v15  ;;  %6596 = vmatpush.bf16.msra.mxu1 %v18198_v5  ;;  %v6504_v15 = vld [vmem:[#allocation1 + $0x3f] sm:$0xff]  ;;  %v6502_v5 = vld [vmem:[#allocation1 + $0x2d] sm:$0xff] }
 0xb7c   :  { %6571 = vmatpush.bf16.msrb.mxu3 %v18210_v11  ;;  %6610 = vmatpush.bf16.msra.mxu2 %v18228_v14  ;;  %v9921_v11 = vld [vmem:[%s19014_s0 + $0x8f] sm:$0x1]  ;;  %v19499_v14 = vld [vmem:[#allocation18_spill] sm:$0xff] }
 0xb7d   :  { %6584 = vmatpush.bf16.msra.mxu0 %v18216_v6  ;;  %6597 = vmatpush.bf16.msra.mxu1 %v18222_v36  ;;  %v19497_v6 = vld [vmem:[#allocation16_spill] sm:$0xff]  ;;  %v19498_v36 = vld [vmem:[#allocation21_spill] sm:$0xff]  ;;  %6506 = vst [vmem:[#allocation1] ss:$9 sm:$0xff] %v9921_v11 }
 0xb80   :  { %6572 = vmatpush.bf16.msrb.mxu3 %v18234_v56  ;;  %6611 = vmatpush.bf16.msra.mxu2 %v19490_v45  ;;  %v19500_v56 = vld [vmem:[#allocation15_spill] sm:$0xff]  ;;  %v10054_v45 = vld [vmem:[%s19017_s3 + $0xfd0] sm:$0xf0] }
 0xb81   :  { %6585 = vmatpush.bf16.msra.mxu0 %v19491_v39  ;;  %6598 = vmatpush.bf16.msra.mxu1 %v19492_v19 }
 0xb82   :  { %6525 = vmatmul.bf16.vlgmr.msra.gmra.mxu3 %v6497_v62  ;;  %6538 = vmatmul.bf16.vlgmr.msrb.gmra.mxu0 %v6498_v18  ;;  %v10786_v62 = vld [vmem:[%s19017_s3 + $0xfc4] sm:$0xf]  ;;  %v10053_v18 = vor.u32 %v10788_v24, %v10052_v12  ;;  %v9990_v12 = vld [vmem:[%s19017_s3 + $0xf50] sm:$0xf0]  ;;  %v9996_v24 = vld [vmem:[%s19017_s3 + $0xf48] sm:$0xf] }
 0xb83   :  { %6564 = vmatmul.bf16.vlgmr.msrb.gmra.mxu2 %v6500_v9  ;;  %6551 = vmatmul.bf16.vlgmr.msrb.gmra.mxu1 %v6499_v41  ;;  %v10060_v9 = vld [vmem:[%s19017_s3 + $0xfc8] sm:$0xf]  ;;  %v10789_v41 = vld [vmem:[%s19017_s3 + $0xfd4] sm:$0xf0]  ;;  %v10057_v19 = vor.u32 %v10786_v62, %v10054_v45  ;;  %v9998_v45 = vld [vmem:[%s19017_s3 + $0xf58] sm:$0xf0] }
 0xb84   :  { %6573 = vmatpush.bf16.msrb.mxu3 %v19493_v33  ;;  %6612 = vmatpush.bf16.msra.mxu2 %v19494_v10  ;;  %v6507_v27 = vld [vmem:[#allocation1] sm:$0xff]  ;;  %v10061_v33 = vor.u32 %v10789_v41, %v10060_v9  ;;  %v10787_v10 = vld [vmem:[%s19017_s3 + $0xfcc] sm:$0xf]  ;;  %v10773_v62 = vld [vmem:[%s19017_s3 + $0xf54] sm:$0xf0]  ;;  %v9993_v41 = vor.u32 %v10770_v57, %v9990_v12 }
 0xb85   :  { %6586 = vmatpush.bf16.msra.mxu0 %v19495_v34  ;;  %6599 = vmatpush.bf16.msra.mxu1 %v19496_v26  ;;  %v10062_v34 = vld [vmem:[%s19017_s3 + $0xfd8] sm:$0xf0]  ;;  %v10798_v12 = vld [vmem:[%s19019_s5 + $0x20] sm:$0xff] }
 0xb88   :  { %6574 = vmatpush.bf16.msrb.mxu3 %v19497_v6  ;;  %6613 = vmatpush.bf16.msra.mxu2 %v19498_v36  ;;  %v10038_v36 = vld [vmem:[%s19017_s3 + $0xfb0] sm:$0xf0] }
 0xb89   :  { %6587 = vmatpush.bf16.msra.mxu0 %v19499_v14  ;;  %6600 = vmatpush.bf16.msra.mxu1 %v19500_v56  ;;  %v10044_v14 = vld [vmem:[%s19017_s3 + $0xfa8] sm:$0xf]  ;;  %v10785_v56 = vld [vmem:[%s19017_s3 + $0xfb4] sm:$0xf0] }
 0xb8c   :  { %6575 = vmatpush.bf16.msrb.mxu3 %v19501_v48  ;;  %6614 = vmatpush.bf16.msra.mxu2 %v19502_v29 }
 0xb8d   :  { %6588 = vmatpush.bf16.msra.mxu0 %v19503_v3  ;;  %6601 = vmatpush.bf16.msra.mxu1 %v19504_v49  ;;  %v10045_v3 = vor.u32 %v10785_v56, %v10044_v14  ;;  %v10783_v49 = vld [vmem:[%s19017_s3 + $0xfac] sm:$0xf] }
 0xb90   :  { %6576 = vmatpush.bf16.msrb.mxu3 %v19505_v46  ;;  %6615 = vmatpush.bf16.msra.mxu2 %v19506_v50  ;;  %v10046_v46 = vld [vmem:[%s19017_s3 + $0xfb8] sm:$0xf0]  ;;  %v10020_v50 = vld [vmem:[%s19017_s3 + $0xf80] sm:$0xf] }
 0xb91   :  { %6589 = vmatpush.bf16.msra.mxu0 %v19508_v52  ;;  %6602 = vmatpush.bf16.msra.mxu1 %v19509_v54  ;;  %v10780_v52 = vld [vmem:[%s19017_s3 + $0xf8c] sm:$0xf0]  ;;  %v10778_v54 = vld [vmem:[%s19017_s3 + $0xf84] sm:$0xf] }
 0xb93   :  { %6577 = vmatmul.bf16.vlgmr.msrb.gmra.mxu3 %v6501_v40  ;;  %6616 = vmatmul.bf16.vlgmr.msra.gmra.mxu2 %v6504_v15  ;;  %v10065_v40 = vor.u32 %v10787_v10, %v10062_v34  ;;  %v10036_v15 = vld [vmem:[%s19017_s3 + $0xfa0] sm:$0xf] }
 0xb94   :  { %6621 = vmatpush.bf16.msra.mxu3 %v19507_v13  ;;  %6590 = vmatmul.bf16.vlgmr.msra.gmra.mxu0 %v6502_v5  ;;  %v10784_v5 = vld [vmem:[%s19017_s3 + $0xfac] sm:$0xf0]  ;;  %v10049_v13 = vor.u32 %v10783_v49, %v10046_v46  ;;  %v9972_v34 = vld [vmem:[%s19017_s3 + $0xf20] sm:$0xf]  ;;  %v9982_v49 = vld [vmem:[%s19017_s3 + $0xf38] sm:$0xf0] }
 0xb95   :  { %6603 = vmatmul.bf16.vlgmr.msra.gmra.mxu1 %v6503_v17  ;;  %6855 = vmatpush.bf16.msrb.mxu2 %v10077_v2  ;;  %v10782_v17 = vld [vmem:[%s19017_s3 + $0xfa4] sm:$0xf]  ;;  %v10037_v6 = vor.u32 %v10784_v5, %v10036_v15  ;;  %v10772_v2 = vld [vmem:[%s19017_s3 + $0xf4c] sm:$0xf0] }
 0xb96   :  { %v10041_v29 = vor.u32 %v10782_v17, %v10038_v36  ;;  %v9974_v17 = vld [vmem:[%s19017_s3 + $0xf30] sm:$0xf0]  ;;  %v10769_v36 = vld [vmem:[%s19017_s3 + $0xf34] sm:$0xf0] }
 0xb98   :  { %6622 = vmatpush.bf16.msra.mxu3 %v19510_v59  ;;  %v10022_v59 = vld [vmem:[%s19017_s3 + $0xf90] sm:$0xf0] }
 0xb99   :  { %6856 = vmatpush.bf16.msrb.mxu2 %v10061_v33 }
 0xb9c   :  { %6623 = vmatpush.bf16.msra.mxu3 %v19511_v0  ;;  %v10021_v0 = vor.u32 %v10780_v52, %v10020_v50  ;;  %v9956_v50 = vld [vmem:[%s19017_s3 + $0xf00] sm:$0xf]  ;;  %v10762_v52 = vld [vmem:[%s19017_s3 + $0xf04] sm:$0xf] }
 0xb9d   :  { %6857 = vmatpush.bf16.msrb.mxu2 %v10045_v3  ;;  %v10767_v3 = vld [vmem:[%s19017_s3 + $0xf2c] sm:$0xf] }
 0xb9e   :  { %v9985_v46 = vor.u32 %v10767_v3, %v9982_v49  ;;  %v10794_v3 = vld [vmem:[%s19019_s5] sm:$0xff] }
 0xb9f   :  { %v10802_v49 = vld [vmem:[%s19019_s5 + $0x40] sm:$0xff] }
 0xba0   :  { %6624 = vmatpush.bf16.msra.mxu3 %v11335_v43  ;;  %v10028_v43 = vld [vmem:[%s19017_s3 + $0xf88] sm:$0xf] }
 0xba4   :  { %6625 = vmatpush.bf16.msra.mxu3 %v11336_v55  ;;  %v10781_v55 = vld [vmem:[%s19017_s3 + $0xf94] sm:$0xf0] }
 0xba8   :  { %6626 = vmatpush.bf16.msra.mxu3 %v11337_v21  ;;  %v10779_v21 = vld [vmem:[%s19017_s3 + $0xf8c] sm:$0xf] }
 0xbac   :  { %6627 = vmatpush.bf16.msra.mxu3 %v11338_v31  ;;  %v10025_v31 = vor.u32 %v10778_v54, %v10022_v59  ;;  %v9958_v59 = vld [vmem:[%s19017_s3 + $0xf10] sm:$0xf0] }
 0xbb0   :  { %6628 = vmatpush.bf16.msra.mxu3 %v11339_v25  ;;  %v10029_v25 = vor.u32 %v10781_v55, %v10028_v43  ;;  %v10765_v43 = vld [vmem:[%s19017_s3 + $0xf14] sm:$0xf0] }
 0xbb2   :  { %6858 = vmatpush.bf16.msrb.mxu2 %v10029_v25  ;;  %v9961_v25 = vor.u32 %v10762_v52, %v9958_v59  ;;  %v10818_v52 = vld [vmem:[%s19019_s5 + $0xc0] sm:$0xff] }
 0xbb3   :  { %6629 = vmatmul.bf16.vlgmr.msra.gmra.mxu3 %v6507_v27  ;;  %v10030_v27 = vld [vmem:[%s19017_s3 + $0xf98] sm:$0xf0] }
 0xbb4   :  { %6868 = vmatpush.bf16.msrb.mxu3 %v10081_v7 }
 0xbb8   :  { %6869 = vmatpush.bf16.msrb.mxu3 %v10065_v40  ;;  %v10766_v40 = vld [vmem:[%s19017_s3 + $0xf24] sm:$0xf] }
 0xbb9   :  { %v9977_v56 = vor.u32 %v10766_v40, %v9974_v17  ;;  %v10813_v17 = vld [vmem:[%s19019_s5 + $0x98] sm:$0xff] }
 0xbbc   :  { %6870 = vmatpush.bf16.msrb.mxu3 %v10049_v13  ;;  %v10764_v13 = vld [vmem:[%s19017_s3 + $0xf0c] sm:$0xf0] }
 0xbbd   :  { %v9957_v54 = vor.u32 %v10764_v13, %v9956_v50  ;;  %v10819_v50 = vld [vmem:[%s19019_s5 + $0xc8] sm:$0xff]  ;;  %v10810_v13 = vld [vmem:[%s19019_s5 + $0x80] sm:$0xff] }
 0xbef   :  { %v6458_v4 = vpop.f32.mrf.mxu0 }
 0xbf0   :  { %v18686_v51 = vadd.f32 %v6458_v4, %v18495_v1  ;;  %v6471_v23 = vpop.f32.mrf.mxu1  ;;  %v10792_v1 = vld [vmem:[%s19017_s3 + $0xfec] sm:$0xf0]  ;;  %v10004_v4 = vld [vmem:[%s19017_s3 + $0xf60] sm:$0xf] }
 0xbf1   :  { %v18689_v35 = vadd.f32 %v6471_v23, %v18474_v37  ;;  %v10790_v37 = vld [vmem:[%s19017_s3 + $0xfe4] sm:$0xf]  ;;  %v10069_v32 = vor.u32 %v10792_v1, %v10068_v44  ;;  %v10776_v23 = vld [vmem:[%s19017_s3 + $0xf6c] sm:$0xf0]  ;;  %v10777_v44 = vld [vmem:[%s19017_s3 + $0xf74] sm:$0xf0] }
 0xbf2   :  { %v10073_v16 = vor.u32 %v10790_v37, %v10070_v20  ;;  %v10775_v1 = vld [vmem:[%s19017_s3 + $0xf6c] sm:$0xf]  ;;  %v10014_v37 = vld [vmem:[%s19017_s3 + $0xf78] sm:$0xf0] }
 0xbf3   :  { %6829 = vmatpush.bf16.msrb.mxu0 %v10069_v32  ;;  %v10005_v32 = vor.u32 %v10776_v23, %v10004_v4  ;;  %v10017_v7 = vor.u32 %v10775_v1, %v10014_v37  ;;  %v10763_v4 = vld [vmem:[%s19017_s3 + $0xf0c] sm:$0xf]  ;;  %v9966_v23 = vld [vmem:[%s19017_s3 + $0xf18] sm:$0xf0]  ;;  %v10808_v37 = vld [vmem:[%s19019_s5 + $0x70] sm:$0xff] }
 0xbf4   :  { %6842 = vmatpush.bf16.msrb.mxu1 %v10073_v16  ;;  %v9988_v16 = vld [vmem:[%s19017_s3 + $0xf40] sm:$0xf]  ;;  %v10825_v1 = vld [vmem:[%s19019_s5 + $0xf8] sm:$0xff] }
 0xbf5   :  { %v6445_v42 = vpop.f32.mrf.mxu3  ;;  %v9989_v9 = vor.u32 %v10772_v2, %v9988_v16  ;;  %v10824_v16 = vld [vmem:[%s19019_s5 + $0xf0] sm:$0xff]  ;;  %v10799_v2 = vld [vmem:[%s19019_s5 + $0x28] sm:$0xff] }
 0xbf6   :  { %v18692_v63 = vadd.f32 %v6445_v42, %v19512_v47  ;;  %v6484_v28 = vpop.f32.mrf.mxu2  ;;  %v10033_v42 = vor.u32 %v10779_v21, %v10030_v27  ;;  %v10774_v47 = vld [vmem:[%s19017_s3 + $0xf64] sm:$0xf] }
 0xbf7   :  { %v18695_v8 = vadd.f32 %v6484_v28, %v19513_v60  ;;  %v6460_v38 = vpop.f32.mrf.mxu0  ;;  %6830 = vmatpush.bf16.msrb.mxu0 %v10053_v18  ;;  %v10006_v28 = vld [vmem:[%s19017_s3 + $0xf70] sm:$0xf0]  ;;  %v10012_v60 = vld [vmem:[%s19017_s3 + $0xf68] sm:$0xf]  ;;  %v10771_v18 = vld [vmem:[%s19017_s3 + $0xf4c] sm:$0xf] }
 0xbf8   :  { %v6473_v22 = vpop.f32.mrf.mxu1  ;;  %6843 = vmatpush.bf16.msrb.mxu1 %v10057_v19  ;;  %v10009_v53 = vor.u32 %v10774_v47, %v10006_v28  ;;  %v10013_v61 = vor.u32 %v10777_v44, %v10012_v60  ;;  %6871 = vmatpush.bf16.msrb.mxu3 %v10033_v42  ;;  %v10001_v19 = vor.u32 %v10771_v18, %v9998_v45  ;;  %v10801_v60 = vld [vmem:[%s19019_s5 + $0x38] sm:$0xff]  ;;  %v10822_v18 = vld [vmem:[%s19019_s5 + $0xe0] sm:$0xff] }
 0xbf9   :  { %v9969_v42 = vor.u32 %v10763_v4, %v9966_v23  ;;  %v10817_v44 = vld [vmem:[%s19019_s5 + $0xb8] sm:$0xff] }
 0xbfa   :  { %6859 = vmatpush.bf16.msrb.mxu2 %v10013_v61  ;;  %v10816_v61 = vld [vmem:[%s19019_s5 + $0xb0] sm:$0xff]  ;;  %v10797_v45 = vld [vmem:[%s19019_s5 + $0x18] sm:$0xff] }
 0xbfb   :  { %6831 = vmatpush.bf16.msrb.mxu0 %v10037_v6  ;;  %v9980_v6 = vld [vmem:[%s19017_s3 + $0xf28] sm:$0xf] }
 0xbfc   :  { %6844 = vmatpush.bf16.msrb.mxu1 %v10041_v29  ;;  %6872 = vmatpush.bf16.msrb.mxu3 %v10017_v7  ;;  %v9981_v29 = vor.u32 %v10769_v36, %v9980_v6  ;;  %v10823_v7 = vld [vmem:[%s19019_s5 + $0xe8] sm:$0xff]  ;;  %v10821_v6 = vld [vmem:[%s19019_s5 + $0xd8] sm:$0xff] }
 0xbfd   :  { %v6447_v39 = vpop.f32.mrf.mxu3  ;;  %v10795_v36 = vld [vmem:[%s19019_s5 + $0x8] sm:$0xff] }
 0xbfe   :  { %v6486_v26 = vpop.f32.mrf.mxu2  ;;  %v9997_v39 = vor.u32 %v10773_v62, %v9996_v24  ;;  %v10814_v62 = vld [vmem:[%s19019_s5 + $0xa0] sm:$0xff] }
 0xbff   :  { %v18754_v11 = vpop.f32.mrf.mxu0  ;;  %6832 = vmatpush.bf16.msrb.mxu0 %v10021_v0  ;;  %v10768_v26 = vld [vmem:[%s19017_s3 + $0xf2c] sm:$0xf0]  ;;  %v9964_v0 = vld [vmem:[%s19017_s3 + $0xf08] sm:$0xf] }
 0xc00   :  { %v18765_v48 = vpop.f32.mrf.mxu1  ;;  %6845 = vmatpush.bf16.msrb.mxu1 %v10025_v31  ;;  %6860 = vmatpush.bf16.msrb.mxu2 %v9997_v39  ;;  %v9973_v5 = vor.u32 %v10768_v26, %v9972_v34  ;;  %v9965_v27 = vor.u32 %v10765_v43, %v9964_v0  ;;  %v10796_v39 = vld [vmem:[%s19019_s5 + $0x10] sm:$0xff] }
 0xc01   :  { %6873 = vmatpush.bf16.msrb.mxu3 %v10001_v19  ;;  %v10804_v19 = vld [vmem:[%s19019_s5 + $0x50] sm:$0xff] }
 0xc03   :  { %6833 = vmatpush.bf16.msrb.mxu0 %v10005_v32 }
 0xc04   :  { %6846 = vmatpush.bf16.msrb.mxu1 %v10009_v53  ;;  %6861 = vmatpush.bf16.msrb.mxu2 %v9981_v29  ;;  %v10820_v29 = vld [vmem:[%s19019_s5 + $0xd0] sm:$0xff] }
 0xc05   :  { %v6526_v38 = vpop.f32.mrf.mxu3  ;;  %6874 = vmatpush.bf16.msrb.mxu3 %v9985_v46  ;;  %v10811_v46 = vld [vmem:[%s19019_s5 + $0x88] sm:$0xff] }
 0xc06   :  { %v18821_v22 = vpop.f32.mrf.mxu2  ;;  %v6527_v55 = vadd.f32 %v18610_v58, %v6526_v38  ;;  %v10809_v38 = vld [vmem:[%s19019_s5 + $0x78] sm:$0xff] }
 0xc07   :  { %v6541_v20 = vpop.f32.mrf.mxu0  ;;  %6834 = vmatpush.bf16.msrb.mxu0 %v9989_v9  ;;  %v10805_v9 = vld [vmem:[%s19019_s5 + $0x58] sm:$0xff] }
 0xc08   :  { %v6554_v30 = vpop.f32.mrf.mxu1  ;;  %6847 = vmatpush.bf16.msrb.mxu1 %v9993_v41  ;;  %6862 = vmatpush.bf16.msrb.mxu2 %v9965_v27  ;;  %v6540_v58 = vadd.f32 %v18754_v11, %v6527_v55  ;;  %v10800_v11 = vld [vmem:[%s19019_s5 + $0x30] sm:$0xff] }
 0xc09   :  { %6875 = vmatpush.bf16.msrb.mxu3 %v9969_v42  ;;  %v10815_v30 = vld [vmem:[%s19019_s5 + $0xa8] sm:$0xff] }
 0xc0a   :  { %v6553_v32 = vadd.f32 %v18765_v48, %v6540_v58  ;;  %v10807_v48 = vld [vmem:[%s19019_s5 + $0x68] sm:$0xff] }
 0xc0b   :  { %6835 = vmatpush.bf16.msrb.mxu0 %v9973_v5 }
 0xc0c   :  { %6848 = vmatpush.bf16.msrb.mxu1 %v9977_v56  ;;  %7193 = vmatpush.bf16.msra.mxu2 %v10817_v44  ;;  %v6566_v57 = vadd.f32 %v18821_v22, %v6553_v32  ;;  %v10806_v22 = vld [vmem:[%s19019_s5 + $0x60] sm:$0xff]  ;;  %v10812_v56 = vld [vmem:[%s19019_s5 + $0x90] sm:$0xff] }
 0xc0d   :  { %v6528_v33 = vpop.f32.mrf.mxu3  ;;  %7206 = vmatpush.bf16.msra.mxu3 %v10825_v1 }
 0xc0e   :  { %v6567_v10 = vpop.f32.mrf.mxu2 }
 0xc0f   :  { %6836 = vmatpush.bf16.msrb.mxu0 %v9957_v54  ;;  %v6885_v54 = vld [vmem:[%s19018_s4] sm:$0xf] }
 0xc10   :  { %6849 = vmatpush.bf16.msrb.mxu1 %v9961_v25  ;;  %7194 = vmatpush.bf16.msra.mxu2 %v10816_v61  ;;  %v6887_v59 = vperm.slane %v6885_v54, 0  ;;  %v6888_v0 = vperm.slane %v6885_v54, 1  ;;  %v6889_v42 = vperm.slane %v6885_v54, 2 }
 0xc11   :  { %v18856_v15 = vpop.f32.mrf.mxu0  ;;  %7207 = vmatpush.bf16.msra.mxu3 %v10824_v16 }
 0xc12   :  { %v18867_v14 = vpop.f32.mrf.mxu1 }
 0xc13   :  { %7167 = vmatpush.bf16.msra.mxu0 %v10801_v60 }
 0xc14   :  { %7180 = vmatpush.bf16.msra.mxu1 %v10809_v38  ;;  %7195 = vmatpush.bf16.msra.mxu2 %v10815_v30 }
 0xc15   :  { %7208 = vmatpush.bf16.msra.mxu3 %v10823_v7 }
 0xc16   :  { %v6578_v21 = vpop.f32.mrf.mxu3  ;;  %v6617_v31 = vpop.f32.mrf.mxu2 }
 0xc17   :  { %7168 = vmatpush.bf16.msra.mxu0 %v10800_v11  ;;  %v6579_v24 = vadd.f32 %v6578_v21, %v6566_v57 }
 0xc18   :  { %7181 = vmatpush.bf16.msra.mxu1 %v10808_v37  ;;  %7196 = vmatpush.bf16.msra.mxu2 %v10814_v62 }
 0xc19   :  { %v6593_v47 = vpop.f32.mrf.mxu0  ;;  %v6592_v41 = vadd.f32 %v18856_v15, %v6579_v24  ;;  %7209 = vmatpush.bf16.msra.mxu3 %v10822_v18 }
 0xc1a   :  { %v6606_v28 = vpop.f32.mrf.mxu1  ;;  %v6890_v47 = vperm.slane %v6885_v54, 3 }
 0xc1b   :  { %7169 = vmatpush.bf16.msra.mxu0 %v10799_v2  ;;  %v6605_v33 = vadd.f32 %v18867_v14, %v6592_v41  ;;  %v10803_v14 = vld [vmem:[%s19019_s5 + $0x48] sm:$0xff] }
 0xc1c   :  { %7182 = vmatpush.bf16.msra.mxu1 %v10807_v48  ;;  %7197 = vmatpush.bf16.msra.mxu2 %v10813_v17 }
 0xc1d   :  { %v6618_v10 = vadd.f32 %v6617_v31, %v6605_v33  ;;  %7210 = vmatpush.bf16.msra.mxu3 %v10821_v6 }
 0xc1e   :  { %v6580_v20 = vpop.f32.mrf.mxu3  ;;  %v6619_v53 = vpop.f32.mrf.mxu2 }
 0xc1f   :  { %7170 = vmatpush.bf16.msra.mxu0 %v10798_v12 }
 0xc20   :  { %7183 = vmatpush.bf16.msra.mxu1 %v10806_v22  ;;  %7198 = vmatpush.bf16.msra.mxu2 %v10812_v56 }
 0xc21   :  { %7211 = vmatpush.bf16.msra.mxu3 %v10820_v29 }
 0xc23   :  { %7171 = vmatpush.bf16.msra.mxu0 %v10797_v45 }
 0xc24   :  { %7184 = vmatpush.bf16.msra.mxu1 %v10805_v9  ;;  %7199 = vmatpush.bf16.msra.mxu2 %v10811_v46 }
 0xc25   :  { %7212 = vmatpush.bf16.msra.mxu3 %v10819_v50 }
 0xc27   :  { %7172 = vmatpush.bf16.msra.mxu0 %v10796_v39 }
 0xc28   :  { %7185 = vmatpush.bf16.msra.mxu1 %v10804_v19  ;;  %7200 = vmatpush.bf16.msra.mxu2 %v10810_v13 }
 0xc29   :  { %7213 = vmatpush.bf16.msra.mxu3 %v10818_v52 }
 0xc2b   :  { %7173 = vmatpush.bf16.msra.mxu0 %v10795_v36 }
 0xc2c   :  { %7186 = vmatpush.bf16.msra.mxu1 %v10803_v14 }
 0xc2f   :  { %7174 = vmatpush.bf16.msra.mxu0 %v10794_v3 }
 0xc30   :  { %7187 = vmatpush.bf16.msra.mxu1 %v10802_v49 }
 0xc36   :  { %v6630_v34 = vpop.f32.mrf.mxu3 }
 0xc37   :  { %v6631_v26 = vadd.f32 %v6630_v34, %v6618_v10 }
 0xc39   :  { %v6634_v40 = vmax.f32 %v6631_v26, 0.0 }
 0xc3b   :  { %v6635_v15 = vpack.c.bf16 %v6634_v40, %v6634_v40 }
 0xc3d   :  { %6837 = vmatmul.bf16.vlgmr.msrb.gmra.mxu0 %v6635_v15  ;;  %6850 = vmatmul.bf16.vlgmr.msrb.gmra.mxu1 %v6635_v15 }
 0xc3e   :  { %6863 = vmatmul.bf16.vlgmr.msrb.gmra.mxu2 %v6635_v15  ;;  %6876 = vmatmul.bf16.vlgmr.msrb.gmra.mxu3 %v6635_v15  ;;  %v6632_v5 = vpop.f32.mrf.mxu3 }
 0xcba   :  { %v6838_v43 = vpop.f32.mrf.mxu0  ;;  %v6851_v55 = vpop.f32.mrf.mxu1 }
 0xcbb   :  { %v6881_v21 = vadd.f32 %v6838_v43, %v18692_v63  ;;  %v6882_v31 = vadd.f32 %v6851_v55, %v18686_v51 }
 0xcbd   :  { %v6895_v25 = vadd.f32 %v6887_v59, %v6881_v21  ;;  %v6896_v27 = vadd.f32 %v6888_v0, %v6882_v31 }
 0xcbf   :  { %v6899_v4 = vmax.f32 %v6895_v25, 0.0  ;;  %v6900_v23 = vmax.f32 %v6896_v27, 0.0 }
 0xcc1   :  { %v6903_v58 = vpack.c.bf16 %v6899_v4, %v6899_v4  ;;  %v6904_v28 = vpack.c.bf16 %v6900_v23, %v6900_v23  ;;  %v6864_v60 = vpop.f32.mrf.mxu2  ;;  %v6877_v38 = vpop.f32.mrf.mxu3 }
 0xcc2   :  { %v6883_v44 = vadd.f32 %v6864_v60, %v18689_v35  ;;  %v6884_v1 = vadd.f32 %v6877_v38, %v18695_v8  ;;  %v6840_v11 = vpop.f32.mrf.mxu0  ;;  %v6853_v37 = vpop.f32.mrf.mxu1  ;;  %v10828_v35 = vld [vmem:[%s19020_s6] ss:$0 sm:$0xff] }
 0xcc3   :  { %7175 = vmatmul.bf16.vlgmr.msra.gmra.mxu0 %v6903_v58  ;;  %7188 = vmatmul.bf16.vlgmr.msra.gmra.mxu1 %v6904_v28 }
 0xcc4   :  { %v6897_v63 = vadd.f32 %v6889_v42, %v6883_v44  ;;  %v6898_v51 = vadd.f32 %v6890_v47, %v6884_v1 }
 0xcc6   :  { %v6901_v32 = vmax.f32 %v6897_v63, 0.0  ;;  %v6902_v20 = vmax.f32 %v6898_v51, 0.0 }
 0xcc8   :  { %v6905_v53 = vpack.c.bf16 %v6901_v32, %v6901_v32  ;;  %v6906_v61 = vpack.c.bf16 %v6902_v20, %v6902_v20 }
 0xcc9   :  { %v6866_v16 = vpop.f32.mrf.mxu2  ;;  %v6879_v2 = vpop.f32.mrf.mxu3 }
 0xcca   :  { %7201 = vmatmul.bf16.vlgmr.msra.gmra.mxu2 %v6905_v53  ;;  %7214 = vmatmul.bf16.vlgmr.msra.gmra.mxu3 %v6906_v61 }
 0xd40   :  { %v7176_v48 = vpop.f32.mrf.mxu0  ;;  %v7189_v57 = vpop.f32.mrf.mxu1 }
 0xd41   :  { %v7177_v8 = vadd.f32 %v10828_v35, %v7176_v48 }
 0xd43   :  { %v7190_v12 = vadd.f32 %v7189_v57, %v7177_v8 }
 0xd48   :  { %v7178_v30 = vpop.f32.mrf.mxu0  ;;  %v7191_v7 = vpop.f32.mrf.mxu1 }
 0xd4d   :  { %v7202_v22 = vpop.f32.mrf.mxu2  ;;  %v7215_v24 = vpop.f32.mrf.mxu3 }
 0xd4e   :  { %v7203_v62 = vadd.f32 %v7202_v22, %v7190_v12 }
 0xd50   :  { %v7216_v18 = vadd.f32 %v7215_v24, %v7203_v62 }
 0xd52   :  { %7219 = vst [vmem:[#allocation2] sm:$0x3] %v7216_v18 }
 0xd53   :  { %7230 = dma.vmem_to_hbm [thread:$0]  %s7226_s9, 32, %s7228_s11, [#allocation3]  }
 0xd55   :  { %v7204_v45 = vpop.f32.mrf.mxu2  ;;  %v7217_v9 = vpop.f32.mrf.mxu3 }
 0xd56   :  { %11364 = dma.done.wait [#allocation3], 32  }
 0xd57   :  { %11365 = vsyncadd [#allocation3], 4294967264 }
 0xd58   :  { %7235 = vsyncpa [#allocation3], 1 }

</bundles_post_ra>
